<compile_context>
chip_gen: v7x
topology: tpu7x:2x2x1
jax: 0.10.0
libtpu: 0.0.40
codegen_flags: <defaults>
</compile_context>

<pallas_src>
import jax
import jax.numpy as jnp
from jax import lax
from jax.experimental import pallas as pl
from jax.experimental.pallas import tpu as pltpu

# Network geometry (fcl_n = 784 = 16 * 7 * 7  =>  28x28x1 MNIST-like input).
H1 = W1 = 28            # conv1 spatial
C1 = 8                  # conv1 out channels
H2 = W2 = 14            # conv2 spatial (after pool1)
C2 = 16                 # conv2 out channels
H3 = W3 = 7             # final spatial (after pool2)
NCLS_PAD = 128          # lane-dense FC output width
PIM = 32                # rows reserved per image in the tall slab (multiple of 8)

LC1 = W1 * C1           # 224 : conv1 output lanes, lane = 8*w + c
LP1 = LC1 - C1          # 216 : after w-pool (valid lanes 16*wo + c, c < 8)
LC2 = W2 * C2           # 224 : conv2 output lanes, lane = 16*w + c
LP2 = LC2 - C2          # 208 : after w-pool (valid lanes 32*wo + c, c < 16)


# ------------------------------ fused kernel -------------------------------- #

def _make_kernel(tb, dot_dtype):
    nr = tb * PIM                                            # rows per grid step

    def kernel(x_ref, w1_ref, b1_ref, w2_ref, b2_ref, wf_ref, bf_ref, o_ref):
        f32 = jnp.float32

        # ---- conv1: 3x3 'same', 1 -> 8, one MXU dot (K = 3*28) ----------------
        # x rows: image i occupies rows [32i, 32i+32): row 0 zero pad, rows 1..28
        # image, rows 29..31 zero.  Valid conv1 output row h of image i lands on
        # row 32i + h (taps = rows 32i+h .. 32i+h+2, always inside the band).
        xp = x_ref[...]                                      # (nr, 28) f32
        t1 = pltpu.roll(xp, shift=nr - 1, axis=0)            # xp[r+1]
        t2 = pltpu.roll(xp, shift=nr - 2, axis=0)            # xp[r+2]
        l1 = jnp.concatenate([xp, t1, t2], axis=-1)          # (nr, 84)
        y1 = jnp.dot(l1.astype(dot_dtype), w1_ref[...],
                     preferred_element_type=f32) + b1_ref[...]
        r1 = jnp.maximum(y1, 0.0)                            # (nr, 224), lane = 8*w + c

        # ---- maxpool 2x2 (ReLU already applied; relu & max-pool commute) -------
        pw1 = jnp.maximum(r1[:, 0:LP1], r1[:, C1:LC1])       # (nr, 216), lane 16*wo + c
        p1 = jnp.maximum(pw1, pltpu.roll(pw1, shift=nr - 1, axis=0))
        # valid rows: 32i + 2*ho.  Zero per-image garbage rows (local row >= 28)
        # so conv2's dy = +/-1 taps read the 'same' zero padding (no concats).
        rid = lax.broadcasted_iota(jnp.int32, p1.shape, 0)
        p1 = jnp.where((rid & (PIM - 1)) < H1, p1, 0.0)

        # ---- conv2: 3x3 'same', 8 -> 16, one MXU dot (K = 3*216) ---------------
        # Rows stay uncompacted (valid data on even local rows) -> dy row step = 2;
        # garbage lanes of p1 hit zero rows of the w2 slab.
        tm = pltpu.roll(p1, shift=2, axis=0)                 # p1[r-2]  (dy = -1)
        tp = pltpu.roll(p1, shift=nr - 2, axis=0)            # p1[r+2]  (dy = +1)
        l2 = jnp.concatenate([tm, p1, tp], axis=-1)          # (nr, 648)
        y2 = jnp.dot(l2.astype(dot_dtype), w2_ref[...],
                     preferred_element_type=f32) + b2_ref[...]
        r2 = jnp.maximum(y2, 0.0)                            # (nr, 224), lane = 16*w + c

        # ---- maxpool 2x2 ---------------------------------------------------------
        pw2 = jnp.maximum(r2[:, 0:LP2], r2[:, C2:LC2])       # (nr, 208), lane 32*wo + c
        pz = jnp.maximum(pw2, pltpu.roll(pw2, shift=nr - 2, axis=0))
        # valid rows: 32i + 4*ho, ho in 0..6

        # ---- flatten (torch NCHW order folded into wf slab) + linear -------------
        # 7 static row-picks per image, fused along K into a single (tb, 1456) dot.
        pz3 = pz.reshape(tb, PIM, LP2)
        fc_lhs = jnp.concatenate([pz3[:, 4 * h, :] for h in range(H3)], axis=-1)
        out = jnp.dot(fc_lhs.astype(dot_dtype), wf_ref[...],
                      preferred_element_type=f32) + bf_ref[...]
        o_ref[...] = out                                     # (tb, 128) f32

    return kernel


# ---------------------- weight lowering (one-time glue) ---------------------- #

def _tap_masks(width):
    """masks[dx, w_in, w_out] = 1.0 iff w_in == w_out + dx - 1  (3x3, pad=1)."""
    w_in = jnp.arange(width)[None, :, None]
    w_out = jnp.arange(width)[None, None, :]
    dx = jnp.arange(3)[:, None, None]
    return (w_in == w_out + dx - 1).astype(jnp.float32)


def _lower_params(p, dot_dtype):
    """Fold dx taps / channel mixing / layout + flatten permutation into MXU slabs."""
    # conv1 (8,1,3,3) OIHW -> fused slab (3*28, 224): row = dy*28 + w_in, col = 8*w_out + c.
    w1k = jnp.transpose(p["w1"][:, 0, :, :], (1, 2, 0))                  # (dy, dx, c)
    w1l = jnp.einsum("xiw,yxc->yiwc", _tap_masks(W1), w1k).reshape(3, W1, LC1)
    w1f = w1l.reshape(3 * W1, LC1).astype(dot_dtype)
    b1t = jnp.tile(p["b1"], W1).reshape(1, LC1)

    # conv2 (16,8,3,3) -> fused slab (3*216, 224):
    #   row = dy*216 + 16*w_in + c_in  (c_in >= 8 rows are pooled garbage lanes -> zero),
    #   col = 16*w_out + c_out.
    w2k = jnp.transpose(p["w2"], (2, 3, 1, 0))                           # (dy, dx, ci, co)
    w2d = jnp.einsum("xiw,yxco->yicwo", _tap_masks(W2), w2k)             # (3,14,8,14,16)
    w2d = jnp.pad(w2d, ((0, 0), (0, 0), (0, C2 - C1), (0, 0), (0, 0)))
    w2l = w2d.reshape(3, W2 * C2, W2 * C2)[:, :LP1, :]                   # (3, 216, 224)
    w2f = w2l.reshape(3 * LP1, LC2).astype(dot_dtype)
    b2t = jnp.tile(p["b2"], W2).reshape(1, LC2)

    # fc (n, 784), torch NCHW flatten f = c*49 + 7*h + w
    #   -> fused slab (7*208, 128): row = h*208 + 32*w + c  (c >= 16 rows -> zero).
    ncls = p["wf"].shape[0]
    wfr = p["wf"].reshape(ncls, C2, H3, W3)                              # (n, c, h, w)
    wfr = jnp.transpose(wfr, (2, 3, 1, 0))                               # (h, w, c, n)
    wfr = jnp.pad(wfr, ((0, 0), (0, 0), (0, C2), (0, 0)))                # (7, 7, 32, n)
    wfl = wfr.reshape(H3, W3 * 2 * C2, ncls)[:, :LP2, :]                 # (7, 208, n)
    wfl = jnp.pad(wfl, ((0, 0), (0, 0), (0, NCLS_PAD - ncls)))           # (7, 208, 128)
    wff = wfl.reshape(H3 * LP2, NCLS_PAD).astype(dot_dtype)
    bft = jnp.pad(p["bf"], (0, NCLS_PAD - ncls)).reshape(1, NCLS_PAD)
    return w1f, b1t, w2f, b2t, wff, bft


# --------------------------------- wrapper ----------------------------------- #

def _round_up(n, m):
    return ((n + m - 1) // m) * m


def cnn_forward(x_nchw, p, *, tb=32, dot_dtype=jnp.bfloat16):
    B = x_nchw.shape[0]
    ncls = p["bf"].shape[0]

    # Batch tile: multiple of 8 (sublane tiling of the (tb, 128) output block),
    # capped at the (padded) batch.  tb is the main VMEM knob: ~32 is safe on all
    # generations; push toward 64-128 on v6e with more vmem_limit headroom.
    tb = max(8, _round_up(min(tb, max(B, 1)), 8))
    bp = _round_up(B, tb)
    grid = bp // tb

    w1f, b1t, w2f, b2t, wff, bft = _lower_params(p, dot_dtype)

    # One-time layout plumbing: fold conv1's 'same' row padding into a 32-row
    # band per image so the kernel sees one tall, lane-dense (B*32, 28) slab.
    xr = jnp.pad(x_nchw[:, 0], ((0, bp - B), (1, PIM - 1 - H1), (0, 0)))
    xr = xr.reshape(bp * PIM, W1)

    flops = (2 * bp * PIM * LC1 * (3 * W1)
             + 2 * bp * PIM * LC2 * (3 * LP1)
             + 2 * bp * (H3 * LP2) * NCLS_PAD)
    bytes_accessed = (xr.size * 4 + bp * NCLS_PAD * 4
                      + (w1f.size + w2f.size + wff.size) * w1f.dtype.itemsize
                      + (b1t.size + b2t.size + bft.size) * 4)

    out = pl.pallas_call(
        _make_kernel(tb, dot_dtype),
        out_shape=jax.ShapeDtypeStruct((bp, NCLS_PAD), jnp.float32),
        grid_spec=pltpu.PrefetchScalarGridSpec(
            num_scalar_prefetch=0,
            grid=(grid,),
            in_specs=[
                pl.BlockSpec((tb * PIM, W1), lambda i: (i, 0)),
                pl.BlockSpec((3 * W1, LC1), lambda i: (0, 0)),
                pl.BlockSpec((1, LC1), lambda i: (0, 0)),
                pl.BlockSpec((3 * LP1, LC2), lambda i: (0, 0)),
                pl.BlockSpec((1, LC2), lambda i: (0, 0)),
                pl.BlockSpec((H3 * LP2, NCLS_PAD), lambda i: (0, 0)),
                pl.BlockSpec((1, NCLS_PAD), lambda i: (0, 0)),
            ],
            out_specs=pl.BlockSpec((tb, NCLS_PAD), lambda i: (i, 0)),
        ),
        compiler_params=pltpu.CompilerParams(
            dimension_semantics=("parallel",),
            vmem_limit_bytes=48 * 1024 * 1024),
        cost_estimate=pl.CostEstimate(
            flops=flops, transcendentals=0, bytes_accessed=bytes_accessed),
    )(xr, w1f, b1t, w2f, b2t, wff, bft)
    return out[:B, :ncls]


# ----------------------------- pure-JAX reference ----------------------------- #

def reference_forward(x, p, dot_dtype=jnp.float32):
    """dot_dtype=float32: exact PyTorch-equivalent math.
       dot_dtype=bfloat16: precision-matched to the kernel (bf16 dot operands,
       f32 accumulation) -- validates layout/indexing at tight tolerance."""
    f32 = jnp.float32

    def conv(x, w, b):
        y = lax.conv_general_dilated(
            x.astype(dot_dtype), w.astype(dot_dtype), (1, 1), ((1, 1), (1, 1)),
            dimension_numbers=("NCHW", "OIHW", "NCHW"),
            preferred_element_type=f32)
        return y + b[None, :, None, None]

    def pool(x):
        return lax.reduce_window(x, -jnp.inf, lax.max,
                                 (1, 1, 2, 2), (1, 1, 2, 2), "VALID")

    y = jnp.maximum(pool(conv(x, p["w1"], p["b1"])), 0.0)
    y = jnp.maximum(pool(conv(y, p["w2"], p["b2"])), 0.0)
    y = y.reshape(x.shape[0], -1)
    return jnp.dot(y.astype(dot_dtype), p["wf"].T.astype(dot_dtype),
                   preferred_element_type=f32) + p["bf"]


# ----------------------------------- main ------------------------------------- #

def init_params(key, n_classes=10, fcl_n=784):
    ks = jax.random.split(key, 6)
    return {
        "w1": 0.1 * jax.random.normal(ks[0], (8, 1, 3, 3), jnp.float32),
        "b1": 0.1 * jax.random.normal(ks[1], (8,), jnp.float32),
        "w2": 0.1 * jax.random.normal(ks[2], (16, 8, 3, 3), jnp.float32),
        "b2": 0.1 * jax.random.normal(ks[3], (16,), jnp.float32),
        "wf": 0.05 * jax.random.normal(ks[4], (n_classes, fcl_n), jnp.float32),
        "bf": 0.05 * jax.random.normal(ks[5], (n_classes,), jnp.float32),
    }


if __name__ == "__main__":
    key = jax.random.PRNGKey(0)
    k_x, k_p = jax.random.split(key)
    # fcl_n = 784 = 16 * 7 * 7 implies a 28x28 single-channel input (MNIST-like).
    x = jax.random.normal(k_x, (2, 1, 28, 28), jnp.float32)
    params = init_params(k_p)

    out = jax.jit(cnn_forward)(x, params)
    out = jax.block_until_ready(out)
    assert out.shape == (2, 10), out.shape

    # (a) layout/lowering check: precision-matched reference (bf16 dot operands,
    #     f32 accumulation) must agree tightly -- catches any indexing/slab bug.
    ref_m = reference_forward(x, params, dot_dtype=jnp.bfloat16)
    err_m = float(jnp.max(jnp.abs(out - ref_m)))
    assert err_m < 5e-3, f"matched-precision max abs err {err_m}"

    # (b) end-to-end numerics vs the pure-f32 reference; the difference is bounded
    #     by bf16 rounding of the MXU inputs (accumulation stays f32 throughout).
    ref_f = reference_forward(x, params, dot_dtype=jnp.float32)
    err_f = float(jnp.max(jnp.abs(out - ref_f)))
    assert err_f < 5e-2, f"f32-reference max abs err {err_f}"

    print("KERNEL_OK")
</pallas_src>

<mosaic_0001>
module attributes {stable_mosaic.version = 11 : i64} {
  func.func @kernel(%arg0: i32, %arg1: memref<256x28xf32, #tpu.memory_space<vmem>>, %arg2: memref<84x224xbf16, #tpu.memory_space<vmem>>, %arg3: memref<1x224xf32, #tpu.memory_space<vmem>>, %arg4: memref<648x224xbf16, #tpu.memory_space<vmem>>, %arg5: memref<1x224xf32, #tpu.memory_space<vmem>>, %arg6: memref<1456x128xbf16, #tpu.memory_space<vmem>>, %arg7: memref<1x128xf32, #tpu.memory_space<vmem>>, %arg8: memref<8x128xf32, #tpu.memory_space<vmem>>) attributes {dimension_semantics = [#tpu.dimension_semantics<parallel>], iteration_bounds = array<i64: 1>, scalar_prefetch = 0 : i64, scratch_operands = 0 : i64, tpu.core_type = #tpu.core_type<tc>, window_params = [{transform_indices = @transform_0, window_bounds = array<i64: 256, 28>}, {pipeline_mode = #tpu.pipeline_mode<synchronous>, transform_indices = @transform_1, window_bounds = array<i64: 84, 224>}, {pipeline_mode = #tpu.pipeline_mode<synchronous>, transform_indices = @transform_2, window_bounds = array<i64: 1, 224>}, {pipeline_mode = #tpu.pipeline_mode<synchronous>, transform_indices = @transform_3, window_bounds = array<i64: 648, 224>}, {pipeline_mode = #tpu.pipeline_mode<synchronous>, transform_indices = @transform_4, window_bounds = array<i64: 1, 224>}, {pipeline_mode = #tpu.pipeline_mode<synchronous>, transform_indices = @transform_5, window_bounds = array<i64: 1456, 128>}, {pipeline_mode = #tpu.pipeline_mode<synchronous>, transform_indices = @transform_6, window_bounds = array<i64: 1, 128>}, {transform_indices = @transform_7, window_bounds = array<i64: 8, 128>}]} {
    %c0 = arith.constant 0 : index
    %c0_0 = arith.constant 0 : index
    %0 = vector.load %arg1[%c0, %c0_0] : memref<256x28xf32, #tpu.memory_space<vmem>>, vector<256x28xf32>
    %c255_i32 = arith.constant 255 : i32
    %1 = tpu.dynamic_rotate %0 by %c255_i32 dim 0 : vector<256x28xf32>, i32 -> vector<256x28xf32>
    %c254_i32 = arith.constant 254 : i32
    %2 = tpu.dynamic_rotate %0 by %c254_i32 dim 0 : vector<256x28xf32>, i32 -> vector<256x28xf32>
    %3 = tpu.concatenate %0, %1, %2 in 1 : vector<256x28xf32>, vector<256x28xf32>, vector<256x28xf32> -> vector<256x84xf32>
    %4 = arith.truncf %3 : vector<256x84xf32> to vector<256x84xbf16>
    %c0_1 = arith.constant 0 : index
    %c0_2 = arith.constant 0 : index
    %5 = vector.load %arg2[%c0_1, %c0_2] : memref<84x224xbf16, #tpu.memory_space<vmem>>, vector<84x224xbf16>
    %cst = arith.constant dense<0.000000e+00> : vector<256x224xf32>
    %6 = tpu.matmul %4, %5, %cst {dimension_numbers = #tpu.dot_dimension_numbers<[1], [0], [0], [1], [0, 0, 1, 1], [], []>} : vector<256x84xbf16>, vector<84x224xbf16>, vector<256x224xf32> -> vector<256x224xf32>
    %c0_3 = arith.constant 0 : index
    %c0_4 = arith.constant 0 : index
    %7 = vector.load %arg3[%c0_3, %c0_4] : memref<1x224xf32, #tpu.memory_space<vmem>>, vector<1x224xf32>
    %8 = vector.broadcast %7 : vector<1x224xf32> to vector<256x224xf32>
    %9 = arith.addf %6, %8 : vector<256x224xf32>
    %cst_5 = arith.constant 0.000000e+00 : f32
    %10 = vector.broadcast %cst_5 : f32 to vector<256x224xf32>
    %11 = arith.maximumf %9, %10 : vector<256x224xf32>
    %12 = vector.extract_strided_slice %11 {offsets = [0, 0], sizes = [256, 216], strides = [1, 1]} : vector<256x224xf32> to vector<256x216xf32>
    %13 = vector.extract_strided_slice %11 {offsets = [0, 8], sizes = [256, 216], strides = [1, 1]} : vector<256x224xf32> to vector<256x216xf32>
    %14 = arith.maximumf %12, %13 : vector<256x216xf32>
    %c255_i32_6 = arith.constant 255 : i32
    %15 = tpu.dynamic_rotate %14 by %c255_i32_6 dim 0 : vector<256x216xf32>, i32 -> vector<256x216xf32>
    %16 = arith.maximumf %14, %15 : vector<256x216xf32>
    %17 = tpu.iota {dimensions = array<i32: 0>} : vector<256x216xi32>
    %c31_i32 = arith.constant 31 : i32
    %18 = vector.broadcast %c31_i32 : i32 to vector<256x216xi32>
    %19 = arith.andi %17, %18 : vector<256x216xi32>
    %c28_i32 = arith.constant 28 : i32
    %20 = vector.broadcast %c28_i32 : i32 to vector<256x216xi32>
    %21 = arith.cmpi slt, %19, %20 : vector<256x216xi32>
    %cst_7 = arith.constant 0.000000e+00 : f32
    %22 = vector.broadcast %cst_7 : f32 to vector<256x216xf32>
    %23 = arith.select %21, %16, %22 : vector<256x216xi1>, vector<256x216xf32>
    %c2_i32 = arith.constant 2 : i32
    %24 = tpu.dynamic_rotate %23 by %c2_i32 dim 0 : vector<256x216xf32>, i32 -> vector<256x216xf32>
    %c254_i32_8 = arith.constant 254 : i32
    %25 = tpu.dynamic_rotate %23 by %c254_i32_8 dim 0 : vector<256x216xf32>, i32 -> vector<256x216xf32>
    %26 = tpu.concatenate %24, %23, %25 in 1 : vector<256x216xf32>, vector<256x216xf32>, vector<256x216xf32> -> vector<256x648xf32>
    %27 = arith.truncf %26 : vector<256x648xf32> to vector<256x648xbf16>
    %c0_9 = arith.constant 0 : index
    %c0_10 = arith.constant 0 : index
    %28 = vector.load %arg4[%c0_9, %c0_10] : memref<648x224xbf16, #tpu.memory_space<vmem>>, vector<648x224xbf16>
    %cst_11 = arith.constant dense<0.000000e+00> : vector<256x224xf32>
    %29 = tpu.matmul %27, %28, %cst_11 {dimension_numbers = #tpu.dot_dimension_numbers<[1], [0], [0], [1], [0, 0, 1, 1], [], []>} : vector<256x648xbf16>, vector<648x224xbf16>, vector<256x224xf32> -> vector<256x224xf32>
    %c0_12 = arith.constant 0 : index
    %c0_13 = arith.constant 0 : index
    %30 = vector.load %arg5[%c0_12, %c0_13] : memref<1x224xf32, #tpu.memory_space<vmem>>, vector<1x224xf32>
    %31 = vector.broadcast %30 : vector<1x224xf32> to vector<256x224xf32>
    %32 = arith.addf %29, %31 : vector<256x224xf32>
    %cst_14 = arith.constant 0.000000e+00 : f32
    %33 = vector.broadcast %cst_14 : f32 to vector<256x224xf32>
    %34 = arith.maximumf %32, %33 : vector<256x224xf32>
    %35 = vector.extract_strided_slice %34 {offsets = [0, 0], sizes = [256, 208], strides = [1, 1]} : vector<256x224xf32> to vector<256x208xf32>
    %36 = vector.extract_strided_slice %34 {offsets = [0, 16], sizes = [256, 208], strides = [1, 1]} : vector<256x224xf32> to vector<256x208xf32>
    %37 = arith.maximumf %35, %36 : vector<256x208xf32>
    %c254_i32_15 = arith.constant 254 : i32
    %38 = tpu.dynamic_rotate %37 by %c254_i32_15 dim 0 : vector<256x208xf32>, i32 -> vector<256x208xf32>
    %39 = arith.maximumf %37, %38 : vector<256x208xf32>
    %40 = vector.shape_cast %39 : vector<256x208xf32> to vector<8x32x208xf32>
    %41 = vector.extract_strided_slice %40 {offsets = [0, 0, 0], sizes = [8, 1, 208], strides = [1, 1, 1]} : vector<8x32x208xf32> to vector<8x1x208xf32>
    %42 = vector.shape_cast %41 : vector<8x1x208xf32> to vector<8x208xf32>
    %43 = vector.extract_strided_slice %40 {offsets = [0, 4, 0], sizes = [8, 1, 208], strides = [1, 1, 1]} : vector<8x32x208xf32> to vector<8x1x208xf32>
    %44 = vector.shape_cast %43 : vector<8x1x208xf32> to vector<8x208xf32>
    %45 = vector.extract_strided_slice %40 {offsets = [0, 8, 0], sizes = [8, 1, 208], strides = [1, 1, 1]} : vector<8x32x208xf32> to vector<8x1x208xf32>
    %46 = vector.shape_cast %45 : vector<8x1x208xf32> to vector<8x208xf32>
    %47 = vector.extract_strided_slice %40 {offsets = [0, 12, 0], sizes = [8, 1, 208], strides = [1, 1, 1]} : vector<8x32x208xf32> to vector<8x1x208xf32>
    %48 = vector.shape_cast %47 : vector<8x1x208xf32> to vector<8x208xf32>
    %49 = vector.extract_strided_slice %40 {offsets = [0, 16, 0], sizes = [8, 1, 208], strides = [1, 1, 1]} : vector<8x32x208xf32> to vector<8x1x208xf32>
    %50 = vector.shape_cast %49 : vector<8x1x208xf32> to vector<8x208xf32>
    %51 = vector.extract_strided_slice %40 {offsets = [0, 20, 0], sizes = [8, 1, 208], strides = [1, 1, 1]} : vector<8x32x208xf32> to vector<8x1x208xf32>
    %52 = vector.shape_cast %51 : vector<8x1x208xf32> to vector<8x208xf32>
    %53 = vector.extract_strided_slice %40 {offsets = [0, 24, 0], sizes = [8, 1, 208], strides = [1, 1, 1]} : vector<8x32x208xf32> to vector<8x1x208xf32>
    %54 = vector.shape_cast %53 : vector<8x1x208xf32> to vector<8x208xf32>
    %55 = tpu.concatenate %42, %44, %46, %48, %50, %52, %54 in 1 : vector<8x208xf32>, vector<8x208xf32>, vector<8x208xf32>, vector<8x208xf32>, vector<8x208xf32>, vector<8x208xf32>, vector<8x208xf32> -> vector<8x1456xf32>
    %56 = arith.truncf %55 : vector<8x1456xf32> to vector<8x1456xbf16>
    %c0_16 = arith.constant 0 : index
    %c0_17 = arith.constant 0 : index
    %57 = vector.load %arg6[%c0_16, %c0_17] : memref<1456x128xbf16, #tpu.memory_space<vmem>>, vector<1456x128xbf16>
    %cst_18 = arith.constant dense<0.000000e+00> : vector<8x128xf32>
    %58 = tpu.matmul %56, %57, %cst_18 {dimension_numbers = #tpu.dot_dimension_numbers<[1], [0], [0], [1], [0, 0, 1, 1], [], []>} : vector<8x1456xbf16>, vector<1456x128xbf16>, vector<8x128xf32> -> vector<8x128xf32>
    %c0_19 = arith.constant 0 : index
    %c0_20 = arith.constant 0 : index
    %59 = vector.load %arg7[%c0_19, %c0_20] : memref<1x128xf32, #tpu.memory_space<vmem>>, vector<1x128xf32>
    %60 = vector.broadcast %59 : vector<1x128xf32> to vector<8x128xf32>
    %61 = arith.addf %58, %60 : vector<8x128xf32>
    %c0_21 = arith.constant 0 : index
    %c0_22 = arith.constant 0 : index
    %62 = vector.load %arg8[%c0_21, %c0_22] : memref<8x128xf32, #tpu.memory_space<vmem>>, vector<8x128xf32>
    tpu.vector_store %arg8[%c0_21, %c0_22], %61 {strides = array<i32>} : memref<8x128xf32, #tpu.memory_space<vmem>>, vector<8x128xf32>,
    return
  }
  func.func @transform_0(%arg0: i32) -> (i32, i32) {
    %c0_i32 = arith.constant 0 : i32
    %c0_i32_0 = arith.constant 0 : i32
    return %arg0, %c0_i32 : i32, i32
  }
  func.func @transform_1(%arg0: i32) -> (i32, i32) {
    %c0_i32 = arith.constant 0 : i32
    %c0_i32_0 = arith.constant 0 : i32
    %c0_i32_1 = arith.constant 0 : i32
    return %c0_i32, %c0_i32_0 : i32, i32
  }
  func.func @transform_2(%arg0: i32) -> (i32, i32) {
    %c0_i32 = arith.constant 0 : i32
    %c0_i32_0 = arith.constant 0 : i32
    %c0_i32_1 = arith.constant 0 : i32
    return %c0_i32, %c0_i32_0 : i32, i32
  }
  func.func @transform_3(%arg0: i32) -> (i32, i32) {
    %c0_i32 = arith.constant 0 : i32
    %c0_i32_0 = arith.constant 0 : i32
    %c0_i32_1 = arith.constant 0 : i32
    return %c0_i32, %c0_i32_0 : i32, i32
  }
  func.func @transform_4(%arg0: i32) -> (i32, i32) {
    %c0_i32 = arith.constant 0 : i32
    %c0_i32_0 = arith.constant 0 : i32
    %c0_i32_1 = arith.constant 0 : i32
    return %c0_i32, %c0_i32_0 : i32, i32
  }
  func.func @transform_5(%arg0: i32) -> (i32, i32) {
    %c0_i32 = arith.constant 0 : i32
    %c0_i32_0 = arith.constant 0 : i32
    %c0_i32_1 = arith.constant 0 : i32
    return %c0_i32, %c0_i32_0 : i32, i32
  }
  func.func @transform_6(%arg0: i32) -> (i32, i32) {
    %c0_i32 = arith.constant 0 : i32
    %c0_i32_0 = arith.constant 0 : i32
    %c0_i32_1 = arith.constant 0 : i32
    return %c0_i32, %c0_i32_0 : i32, i32
  }
  func.func @transform_7(%arg0: i32) -> (i32, i32) {
    %c0_i32 = arith.constant 0 : i32
    %c0_i32_0 = arith.constant 0 : i32
    return %arg0, %c0_i32 : i32, i32
  }
}

</mosaic_0001>

<bundles_post_ra>
// kernel: tile.13
= control target key start
LH: loop header
LB: loop body
LE: loop exit
PB: predicated region body
PF: predicated region fallthrough
CT: control target
= control target key end

     0   :  { %s40_s0 = inlined_call_operand.vmem [shape: f32[8], index: 0, kind: input, shape index: {}]   ;;  %s41_s1 = inlined_call_operand.vmem [shape: f32[28,8], index: 1, kind: output, shape index: {}]  }
   0x1   :  { %v4_v0 = vld [vmem:[%s40_s0] ss:$0 sm:$0xff] }
   0x2   :  { %5 = vst [vmem:[%s41_s1] sm:$0xff] %v4_v0  ;;  %12 = vst [vmem:[%s41_s1 + $0x8] sm:$0xff] %v4_v0 }
   0x3   :  { %13 = vst [vmem:[%s41_s1 + $0x10] sm:$0xff] %v4_v0  ;;  %14 = vst [vmem:[%s41_s1 + $0x18] sm:$0xff] %v4_v0 }

// kernel: tile.14
= control target key start
LH: loop header
LB: loop body
LE: loop exit
PB: predicated region body
PF: predicated region fallthrough
CT: control target
= control target key end

     0   :  { %s149_s10 = smov 120   ;;  %s150_s11 = smov 104   ;;  %vm4_vm0 = vcmask 64512   ;;  %vm10_vm1 = vcmask 1048512   ;;  %vm16_vm2 = vcmask 982912   ;;  %vm22_vm3 = vcmask 917312   ;;  %s228_s0 = inlined_call_operand.vmem [shape: f32[28,8], index: 0, kind: input, shape index: {}]   ;;  %s229_s1 = inlined_call_operand.vmem [shape: f32[1,224], index: 1, kind: output, shape index: {}]  }
   0x1   :  { %v118_v0 = vld [vmem:[%s228_s0 + $0xf] sm:$0x1]   ;;  %v120_v1 = vld [vmem:[%s228_s0 + $0xd] sm:$0x1]   ;;  %v119_v2 = vld [vmem:[%s228_s0 + $0xe] sm:$0x1]  }
   0x2   :  { %8 = vrot.lane.b32.xlu0 %v118_v0, %s149_s10  ;;  %20 = vrot.lane.b32.xlu1 %v120_v1, %s150_s11  ;;  %v121_v3 = vld [vmem:[%s228_s0 + $0xc] sm:$0x1]   ;;  %s31_s16 = smov 3  ;;  %s38_s17 = smov 3  ;;  %vm28_vm4 = vcmask 851712   ;;  %vm35_vm5 = vcmask 786112  }
   0x3   :  { %s151_s18 = smov 112   ;;  %s152_s19 = smov 96   ;;  %v122_v4 = vld [vmem:[%s228_s0 + $0xb] ss:$16 sm:%s31_s16]   ;;  %v123_v5 = vld [vmem:[%s228_s0 + $0xa] ss:$16 sm:%s38_s17]  }
   0x4   :  { %s45_s24 = smov 3  ;;  %s52_s25 = smov 3  ;;  %vm42_vm6 = vcmask 720512   ;;  %vm49_vm7 = vcmask 654912   ;;  %vm56_vm8 = vcmask 589312   ;;  %vm63_vm9 = vcmask 523712  }
   0x5   :  { %s153_s26 = smov 88   ;;  %s154_s27 = smov 80   ;;  %v124_v6 = vld [vmem:[%s228_s0 + $0x9] ss:$16 sm:%s45_s24]   ;;  %v125_v7 = vld [vmem:[%s228_s0 + $0x8] ss:$16 sm:%s52_s25]  }
   0x6   :  { %14 = vrot.lane.b32.xlu0 %v119_v2, %s151_s18  ;;  %26 = vrot.lane.b32.xlu1 %v121_v3, %s152_s19  ;;  %s59_s3 = smov 3  ;;  %s66_s4 = smov 3  ;;  %vm70_vm10 = vcmask 458112   ;;  %vm77_vm11 = vcmask 392512   ;;  %vm84_vm12 = vcmask 326912   ;;  %vm91_vm13 = vcmask 261312  }
   0x7   :  { %s155_s5 = smov 72   ;;  %s156_s6 = smov 64   ;;  %v126_v8 = vld [vmem:[%s228_s0 + $0x7] ss:$16 sm:%s59_s3]   ;;  %v127_v9 = vld [vmem:[%s228_s0 + $0x6] ss:$16 sm:%s66_s4]  }
   0x8   :  { %s2_s9 = smov 3  ;;  %s73_s14 = smov 3  ;;  %vm98_vm14 = vcmask 195712   ;;  %vm105_vm15 = vcmask 130112  }
   0x9   :  { %v3_v10 = vld [vmem:[%s228_s0] ss:$16 sm:%s2_s9]   ;;  %s80_s15 = smov 3  ;;  %s157_s16 = smov 56   ;;  %v128_v11 = vld [vmem:[%s228_s0 + $0x5] ss:$16 sm:%s73_s14]  }
   0xa   :  { %33 = vrot.lane.b32.xlu0 %v122_v4, %s153_s26  ;;  %40 = vrot.lane.b32.xlu1 %v123_v5, %s154_s27  ;;  %5 = vst.msk [vmem:[#allocation0] ss:$8 sm:$0x3] %vm4_vm0, %v3_v10   ;;  %s158_s17 = smov 48   ;;  %v129_v12 = vld [vmem:[%s228_s0 + $0x4] ss:$16 sm:%s80_s15]  }
   0xb   :  { %s87_s22 = smov 3  ;;  %s94_s23 = smov 3 }
   0xc   :  { %s159_s24 = smov 40   ;;  %s160_s25 = smov 32   ;;  %v130_v13 = vld [vmem:[%s228_s0 + $0x3] ss:$16 sm:%s87_s22]   ;;  %v131_v14 = vld [vmem:[%s228_s0 + $0x2] ss:$16 sm:%s94_s23]  }
   0xd   :  { %s101_s30 = smov 3  ;;  %s161_s2 = smov 24  }
   0xe   :  { %47 = vrot.lane.b32.xlu0 %v124_v6, %s155_s5  ;;  %54 = vrot.lane.b32.xlu1 %v125_v7, %s156_s6  ;;  %s162_s3 = smov 16   ;;  %v132_v15 = vld [vmem:[%s228_s0 + $0x1] ss:$16 sm:%s101_s30]   ;;  %s163_s0 = smov 8  }
  0x12   :  { %61 = vrot.lane.b32.xlu0 %v126_v8, %s157_s16  ;;  %68 = vrot.lane.b32.xlu1 %v127_v9, %s158_s17 }
  0x16   :  { %75 = vrot.lane.b32.xlu0 %v128_v11, %s159_s24  ;;  %82 = vrot.lane.b32.xlu1 %v129_v12, %s160_s25 }
  0x1a   :  { %89 = vrot.lane.b32.xlu0 %v130_v13, %s161_s2  ;;  %96 = vrot.lane.b32.xlu1 %v131_v14, %s162_s3 }
  0x1e   :  { %103 = vrot.lane.b32.xlu0 %v132_v15, %s163_s0 }
  0x74   :  { %v9_v16 = vpop.permute.xlu0 %8   ;;  %v21_v17 = vpop.permute.xlu1 %20  }
  0x75   :  { %11 = vst.msk [vmem:[#allocation0] sm:$0x1] %vm10_vm1, %v9_v16  }
  0x78   :  { %v15_v18 = vpop.permute.xlu0 %14   ;;  %v27_v19 = vpop.permute.xlu1 %26  }
  0x79   :  { %17 = vst.msk [vmem:[#allocation0] sm:$0x1] %vm16_vm2, %v15_v18  }
  0x7a   :  { %23 = vst.msk [vmem:[#allocation0] sm:$0x1] %vm22_vm3, %v21_v17  }
  0x7b   :  { %29 = vst.msk [vmem:[#allocation0] sm:$0x1] %vm28_vm4, %v27_v19  }
  0x7c   :  { %v34_v20 = vpop.permute.xlu0 %33   ;;  %v41_v21 = vpop.permute.xlu1 %40  }
  0x7d   :  { %36 = vst.msk [vmem:[#allocation0] ss:$8 sm:$0x3] %vm35_vm5, %v34_v20  }
  0x7e   :  { %43 = vst.msk [vmem:[#allocation0] ss:$8 sm:$0x3] %vm42_vm6, %v41_v21  }
  0x80   :  { %v48_v22 = vpop.permute.xlu0 %47   ;;  %v55_v23 = vpop.permute.xlu1 %54  }
  0x81   :  { %50 = vst.msk [vmem:[#allocation0] ss:$8 sm:$0x3] %vm49_vm7, %v48_v22  }
  0x82   :  { %57 = vst.msk [vmem:[#allocation0] ss:$8 sm:$0x3] %vm56_vm8, %v55_v23  }
  0x84   :  { %v62_v24 = vpop.permute.xlu0 %61   ;;  %v69_v25 = vpop.permute.xlu1 %68  }
  0x85   :  { %64 = vst.msk [vmem:[#allocation0] ss:$8 sm:$0x3] %vm63_vm9, %v62_v24  }
  0x86   :  { %71 = vst.msk [vmem:[#allocation0] ss:$8 sm:$0x3] %vm70_vm10, %v69_v25  }
  0x88   :  { %v76_v26 = vpop.permute.xlu0 %75   ;;  %v83_v27 = vpop.permute.xlu1 %82  }
  0x89   :  { %78 = vst.msk [vmem:[#allocation0] ss:$8 sm:$0x3] %vm77_vm11, %v76_v26  }
  0x8a   :  { %85 = vst.msk [vmem:[#allocation0] ss:$8 sm:$0x3] %vm84_vm12, %v83_v27  }
  0x8c   :  { %v90_v28 = vpop.permute.xlu0 %89   ;;  %v97_v29 = vpop.permute.xlu1 %96  }
  0x8d   :  { %92 = vst.msk [vmem:[#allocation0] ss:$8 sm:$0x3] %vm91_vm13, %v90_v28  }
  0x8e   :  { %99 = vst.msk [vmem:[#allocation0] ss:$8 sm:$0x3] %vm98_vm14, %v97_v29  }
  0x90   :  { %v104_v30 = vpop.permute.xlu0 %103  }
  0x91   :  { %106 = vst.msk [vmem:[#allocation0] ss:$8 sm:$0x3] %vm105_vm15, %v104_v30  }
  0x98   :  { %v110_v31 = vld [vmem:[#allocation0] sm:$0x1]  ;;  %v114_v32 = vld [vmem:[#allocation0 + $0x8] sm:$0x1] }
  0x99   :  { %112 = vst [vmem:[%s229_s1] sm:$0x1] %v110_v31  ;;  %133 = vst [vmem:[%s229_s1 + $0x1] sm:$0x1] %v114_v32 }

// kernel: tile.18
= control target key start
LH: loop header
LB: loop body
LE: loop exit
PB: predicated region body
PF: predicated region fallthrough
CT: control target
= control target key end

     0   :  { %s28_s0 = inlined_call_operand.vmem [shape: f32[16], index: 0, kind: input, shape index: {}]   ;;  %s29_s1 = inlined_call_operand.vmem [shape: f32[14,16], index: 1, kind: output, shape index: {}]  }
   0x1   :  { %v4_v0 = vld [vmem:[%s28_s0] ss:$0 sm:$0xff] }
   0x2   :  { %5 = vst [vmem:[%s29_s1] sm:$0xff] %v4_v0  ;;  %8 = vst [vmem:[%s29_s1 + $0x8] sm:$0xff] %v4_v0 }

// kernel: tile.19
= control target key start
LH: loop header
LB: loop body
LE: loop exit
PB: predicated region body
PF: predicated region fallthrough
CT: control target
= control target key end

     0   :  { %s19_s8 = smov 3  ;;  %s79_s9 = smov 112   ;;  %vm4_vm0 = vcmask 130048   ;;  %vm10_vm1 = vcmask 1048448   ;;  %vm16_vm2 = vcmask 917248   ;;  %vm23_vm3 = vcmask 786048   ;;  %s126_s0 = inlined_call_operand.vmem [shape: f32[14,16], index: 0, kind: input, shape index: {}]   ;;  %s127_s1 = inlined_call_operand.vmem [shape: f32[1,224], index: 1, kind: output, shape index: {}]  }
   0x1   :  { %v64_v0 = vld [vmem:[%s126_s0 + $0x7] sm:$0x1]   ;;  %v66_v1 = vld [vmem:[%s126_s0 + $0x5] ss:$8 sm:%s19_s8]   ;;  %s80_s12 = smov 80   ;;  %s26_s15 = smov 3 }
   0x2   :  { %8 = vrot.lane.b32.xlu0 %v64_v0, %s79_s9  ;;  %21 = vrot.lane.b32.xlu1 %v66_v1, %s80_s12  ;;  %v65_v2 = vld [vmem:[%s126_s0 + $0x6] sm:$0x1]   ;;  %s33_s18 = smov 3  ;;  %s40_s19 = smov 3  ;;  %vm30_vm4 = vcmask 654848   ;;  %vm37_vm5 = vcmask 523648  }
   0x3   :  { %v67_v3 = vld [vmem:[%s126_s0 + $0x4] ss:$8 sm:%s26_s15]   ;;  %s81_s20 = smov 96   ;;  %s82_s21 = smov 64   ;;  %v68_v4 = vld [vmem:[%s126_s0 + $0x3] ss:$8 sm:%s33_s18]  }
   0x4   :  { %s2_s24 = smov 3  ;;  %v69_v5 = vld [vmem:[%s126_s0 + $0x2] ss:$8 sm:%s40_s19]   ;;  %s47_s27 = smov 3  ;;  %vm44_vm6 = vcmask 392448   ;;  %vm51_vm7 = vcmask 261248  }
   0x5   :  { %v3_v6 = vld [vmem:[%s126_s0] ss:$8 sm:%s2_s24]   ;;  %s83_s30 = smov 48   ;;  %s84_s2 = smov 32   ;;  %v70_v7 = vld [vmem:[%s126_s0 + $0x1] ss:$8 sm:%s47_s27]  }
   0x6   :  { %14 = vrot.lane.b32.xlu0 %v65_v2, %s81_s20  ;;  %28 = vrot.lane.b32.xlu1 %v67_v3, %s82_s21  ;;  %5 = vst.msk [vmem:[#allocation0] ss:$8 sm:$0x3] %vm4_vm0, %v3_v6   ;;  %s85_s0 = smov 16  }
   0xa   :  { %35 = vrot.lane.b32.xlu0 %v68_v4, %s83_s30  ;;  %42 = vrot.lane.b32.xlu1 %v69_v5, %s84_s2 }
   0xe   :  { %49 = vrot.lane.b32.xlu0 %v70_v7, %s85_s0 }
  0x74   :  { %v9_v8 = vpop.permute.xlu0 %8   ;;  %v22_v9 = vpop.permute.xlu1 %21  }
  0x75   :  { %11 = vst.msk [vmem:[#allocation0] sm:$0x1] %vm10_vm1, %v9_v8  }
  0x78   :  { %v15_v10 = vpop.permute.xlu0 %14   ;;  %v29_v11 = vpop.permute.xlu1 %28  }
  0x79   :  { %17 = vst.msk [vmem:[#allocation0] sm:$0x1] %vm16_vm2, %v15_v10  }
  0x7a   :  { %24 = vst.msk [vmem:[#allocation0] ss:$8 sm:$0x3] %vm23_vm3, %v22_v9  }
  0x7b   :  { %31 = vst.msk [vmem:[#allocation0] ss:$8 sm:$0x3] %vm30_vm4, %v29_v11  }
  0x7c   :  { %v36_v12 = vpop.permute.xlu0 %35   ;;  %v43_v13 = vpop.permute.xlu1 %42  }
  0x7d   :  { %38 = vst.msk [vmem:[#allocation0] ss:$8 sm:$0x3] %vm37_vm5, %v36_v12  }
  0x7e   :  { %45 = vst.msk [vmem:[#allocation0] ss:$8 sm:$0x3] %vm44_vm6, %v43_v13  }
  0x80   :  { %v50_v14 = vpop.permute.xlu0 %49  }
  0x81   :  { %52 = vst.msk [vmem:[#allocation0] ss:$8 sm:$0x3] %vm51_vm7, %v50_v14  }
  0x88   :  { %v56_v15 = vld [vmem:[#allocation0] sm:$0x1]  ;;  %v60_v16 = vld [vmem:[#allocation0 + $0x8] sm:$0x1] }
  0x89   :  { %58 = vst [vmem:[%s127_s1] sm:$0x1] %v56_v15  ;;  %71 = vst [vmem:[%s127_s1 + $0x1] sm:$0x1] %v60_v16 }

// kernel: cnn_forward.1
= control target key start
LH: loop header
LB: loop body
LE: loop exit
PB: predicated region body
PF: predicated region fallthrough
CT: control target
= control target key end

     0   :  { %v91_v0 = vlaneseq  ;;  %v13203_v10 = vmov 0   ;;  %s7359_s19 = smov 28   ;;  %s7360_s24 = smov 56   ;;  %vm656_vm2 = vcmask 1041408   ;;  %vm447_vm3 = vcmask 228352   ;;  %s13195_s0 = inlined_call_operand.vmem [shape: f32[256,28], index: 0, kind: input, shape index: {}]   ;;  %s13196_s1 = inlined_call_operand.vmem [shape: bf16[84,224], index: 1, kind: input, shape index: {}]   ;;  %s13197_s2 = inlined_call_operand.vmem [shape: f32[1,224], index: 2, kind: input, shape index: {}]   ;;  %s13198_s3 = inlined_call_operand.vmem [shape: bf16[648,224], index: 3, kind: input, shape index: {}]   ;;  %s13199_s4 = inlined_call_operand.vmem [shape: f32[1,224], index: 4, kind: input, shape index: {}]   ;;  %s13200_s5 = inlined_call_operand.vmem [shape: bf16[1456,128], index: 5, kind: input, shape index: {}]   ;;  %s13201_s6 = inlined_call_operand.vmem [shape: f32[1,128], index: 6, kind: input, shape index: {}]   ;;  %s13202_s7 = inlined_call_operand.vmem [shape: f32[8,128], index: 7, kind: output, shape index: {}]  }
   0x1   :  { %v7413_v1 = vld [vmem:[%s13195_s0] sm:$0xff]  ;;  %v7418_v2 = vld [vmem:[%s13195_s0 + $0x8] sm:$0xff]  ;;  %v7423_v3 = vld [vmem:[%s13195_s0 + $0x10] sm:$0xff]  ;;  %695 = vmatprep.mubr.bf16.mxu0 %v13203_v10  ;;  %vm480_vm4 = vcmask 457728   ;;  %vm607_vm5 = vcmask 687104   ;;  %vm1112_vm6 = vcmask 982016  }
   0x2   :  { %v59_v4 = vrot.slane %v7413_v1, 1  ;;  %v60_v5 = vrot.slane %v7418_v2, 1  ;;  %v61_v6 = vrot.slane %v7423_v3, 1  ;;  %v7428_v7 = vshrl.u32 %v91_v0, 7  ;;  %v7433_v8 = vld [vmem:[%s13195_s0 + $0x18] sm:$0xff]  ;;  %v7438_v9 = vld [vmem:[%s13195_s0 + $0x20] sm:$0xff] }
   0x3   :  { %v126_v11 = vrot.slane %v7413_v1, 2  ;;  %v127_v12 = vrot.slane %v7418_v2, 2  ;;  %v128_v13 = vrot.slane %v7423_v3, 2  ;;  %v62_v14 = vrot.slane %v7433_v8, 1  ;;  %v7452_v17 = vld [vmem:[%s13195_s0 + $0x28] sm:$0xff]  ;;  %v7469_v22 = vld [vmem:[%s13195_s0 + $0x30] sm:$0xff] }
   0x4   :  { %vm93_vm0 = vcmp.lt.s32.totalorder %v7428_v7, 7  ;;  %vm158_vm1 = vcmp.lt.s32.totalorder %v7428_v7, 6  ;;  %v63_v15 = vrot.slane %v7438_v9, 1  ;;  %v129_v16 = vrot.slane %v7433_v8, 2  ;;  %v7474_v23 = vld [vmem:[%s13195_s0 + $0x38] sm:$0xff]  ;;  %v7483_v28 = vld [vmem:[%s13195_s0 + $0x40] sm:$0xff] }
   0x5   :  { %v123_v18 = vsel %vm93_vm0, %v60_v5, %v61_v6  ;;  %v124_v19 = vsel %vm93_vm0, %v59_v4, %v60_v5  ;;  %v188_v20 = vsel %vm158_vm1, %v127_v12, %v128_v13  ;;  %v189_v21 = vsel %vm158_vm1, %v126_v11, %v127_v12  ;;  %v7510_v45 = vld [vmem:[%s13195_s0 + $0x48] sm:$0xff]  ;;  %v7515_v46 = vld [vmem:[%s13195_s0 + $0x50] sm:$0xff]  ;;  %v7535_v56 = vld [vmem:[%s13195_s0 + $0x58] sm:$0xff]  ;;  %s7362_s14 = smov 88   ;;  %s7363_s30 = smov 48  }
   0x6   :  { %v6313_v24 = vpack.i.bf16 %v123_v18, %v124_v19  ;;  %v6318_v25 = vpack.i.bf16 %v188_v20, %v189_v21  ;;  %v121_v26 = vsel %vm93_vm0, %v62_v14, %v63_v15  ;;  %v122_v27 = vsel %vm93_vm0, %v61_v6, %v62_v14  ;;  %v7128_v50 = vld [vmem:[%s13196_s1 + $0x4] ss:$8 sps:$4 sm:$0xff]   ;;  %v7130_v51 = vld [vmem:[%s13196_s1] ss:$8 sps:$4 sm:$0xff]   ;;  %v7131_v62 = vld [vmem:[%s13196_s1 + $0x14] ss:$8 sps:$4 sm:$0xff]  }
   0x7   :  { %v6323_v29 = vpack.i.bf16 %v121_v26, %v122_v27  ;;  %v130_v30 = vrot.slane %v7438_v9, 2  ;;  %v187_v31 = vsel %vm158_vm1, %v128_v13, %v129_v16  ;;  %v64_v32 = vrot.slane %v7452_v17, 1  ;;  %v7546_v61 = vld [vmem:[%s13195_s0 + $0x60] sm:$0xff]  ;;  %663 = vmatprep.subr.bf16.mxu0 %v7128_v50  ;;  %v7133_v63 = vld [vmem:[%s13196_s1 + $0x10] ss:$8 sps:$4 sm:$0xff]   ;;  %v7559_v6 = vld [vmem:[%s13195_s0 + $0x68] sm:$0xff] }
   0x8   :  { %6314 = vrot.lane.b32.xlu0 %v6313_v24, %s7359_s19  ;;  %v65_v33 = vrot.slane %v7469_v22, 1  ;;  %v131_v34 = vrot.slane %v7452_v17, 2  ;;  %v132_v35 = vrot.slane %v7469_v22, 2  ;;  %v66_v36 = vrot.slane %v7474_v23, 1  ;;  %664 = vmatpush1.bf16.msra.mxu0 %v7130_v51  ;;  %v7134_v24 = vld [vmem:[%s13196_s1 + $0x24] ss:$8 sps:$4 sm:$0xff]  }
   0x9   :  { %6324 = vrot.lane.b32.xlu1 %v6323_v29, %s7359_s19  ;;  %v186_v37 = vsel %vm158_vm1, %v129_v16, %v130_v30  ;;  %v120_v38 = vsel %vm93_vm0, %v63_v15, %v64_v32  ;;  %v67_v39 = vrot.slane %v7483_v28, 1  ;;  %v133_v40 = vrot.slane %v7474_v23, 2  ;;  %v7570_v16 = vld [vmem:[%s13195_s0 + $0x70] sm:$0xff]  ;;  %665 = vmatprep.subr.bf16.mxu0 %v7131_v62  ;;  %v7136_v26 = vld [vmem:[%s13196_s1 + $0x20] ss:$8 sps:$4 sm:$0xff]   ;;  %s7365_s21 = smov 80  }
   0xa   :  { %v6328_v41 = vpack.i.bf16 %v186_v37, %v187_v31  ;;  %v119_v42 = vsel %vm93_vm0, %v64_v32, %v65_v33  ;;  %v184_v43 = vsel %vm158_vm1, %v131_v34, %v132_v35  ;;  %v185_v44 = vsel %vm158_vm1, %v130_v30, %v131_v34  ;;  %v7595_v31 = vld [vmem:[%s13195_s0 + $0x80] sm:$0xff]  ;;  %v7137_v32 = vld [vmem:[%s13196_s1 + $0x34] ss:$8 sps:$4 sm:$0xff]   ;;  %s7366_s22 = smov 32   ;;  %s7367_s28 = smov 16  }
   0xb   :  { %v6333_v47 = vpack.i.bf16 %v119_v42, %v120_v38  ;;  %v6338_v48 = vpack.i.bf16 %v184_v43, %v185_v44  ;;  %v134_v49 = vrot.slane %v7483_v28, 2  ;;  %v117_v52 = vsel %vm93_vm0, %v66_v36, %v67_v39  ;;  %v7139_v42 = vld [vmem:[%s13196_s1 + $0x30] ss:$8 sps:$4 sm:$0xff]   ;;  %s7368_s8 = smov 64   ;;  %s7369_s9 = smov 96  }
   0xc   :  { %6319 = vrot.lane.b32.xlu0 %v6318_v25, %s7360_s24  ;;  %v118_v53 = vsel %vm93_vm0, %v65_v33, %v66_v36  ;;  %v68_v54 = vrot.slane %v7510_v45, 1  ;;  %v69_v55 = vrot.slane %v7515_v46, 1  ;;  %v183_v58 = vsel %vm158_vm1, %v132_v35, %v133_v40  ;;  %v7584_v25 = vld [vmem:[%s13195_s0 + $0x78] sm:$0xff]  ;;  %666 = vmatpush1.bf16.msra.mxu0 %v7133_v63  ;;  %v7633_v51 = vld [vmem:[%s13195_s0 + $0x90] sm:$0xff] }
   0xd   :  { %6329 = vrot.lane.b32.xlu1 %v6328_v41, %s7360_s24  ;;  %v182_v57 = vsel %vm158_vm1, %v133_v40, %v134_v49  ;;  %v135_v59 = vrot.slane %v7510_v45, 2  ;;  %v136_v60 = vrot.slane %v7515_v46, 2  ;;  %v6343_v0 = vpack.i.bf16 %v117_v52, %v118_v53  ;;  %667 = vmatprep.subr.bf16.mxu0 %v7134_v24 }
   0xe   :  { %v70_v5 = vrot.slane %v7535_v56, 1  ;;  %v6348_v12 = vpack.i.bf16 %v182_v57, %v183_v58  ;;  %v115_v13 = vsel %vm93_vm0, %v68_v54, %v69_v55  ;;  %v116_v14 = vsel %vm93_vm0, %v67_v39, %v68_v54 }
   0xf   :  { %v71_v15 = vrot.slane %v7546_v61, 1  ;;  %v180_v18 = vsel %vm158_vm1, %v135_v59, %v136_v60  ;;  %v181_v19 = vsel %vm158_vm1, %v134_v49, %v135_v59  ;;  %v137_v20 = vrot.slane %v7535_v56, 2  ;;  %v7140_v49 = vld [vmem:[%s13196_s1 + $0x44] ss:$8 sps:$4 sm:$0xff]  }
  0x10   :  { %6334 = vrot.lane.b32.xlu0 %v6333_v47, %s7359_s19  ;;  %v138_v21 = vrot.slane %v7546_v61, 2  ;;  %v6353_v27 = vpack.i.bf16 %v115_v13, %v116_v14  ;;  %v72_v29 = vrot.slane %v7559_v6, 1  ;;  %v73_v30 = vrot.slane %v7570_v16, 1  ;;  %668 = vmatpush1.bf16.msra.mxu0 %v7136_v26  ;;  %v7661_v13 = vld [vmem:[%s13195_s0 + $0xa0] sm:$0xff] }
  0x11   :  { %6339 = vrot.lane.b32.xlu1 %v6338_v48, %s7360_s24  ;;  %v6358_v33 = vpack.i.bf16 %v180_v18, %v181_v19  ;;  %v113_v34 = vsel %vm93_vm0, %v70_v5, %v71_v15  ;;  %v114_v35 = vsel %vm93_vm0, %v69_v55, %v70_v5  ;;  %v179_v37 = vsel %vm158_vm1, %v136_v60, %v137_v20  ;;  %v7624_v48 = vld [vmem:[%s13195_s0 + $0x88] sm:$0xff] }
  0x12   :  { %v178_v36 = vsel %vm158_vm1, %v137_v20, %v138_v21  ;;  %v139_v38 = vrot.slane %v7559_v6, 2  ;;  %v140_v39 = vrot.slane %v7570_v16, 2  ;;  %v74_v40 = vrot.slane %v7584_v25, 1  ;;  %669 = vmatprep.subr.bf16.mxu0 %v7137_v32  ;;  %v7142_v60 = vld [vmem:[%s13196_s1 + $0x40] ss:$8 sps:$4 sm:$0xff]  }
  0x13   :  { %v75_v41 = vrot.slane %v7595_v31, 1  ;;  %v6363_v43 = vpack.i.bf16 %v113_v34, %v114_v35  ;;  %v111_v44 = vsel %vm93_vm0, %v72_v29, %v73_v30  ;;  %v112_v47 = vsel %vm93_vm0, %v71_v15, %v72_v29  ;;  %v7685_v34 = vld [vmem:[%s13195_s0 + $0xa8] sm:$0xff]  ;;  %v7690_v35 = vld [vmem:[%s13195_s0 + $0xb0] sm:$0xff] }
  0x14   :  { %6344 = vrot.lane.b32.xlu0 %v6343_v0, %s7359_s19  ;;  %v6368_v50 = vpack.i.bf16 %v178_v36, %v179_v37  ;;  %v176_v52 = vsel %vm158_vm1, %v139_v38, %v140_v39  ;;  %v177_v53 = vsel %vm158_vm1, %v138_v21, %v139_v38  ;;  %v141_v54 = vrot.slane %v7584_v25, 2  ;;  %670 = vmatpush1.bf16.msra.mxu0 %v7139_v42  ;;  %v539_v38 = vld [vmem:[%s13196_s1 + $0x50] sm:$0x33] }
  0x15   :  { %6349 = vrot.lane.b32.xlu1 %v6348_v12, %s7360_s24  ;;  %v142_v55 = vrot.slane %v7595_v31, 2  ;;  %v6373_v57 = vpack.i.bf16 %v111_v44, %v112_v47  ;;  %v109_v58 = vsel %vm93_vm0, %v74_v40, %v75_v41  ;;  %v76_v59 = vrot.slane %v7624_v48, 1  ;;  %v7656_v12 = vld [vmem:[%s13195_s0 + $0x98] sm:$0xff]  ;;  %671 = vmatprep.subr.bf16.mxu0 %v7140_v49 }
  0x16   :  { %v110_v62 = vsel %vm93_vm0, %v73_v30, %v74_v40  ;;  %v77_v63 = vrot.slane %v7633_v51, 1  ;;  %v143_v0 = vrot.slane %v7624_v48, 2  ;;  %v144_v5 = vrot.slane %v7633_v51, 2 }
  0x17   :  { %v6378_v14 = vpack.i.bf16 %v176_v52, %v177_v53  ;;  %v174_v15 = vsel %vm158_vm1, %v141_v54, %v142_v55  ;;  %v175_v18 = vsel %vm158_vm1, %v140_v39, %v141_v54  ;;  %v6383_v19 = vpack.i.bf16 %v109_v58, %v110_v62  ;;  %v7717_v52 = vld [vmem:[%s13195_s0 + $0xc0] sm:$0xff] }
  0x18   :  { %6354 = vrot.lane.b32.xlu0 %v6353_v27, %s7359_s19  ;;  %v108_v20 = vsel %vm93_vm0, %v75_v41, %v76_v59  ;;  %v78_v21 = vrot.slane %v7656_v12, 1  ;;  %v79_v24 = vrot.slane %v7661_v13, 1  ;;  %672 = vmatpush1.bf16.msra.mxu0 %v7142_v60  ;;  %v107_v26 = vsel %vm93_vm0, %v76_v59, %v77_v63 }
  0x19   :  { %6359 = vrot.lane.b32.xlu1 %v6358_v33, %s7360_s24  ;;  %v172_v27 = vsel %vm158_vm1, %v143_v0, %v144_v5  ;;  %v173_v29 = vsel %vm158_vm1, %v142_v55, %v143_v0  ;;  %v145_v30 = vrot.slane %v7656_v12, 2  ;;  %v6388_v32 = vpack.i.bf16 %v174_v15, %v175_v18 }
  0x1a   :  { %v146_v33 = vrot.slane %v7661_v13, 2  ;;  %v6393_v36 = vpack.i.bf16 %v107_v26, %v108_v20  ;;  %v6398_v37 = vpack.i.bf16 %v172_v27, %v173_v29  ;;  %v105_v39 = vsel %vm93_vm0, %v78_v21, %v79_v24 }
  0x1b   :  { %v106_v40 = vsel %vm93_vm0, %v77_v63, %v78_v21  ;;  %v171_v41 = vsel %vm158_vm1, %v144_v5, %v145_v30  ;;  %v80_v42 = vrot.slane %v7685_v34, 1  ;;  %v81_v44 = vrot.slane %v7690_v35, 1  ;;  %v7734_v5 = vld [vmem:[%s13195_s0 + $0xc8] sm:$0xff] }
  0x1c   :  { %6364 = vrot.lane.b32.xlu0 %v6363_v43, %s7359_s19  ;;  %v170_v43 = vsel %vm158_vm1, %v145_v30, %v146_v33  ;;  %v147_v47 = vrot.slane %v7685_v34, 2  ;;  %v148_v49 = vrot.slane %v7690_v35, 2  ;;  %v5757_v53 = vcombine.high %v539_v38, %v539_v38 }
  0x1d   :  { %6369 = vrot.lane.b32.xlu1 %v6368_v50, %s7360_s24  ;;  %v7712_v50 = vld [vmem:[%s13195_s0 + $0xb8] sm:$0xff]  ;;  %v6403_v54 = vpack.i.bf16 %v105_v39, %v106_v40  ;;  %v5756_v55 = vcombine.low %v539_v38, %v539_v38  ;;  %v104_v58 = vsel %vm93_vm0, %v79_v24, %v80_v42  ;;  %v83_v60 = vrot.slane %v7717_v52, 1 }
  0x1e   :  { %v82_v59 = vrot.slane %v7712_v50, 1  ;;  %v103_v62 = vsel %vm93_vm0, %v80_v42, %v81_v44  ;;  %v168_v63 = vsel %vm158_vm1, %v147_v47, %v148_v49  ;;  %v169_v0 = vsel %vm158_vm1, %v146_v33, %v147_v47  ;;  %5758 = vmatprep.subr.msk.bf16.mxu0 %vm656_vm2, %v5757_v53  ;;  %v7756_v33 = vld [vmem:[%s13195_s0 + $0xd8] sm:$0xff] }
  0x1f   :  { %v149_v15 = vrot.slane %v7712_v50, 2  ;;  %v150_v18 = vrot.slane %v7717_v52, 2  ;;  %v6413_v20 = vpack.i.bf16 %v103_v62, %v104_v58  ;;  %v6418_v21 = vpack.i.bf16 %v168_v63, %v169_v0 }
  0x20   :  { %6374 = vrot.lane.b32.xlu0 %v6373_v57, %s7359_s19  ;;  %v6408_v57 = vpack.i.bf16 %v170_v43, %v171_v41  ;;  %v101_v24 = vsel %vm93_vm0, %v82_v59, %v83_v60  ;;  %v84_v26 = vrot.slane %v7734_v5, 1  ;;  %v102_v27 = vsel %vm93_vm0, %v81_v44, %v82_v59 }
  0x21   :  { %6379 = vrot.lane.b32.xlu1 %v6378_v14, %s7360_s24  ;;  %v658_v14 = vsel %vm656_vm2, %v5756_v55, 0  ;;  %v151_v30 = vrot.slane %v7734_v5, 2  ;;  %v167_v38 = vsel %vm158_vm1, %v148_v49, %v149_v15  ;;  %v6423_v39 = vpack.i.bf16 %v101_v24, %v102_v27  ;;  %v7784_v55 = vld [vmem:[%s13195_s0 + $0xe8] sm:$0xff] }
  0x22   :  { %674 = vmatpush1.bf16.msra.mxu0 %v658_v14  ;;  %v100_v40 = vsel %vm93_vm0, %v83_v60, %v84_v26  ;;  %v86_v41 = vrot.slane %v7756_v33, 1  ;;  %v153_v53 = vrot.slane %v7756_v33, 2  ;;  %v88_v63 = vrot.slane %v7784_v55, 1 }
  0x23   :  { %v165_v49 = vsel %vm158_vm1, %v150_v18, %v151_v30  ;;  %vm1688_vm10 = vcmp.lt.s32.totalorder %v7428_v7, 2  ;;  %vm2073_vm14 = vcmask 719872  }
  0x24   :  { %6384 = vrot.lane.b32.xlu0 %v6383_v19, %s7359_s19  ;;  %v7741_v19 = vld [vmem:[%s13195_s0 + $0xd0] sm:$0xff] }
  0x25   :  { %6389 = vrot.lane.b32.xlu1 %v6388_v32, %s7360_s24  ;;  %v85_v29 = vrot.slane %v7741_v19, 1  ;;  %v152_v32 = vrot.slane %v7741_v19, 2 }
  0x27   :  { %v99_v44 = vsel %vm93_vm0, %v84_v26, %v85_v29  ;;  %v164_v47 = vsel %vm158_vm1, %v151_v30, %v152_v32  ;;  %v98_v62 = vsel %vm93_vm0, %v85_v29, %v86_v41 }
  0x28   :  { %6394 = vrot.lane.b32.xlu0 %v6393_v36, %s7359_s19  ;;  %v7761_v36 = vld [vmem:[%s13195_s0 + $0xe0] sm:$0xff]  ;;  %v6433_v58 = vpack.i.bf16 %v99_v44, %v100_v40  ;;  %v6438_v59 = vpack.i.bf16 %v164_v47, %v165_v49 }
  0x29   :  { %6399 = vrot.lane.b32.xlu1 %v6398_v37, %s7360_s24  ;;  %v166_v37 = vsel %vm158_vm1, %v149_v15, %v150_v18  ;;  %v87_v42 = vrot.slane %v7761_v36, 1  ;;  %v163_v15 = vsel %vm158_vm1, %v152_v32, %v153_v53  ;;  %v155_v18 = vrot.slane %v7784_v55, 2 }
  0x2a   :  { %v6428_v43 = vpack.i.bf16 %v166_v37, %v167_v38 }
  0x2b   :  { %v97_v60 = vsel %vm93_vm0, %v86_v41, %v87_v42  ;;  %v96_v29 = vsel %vm93_vm0, %v87_v42, %v88_v63 }
  0x2c   :  { %6404 = vrot.lane.b32.xlu0 %v6403_v54, %s7359_s19  ;;  %v154_v54 = vrot.slane %v7761_v36, 2  ;;  %v6443_v24 = vpack.i.bf16 %v97_v60, %v98_v62 }
  0x2d   :  { %6409 = vrot.lane.b32.xlu1 %v6408_v57, %s7360_s24  ;;  %v7789_v57 = vld [vmem:[%s13195_s0 + $0xf0] sm:$0xff] }
  0x2e   :  { %v89_v0 = vrot.slane %v7789_v57, 1  ;;  %v162_v14 = vsel %vm158_vm1, %v153_v53, %v154_v54  ;;  %v161_v37 = vsel %vm158_vm1, %v154_v54, %v155_v18 }
  0x2f   :  { %v6448_v26 = vpack.i.bf16 %v162_v14, %v163_v15 }
  0x30   :  { %6414 = vrot.lane.b32.xlu0 %v6413_v20, %s7359_s19  ;;  %v156_v20 = vrot.slane %v7789_v57, 2  ;;  %v95_v27 = vsel %vm93_vm0, %v88_v63, %v89_v0 }
  0x31   :  { %6419 = vrot.lane.b32.xlu1 %v6418_v21, %s7360_s24  ;;  %v7808_v21 = vld [vmem:[%s13195_s0 + $0xf8] sm:$0xff] }
  0x32   :  { %v90_v30 = vrot.slane %v7808_v21, 1  ;;  %v160_v32 = vsel %vm158_vm1, %v155_v18, %v156_v20  ;;  %v157_v38 = vrot.slane %v7808_v21, 2 }
  0x33   :  { %v6458_v40 = vpack.i.bf16 %v160_v32, %v161_v37 }
  0x34   :  { %6424 = vrot.lane.b32.xlu0 %v6423_v39, %s7359_s19  ;;  %v6453_v39 = vpack.i.bf16 %v95_v27, %v96_v29  ;;  %v94_v41 = vsel %vm93_vm0, %v89_v0, %v90_v30  ;;  %v125_v42 = vsel %vm93_vm0, %v90_v30, %v59_v4  ;;  %v190_v44 = vsel %vm158_vm1, %v157_v38, %v126_v11 }
  0x35   :  { %6429 = vrot.lane.b32.xlu1 %v6428_v43, %s7360_s24  ;;  %v159_v43 = vsel %vm158_vm1, %v156_v20, %v157_v38  ;;  %v6463_v47 = vpack.i.bf16 %v125_v42, %v94_v41 }
  0x36   :  { %v6468_v49 = vpack.i.bf16 %v190_v44, %v159_v43 }
  0x38   :  { %6434 = vrot.lane.b32.xlu0 %v6433_v58, %s7359_s19 }
  0x39   :  { %6439 = vrot.lane.b32.xlu1 %v6438_v59, %s7360_s24 }
  0x3c   :  { %6444 = vrot.lane.b32.xlu0 %v6443_v24, %s7359_s19 }
  0x3d   :  { %6449 = vrot.lane.b32.xlu1 %v6448_v26, %s7360_s24 }
  0x40   :  { %6454 = vrot.lane.b32.xlu0 %v6453_v39, %s7359_s19 }
  0x41   :  { %6459 = vrot.lane.b32.xlu1 %v6458_v40, %s7360_s24 }
  0x44   :  { %6464 = vrot.lane.b32.xlu0 %v6463_v47, %s7359_s19 }
  0x45   :  { %6469 = vrot.lane.b32.xlu1 %v6468_v49, %s7360_s24 }
  0x7a   :  { %v6315_v53 = vpop.permute.xlu0 %6314 }
  0x7b   :  { %v6325_v4 = vpop.permute.xlu1 %6324  ;;  %v6317_v54 = vunpack.i.h.bf16 %v6315_v53  ;;  %v6316_v58 = vunpack.i.l.bf16 %v6315_v53 }
  0x7c   :  { %v6327_v14 = vunpack.i.h.bf16 %v6325_v4  ;;  %v6326_v15 = vunpack.i.l.bf16 %v6325_v4 }
  0x7d   :  { %v449_v63 = vsel %vm447_vm3, %v7418_v2, %v6317_v54  ;;  %v448_v0 = vsel %vm447_vm3, %v7413_v1, %v6316_v58 }
  0x7e   :  { %v6320_v59 = vpop.permute.xlu0 %6319  ;;  %v451_v32 = vsel %vm447_vm3, %v7433_v8, %v6327_v14  ;;  %v450_v2 = vsel %vm447_vm3, %v7423_v3, %v6326_v15 }
  0x7f   :  { %v6322_v60 = vunpack.i.h.bf16 %v6320_v59  ;;  %v6321_v62 = vunpack.i.l.bf16 %v6320_v59  ;;  %v6330_v11 = vpop.permute.xlu1 %6329 }
  0x80   :  { %v6332_v27 = vunpack.i.h.bf16 %v6330_v11  ;;  %v6331_v29 = vunpack.i.l.bf16 %v6330_v11 }
  0x81   :  { %v481_v18 = vsel %vm480_vm4, %v448_v0, %v6321_v62  ;;  %v482_v20 = vsel %vm480_vm4, %v449_v63, %v6322_v60 }
  0x82   :  { %v513_v24 = vpack.c.bf16 %v482_v20, %v481_v18  ;;  %v6335_v26 = vpop.permute.xlu0 %6334  ;;  %v483_v39 = vsel %vm480_vm4, %v450_v2, %v6331_v29  ;;  %v484_v40 = vsel %vm480_vm4, %v451_v32, %v6332_v27 }
  0x83   :  { %v6340_v30 = vpop.permute.xlu1 %6339  ;;  %v6337_v1 = vunpack.i.h.bf16 %v6335_v26  ;;  %v6336_v37 = vunpack.i.l.bf16 %v6335_v26  ;;  %v514_v44 = vpack.c.bf16 %v484_v40, %v483_v39 }
  0x84   :  { %5759 = vmatmul.mubr.msk.bf16.vlgmr.msra.gmra.mrb[0].mxu0 %vm607_vm5, %v513_v24  ;;  %v6342_v42 = vunpack.i.h.bf16 %v6340_v30  ;;  %v6341_v43 = vunpack.i.l.bf16 %v6340_v30 }
  0x85   :  { %705 = vmatprep.mubr.bf16.mxu0 %v13203_v10  ;;  %v453_v8 = vsel %vm447_vm3, %v7452_v17, %v6337_v1  ;;  %v452_v3 = vsel %vm447_vm3, %v7438_v9, %v6336_v37 }
  0x86   :  { %v6345_v38 = vpop.permute.xlu0 %6344  ;;  %v485_v53 = vsel %vm480_vm4, %v452_v3, %v6341_v43  ;;  %v486_v4 = vsel %vm480_vm4, %v453_v8, %v6342_v42 }
  0x87   :  { %v6350_v41 = vpop.permute.xlu1 %6349  ;;  %v6347_v54 = vunpack.i.h.bf16 %v6345_v38  ;;  %v6346_v58 = vunpack.i.l.bf16 %v6345_v38  ;;  %v515_v62 = vpack.c.bf16 %v486_v4, %v485_v53 }
  0x88   :  { %v6352_v17 = vunpack.i.h.bf16 %v6350_v41  ;;  %v6351_v11 = vunpack.i.l.bf16 %v6350_v41 }
  0x89   :  { %v455_v9 = vsel %vm447_vm3, %v7474_v23, %v6347_v54  ;;  %v454_v63 = vsel %vm447_vm3, %v7469_v22, %v6346_v58 }
  0x8a   :  { %v6355_v47 = vpop.permute.xlu0 %6354  ;;  %v487_v15 = vsel %vm480_vm4, %v454_v63, %v6351_v11  ;;  %v488_v18 = vsel %vm480_vm4, %v455_v9, %v6352_v17 }
  0x8b   :  { %v6360_v49 = vpop.permute.xlu1 %6359  ;;  %v6357_v20 = vunpack.i.h.bf16 %v6355_v47  ;;  %v6356_v24 = vunpack.i.l.bf16 %v6355_v47  ;;  %v516_v27 = vpack.c.bf16 %v488_v18, %v487_v15 }
  0x8c   :  { %5760 = vmatmul.mubr.msk.bf16.gmra.mrb[4].mxu0 %vm607_vm5, %v514_v44  ;;  %v6362_v22 = vunpack.i.h.bf16 %v6360_v49  ;;  %v6361_v29 = vunpack.i.l.bf16 %v6360_v49 }
  0x8d   :  { %715 = vmatprep.mubr.bf16.mxu0 %v13203_v10  ;;  %v457_v30 = vsel %vm447_vm3, %v7510_v45, %v6357_v20  ;;  %v456_v32 = vsel %vm447_vm3, %v7483_v28, %v6356_v24 }
  0x8e   :  { %v6365_v59 = vpop.permute.xlu0 %6364  ;;  %v489_v41 = vsel %vm480_vm4, %v456_v32, %v6361_v29  ;;  %v490_v42 = vsel %vm480_vm4, %v457_v30, %v6362_v22 }
  0x8f   :  { %v7862_v60 = vpop.permute.xlu1 %6369  ;;  %v6367_v43 = vunpack.i.h.bf16 %v6365_v59  ;;  %v6366_v44 = vunpack.i.l.bf16 %v6365_v59  ;;  %v517_v58 = vpack.c.bf16 %v490_v42, %v489_v41 }
  0x90   :  { %v6371_v59 = vunpack.i.l.bf16 %v7862_v60 }
  0x91   :  { %v459_v9 = vsel %vm447_vm3, %v7535_v56, %v6367_v43  ;;  %v458_v63 = vsel %vm447_vm3, %v7515_v46, %v6366_v44 }
  0x92   :  { %v7868_v0 = vpop.permute.xlu0 %6374  ;;  %v491_v22 = vsel %vm480_vm4, %v458_v63, %v6371_v59 }
  0x93   :  { %v7870_v14 = vpop.permute.xlu1 %6379  ;;  %v6377_v32 = vunpack.i.h.bf16 %v7868_v0 }
  0x94   :  { %5761 = vmatmul.mubr.msk.bf16.gmra.mrb[8].mxu0 %vm607_vm5, %v515_v62 }
  0x95   :  { %725 = vmatprep.mubr.bf16.mxu0 %v13203_v10 }
  0x96   :  { %v7876_v26 = vpop.permute.xlu0 %6384 }
  0x97   :  { %v7878_v23 = vpop.permute.xlu1 %6389 }
  0x9a   :  { %v6395_v2 = vpop.permute.xlu0 %6394 }
  0x9b   :  { %v6397_v1 = vunpack.i.h.bf16 %v6395_v2  ;;  %v6396_v37 = vunpack.i.l.bf16 %v6395_v2  ;;  %v6400_v38 = vpop.permute.xlu1 %6399  ;;  %v6376_v2 = vunpack.i.l.bf16 %v7868_v0  ;;  %v6381_v0 = vunpack.i.l.bf16 %v7870_v14 }
  0x9c   :  { %5762 = vmatmul.mubr.msk.bf16.gmra.mrb[12].mxu0 %vm607_vm5, %v516_v27  ;;  %v6402_v39 = vunpack.i.h.bf16 %v6400_v38  ;;  %v6401_v40 = vunpack.i.l.bf16 %v6400_v38 }
  0x9d   :  { %735 = vmatprep.mubr.bf16.mxu0 %v13203_v10  ;;  %v465_v45 = vsel %vm447_vm3, %v7624_v48, %v6397_v1  ;;  %v464_v28 = vsel %vm447_vm3, %v7595_v31, %v6396_v37  ;;  %v6372_v31 = vunpack.i.h.bf16 %v7862_v60 }
  0x9e   :  { %v7893_v8 = vsel %vm480_vm4, %v464_v28, %v6401_v40  ;;  %v7896_v3 = vsel %vm480_vm4, %v465_v45, %v6402_v39  ;;  %v6405_v47 = vpop.permute.xlu0 %6404  ;;  %v6382_v28 = vunpack.i.h.bf16 %v7870_v14 }
  0x9f   :  { %v521_v49 = vpack.c.bf16 %v7896_v3, %v7893_v8  ;;  %v6407_v53 = vunpack.i.h.bf16 %v6405_v47  ;;  %v6406_v4 = vunpack.i.l.bf16 %v6405_v47  ;;  %v6410_v54 = vpop.permute.xlu1 %6409  ;;  %v492_v46 = vsel %vm480_vm4, %v459_v9, %v6372_v31 }
  0xa0   :  { %v6412_v48 = vunpack.i.h.bf16 %v6410_v54  ;;  %v6411_v62 = vunpack.i.l.bf16 %v6410_v54  ;;  %v518_v42 = vpack.c.bf16 %v492_v46, %v491_v22  ;;  %v461_v47 = vsel %vm447_vm3, %v7559_v6, %v6377_v32 }
  0xa1   :  { %v467_v17 = vsel %vm447_vm3, %v7656_v12, %v6407_v53  ;;  %v466_v11 = vsel %vm447_vm3, %v7633_v51, %v6406_v4  ;;  %v460_v53 = vsel %vm447_vm3, %v7546_v61, %v6376_v2  ;;  %v494_v61 = vsel %vm480_vm4, %v461_v47, %v6382_v28 }
  0xa2   :  { %v7911_v15 = vsel %vm480_vm4, %v466_v11, %v6411_v62  ;;  %v7914_v18 = vsel %vm480_vm4, %v467_v17, %v6412_v48  ;;  %v6415_v20 = vpop.permute.xlu0 %6414  ;;  %v493_v31 = vsel %vm480_vm4, %v460_v53, %v6381_v0  ;;  %v6387_v11 = vunpack.i.h.bf16 %v7876_v26 }
  0xa3   :  { %v522_v60 = vpack.c.bf16 %v7914_v18, %v7911_v15  ;;  %v6417_v12 = vunpack.i.h.bf16 %v6415_v20  ;;  %v6416_v24 = vunpack.i.l.bf16 %v6415_v20  ;;  %v6420_v27 = vpop.permute.xlu1 %6419  ;;  %v6386_v9 = vunpack.i.l.bf16 %v7876_v26 }
  0xa4   :  { %5763 = vmatmul.mubr.msk.bf16.gmra.mrb[16].mxu0 %vm607_vm5, %v517_v58  ;;  %v6422_v51 = vunpack.i.h.bf16 %v6420_v27  ;;  %v6421_v56 = vunpack.i.l.bf16 %v6420_v27  ;;  %v519_v22 = vpack.c.bf16 %v494_v61, %v493_v31  ;;  %v463_v32 = vsel %vm447_vm3, %v7584_v25, %v6387_v11 }
  0xa5   :  { %745 = vmatprep.mubr.bf16.mxu0 %v13203_v10  ;;  %v469_v29 = vsel %vm447_vm3, %v7685_v34, %v6417_v12  ;;  %v468_v30 = vsel %vm447_vm3, %v7661_v13, %v6416_v24  ;;  %v462_v2 = vsel %vm447_vm3, %v7570_v16, %v6386_v9 }
  0xa6   :  { %v7929_v1 = vsel %vm480_vm4, %v468_v30, %v6421_v56  ;;  %v7932_v37 = vsel %vm480_vm4, %v469_v29, %v6422_v51  ;;  %v6425_v38 = vpop.permute.xlu0 %6424 }
  0xa7   :  { %v523_v39 = vpack.c.bf16 %v7932_v37, %v7929_v1  ;;  %v6427_v40 = vunpack.i.h.bf16 %v6425_v38  ;;  %v6426_v41 = vunpack.i.l.bf16 %v6425_v38  ;;  %v6430_v34 = vpop.permute.xlu1 %6429 }
  0xa8   :  { %v6432_v45 = vunpack.i.h.bf16 %v6430_v34  ;;  %v6431_v13 = vunpack.i.l.bf16 %v6430_v34 }
  0xa9   :  { %v471_v43 = vsel %vm447_vm3, %v7712_v50, %v6427_v40  ;;  %v470_v44 = vsel %vm447_vm3, %v7690_v35, %v6426_v41 }
  0xaa   :  { %v7947_v4 = vsel %vm480_vm4, %v470_v44, %v6431_v13  ;;  %v7950_v54 = vsel %vm480_vm4, %v471_v43, %v6432_v45  ;;  %v6435_v58 = vpop.permute.xlu0 %6434 }
  0xab   :  { %v524_v14 = vpack.c.bf16 %v7950_v54, %v7947_v4  ;;  %v6437_v50 = vunpack.i.h.bf16 %v6435_v58  ;;  %v6436_v48 = vunpack.i.l.bf16 %v6435_v58  ;;  %v6440_v62 = vpop.permute.xlu1 %6439 }
  0xac   :  { %5764 = vmatmul.mubr.msk.bf16.gmra.mrb[20].mxu0 %vm607_vm5, %v518_v42  ;;  %v6442_v35 = vunpack.i.h.bf16 %v6440_v62  ;;  %v6441_v6 = vunpack.i.l.bf16 %v6440_v62 }
  0xad   :  { %755 = vmatprep.mubr.bf16.mxu0 %v13203_v10  ;;  %v473_v59 = vsel %vm447_vm3, %v7734_v5, %v6437_v50  ;;  %v472_v17 = vsel %vm447_vm3, %v7717_v52, %v6436_v48  ;;  %v6392_v5 = vunpack.i.h.bf16 %v7878_v23  ;;  %v6391_v52 = vunpack.i.l.bf16 %v7878_v23 }
  0xae   :  { %v505_v63 = vsel %vm480_vm4, %v472_v17, %v6441_v6  ;;  %v506_v20 = vsel %vm480_vm4, %v473_v59, %v6442_v35  ;;  %v6445_v12 = vpop.permute.xlu0 %6444 }
  0xaf   :  { %v525_v24 = vpack.c.bf16 %v506_v20, %v505_v63  ;;  %v6447_v27 = vunpack.i.h.bf16 %v6445_v12  ;;  %v6446_v51 = vunpack.i.l.bf16 %v6445_v12  ;;  %v6450_v56 = vpop.permute.xlu1 %6449  ;;  %v496_v25 = vsel %vm480_vm4, %v463_v32, %v6392_v5 }
  0xb0   :  { %v6452_v46 = vunpack.i.h.bf16 %v6450_v56  ;;  %v6451_v29 = vunpack.i.l.bf16 %v6450_v56  ;;  %v13206_v5 = vsub.s32 0, %v7428_v7 }
  0xb1   :  { %v475_v30 = vsel %vm447_vm3, %v7756_v33, %v6447_v27  ;;  %v474_v26 = vsel %vm447_vm3, %v7741_v19, %v6446_v51  ;;  %v495_v19 = vsel %vm480_vm4, %v462_v2, %v6391_v52  ;;  %v540_v52 = vld [vmem:[%s13197_s2] sm:$0x3]  ;;  %s7361_s2 = smov 120  }
  0xb2   :  { %v507_v38 = vsel %vm480_vm4, %v474_v26, %v6451_v29  ;;  %v508_v40 = vsel %vm480_vm4, %v475_v30, %v6452_v46  ;;  %v6455_v41 = vpop.permute.xlu0 %6454  ;;  %v520_v48 = vpack.c.bf16 %v496_v25, %v495_v19  ;;  %v13205_v30 = vsub.s32 1, %v7428_v7 }
  0xb3   :  { %v526_v34 = vpack.c.bf16 %v508_v40, %v507_v38  ;;  %v6457_v42 = vunpack.i.h.bf16 %v6455_v41  ;;  %v6456_v23 = vunpack.i.l.bf16 %v6455_v41  ;;  %v6460_v45 = vpop.permute.xlu1 %6459  ;;  %v8086_v32 = vrot.slane %v540_v52, %v13206_v5 }
  0xb4   :  { %5765 = vmatmul.mubr.msk.bf16.gmra.mrb[24].mxu0 %vm607_vm5, %v519_v22  ;;  %v6462_v33 = vunpack.i.h.bf16 %v6460_v45  ;;  %v6461_v13 = vunpack.i.l.bf16 %v6460_v45  ;;  %v8090_v38 = vrot.slane %v540_v52, %v13205_v30 }
  0xb5   :  { %765 = vmatprep.mubr.bf16.mxu0 %v13203_v10  ;;  %v477_v16 = vsel %vm447_vm3, %v7784_v55, %v6457_v42  ;;  %v476_v28 = vsel %vm447_vm3, %v7761_v36, %v6456_v23 }
  0xb6   :  { %v509_v0 = vsel %vm480_vm4, %v476_v28, %v6461_v13  ;;  %v510_v43 = vsel %vm480_vm4, %v477_v16, %v6462_v33  ;;  %v6465_v44 = vpop.permute.xlu0 %6464 }
  0xb7   :  { %v527_v47 = vpack.c.bf16 %v510_v43, %v509_v0  ;;  %v6467_v53 = vunpack.i.h.bf16 %v6465_v44  ;;  %v6466_v58 = vunpack.i.l.bf16 %v6465_v44  ;;  %v6470_v50 = vpop.permute.xlu1 %6469 }
  0xb8   :  { %v6472_v62 = vunpack.i.h.bf16 %v6470_v50  ;;  %v6471_v35 = vunpack.i.l.bf16 %v6470_v50 }
  0xb9   :  { %v479_v6 = vsel %vm447_vm3, %v7808_v21, %v6467_v53  ;;  %v478_v55 = vsel %vm447_vm3, %v7789_v57, %v6466_v58  ;;  %vm3230_vm3 = vcmask 1043456  }
  0xba   :  { %v511_v36 = vsel %vm480_vm4, %v478_v55, %v6471_v35  ;;  %v512_v31 = vsel %vm480_vm4, %v479_v6, %v6472_v62  ;;  %vm3181_vm4 = vcmask 64512  }
  0xbb   :  { %v528_v61 = vpack.c.bf16 %v512_v31, %v511_v36 }
  0xbc   :  { %5766 = vmatmul.mubr.msk.bf16.gmra.mrb[28].mxu0 %vm607_vm5, %v520_v48 }
  0xbd   :  { %775 = vmatprep.mubr.bf16.mxu0 %v13203_v10 }
  0xc4   :  { %5767 = vmatmul.mubr.msk.bf16.gmra.mrb[32].mxu0 %vm607_vm5, %v521_v49 }
  0xc5   :  { %785 = vmatprep.mubr.bf16.mxu0 %v13203_v10 }
  0xcc   :  { %5768 = vmatmul.mubr.msk.bf16.gmra.mrb[36].mxu0 %vm607_vm5, %v522_v60 }
  0xcd   :  { %795 = vmatprep.mubr.bf16.mxu0 %v13203_v10 }
  0xd4   :  { %5769 = vmatmul.mubr.msk.bf16.gmra.mrb[40].mxu0 %vm607_vm5, %v523_v39 }
  0xd5   :  { %805 = vmatprep.mubr.bf16.mxu0 %v13203_v10 }
  0xdc   :  { %5770 = vmatmul.mubr.msk.bf16.gmra.mrb[44].mxu0 %vm607_vm5, %v524_v14 }
  0xdd   :  { %815 = vmatprep.mubr.bf16.mxu0 %v13203_v10 }
  0xe4   :  { %5771 = vmatmul.mubr.msk.bf16.gmra.mrb[48].mxu0 %vm607_vm5, %v525_v24 }
  0xe5   :  { %825 = vmatprep.mubr.bf16.mxu0 %v13203_v10 }
  0xec   :  { %5772 = vmatmul.mubr.msk.bf16.gmra.mrb[52].mxu0 %vm607_vm5, %v526_v34 }
  0xed   :  { %835 = vmatprep.mubr.bf16.mxu0 %v13203_v10 }
  0xf4   :  { %5773 = vmatmul.mubr.msk.bf16.gmra.mrb[56].mxu0 %vm607_vm5, %v527_v47 }
  0xf5   :  { %845 = vmatprep.mubr.bf16.mxu0 %v13203_v10 }
  0xfc   :  { %5774 = vmatmul.mubr.msk.bf16.gmra.mrb[60].mxu0 %vm607_vm5, %v528_v61  ;;  %vm4072_vm5 = vcmask 916480  }
 0x157   :  { %v8023_v57 = vpop.f32.mrb[0].mxu0 }
 0x158   :  { %v8025_v21 = vpop.f32.mrb[1].mxu0 }
 0x159   :  { %v8027_v8 = vpop.f32.mrb[2].mxu0 }
 0x15a   :  { %v8029_v3 = vpop.f32.mrb[3].mxu0 }
 0x15f   :  { %v8031_v49 = vpop.f32.mrb[4].mxu0 }
 0x160   :  { %v8033_v15 = vpop.f32.mrb[5].mxu0 }
 0x161   :  { %v8035_v18 = vpop.f32.mrb[6].mxu0 }
 0x162   :  { %v8037_v60 = vpop.f32.mrb[7].mxu0 }
 0x167   :  { %v8039_v1 = vpop.f32.mrb[8].mxu0 }
 0x168   :  { %v8041_v37 = vpop.f32.mrb[9].mxu0 }
 0x169   :  { %v8043_v39 = vpop.f32.mrb[10].mxu0 }
 0x16a   :  { %v8045_v4 = vpop.f32.mrb[11].mxu0 }
 0x16f   :  { %v8047_v54 = vpop.f32.mrb[12].mxu0 }
 0x170   :  { %v8049_v14 = vpop.f32.mrb[13].mxu0 }
 0x171   :  { %v8051_v59 = vpop.f32.mrb[14].mxu0 }
 0x172   :  { %v8053_v17 = vpop.f32.mrb[15].mxu0 }
 0x177   :  { %v8055_v11 = vpop.f32.mrb[16].mxu0 }
 0x178   :  { %v8057_v9 = vpop.f32.mrb[17].mxu0 }
 0x179   :  { %v8059_v63 = vpop.f32.mrb[18].mxu0 }
 0x17a   :  { %v8061_v20 = vpop.f32.mrb[19].mxu0 }
 0x17f   :  { %v8063_v12 = vpop.f32.mrb[20].mxu0 }
 0x180   :  { %v8065_v24 = vpop.f32.mrb[21].mxu0 }
 0x181   :  { %v8067_v27 = vpop.f32.mrb[22].mxu0 }
 0x182   :  { %v8069_v51 = vpop.f32.mrb[23].mxu0 }
 0x187   :  { %v8071_v56 = vpop.f32.mrb[24].mxu0 }
 0x188   :  { %13573 = vst [vmem:[#allocation2_spill] sm:$0xff] %v8071_v56  ;;  %v8073_v22 = vpop.f32.mrb[25].mxu0 }
 0x189   :  { %13574 = vst [vmem:[#allocation3_spill] sm:$0xff] %v8073_v22  ;;  %v8075_v46 = vpop.f32.mrb[26].mxu0 }
 0x18a   :  { %v8077_v29 = vpop.f32.mrb[27].mxu0 }
 0x18f   :  { %v767_v26 = vpop.f32.mrb[28].mxu0 }
 0x190   :  { %v769_v2 = vpop.f32.mrb[29].mxu0  ;;  %v8096_v42 = vadd.f32 %v767_v26, %v8086_v32 }
 0x191   :  { %v771_v40 = vpop.f32.mrb[30].mxu0  ;;  %v8099_v23 = vadd.f32 %v769_v2, %v8090_v38 }
 0x192   :  { %v8093_v41 = vadd.f32 %v771_v40, %v8086_v32  ;;  %v773_v34 = vpop.f32.mrb[31].mxu0  ;;  %v13219_v19 = vmax.f32 %v8096_v42, 0.0 }
 0x193   :  { %v8102_v45 = vadd.f32 %v773_v34, %v8090_v38  ;;  %v13220_v25 = vmax.f32 %v8099_v23, 0.0 }
 0x194   :  { %v13223_v33 = vmax.f32 %v8093_v41, 0.0 }
 0x195   :  { %v13226_v13 = vmax.f32 %v8102_v45, 0.0  ;;  %v6483_v48 = vpack.i.bf16 %v13220_v25, %v13219_v19 }
 0x197   :  { %v6473_v16 = vpack.i.bf16 %v13226_v13, %v13223_v33  ;;  %v777_v28 = vpop.f32.mrb[32].mxu0 }
 0x198   :  { %v8113_v0 = vadd.f32 %v777_v28, %v8086_v32  ;;  %v779_v43 = vpop.f32.mrb[33].mxu0 }
 0x199   :  { %v8116_v44 = vadd.f32 %v779_v43, %v8090_v38  ;;  %v781_v47 = vpop.f32.mrb[34].mxu0  ;;  %6474 = vrot.lane.b32.xlu0 %v6473_v16, %s7361_s2 }
 0x19a   :  { %v13215_v53 = vmax.f32 %v8113_v0, 0.0  ;;  %v8121_v58 = vadd.f32 %v781_v47, %v8086_v32  ;;  %v783_v50 = vpop.f32.mrb[35].mxu0 }
 0x19b   :  { %v13218_v62 = vmax.f32 %v8116_v44, 0.0  ;;  %v8129_v35 = vadd.f32 %v783_v50, %v8090_v38 }
 0x19c   :  { %v13211_v55 = vmax.f32 %v8121_v58, 0.0 }
 0x19d   :  { %v6478_v6 = vpack.i.bf16 %v13218_v62, %v13215_v53  ;;  %v13212_v36 = vmax.f32 %v8129_v35, 0.0  ;;  %6484 = vrot.lane.b32.xlu0 %v6483_v48, %s7361_s2 }
 0x19f   :  { %v787_v31 = vpop.f32.mrb[36].mxu0  ;;  %6479 = vrot.lane.b32.xlu1 %v6478_v6, %s7361_s2  ;;  %v6488_v26 = vpack.i.bf16 %v13212_v36, %v13211_v55 }
 0x1a0   :  { %v8140_v61 = vadd.f32 %v787_v31, %v8086_v32  ;;  %v789_v52 = vpop.f32.mrb[37].mxu0 }
 0x1a1   :  { %v8147_v2 = vadd.f32 %v789_v52, %v8090_v38  ;;  %v791_v40 = vpop.f32.mrb[38].mxu0 }
 0x1a2   :  { %v13207_v34 = vmax.f32 %v8140_v61, 0.0  ;;  %v8151_v16 = vadd.f32 %v791_v40, %v8086_v32  ;;  %v793_v28 = vpop.f32.mrb[39].mxu0 }
 0x1a3   :  { %v13210_v43 = vmax.f32 %v8147_v2, 0.0  ;;  %v8155_v47 = vadd.f32 %v793_v28, %v8090_v38  ;;  %6489 = vrot.lane.b32.xlu1 %v6488_v26, %s7361_s2 }
 0x1a4   :  { %v13208_v50 = vmax.f32 %v8151_v16, 0.0 }
 0x1a5   :  { %v6493_v48 = vpack.i.bf16 %v13210_v43, %v13207_v34  ;;  %v13209_v6 = vmax.f32 %v8155_v47, 0.0 }
 0x1a7   :  { %v6498_v31 = vpack.i.bf16 %v13209_v6, %v13208_v50  ;;  %v797_v52 = vpop.f32.mrb[40].mxu0  ;;  %6494 = vrot.lane.b32.xlu0 %v6493_v48, %s7361_s2 }
 0x1a8   :  { %v8170_v40 = vadd.f32 %v797_v52, %v8086_v32  ;;  %v799_v26 = vpop.f32.mrb[41].mxu0 }
 0x1a9   :  { %v8173_v28 = vadd.f32 %v799_v26, %v8090_v38  ;;  %v801_v10 = vpop.f32.mrb[42].mxu0  ;;  %6499 = vrot.lane.b32.xlu1 %v6498_v31, %s7361_s2 }
 0x1aa   :  { %v13213_v30 = vmax.f32 %v8170_v40, 0.0  ;;  %v8178_v5 = vadd.f32 %v801_v10, %v8086_v32  ;;  %v803_v34 = vpop.f32.mrb[43].mxu0 }
 0x1ab   :  { %v13214_v50 = vmax.f32 %v8173_v28, 0.0  ;;  %v8182_v48 = vadd.f32 %v803_v34, %v8090_v38 }
 0x1ac   :  { %v13216_v52 = vmax.f32 %v8178_v5, 0.0 }
 0x1ad   :  { %v6503_v26 = vpack.i.bf16 %v13214_v50, %v13213_v30  ;;  %v13217_v31 = vmax.f32 %v8182_v48, 0.0 }
 0x1af   :  { %v6508_v10 = vpack.i.bf16 %v13217_v31, %v13216_v52  ;;  %v807_v6 = vpop.f32.mrb[44].mxu0  ;;  %6504 = vrot.lane.b32.xlu0 %v6503_v26, %s7361_s2 }
 0x1b0   :  { %v8196_v34 = vadd.f32 %v807_v6, %v8086_v32  ;;  %v809_v43 = vpop.f32.mrb[45].mxu0 }
 0x1b1   :  { %v8199_v55 = vadd.f32 %v809_v43, %v8090_v38  ;;  %v811_v36 = vpop.f32.mrb[46].mxu0  ;;  %6509 = vrot.lane.b32.xlu1 %v6508_v10, %s7361_s2 }
 0x1b2   :  { %v13221_v30 = vmax.f32 %v8196_v34, 0.0  ;;  %v8204_v50 = vadd.f32 %v811_v36, %v8086_v32  ;;  %v813_v53 = vpop.f32.mrb[47].mxu0 }
 0x1b3   :  { %v13222_v52 = vmax.f32 %v8199_v55, 0.0  ;;  %v8208_v26 = vadd.f32 %v813_v53, %v8090_v38 }
 0x1b4   :  { %v13224_v6 = vmax.f32 %v8204_v50, 0.0 }
 0x1b5   :  { %v6513_v43 = vpack.i.bf16 %v13222_v52, %v13221_v30  ;;  %v13225_v10 = vmax.f32 %v8208_v26, 0.0 }
 0x1b7   :  { %v6518_v36 = vpack.i.bf16 %v13225_v10, %v13224_v6  ;;  %v817_v31 = vpop.f32.mrb[48].mxu0  ;;  %6514 = vrot.lane.b32.xlu0 %v6513_v43, %s7361_s2 }
 0x1b8   :  { %v8222_v53 = vadd.f32 %v817_v31, %v8086_v32  ;;  %v819_v62 = vpop.f32.mrb[49].mxu0 }
 0x1b9   :  { %v8225_v19 = vadd.f32 %v819_v62, %v8090_v38  ;;  %v821_v25 = vpop.f32.mrb[50].mxu0  ;;  %6519 = vrot.lane.b32.xlu1 %v6518_v36, %s7361_s2 }
 0x1ba   :  { %13575 = vst [vmem:[#allocation4_spill] sm:$0xff] %v8222_v53  ;;  %v13227_v30 = vmax.f32 %v8222_v53, 0.0  ;;  %v8230_v52 = vadd.f32 %v821_v25, %v8086_v32  ;;  %v823_v33 = vpop.f32.mrb[51].mxu0 }
 0x1bb   :  { %v13228_v6 = vmax.f32 %v8225_v19, 0.0  ;;  %v8234_v43 = vadd.f32 %v823_v33, %v8090_v38 }
 0x1bc   :  { %13576 = vst [vmem:[#allocation5_spill] sm:$0xff] %v8230_v52  ;;  %v13230_v31 = vmax.f32 %v8230_v52, 0.0 }
 0x1bd   :  { %13577 = vst [vmem:[#allocation6_spill] sm:$0xff] %v8234_v43  ;;  %v6523_v62 = vpack.i.bf16 %v13228_v6, %v13227_v30  ;;  %v13231_v36 = vmax.f32 %v8234_v43, 0.0 }
 0x1bf   :  { %v6528_v25 = vpack.i.bf16 %v13231_v36, %v13230_v31  ;;  %v827_v10 = vpop.f32.mrb[52].mxu0  ;;  %6524 = vrot.lane.b32.xlu0 %v6523_v62, %s7361_s2 }
 0x1c0   :  { %v8248_v33 = vadd.f32 %v827_v10, %v8086_v32  ;;  %v829_v13 = vpop.f32.mrb[53].mxu0 }
 0x1c1   :  { %v8251_v22 = vadd.f32 %v829_v13, %v8090_v38  ;;  %v831_v56 = vpop.f32.mrb[54].mxu0  ;;  %6529 = vrot.lane.b32.xlu1 %v6528_v25, %s7361_s2 }
 0x1c2   :  { %13578 = vst [vmem:[#allocation7_spill] sm:$0xff] %v8248_v33  ;;  %v13234_v30 = vmax.f32 %v8248_v33, 0.0  ;;  %v8256_v6 = vadd.f32 %v831_v56, %v8086_v32  ;;  %v833_v52 = vpop.f32.mrb[55].mxu0 }
 0x1c3   :  { %13579 = vst [vmem:[#allocation8_spill] sm:$0xff] %v8251_v22  ;;  %v13235_v31 = vmax.f32 %v8251_v22, 0.0  ;;  %v8260_v62 = vadd.f32 %v833_v52, %v8090_v38  ;;  %v8275_v52 = vadd.f32 %v8077_v29, %v8090_v38  ;;  %v8308_v22 = vadd.f32 %v8075_v46, %v8086_v32 }
 0x1c4   :  { %13580 = vst [vmem:[#allocation9_spill] sm:$0xff] %v8256_v6  ;;  %v13237_v10 = vmax.f32 %v8256_v6, 0.0 }
 0x1c5   :  { %13581 = vst [vmem:[#allocation10_spill] sm:$0xff] %v8260_v62  ;;  %v6533_v13 = vpack.i.bf16 %v13235_v31, %v13234_v30  ;;  %v13238_v25 = vmax.f32 %v8260_v62, 0.0  ;;  %13582 = vst [vmem:[#allocation11_spill] sm:$0xff] %v8275_v52  ;;  %v13244_v29 = vmax.f32 %v8275_v52, 0.0 }
 0x1c6   :  { %13586 = vst [vmem:[#allocation15_spill] sm:$0xff] %v8308_v22 }
 0x1c7   :  { %v6538_v56 = vpack.i.bf16 %v13238_v25, %v13237_v10  ;;  %v837_v36 = vpop.f32.mrb[56].mxu0  ;;  %6534 = vrot.lane.b32.xlu0 %v6533_v13, %s7361_s2 }
 0x1c8   :  { %v8278_v43 = vadd.f32 %v837_v36, %v8086_v32  ;;  %v839_v33 = vpop.f32.mrb[57].mxu0 }
 0x1c9   :  { %v8281_v30 = vadd.f32 %v839_v33, %v8090_v38  ;;  %v841_v31 = vpop.f32.mrb[58].mxu0  ;;  %6539 = vrot.lane.b32.xlu1 %v6538_v56, %s7361_s2  ;;  %v8300_v56 = vadd.f32 %v8023_v57, %v8086_v32 }
 0x1ca   :  { %13583 = vst [vmem:[#allocation12_spill] sm:$0xff] %v8278_v43  ;;  %v13242_v6 = vmax.f32 %v8278_v43, 0.0  ;;  %v8286_v10 = vadd.f32 %v841_v31, %v8086_v32  ;;  %v843_v13 = vpop.f32.mrb[59].mxu0  ;;  %v8313_v43 = vadd.f32 %v8025_v21, %v8090_v38 }
 0x1cb   :  { %13584 = vst [vmem:[#allocation13_spill] sm:$0xff] %v8281_v30  ;;  %v13243_v25 = vmax.f32 %v8281_v30, 0.0  ;;  %v8292_v62 = vadd.f32 %v843_v13, %v8090_v38 }
 0x1cc   :  { %13585 = vst [vmem:[#allocation14_spill] sm:$0xff] %v8286_v10  ;;  %v13245_v36 = vmax.f32 %v8286_v10, 0.0  ;;  %v13262_v10 = vmax.f32 %v8313_v43, 0.0 }
 0x1cd   :  { %v6543_v33 = vpack.i.bf16 %v13243_v25, %v13242_v6  ;;  %v8330_v6 = vadd.f32 %v8027_v8, %v8086_v32 }
 0x1ce   :  { %v6548_v31 = vpack.i.bf16 %v13245_v36, %v13244_v29  ;;  %v8340_v36 = vadd.f32 %v8029_v3, %v8090_v38 }
 0x1cf   :  { %v847_v13 = vpop.f32.mrb[60].mxu0  ;;  %6544 = vrot.lane.b32.xlu0 %v6543_v33, %s7361_s2 }
 0x1d0   :  { %v8317_v57 = vadd.f32 %v847_v13, %v8086_v32  ;;  %v849_v25 = vpop.f32.mrb[61].mxu0  ;;  %6549 = vrot.lane.b32.xlu1 %v6548_v31, %s7361_s2  ;;  %v13252_v13 = vmax.f32 %v8308_v22, 0.0  ;;  %13588 = vst [vmem:[#allocation17_spill] sm:$0xff] %v8340_v36 }
 0x1d1   :  { %v8321_v29 = vadd.f32 %v849_v25, %v8090_v38  ;;  %v851_v46 = vpop.f32.mrb[62].mxu0 }
 0x1d2   :  { %13587 = vst [vmem:[#allocation16_spill] sm:$0xff] %v8317_v57  ;;  %v13250_v33 = vmax.f32 %v8317_v57, 0.0  ;;  %v8326_v52 = vadd.f32 %v851_v46, %v8086_v32  ;;  %v853_v21 = vpop.f32.mrb[63].mxu0  ;;  %v13589_v46 = vmax.f32 %v8292_v62, 0.0  ;;  %v13256_v57 = vmax.f32 %v8330_v6, 0.0 }
 0x1d3   :  { %v13253_v31 = vmax.f32 %v8321_v29, 0.0  ;;  %v8335_v25 = vadd.f32 %v853_v21, %v8090_v38 }
 0x1d4   :  { %v6553_v30 = vpack.i.bf16 %v13250_v33, %v13589_v46  ;;  %v13254_v8 = vmax.f32 %v8326_v52, 0.0  ;;  %v13590_v46 = vmax.f32 %v8300_v56, 0.0 }
 0x1d5   :  { %v6558_v53 = vpack.i.bf16 %v13252_v13, %v13253_v31  ;;  %v13261_v21 = vmax.f32 %v8335_v25, 0.0  ;;  %v13255_v13 = vmax.f32 %v8340_v36, 0.0  ;;  %v8366_v31 = vadd.f32 %v8035_v18, %v8086_v32 }
 0x1d6   :  { %6554 = vrot.lane.b32.xlu0 %v6553_v30, %s7361_s2  ;;  %v6563_v33 = vpack.i.bf16 %v13262_v10, %v13590_v46  ;;  %v8370_v30 = vadd.f32 %v8037_v60, %v8090_v38  ;;  %v8382_v18 = vadd.f32 %v8039_v1, %v8086_v32  ;;  %v8386_v60 = vadd.f32 %v8041_v37, %v8090_v38 }
 0x1d7   :  { %v6568_v3 = vpack.i.bf16 %v13261_v21, %v13254_v8  ;;  %6559 = vrot.lane.b32.xlu1 %v6558_v53, %s7361_s2  ;;  %13591 = vst [vmem:[#allocation18_spill] sm:$0xff] %v8366_v31  ;;  %v6573_v53 = vpack.i.bf16 %v13255_v13, %v13256_v57  ;;  %v13257_v46 = vmax.f32 %v8366_v31, 0.0  ;;  %v7150_v57 = vld [vmem:[%s13198_s3 + $0x10] ss:$8 sps:$4 sm:$0xff]   ;;  %v1479_v21 = vadd.s32 120, %v7428_v7 }
 0x1d8   :  { %13592 = vst [vmem:[#allocation19_spill] sm:$0xff] %v8370_v30  ;;  %v13258_v8 = vmax.f32 %v8370_v30, 0.0  ;;  %13593 = vst [vmem:[#allocation20_spill] sm:$0xff] %v8382_v18  ;;  %v13259_v37 = vmax.f32 %v8382_v18, 0.0  ;;  %v13260_v13 = vmax.f32 %v8386_v60, 0.0  ;;  %v13599_v31 = vmax.f32 %v8102_v45, 0.0 }
 0x1d9   :  { %13594 = vst [vmem:[#allocation21_spill] sm:$0xff] %v8386_v60  ;;  %v7186_v45 = vld [vmem:[%s13198_s3 + $0xd0] ss:$8 sps:$4 sm:$0xff]  }
 0x1da   :  { %6564 = vrot.lane.b32.xlu0 %v6563_v33, %s7361_s2  ;;  %v7145_v33 = vld [vmem:[%s13198_s3 + $0x4] ss:$8 sps:$4 sm:$0xff]   ;;  %v6588_v1 = vpack.i.bf16 %v13258_v8, %v13257_v46  ;;  %v7153_v46 = vld [vmem:[%s13198_s3 + $0x20] ss:$8 sps:$4 sm:$0xff]   ;;  %v7154_v8 = vld [vmem:[%s13198_s3 + $0x34] ss:$8 sps:$4 sm:$0xff]  }
 0x1db   :  { %6569 = vrot.lane.b32.xlu1 %v6568_v3, %s7361_s2  ;;  %v7147_v3 = vld [vmem:[%s13198_s3] ss:$8 sps:$4 sm:$0xff]   ;;  %6077 = vmatprep.subr.bf16.mxu1 %v7145_v33 }
 0x1dc   :  { %3237 = vmatprep.subr.bf16.mxu0 %v7145_v33  ;;  %6093 = vmatpush1.bf16.msra.mxu1 %v7147_v3  ;;  %v7151_v33 = vld [vmem:[%s13198_s3 + $0x24] ss:$8 sps:$4 sm:$0xff]  }
 0x1dd   :  { %3238 = vmatpush1.bf16.msra.mxu0 %v7147_v3  ;;  %v6593_v3 = vpack.i.bf16 %v13260_v13, %v13259_v37 }
 0x1df   :  { %6574 = vrot.lane.b32.xlu1 %v6573_v53, %s7361_s2  ;;  %v7148_v53 = vld [vmem:[%s13198_s3 + $0x14] ss:$8 sps:$4 sm:$0xff]  }
 0x1e0   :  { %6078 = vmatprep.subr.bf16.mxu1 %v7148_v53  ;;  %3239 = vmatprep.subr.bf16.mxu0 %v7148_v53  ;;  %v7157_v53 = vld [vmem:[%s13198_s3 + $0x44] ss:$8 sps:$4 sm:$0xff]  }
 0x1e1   :  { %6094 = vmatpush1.bf16.msra.mxu1 %v7150_v57  ;;  %3240 = vmatpush1.bf16.msra.mxu0 %v7150_v57  ;;  %v7159_v57 = vld [vmem:[%s13198_s3 + $0x40] ss:$8 sps:$4 sm:$0xff]  }
 0x1e2   :  { %6079 = vmatprep.subr.bf16.mxu1 %v7151_v33  ;;  %3241 = vmatprep.subr.bf16.mxu0 %v7151_v33  ;;  %v7160_v33 = vld [vmem:[%s13198_s3 + $0x54] ss:$8 sps:$4 sm:$0xff]  }
 0x1e3   :  { %6589 = vrot.lane.b32.xlu1 %v6588_v1, %s7361_s2  ;;  %v7156_v1 = vld [vmem:[%s13198_s3 + $0x30] ss:$8 sps:$4 sm:$0xff]  }
 0x1e5   :  { %6095 = vmatpush1.bf16.msra.mxu1 %v7153_v46  ;;  %3242 = vmatpush1.bf16.msra.mxu0 %v7153_v46  ;;  %v7162_v46 = vld [vmem:[%s13198_s3 + $0x50] ss:$8 sps:$4 sm:$0xff]  }
 0x1e6   :  { %6080 = vmatprep.subr.bf16.mxu1 %v7154_v8  ;;  %3243 = vmatprep.subr.bf16.mxu0 %v7154_v8  ;;  %v7163_v8 = vld [vmem:[%s13198_s3 + $0x64] ss:$8 sps:$4 sm:$0xff]  }
 0x1e7   :  { %6594 = vrot.lane.b32.xlu1 %v6593_v3, %s7361_s2  ;;  %v7165_v3 = vld [vmem:[%s13198_s3 + $0x60] ss:$8 sps:$4 sm:$0xff]  }
 0x1e9   :  { %6096 = vmatpush1.bf16.msra.mxu1 %v7156_v1  ;;  %3244 = vmatpush1.bf16.msra.mxu0 %v7156_v1  ;;  %v7166_v1 = vld [vmem:[%s13198_s3 + $0x74] ss:$8 sps:$4 sm:$0xff]  }
 0x1ea   :  { %6081 = vmatprep.subr.bf16.mxu1 %v7157_v53  ;;  %3245 = vmatprep.subr.bf16.mxu0 %v7157_v53  ;;  %v7168_v53 = vld [vmem:[%s13198_s3 + $0x70] ss:$8 sps:$4 sm:$0xff]  }
 0x1ed   :  { %6097 = vmatpush1.bf16.msra.mxu1 %v7159_v57  ;;  %3246 = vmatpush1.bf16.msra.mxu0 %v7159_v57  ;;  %v7169_v57 = vld [vmem:[%s13198_s3 + $0x84] ss:$8 sps:$4 sm:$0xff]  }
 0x1ee   :  { %6082 = vmatprep.subr.bf16.mxu1 %v7160_v33  ;;  %3247 = vmatprep.subr.bf16.mxu0 %v7160_v33  ;;  %v7171_v33 = vld [vmem:[%s13198_s3 + $0x80] ss:$8 sps:$4 sm:$0xff]  }
 0x1f1   :  { %6098 = vmatpush1.bf16.msra.mxu1 %v7162_v46  ;;  %3248 = vmatpush1.bf16.msra.mxu0 %v7162_v46  ;;  %v7172_v46 = vld [vmem:[%s13198_s3 + $0x94] ss:$8 sps:$4 sm:$0xff]  }
 0x1f2   :  { %6083 = vmatprep.subr.bf16.mxu1 %v7163_v8  ;;  %3249 = vmatprep.subr.bf16.mxu0 %v7163_v8  ;;  %v7174_v8 = vld [vmem:[%s13198_s3 + $0x90] ss:$8 sps:$4 sm:$0xff]  }
 0x1f5   :  { %6099 = vmatpush1.bf16.msra.mxu1 %v7165_v3  ;;  %3250 = vmatpush1.bf16.msra.mxu0 %v7165_v3  ;;  %v7175_v3 = vld [vmem:[%s13198_s3 + $0xa4] ss:$8 sps:$4 sm:$0xff]  }
 0x1f6   :  { %6084 = vmatprep.subr.bf16.mxu1 %v7166_v1  ;;  %3251 = vmatprep.subr.bf16.mxu0 %v7166_v1  ;;  %v7177_v1 = vld [vmem:[%s13198_s3 + $0xa0] ss:$8 sps:$4 sm:$0xff]  }
 0x1f9   :  { %6100 = vmatpush1.bf16.msra.mxu1 %v7168_v53  ;;  %3252 = vmatpush1.bf16.msra.mxu0 %v7168_v53  ;;  %v7178_v53 = vld [vmem:[%s13198_s3 + $0xb4] ss:$8 sps:$4 sm:$0xff]  }
 0x1fa   :  { %6085 = vmatprep.subr.bf16.mxu1 %v7169_v57  ;;  %3253 = vmatprep.subr.bf16.mxu0 %v7169_v57  ;;  %v8472_v57 = vadd.f32 %v8031_v49, %v8086_v32  ;;  %v8486_v49 = vadd.f32 %v8043_v39, %v8086_v32 }
 0x1fc   :  { %13595 = vst [vmem:[#allocation22_spill] sm:$0xff] %v8472_v57  ;;  %13597 = vst [vmem:[#allocation24_spill] sm:$0xff] %v8486_v49 }
 0x1fd   :  { %6101 = vmatpush1.bf16.msra.mxu1 %v7171_v33  ;;  %3254 = vmatpush1.bf16.msra.mxu0 %v7171_v33  ;;  %v8476_v33 = vadd.f32 %v8033_v15, %v8090_v38  ;;  %v8490_v15 = vadd.f32 %v8045_v4, %v8090_v38  ;;  %v7184_v4 = vld [vmem:[%s13198_s3 + $0xd4] ss:$8 sps:$4 sm:$0xff]  }
 0x1fe   :  { %6086 = vmatprep.subr.bf16.mxu1 %v7172_v46  ;;  %3255 = vmatprep.subr.bf16.mxu0 %v7172_v46  ;;  %v7180_v46 = vld [vmem:[%s13198_s3 + $0xb0] ss:$8 sps:$4 sm:$0xff]  }
 0x1ff   :  { %13596 = vst [vmem:[#allocation23_spill] sm:$0xff] %v8476_v33  ;;  %13598 = vst [vmem:[#allocation25_spill] sm:$0xff] %v8490_v15  ;;  %v13601_v60 = vmax.f32 %v8476_v33, 0.0 }
 0x201   :  { %6102 = vmatpush1.bf16.msra.mxu1 %v7174_v8  ;;  %3256 = vmatpush1.bf16.msra.mxu0 %v7174_v8  ;;  %v7181_v8 = vld [vmem:[%s13198_s3 + $0xc4] ss:$8 sps:$4 sm:$0xff]  }
 0x202   :  { %6087 = vmatprep.subr.bf16.mxu1 %v7175_v3  ;;  %3257 = vmatprep.subr.bf16.mxu0 %v7175_v3 }
 0x205   :  { %6103 = vmatpush1.bf16.msra.mxu1 %v7177_v1  ;;  %3258 = vmatpush1.bf16.msra.mxu0 %v7177_v1 }
 0x206   :  { %6088 = vmatprep.subr.bf16.mxu1 %v7178_v53  ;;  %3259 = vmatprep.subr.bf16.mxu0 %v7178_v53  ;;  %v7183_v53 = vld [vmem:[%s13198_s3 + $0xc0] ss:$8 sps:$4 sm:$0xff]  }
 0x209   :  { %6104 = vmatpush1.bf16.msra.mxu1 %v7180_v46  ;;  %3260 = vmatpush1.bf16.msra.mxu0 %v7180_v46 }
 0x20a   :  { %6089 = vmatprep.subr.bf16.mxu1 %v7181_v8  ;;  %3261 = vmatprep.subr.bf16.mxu0 %v7181_v8  ;;  %v13602_v8 = vmax.f32 %v8093_v41, 0.0  ;;  %v7187_v41 = vld [vmem:[%s13198_s3 + $0xe4] ss:$8 sps:$4 sm:$0xff]  }
 0x20b   :  { %v6475_v3 = vpop.permute.xlu0 %6474 }
 0x20c   :  { %v6477_v37 = vunpack.i.h.bf16 %v6475_v3  ;;  %v6476_v13 = vunpack.i.l.bf16 %v6475_v3 }
 0x20d   :  { %6105 = vmatpush1.bf16.msra.mxu1 %v7183_v53  ;;  %3262 = vmatpush1.bf16.msra.mxu0 %v7183_v53 }
 0x20e   :  { %v1128_v39 = vsel %vm1112_vm6, %v6476_v13, %v6477_v37  ;;  %v8506_v30 = vmax.f32 %v13599_v31, %v6477_v37  ;;  %v13600_v13 = vmax.f32 %v8472_v57, 0.0  ;;  %v13603_v31 = vmax.f32 %v8099_v23, 0.0  ;;  %6090 = vmatprep.subr.bf16.mxu1 %v7184_v4  ;;  %3263 = vmatprep.subr.bf16.mxu0 %v7184_v4 }
 0x20f   :  { %v6485_v1 = vpop.permute.xlu0 %6484  ;;  %v8516_v3 = vmax.f32 %v13602_v8, %v1128_v39  ;;  %v13605_v39 = vmax.f32 %v8486_v49, 0.0  ;;  %v8537_v23 = vadd.f32 %v8047_v54, %v8086_v32  ;;  %v13608_v4 = vmax.f32 %v8116_v44, 0.0  ;;  %v7189_v44 = vld [vmem:[%s13198_s3 + $0xe0] ss:$8 sps:$4 sm:$0xff]  }
 0x210   :  { %v6487_v46 = vunpack.i.h.bf16 %v6485_v1  ;;  %v6486_v18 = vunpack.i.l.bf16 %v6485_v1  ;;  %v8512_v22 = vpack.i.bf16 %v13601_v60, %v13600_v13  ;;  %v13606_v13 = vmax.f32 %v8490_v15, 0.0 }
 0x211   :  { %v6480_v10 = vpop.permute.xlu1 %6479  ;;  %v1303_v54 = vrot.slane %v8516_v3, 1  ;;  %6106 = vmatpush1.bf16.msra.mxu1 %v7186_v45  ;;  %3264 = vmatpush1.bf16.msra.mxu0 %v7186_v45 }
 0x212   :  { %v8523_v37 = vmax.f32 %v13603_v31, %v6487_v46  ;;  %v1127_v1 = vsel %vm1112_vm6, %v6486_v18, %v6487_v46  ;;  %v6482_v57 = vunpack.i.h.bf16 %v6480_v10  ;;  %v6481_v60 = vunpack.i.l.bf16 %v6480_v10  ;;  %6091 = vmatprep.subr.bf16.mxu1 %v7187_v41  ;;  %3265 = vmatprep.subr.bf16.mxu0 %v7187_v41 }
 0x213   :  { %v8533_v8 = vpack.i.bf16 %v13606_v13, %v13605_v39  ;;  %v13607_v18 = vmax.f32 %v8096_v42, 0.0  ;;  %v1511_v10 = vand.u32 31, %v1479_v21  ;;  %v1304_v46 = vrot.slane %v8506_v30, 1 }
 0x214   :  { %13604 = vst [vmem:[#allocation26_spill] sm:$0xff] %v8523_v37  ;;  %v13271_v31 = vrot.slane %v8523_v37, 1  ;;  %v1242_v49 = vmax.f32 %v13608_v4, %v6482_v57  ;;  %v1129_v15 = vsel %vm1112_vm6, %v6481_v60, %v6482_v57  ;;  %v8550_v39 = vadd.f32 %v8049_v14, %v8090_v38 }
 0x215   :  { %v8541_v53 = vmax.f32 %v13607_v18, %v1127_v1  ;;  %v13609_v1 = vmax.f32 %v8113_v0, 0.0  ;;  %v6490_v13 = vpop.permute.xlu1 %6489  ;;  %v7190_v0 = vld [vmem:[%s13198_s3 + $0xf4] ss:$8 sps:$4 sm:$0xff]   ;;  %vm8576_vm7 = vcmp.lt.s32.totalorder %v1511_v10, 28  ;;  %v13616_v10 = vmax.f32 %v8121_v58, 0.0  ;;  %6107 = vmatpush1.bf16.msra.mxu1 %v7189_v44  ;;  %3266 = vmatpush1.bf16.msra.mxu0 %v7189_v44 }
 0x216   :  { %v1370_v14 = vsel %vm93_vm0, %v13271_v31, %v1304_v46  ;;  %v1306_v57 = vrot.slane %v1242_v49, 1  ;;  %v6492_v60 = vunpack.i.h.bf16 %v6490_v13  ;;  %v6491_v18 = vunpack.i.l.bf16 %v6490_v13  ;;  %6092 = vmatprep.subr.bf16.mxu1 %v7190_v0  ;;  %3267 = vmatprep.subr.bf16.mxu0 %v7190_v0 }
 0x217   :  { %v8556_v21 = vmax.f32 %v13609_v1, %v1129_v15  ;;  %v8570_v15 = vadd.f32 %v8051_v59, %v8086_v32  ;;  %v8573_v45 = vmax.f32 %v8523_v37, %v1370_v14  ;;  %v13614_v13 = vmax.f32 %v8129_v35, 0.0 }
 0x218   :  { %v1130_v42 = vsel %vm1112_vm6, %v6491_v18, %v6492_v60  ;;  %v1368_v41 = vsel %vm93_vm0, %v1304_v46, %v1306_v57  ;;  %v13615_v59 = vrot.slane %v8541_v53, 1  ;;  %v7192_v46 = vld [vmem:[%s13198_s3 + $0xf0] ss:$8 sps:$4 sm:$0xff]   ;;  %v8601_v58 = vadd.f32 %v8053_v17, %v8090_v38 }
 0x219   :  { %13610 = vst [vmem:[#allocation27_spill] sm:$0xff] %v8570_v15  ;;  %13611 = vst [vmem:[#allocation28_spill] sm:$0xff] %v8573_v45  ;;  %v1305_v4 = vrot.slane %v8556_v21, 1  ;;  %v1244_v31 = vmax.f32 %v13614_v13, %v6492_v60  ;;  %v1243_v45 = vmax.f32 %v13616_v10, %v1130_v42  ;;  %v6495_v37 = vpop.permute.xlu0 %6494  ;;  %v1432_v13 = vmax.f32 %v8506_v30, %v1368_v41 }
 0x21a   :  { %v1369_v14 = vsel %vm93_vm0, %v13615_v59, %v1303_v54  ;;  %v6497_v18 = vunpack.i.h.bf16 %v6495_v37  ;;  %v6496_v59 = vunpack.i.l.bf16 %v6495_v37  ;;  %13617 = vst [vmem:[#allocation29_spill] sm:$0xff] %v8601_v58  ;;  %6108 = vmatpush1.bf16.msra.mxu1 %v7192_v46  ;;  %3268 = vmatpush1.bf16.msra.mxu0 %v7192_v46  ;;  %v8652_v1 = vadd.f32 %v8057_v9, %v8090_v38 }
 0x21b   :  { %v1367_v35 = vsel %vm93_vm0, %v1303_v54, %v1305_v4  ;;  %v1308_v60 = vrot.slane %v1244_v31, 1  ;;  %v1307_v54 = vrot.slane %v1243_v45, 1  ;;  %v6500_v42 = vpop.permute.xlu1 %6499  ;;  %v8604_v30 = vmax.f32 %v8541_v53, %v1369_v14 }
 0x21c   :  { %v1431_v33 = vmax.f32 %v8516_v3, %v1367_v35  ;;  %v8608_v41 = vsel %vm8576_vm7, %v1432_v13, 0.0  ;;  %v13620_v3 = vmax.f32 %v8147_v2, 0.0  ;;  %v1131_v0 = vsel %vm1112_vm6, %v6496_v59, %v6497_v18  ;;  %13627 = vst [vmem:[#allocation35_spill] sm:$0xff] %v8652_v1 }
 0x21d   :  { %13618 = vst [vmem:[#allocation30_spill] sm:$0xff] %v8604_v30  ;;  %13619 = vst [vmem:[#allocation31_spill] sm:$0xff] %v8608_v41  ;;  %v1366_v37 = vsel %vm93_vm0, %v1306_v57, %v1308_v60  ;;  %v6502_v10 = vunpack.i.h.bf16 %v6500_v42  ;;  %v13622_v35 = vmax.f32 %v8140_v61, 0.0  ;;  %v6501_v14 = vunpack.i.l.bf16 %v6500_v42 }
 0x21e   :  { %v1246_v44 = vmax.f32 %v13620_v3, %v6497_v18  ;;  %v8615_v17 = vmax.f32 %v1242_v49, %v1366_v37  ;;  %v8623_v13 = vsel %vm8576_vm7, %v1431_v33, 0.0  ;;  %v13623_v18 = vmax.f32 %v8155_v47, 0.0 }
 0x21f   :  { %v8619_v36 = vmax.f32 %v13622_v35, %v1131_v0  ;;  %v1132_v61 = vsel %vm1112_vm6, %v6501_v14, %v6502_v10  ;;  %v6578_v42 = vpack.i.bf16 %v8623_v13, %v8604_v30  ;;  %v1483_v33 = vadd.s32 152, %v7428_v7 }
 0x220   :  { %13621 = vst [vmem:[#allocation32_spill] sm:$0xff] %v8615_v17  ;;  %v1310_v3 = vrot.slane %v1246_v44, 1  ;;  %v1248_v49 = vmax.f32 %v13623_v18, %v6502_v10  ;;  %v1365_v0 = vsel %vm93_vm0, %v1305_v4, %v1307_v54  ;;  %v8641_v47 = vadd.f32 %v8055_v11, %v8086_v32 }
 0x221   :  { %v1309_v59 = vrot.slane %v8619_v36, 1  ;;  %v13626_v10 = vmax.f32 %v8151_v16, 0.0  ;;  %6579 = vrot.lane.b32.xlu0 %v6578_v42, %s7362_s14  ;;  %v6505_v18 = vpop.permute.xlu0 %6504  ;;  %vm4445_vm7 = vcmask 1042434  }
 0x222   :  { %v1364_v46 = vsel %vm93_vm0, %v1308_v60, %v1310_v3  ;;  %v1312_v37 = vrot.slane %v1248_v49, 1  ;;  %13624 = vst [vmem:[#allocation33_spill] sm:$0xff] %v8641_v47  ;;  %v6507_v4 = vunpack.i.h.bf16 %v6505_v18 }
 0x223   :  { %v8643_v35 = vmax.f32 %v1244_v31, %v1364_v46  ;;  %v1247_v14 = vmax.f32 %v13626_v10, %v1132_v61  ;;  %v1363_v60 = vsel %vm93_vm0, %v1307_v54, %v1309_v59  ;;  %v6506_v31 = vunpack.i.l.bf16 %v6505_v18  ;;  %v6510_v16 = vpop.permute.xlu1 %6509 }
 0x224   :  { %v1362_v11 = vsel %vm93_vm0, %v1310_v3, %v1312_v37  ;;  %v8659_v61 = vmax.f32 %v8556_v21, %v1365_v0  ;;  %v8661_v42 = vmax.f32 %v1243_v45, %v1363_v60  ;;  %v1515_v10 = vand.u32 31, %v1483_v33 }
 0x225   :  { %13625 = vst [vmem:[#allocation34_spill] sm:$0xff] %v8643_v35  ;;  %v8656_v46 = vmax.f32 %v1246_v44, %v1362_v11  ;;  %v13629_v54 = vmax.f32 %v8173_v28, 0.0  ;;  %v1133_v9 = vsel %vm1112_vm6, %v6506_v31, %v6507_v4  ;;  %v6512_v57 = vunpack.i.h.bf16 %v6510_v16  ;;  %6584 = vrot.lane.b32.xlu0 %v8512_v22, %s7361_s2 }
 0x226   :  { %v6511_v30 = vunpack.i.l.bf16 %v6510_v16  ;;  %v13630_v3 = vmax.f32 %v8537_v23, 0.0  ;;  %v13631_v18 = vmax.f32 %v8550_v39, 0.0  ;;  %v1311_v11 = vrot.slane %v1247_v14, 1 }
 0x227   :  { %13628 = vst [vmem:[#allocation36_spill] sm:$0xff] %v8656_v46  ;;  %v1250_v2 = vmax.f32 %v13629_v54, %v6507_v4  ;;  %v13632_v46 = vmax.f32 %v8170_v40, 0.0  ;;  %v6598_v28 = vpack.i.bf16 %v8661_v42, %v8659_v61  ;;  %v13633_v45 = vmax.f32 %v8570_v15, 0.0 }
 0x228   :  { %v6608_v44 = vpack.i.bf16 %v13631_v18, %v13630_v3  ;;  %v13634_v33 = vmax.f32 %v8601_v58, 0.0  ;;  %v13635_v4 = vmax.f32 %v8182_v48, 0.0  ;;  %v1134_v40 = vsel %vm1112_vm6, %v6511_v30, %v6512_v57 }
 0x229   :  { %v8672_v21 = vmax.f32 %v13632_v46, %v1133_v9  ;;  %v1314_v60 = vrot.slane %v1250_v2, 1  ;;  %v8690_v22 = vadd.f32 %v8059_v63, %v8086_v32  ;;  %v13637_v54 = vmax.f32 %v8178_v5, 0.0  ;;  %6599 = vrot.lane.b32.xlu0 %v6598_v28, %s7362_s14  ;;  %v6515_v63 = vpop.permute.xlu0 %6514 }
 0x22a   :  { %v8682_v0 = vpack.i.bf16 %v13634_v33, %v13633_v45  ;;  %v1252_v31 = vmax.f32 %v13635_v4, %v6512_v57  ;;  %vm8698_vm8 = vcmp.lt.s32.totalorder %v1515_v10, 28  ;;  %v8704_v30 = vadd.f32 %v8061_v20, %v8090_v38 }
 0x22b   :  { %13636 = vst [vmem:[#allocation37_spill] sm:$0xff] %v8690_v22  ;;  %v1313_v16 = vrot.slane %v8672_v21, 1  ;;  %v1251_v9 = vmax.f32 %v13637_v54, %v1134_v40  ;;  %v1360_v48 = vsel %vm93_vm0, %v1312_v37, %v1314_v60  ;;  %v1361_v57 = vsel %vm93_vm0, %v1309_v59, %v1311_v11  ;;  %v6520_v28 = vpop.permute.xlu1 %6519 }
 0x22c   :  { %v1316_v18 = vrot.slane %v1252_v31, 1  ;;  %13640 = vst [vmem:[#allocation38_spill] sm:$0xff] %v8704_v30  ;;  %v1440_v33 = vmax.f32 %v1248_v49, %v1360_v48  ;;  %v6517_v10 = vunpack.i.h.bf16 %v6515_v63  ;;  %v6516_v4 = vunpack.i.l.bf16 %v6515_v63 }
 0x22d   :  { %v1359_v5 = vsel %vm93_vm0, %v1311_v11, %v1313_v16  ;;  %v13281_v54 = vmax.f32 %v8690_v22, 0.0  ;;  %v1315_v20 = vrot.slane %v1251_v9, 1  ;;  %v13643_v58 = vmax.f32 %v8199_v55, 0.0  ;;  %6604 = vrot.lane.b32.xlu0 %v8533_v8, %s7361_s2 }
 0x22e   :  { %v1358_v37 = vsel %vm93_vm0, %v1314_v60, %v1316_v18  ;;  %v1439_v40 = vmax.f32 %v1247_v14, %v1359_v5  ;;  %v8718_v46 = vsel %vm8698_vm8, %v1440_v33, 0.0  ;;  %v1135_v49 = vsel %vm1112_vm6, %v6516_v4, %v6517_v10 }
 0x22f   :  { %v8714_v3 = vmax.f32 %v1250_v2, %v1358_v37  ;;  %13642 = vst [vmem:[#allocation40_spill] sm:$0xff] %v8718_v46  ;;  %v1254_v59 = vmax.f32 %v13643_v58, %v6517_v10  ;;  %v6522_v11 = vunpack.i.h.bf16 %v6520_v28  ;;  %v6521_v60 = vunpack.i.l.bf16 %v6520_v28 }
 0x230   :  { %v13644_v48 = vmax.f32 %v8641_v47, 0.0  ;;  %v13645_v14 = vmax.f32 %v8652_v1, 0.0  ;;  %v13646_v2 = vmax.f32 %v8196_v34, 0.0  ;;  %v8734_v33 = vmax.f32 %v8619_v36, %v1361_v57 }
 0x231   :  { %13641 = vst [vmem:[#allocation39_spill] sm:$0xff] %v8714_v3  ;;  %v8738_v55 = vsel %vm8698_vm8, %v1439_v40, 0.0  ;;  %v8742_v58 = vadd.f32 %v8063_v12, %v8086_v32  ;;  %v1318_v37 = vrot.slane %v1254_v59, 1  ;;  %v13648_v10 = vmax.f32 %v8208_v26, 0.0  ;;  %6609 = vrot.lane.b32.xlu0 %v6608_v44, %s7361_s2 }
 0x232   :  { %v6623_v63 = vpack.i.bf16 %v13645_v14, %v13644_v48  ;;  %v8729_v5 = vmax.f32 %v13646_v2, %v1135_v49  ;;  %v1136_v4 = vsel %vm1112_vm6, %v6521_v60, %v6522_v11  ;;  %v8749_v8 = vadd.f32 %v8065_v24, %v8090_v38 }
 0x233   :  { %13647 = vst [vmem:[#allocation41_spill] sm:$0xff] %v8742_v58  ;;  %v1256_v34 = vmax.f32 %v13648_v10, %v6522_v11  ;;  %v6613_v45 = vpack.i.bf16 %v8738_v55, %v8734_v33  ;;  %v1487_v57 = vadd.s32 184, %v7428_v7  ;;  %v8757_v12 = vadd.f32 %v8067_v27, %v8086_v32  ;;  %v6525_v27 = vpop.permute.xlu0 %6524  ;;  %v6530_v10 = vpop.permute.xlu1 %6529 }
 0x234   :  { %13649 = vst [vmem:[#allocation42_spill] sm:$0xff] %v8749_v8  ;;  %v1317_v36 = vrot.slane %v8729_v5, 1  ;;  %v1356_v26 = vsel %vm93_vm0, %v1316_v18, %v1318_v37  ;;  %v1357_v28 = vsel %vm93_vm0, %v1313_v16, %v1315_v20  ;;  %v13280_v24 = vmax.f32 %v8704_v30, 0.0 }
 0x235   :  { %13650 = vst [vmem:[#allocation43_spill] sm:$0xff] %v8757_v12  ;;  %v1320_v40 = vrot.slane %v1256_v34, 1  ;;  %v8764_v49 = vmax.f32 %v1252_v31, %v1356_v26  ;;  %v13652_v11 = vmax.f32 %v8204_v50, 0.0  ;;  %6614 = vrot.lane.b32.xlu1 %v6613_v45, %s7362_s14  ;;  %v6527_v14 = vunpack.i.h.bf16 %v6525_v27 }
 0x236   :  { %v1355_v48 = vsel %vm93_vm0, %v1315_v20, %v1317_v36  ;;  %v6526_v16 = vunpack.i.l.bf16 %v6525_v27  ;;  %v8778_v31 = vadd.f32 %v8069_v51, %v8090_v38  ;;  %v8783_v44 = vmax.f32 %v8672_v21, %v1357_v28  ;;  %v13658_v28 = vld [vmem:[#allocation6_spill] sm:$0xff] }
 0x237   :  { %13651 = vst [vmem:[#allocation44_spill] sm:$0xff] %v8764_v49  ;;  %v1255_v60 = vmax.f32 %v13652_v11, %v1136_v4  ;;  %v1354_v18 = vsel %vm93_vm0, %v1318_v37, %v1320_v40  ;;  %v8774_v2 = vmax.f32 %v1251_v9, %v1355_v48  ;;  %v1519_v4 = vand.u32 31, %v1487_v57 }
 0x238   :  { %13653 = vst [vmem:[#allocation45_spill] sm:$0xff] %v8778_v31  ;;  %v8780_v50 = vmax.f32 %v1254_v59, %v1354_v18  ;;  %v13655_v20 = vmax.f32 %v8225_v19, 0.0  ;;  %v1137_v37 = vsel %vm1112_vm6, %v6526_v16, %v6527_v14  ;;  %v6532_v26 = vunpack.i.h.bf16 %v6530_v10  ;;  %v13656_v59 = vld [vmem:[#allocation4_spill] sm:$0xff] }
 0x239   :  { %v6531_v11 = vunpack.i.l.bf16 %v6530_v10  ;;  %v6633_v51 = vpack.i.bf16 %v13280_v24, %v13281_v54  ;;  %v1319_v9 = vrot.slane %v1255_v60, 1  ;;  %v13657_v27 = vmax.f32 %v13656_v59, 0.0  ;;  %6619 = vrot.lane.b32.xlu1 %v8682_v0, %s7361_s2  ;;  %v13666_v10 = vld [vmem:[#allocation2_spill] sm:$0xff] }
 0x23a   :  { %13654 = vst [vmem:[#allocation46_spill] sm:$0xff] %v8780_v50  ;;  %v1258_v45 = vmax.f32 %v13655_v20, %v6527_v14  ;;  %v6628_v19 = vpack.i.bf16 %v8774_v2, %v8783_v44  ;;  %v13659_v18 = vmax.f32 %v13658_v28, 0.0  ;;  %vm8810_vm9 = vcmp.lt.s32.totalorder %v1519_v4, 28 }
 0x23b   :  { %v1257_v48 = vmax.f32 %v13657_v27, %v1137_v37  ;;  %v1138_v16 = vsel %vm1112_vm6, %v6531_v11, %v6532_v26  ;;  %v13660_v37 = vld [vmem:[#allocation5_spill] sm:$0xff]  ;;  %v6535_v11 = vpop.permute.xlu0 %6534  ;;  %v6540_v20 = vpop.permute.xlu1 %6539  ;;  %v8830_v30 = vadd.f32 %v13666_v10, %v8086_v32  ;;  %v13674_v10 = vmax.f32 %v8757_v12, 0.0 }
 0x23c   :  { %v1322_v57 = vrot.slane %v1258_v45, 1  ;;  %v1260_v14 = vmax.f32 %v13659_v18, %v6532_v26  ;;  %v13661_v27 = vmax.f32 %v13660_v37, 0.0  ;;  %6629 = vrot.lane.b32.xlu0 %v6628_v19, %s7362_s14  ;;  %v1353_v19 = vsel %vm93_vm0, %v1317_v36, %v1319_v9 }
 0x23d   :  { %v1321_v59 = vrot.slane %v1257_v48, 1  ;;  %6624 = vrot.lane.b32.xlu1 %v6623_v63, %s7361_s2  ;;  %13667 = vst [vmem:[#allocation5_spill] sm:$0xff] %v8830_v30  ;;  %vm4448_vm8 = vcmask 1043459  }
 0x23e   :  { %v1259_v24 = vmax.f32 %v13661_v27, %v1138_v16  ;;  %v1324_v54 = vrot.slane %v1260_v14, 1  ;;  %v1352_v21 = vsel %vm93_vm0, %v1320_v40, %v1322_v57  ;;  %v6537_v27 = vunpack.i.h.bf16 %v6535_v11 }
 0x23f   :  { %v1351_v18 = vsel %vm93_vm0, %v1319_v9, %v1321_v59  ;;  %v1448_v16 = vmax.f32 %v1256_v34, %v1352_v21  ;;  %v6536_v40 = vunpack.i.l.bf16 %v6535_v11  ;;  %v13668_v34 = vld [vmem:[#allocation8_spill] sm:$0xff]  ;;  %v13672_v11 = vld [vmem:[#allocation7_spill] sm:$0xff] }
 0x240   :  { %v1323_v26 = vrot.slane %v1259_v24, 1  ;;  %v1350_v37 = vsel %vm93_vm0, %v1322_v57, %v1324_v54  ;;  %v1447_v4 = vmax.f32 %v1255_v60, %v1351_v18  ;;  %6634 = vrot.lane.b32.xlu0 %v6633_v51, %s7361_s2  ;;  %v13669_v36 = vmax.f32 %v13668_v34, 0.0 }
 0x241   :  { %v8821_v0 = vmax.f32 %v1258_v45, %v1350_v37  ;;  %v8826_v63 = vsel %vm8810_vm9, %v1448_v16, 0.0  ;;  %v1139_v21 = vsel %vm1112_vm6, %v6536_v40, %v6537_v27  ;;  %v6542_v57 = vunpack.i.h.bf16 %v6540_v20 }
 0x242   :  { %13665 = vst [vmem:[#allocation6_spill] sm:$0xff] %v8826_v63  ;;  %v1262_v9 = vmax.f32 %v13669_v36, %v6537_v27  ;;  %v13670_v60 = vmax.f32 %v8742_v58, 0.0  ;;  %v13671_v45 = vmax.f32 %v8749_v8, 0.0  ;;  %v13673_v18 = vmax.f32 %v13672_v11, 0.0  ;;  %v13676_v36 = vld [vmem:[#allocation10_spill] sm:$0xff] }
 0x243   :  { %13664 = vst [vmem:[#allocation4_spill] sm:$0xff] %v8821_v0  ;;  %v8844_v16 = vmax.f32 %v8729_v5, %v1353_v19  ;;  %v8848_v32 = vsel %vm8810_vm9, %v1447_v4, 0.0  ;;  %v13675_v27 = vmax.f32 %v8778_v31, 0.0  ;;  %v13677_v58 = vmax.f32 %v13676_v36, 0.0  ;;  %v13678_v5 = vld [vmem:[#allocation3_spill] sm:$0xff] }
 0x244   :  { %v6638_v51 = vpack.i.bf16 %v13671_v45, %v13670_v60  ;;  %v8841_v37 = vmax.f32 %v13673_v18, %v1139_v21  ;;  %v1326_v34 = vrot.slane %v1262_v9, 1  ;;  %v1349_v21 = vsel %vm93_vm0, %v1321_v59, %v1323_v26 }
 0x245   :  { %v6648_v40 = vpack.i.bf16 %v13675_v27, %v13674_v10  ;;  %v8856_v60 = vmax.f32 %v13677_v58, %v6542_v57  ;;  %v8862_v19 = vadd.f32 %v13678_v5, %v8090_v38  ;;  %v6541_v4 = vunpack.i.l.bf16 %v6540_v20  ;;  %v6545_v38 = vpop.permute.xlu0 %6544 }
 0x246   :  { %v13284_v28 = vrot.slane %v8841_v37, 1  ;;  %6639 = vrot.lane.b32.xlu0 %v6638_v51, %s7361_s2  ;;  %v6643_v45 = vpack.i.bf16 %v8848_v32, %v8844_v16  ;;  %v1348_v18 = vsel %vm93_vm0, %v1324_v54, %v1326_v34  ;;  %v8880_v51 = vmax.f32 %v1257_v48, %v1349_v21 }
 0x247   :  { %13679 = vst [vmem:[#allocation2_spill] sm:$0xff] %v8862_v19  ;;  %v1328_v59 = vrot.slane %v8856_v60, 1  ;;  %v8873_v10 = vmax.f32 %v1260_v14, %v1348_v18  ;;  %v1664_v27 = vrot.slane %v8783_v44, 6  ;;  %v6547_v54 = vunpack.i.h.bf16 %v6545_v38  ;;  %v8902_v14 = vpop.permute.xlu1 %6549 }
 0x248   :  { %6644 = vrot.lane.b32.xlu1 %v6643_v45, %s7362_s14  ;;  %v1347_v20 = vsel %vm93_vm0, %v1323_v26, %v13284_v28  ;;  %v6546_v5 = vunpack.i.l.bf16 %v6545_v38  ;;  %v1140_v45 = vsel %vm1112_vm6, %v6541_v4, %v6542_v57  ;;  %v1491_v58 = vadd.s32 216, %v7428_v7  ;;  %v13682_v26 = vld [vmem:[#allocation13_spill] sm:$0xff] }
 0x249   :  { %13680 = vst [vmem:[#allocation8_spill] sm:$0xff] %v8873_v10  ;;  %v1346_v36 = vsel %vm93_vm0, %v1326_v34, %v1328_v59  ;;  %v8885_v11 = vmax.f32 %v1259_v24, %v1347_v20  ;;  %v13290_v48 = vrot.slane %v8826_v63, 6  ;;  %v13683_v21 = vmax.f32 %v13682_v26, 0.0  ;;  %v13684_v24 = vld [vmem:[#allocation12_spill] sm:$0xff]  ;;  %v13686_v57 = vld [vmem:[#allocation9_spill] sm:$0xff] }
 0x24a   :  { %v8889_v18 = vmax.f32 %v1262_v9, %v1346_v36  ;;  %v1141_v31 = vsel %vm1112_vm6, %v6546_v5, %v6547_v54  ;;  %v13685_v38 = vmax.f32 %v13684_v24, 0.0  ;;  %v13286_v9 = vrot.slane %v8774_v2, 6 }
 0x24b   :  { %v1266_v28 = vmax.f32 %v13683_v21, %v6547_v54  ;;  %v6653_v34 = vpack.i.bf16 %v8885_v11, %v8880_v51  ;;  %v13687_v4 = vmax.f32 %v13686_v57, 0.0  ;;  %v13688_v54 = vrot.slane %v8738_v55, 6 }
 0x24c   :  { %13681 = vst [vmem:[#allocation7_spill] sm:$0xff] %v8889_v18  ;;  %v8900_v20 = vmax.f32 %v13685_v38, %v1141_v31  ;;  %6649 = vrot.lane.b32.xlu1 %v6648_v40, %s7361_s2  ;;  %v13690_v40 = vmax.f32 %v8830_v30, 0.0  ;;  %v13691_v21 = vmax.f32 %v8862_v19, 0.0  ;;  %v1523_v57 = vand.u32 31, %v1491_v58 }
 0x24d   :  { %v1263_v36 = vmax.f32 %v13687_v4, %v1140_v45  ;;  %v1330_v26 = vrot.slane %v1266_v28, 1  ;;  %6654 = vrot.lane.b32.xlu0 %v6653_v34, %s7362_s14  ;;  %v8914_v31 = vsel %vm1688_vm10, %v13688_v54, %v1664_v27  ;;  %v8926_v45 = vsel %vm1688_vm10, %v1664_v27, %v13286_v9  ;;  %v6555_v4 = vpop.permute.xlu0 %6554  ;;  %v8943_v34 = vpop.permute.xlu1 %6559 }
 0x24e   :  { %13689 = vst [vmem:[#allocation10_spill] sm:$0xff] %v8914_v31  ;;  %v6658_v24 = vpack.i.bf16 %v13691_v21, %v13690_v40  ;;  %13692 = vst [vmem:[#allocation3_spill] sm:$0xff] %v8926_v45  ;;  %v13693_v40 = vrot.slane %v8780_v50, 6  ;;  %v6552_v27 = vunpack.i.h.bf16 %v8902_v14  ;;  %v6557_v21 = vunpack.i.h.bf16 %v6555_v4 }
 0x24f   :  { %v1344_v54 = vsel %vm93_vm0, %v1328_v59, %v1330_v26  ;;  %v6556_v9 = vunpack.i.l.bf16 %v6555_v4  ;;  %v13295_v59 = vrot.slane %v8844_v16, 6  ;;  %v1327_v38 = vrot.slane %v1263_v36, 1 }
 0x250   :  { %v8939_v58 = vsel %vm1688_vm10, %v13693_v40, %v13290_v48  ;;  %6659 = vrot.lane.b32.xlu1 %v6658_v24, %s7361_s2  ;;  %v6561_v5 = vunpack.i.l.bf16 %v8943_v34  ;;  %v13695_v19 = vmax.f32 %v8292_v62, 0.0  ;;  %v1456_v40 = vmax.f32 %v8856_v60, %v1344_v54  ;;  %v13698_v62 = vld [vmem:[#allocation14_spill] sm:$0xff] }
 0x251   :  { %13694 = vst [vmem:[#allocation13_spill] sm:$0xff] %v8939_v58  ;;  %v1142_v30 = vsel %vm1112_vm6, %v6552_v27, %v6556_v9  ;;  %v13696_v48 = vrot.slane %v8848_v32, 6  ;;  %v6565_v58 = vpop.permute.xlu0 %6564  ;;  %v13697_v8 = vrot.slane %v8900_v20, 1  ;;  %v13700_v54 = vmax.f32 %v8321_v29, 0.0  ;;  %v6570_v45 = vpop.permute.xlu1 %6569 }
 0x252   :  { %v1268_v12 = vmax.f32 %v13695_v19, %v6556_v9  ;;  %v1143_v4 = vsel %vm1112_vm6, %v6557_v21, %v6561_v5  ;;  %v13699_v19 = vmax.f32 %v13698_v62, 0.0  ;;  %vm8968_vm11 = vcmp.lt.s32.totalorder %v1523_v57, 28 }
 0x253   :  { %v8957_v24 = vsel %vm1688_vm10, %v13295_v59, %v13696_v48  ;;  %v1343_v27 = vsel %vm93_vm0, %v1327_v38, %v13697_v8  ;;  %v1270_v31 = vmax.f32 %v13700_v54, %v6561_v5  ;;  %v13703_v48 = vld [vmem:[#allocation16_spill] sm:$0xff]  ;;  %v6567_v47 = vunpack.i.h.bf16 %v6565_v58 }
 0x254   :  { %v1267_v9 = vmax.f32 %v13699_v19, %v1142_v30  ;;  %v1332_v60 = vrot.slane %v1268_v12, 1  ;;  %v13704_v21 = vmax.f32 %v13703_v48, 0.0  ;;  %v6566_v1 = vunpack.i.l.bf16 %v6565_v58 }
 0x255   :  { %v6572_v15 = vunpack.i.h.bf16 %v6570_v45  ;;  %v1334_v62 = vrot.slane %v1270_v31, 1  ;;  %v1455_v30 = vmax.f32 %v1263_v36, %v1343_v27  ;;  %v1495_v19 = vadd.s32 248, %v7428_v7 }
 0x256   :  { %v1269_v59 = vmax.f32 %v13704_v21, %v1143_v4  ;;  %v1342_v8 = vsel %vm93_vm0, %v1330_v26, %v1332_v60  ;;  %v13706_v5 = vmax.f32 %v8313_v43, 0.0  ;;  %v1113_v54 = vsel %vm1112_vm6, %v6566_v1, %v6567_v47 }
 0x257   :  { %v8977_v29 = vmax.f32 %v1266_v28, %v1342_v8  ;;  %v13707_v4 = vmax.f32 %v8335_v25, 0.0  ;;  %v1331_v58 = vrot.slane %v1267_v9, 1  ;;  %v1340_v21 = vsel %vm93_vm0, %v1332_v60, %v1334_v62 }
 0x258   :  { %v8981_v57 = vmax.f32 %v13706_v5, %v6567_v47  ;;  %v6571_v26 = vunpack.i.l.bf16 %v6570_v45  ;;  %v13708_v36 = vrot.slane %v8841_v37, 1  ;;  %v1333_v27 = vrot.slane %v1269_v59, 1 }
 0x259   :  { %13705 = vst [vmem:[#allocation12_spill] sm:$0xff] %v8977_v29  ;;  %v1272_v48 = vmax.f32 %v13707_v4, %v6572_v15  ;;  %v8992_v8 = vmax.f32 %v1268_v12, %v1340_v21  ;;  %v13710_v1 = vmax.f32 %v8300_v56, 0.0  ;;  %v9000_v60 = vsel %vm8968_vm11, %v1455_v30, 0.0 }
 0x25a   :  { %v1345_v28 = vsel %vm93_vm0, %v13708_v36, %v1327_v38  ;;  %v13300_v43 = vrot.slane %v8981_v57, 1  ;;  %v1144_v47 = vsel %vm1112_vm6, %v6571_v26, %v6572_v15  ;;  %v9004_v45 = vsel %vm8968_vm11, %v1456_v40, 0.0  ;;  %v6575_v38 = vpop.permute.xlu1 %6574 }
 0x25b   :  { %13709 = vst [vmem:[#allocation9_spill] sm:$0xff] %v8992_v8  ;;  %v1336_v5 = vrot.slane %v1272_v48, 1  ;;  %v1209_v25 = vmax.f32 %v13710_v1, %v1113_v54  ;;  %13711 = vst [vmem:[#allocation14_spill] sm:$0xff] %v9004_v45  ;;  %v13712_v12 = vmax.f32 %v8326_v52, 0.0  ;;  %v9015_v15 = vmax.f32 %v8841_v37, %v1345_v28 }
 0x25c   :  { %v6577_v52 = vunpack.i.h.bf16 %v6575_v38  ;;  %v1527_v26 = vand.u32 31, %v1495_v19  ;;  %v6576_v1 = vunpack.i.l.bf16 %v6575_v38  ;;  %vm4451_vm9 = vcmask 1044484  }
 0x25d   :  { %v1271_v4 = vmax.f32 %v13712_v12, %v1144_v47  ;;  %v1338_v21 = vsel %vm93_vm0, %v1334_v62, %v1336_v5  ;;  %v1400_v56 = vsel %vm93_vm0, %v1336_v5, %v13300_v43  ;;  %v6663_v54 = vpack.i.bf16 %v9000_v60, %v9015_v15  ;;  %v7195_v12 = vld [vmem:[%s13198_s3 + $0x104] ss:$8 sps:$4 sm:$0xff]  }
 0x25e   :  { %v9017_v30 = vmax.f32 %v1270_v31, %v1338_v21  ;;  %v1464_v22 = vmax.f32 %v1272_v48, %v1400_v56  ;;  %v1273_v36 = vrot.slane %v1209_v25, 1  ;;  %v1339_v62 = vsel %vm93_vm0, %v1331_v58, %v1333_v27  ;;  %3430 = vmatprep.subr.bf16.mxu1 %v7195_v12 }
 0x25f   :  { %v1335_v40 = vrot.slane %v1271_v4, 1  ;;  %6664 = vrot.lane.b32.xlu0 %v6663_v54, %s7362_s14  ;;  %v13714_v5 = vrot.slane %v8900_v20, 1  ;;  %v9028_v31 = vmax.f32 %v1267_v9, %v1339_v62  ;;  %v1114_v48 = vsel %vm1112_vm6, %v6576_v1, %v6577_v52 }
 0x260   :  { %13713 = vst [vmem:[#allocation16_spill] sm:$0xff] %v9017_v30  ;;  %v13715_v47 = vmax.f32 %v8330_v6, 0.0  ;;  %vm1559_vm12 = vcmp.lt.s32.totalorder %v1527_v26, 28  ;;  %v13718_v26 = vld [vmem:[#allocation17_spill] sm:$0xff]  ;;  %v13722_v12 = vrot.slane %v8826_v63, 6  ;;  %vm4457_vm11 = vcmask 1046534  }
 0x261   :  { %v1341_v37 = vsel %vm93_vm0, %v13714_v5, %v1331_v58  ;;  %v1337_v19 = vsel %vm93_vm0, %v1333_v27, %v1335_v40  ;;  %v1399_v58 = vsel %vm93_vm0, %v1335_v40, %v1273_v36  ;;  %v9051_v21 = vsel %vm1559_vm12, %v1464_v22, 0.0 }
 0x262   :  { %v9032_v28 = vmax.f32 %v8900_v20, %v1341_v37  ;;  %v9038_v38 = vmax.f32 %v13715_v47, %v1114_v48  ;;  %v9047_v20 = vmax.f32 %v1269_v59, %v1337_v19  ;;  %v1463_v6 = vmax.f32 %v1271_v4, %v1399_v58  ;;  %13716 = vst [vmem:[#allocation47_spill] sm:$0xff] %v9051_v21 }
 0x263   :  { %v13719_v1 = vmax.f32 %v13718_v26, 0.0  ;;  %v13720_v4 = vrot.slane %v8844_v16, 6  ;;  %v13721_v22 = vrot.slane %v8774_v2, 6  ;;  %v1673_v37 = vrot.slane %v8821_v0, 6 }
 0x264   :  { %v6668_v9 = vpack.i.bf16 %v9028_v31, %v9032_v28  ;;  %v13299_v27 = vrot.slane %v9038_v38, 1  ;;  %v9053_v56 = vsel %vm1559_vm12, %v1463_v6, 0.0  ;;  %v1678_v48 = vrot.slane %v9000_v60, 6 }
 0x265   :  { %v6673_v54 = vpack.i.bf16 %v9053_v56, %v9047_v20  ;;  %v9066_v62 = vmax.f32 %v13719_v1, %v6577_v52  ;;  %v9074_v5 = vsel %vm1688_vm10, %v13721_v22, %v13720_v4  ;;  %v1679_v52 = vrot.slane %v9004_v45, 6 }
 0x266   :  { %6669 = vrot.lane.b32.xlu1 %v6668_v9, %s7362_s14  ;;  %v1397_v40 = vsel %vm93_vm0, %v1273_v36, %v13299_v27  ;;  %v6562_v19 = vunpack.i.h.bf16 %v8943_v34  ;;  %v1675_v47 = vrot.slane %v8873_v10, 6  ;;  %v9088_v9 = vsel %vm1688_vm10, %v13722_v12, %v1673_v37 }
 0x267   :  { %6674 = vrot.lane.b32.xlu0 %v6673_v54, %s7362_s14  ;;  %v9062_v59 = vmax.f32 %v1209_v25, %v1397_v40  ;;  %v1672_v58 = vrot.slane %v8880_v51, 6  ;;  %v1674_v54 = vrot.slane %v8885_v11, 6  ;;  %v1677_v40 = vrot.slane %v8889_v18, 6 }
 0x268   :  { %v1676_v26 = vrot.slane %v9015_v15, 6  ;;  %v9097_v34 = vsel %vm1688_vm10, %v1673_v37, %v1675_v47  ;;  %v13723_v1 = vrot.slane %v8848_v32, 6  ;;  %v1681_v22 = vrot.slane %v8977_v29, 6 }
 0x269   :  { %13717 = vst [vmem:[#allocation48_spill] sm:$0xff] %v9062_v59  ;;  %v1683_v12 = vrot.slane %v8992_v8, 6  ;;  %v9109_v36 = vsel %vm1688_vm10, %v1672_v58, %v1674_v54  ;;  %v9113_v27 = vsel %vm1688_vm10, %v1677_v40, %v1679_v52  ;;  %v9117_v37 = vsel %vm1688_vm10, %v1675_v47, %v1677_v40 }
 0x26a   :  { %v9103_v4 = vsel %vm1688_vm10, %v13723_v1, %v1672_v58  ;;  %13724 = vst [vmem:[#allocation17_spill] sm:$0xff] %v9113_v27  ;;  %13725 = vst [vmem:[#allocation49_spill] sm:$0xff] %v9117_v37  ;;  %v9121_v1 = vsel %vm1688_vm10, %v1676_v26, %v1678_v48  ;;  %v9128_v58 = vsel %vm1688_vm10, %v1674_v54, %v1676_v26  ;;  %v1680_v43 = vrot.slane %v9032_v28, 6 }
 0x26b   :  { %13726 = vst [vmem:[#allocation50_spill] sm:$0xff] %v9121_v1  ;;  %13727 = vst [vmem:[#allocation51_spill] sm:$0xff] %v9128_v58  ;;  %v9132_v25 = vsel %vm1688_vm10, %v1681_v22, %v1683_v12  ;;  %v9138_v40 = vsel %vm1688_vm10, %v1679_v52, %v1681_v22  ;;  %v1682_v27 = vrot.slane %v9028_v31, 6  ;;  %v1685_v6 = vrot.slane %v9017_v30, 6 }
 0x26c   :  { %13728 = vst [vmem:[#allocation52_spill] sm:$0xff] %v9132_v25  ;;  %13729 = vst [vmem:[#allocation53_spill] sm:$0xff] %v9138_v40  ;;  %v13730_v54 = vunpack.i.l.bf16 %v8902_v14  ;;  %v9153_v52 = vsel %vm1688_vm10, %v1678_v48, %v1680_v43  ;;  %v1791_v22 = vrot.slane %v8738_v55, 2  ;;  %v13733_v40 = vrot.slane %v9051_v21, 6 }
 0x26d   :  { %v9149_v25 = vsel %vm1688_vm10, %v1680_v43, %v1682_v27  ;;  %13732 = vst [vmem:[#allocation55_spill] sm:$0xff] %v9153_v52  ;;  %v13736_v37 = vrot.slane %v9066_v62, 1  ;;  %v13737_v43 = vrot.slane %v8981_v57, 1  ;;  %v1684_v58 = vrot.slane %v9047_v20, 6  ;;  %v13738_v52 = vld [vmem:[#allocation15_spill] sm:$0xff] }
 0x26e   :  { %v1126_v26 = vsel %vm1112_vm6, %v6562_v19, %v13730_v54  ;;  %13731 = vst [vmem:[#allocation54_spill] sm:$0xff] %v9149_v25  ;;  %v9162_v19 = vsel %vm1688_vm10, %v1685_v6, %v13733_v40  ;;  %v9166_v54 = vsel %vm1688_vm10, %v1683_v12, %v1685_v6  ;;  %v1799_v47 = vrot.slane %v8848_v32, 2 }
 0x26f   :  { %13734 = vst [vmem:[#allocation56_spill] sm:$0xff] %v9162_v19  ;;  %13735 = vst [vmem:[#allocation57_spill] sm:$0xff] %v9166_v54  ;;  %v1398_v48 = vsel %vm93_vm0, %v13737_v43, %v13736_v37  ;;  %v13739_v25 = vmax.f32 %v13738_v52, 0.0  ;;  %v13305_v40 = vrot.slane %v8734_v33, 2  ;;  %v1807_v6 = vrot.slane %v9000_v60, 2 }
 0x270   :  { %v13740_v12 = vrot.slane %v9053_v56, 6  ;;  %v9190_v37 = vsel %vm1688_vm10, %v1682_v27, %v1684_v58  ;;  %v1793_v32 = vrot.slane %v8783_v44, 2  ;;  %v1815_v52 = vrot.slane %v9053_v56, 2 }
 0x271   :  { %v9178_v1 = vmax.f32 %v13739_v25, %v1126_v26  ;;  %13742 = vst [vmem:[#allocation58_spill] sm:$0xff] %v9190_v37  ;;  %v9195_v25 = vmax.f32 %v8981_v57, %v1398_v48  ;;  %v9203_v26 = vsel %vm158_vm1, %v13305_v40, %v1791_v22  ;;  %v13306_v43 = vrot.slane %v9062_v59, 2  ;;  %v9232_v48 = vpop.permute.xlu1 %6589 }
 0x272   :  { %v9186_v19 = vsel %vm1688_vm10, %v1684_v58, %v13740_v12  ;;  %13743 = vst [vmem:[#allocation59_spill] sm:$0xff] %v9203_v26  ;;  %v9208_v27 = vsel %vm158_vm1, %v1791_v22, %v1793_v32  ;;  %v1795_v44 = vrot.slane %v8774_v2, 2  ;;  %v1797_v57 = vrot.slane %v8844_v16, 2 }
 0x273   :  { %13741 = vst [vmem:[#allocation15_spill] sm:$0xff] %v9186_v19  ;;  %13744 = vst [vmem:[#allocation60_spill] sm:$0xff] %v9208_v27  ;;  %v1801_v12 = vrot.slane %v8880_v51, 2  ;;  %v1803_v22 = vrot.slane %v8885_v11, 2  ;;  %v1805_v58 = vrot.slane %v9015_v15, 2  ;;  %v13317_v51 = vrot.slane %v8780_v50, 2 }
 0x274   :  { %v9221_v40 = vsel %vm158_vm1, %v1795_v44, %v1797_v57  ;;  %v9225_v2 = vsel %vm158_vm1, %v1793_v32, %v1795_v44  ;;  %v9229_v16 = vsel %vm158_vm1, %v1797_v57, %v1799_v47  ;;  %v1809_v57 = vrot.slane %v9032_v28, 2 }
 0x275   :  { %13745 = vst [vmem:[#allocation61_spill] sm:$0xff] %v9221_v40  ;;  %13746 = vst [vmem:[#allocation62_spill] sm:$0xff] %v9225_v2  ;;  %v9238_v60 = vsel %vm158_vm1, %v1799_v47, %v1801_v12  ;;  %v9247_v11 = vsel %vm158_vm1, %v1801_v12, %v1803_v22  ;;  %v9254_v47 = vsel %vm158_vm1, %v1803_v22, %v1805_v58  ;;  %v1811_v32 = vrot.slane %v9028_v31, 2 }
 0x276   :  { %13747 = vst [vmem:[#allocation63_spill] sm:$0xff] %v9229_v16  ;;  %13748 = vst [vmem:[#allocation64_spill] sm:$0xff] %v9238_v60  ;;  %v9258_v15 = vsel %vm158_vm1, %v1805_v58, %v1807_v6  ;;  %v1813_v44 = vrot.slane %v9047_v20, 2  ;;  %v9266_v28 = vsel %vm158_vm1, %v1807_v6, %v1809_v57  ;;  %v9274_v58 = vsel %vm158_vm1, %v1815_v52, %v13306_v43  ;;  %v6595_v43 = vpop.permute.xlu1 %6594 }
 0x277   :  { %13749 = vst [vmem:[#allocation65_spill] sm:$0xff] %v9247_v11  ;;  %13750 = vst [vmem:[#allocation66_spill] sm:$0xff] %v9254_v47  ;;  %v9284_v6 = vsel %vm158_vm1, %v1809_v57, %v1811_v32  ;;  %v1800_v31 = vrot.slane %v8826_v63, 2  ;;  %v13758_v11 = vld [vmem:[#allocation11_spill] sm:$0xff]  ;;  %v6592_v12 = vunpack.i.h.bf16 %v9232_v48  ;;  %v1814_v47 = vrot.slane %v9017_v30, 2 }
 0x278   :  { %13751 = vst [vmem:[#allocation67_spill] sm:$0xff] %v9258_v15  ;;  %13752 = vst [vmem:[#allocation68_spill] sm:$0xff] %v9266_v28  ;;  %v9280_v20 = vsel %vm158_vm1, %v1811_v32, %v1813_v44  ;;  %v9288_v22 = vsel %vm158_vm1, %v1813_v44, %v1815_v52  ;;  %v1802_v15 = vrot.slane %v8821_v0, 2  ;;  %v13757_v28 = vunpack.i.l.bf16 %v8902_v14 }
 0x279   :  { %13753 = vst [vmem:[#allocation69_spill] sm:$0xff] %v9274_v58  ;;  %13754 = vst [vmem:[#allocation70_spill] sm:$0xff] %v9280_v20  ;;  %v13759_v32 = vmax.f32 %v13758_v11, 0.0  ;;  %v6597_v58 = vunpack.i.h.bf16 %v6595_v43  ;;  %v6596_v20 = vunpack.i.l.bf16 %v6595_v43  ;;  %v1816_v14 = vrot.slane %v9051_v21, 2 }
 0x27a   :  { %13755 = vst [vmem:[#allocation71_spill] sm:$0xff] %v9284_v6  ;;  %13756 = vst [vmem:[#allocation72_spill] sm:$0xff] %v9288_v22  ;;  %v1808_v6 = vrot.slane %v9004_v45, 2  ;;  %v6591_v22 = vunpack.i.l.bf16 %v9232_v48  ;;  %v9311_v11 = vsel %vm158_vm1, %v1800_v31, %v1802_v15  ;;  %v1804_v48 = vrot.slane %v8873_v10, 2 }
 0x27b   :  { %v9300_v57 = vmax.f32 %v13759_v32, %v13757_v28  ;;  %13760 = vst [vmem:[#allocation11_spill] sm:$0xff] %v9311_v11  ;;  %v9317_v28 = vsel %vm158_vm1, %v13317_v51, %v1800_v31  ;;  %v1806_v43 = vrot.slane %v8889_v18, 2  ;;  %v1810_v44 = vrot.slane %v8977_v29, 2 }
 0x27c   :  { %13761 = vst [vmem:[#allocation73_spill] sm:$0xff] %v9317_v28  ;;  %v1812_v45 = vrot.slane %v8992_v8, 2  ;;  %v13762_v0 = vrot.slane %v9195_v25, 2  ;;  %v9339_v52 = vsel %vm158_vm1, %v1802_v15, %v1804_v48  ;;  %v13323_v28 = vrot.slane %v9195_v25, 6 }
 0x27d   :  { %v9335_v51 = vsel %vm158_vm1, %v1804_v48, %v1806_v43  ;;  %13765 = vst [vmem:[#allocation76_spill] sm:$0xff] %v9339_v52  ;;  %v9343_v32 = vsel %vm158_vm1, %v1806_v43, %v1808_v6  ;;  %v9366_v11 = vsel %vm158_vm1, %v1814_v47, %v1816_v14  ;;  %v13773_v43 = vrot.slane %v9062_v59, 6  ;;  %v13778_v48 = vld [vmem:[#allocation21_spill] sm:$0xff] }
 0x27e   :  { %v9331_v31 = vsel %vm158_vm1, %v1816_v14, %v13762_v0  ;;  %13764 = vst [vmem:[#allocation75_spill] sm:$0xff] %v9335_v51  ;;  %13766 = vst [vmem:[#allocation77_spill] sm:$0xff] %v9343_v32  ;;  %v9350_v0 = vsel %vm158_vm1, %v1808_v6, %v1810_v44  ;;  %v9354_v30 = vsel %vm158_vm1, %v1812_v45, %v1814_v47  ;;  %v13771_v6 = vrot.slane %v9051_v21, 6  ;;  %v13792_v21 = vld [vmem:[#allocation30_spill] sm:$0xff] }
 0x27f   :  { %13763 = vst [vmem:[#allocation74_spill] sm:$0xff] %v9331_v31  ;;  %13767 = vst [vmem:[#allocation78_spill] sm:$0xff] %v9350_v0  ;;  %v9358_v15 = vsel %vm158_vm1, %v1810_v44, %v1812_v45  ;;  %v1117_v44 = vsel %vm1112_vm6, %v6596_v20, %v6597_v58  ;;  %v13774_v47 = vrot.slane %v9053_v56, 6  ;;  %v1116_v45 = vsel %vm1112_vm6, %v6591_v22, %v6592_v12  ;;  %v13780_v56 = vld [vmem:[#allocation20_spill] sm:$0xff] }
 0x280   :  { %13768 = vst [vmem:[#allocation79_spill] sm:$0xff] %v9354_v30  ;;  %13769 = vst [vmem:[#allocation80_spill] sm:$0xff] %v9358_v15  ;;  %v9374_v52 = vsel %vm1688_vm10, %v13771_v6, %v13323_v28  ;;  %v1467_v15 = vadd.s32 24, %v7428_v7  ;;  %v13776_v6 = vrot.slane %v8541_v53, 1  ;;  %v13777_v28 = vrot.slane %v9178_v1, 1 }
 0x281   :  { %13770 = vst [vmem:[#allocation81_spill] sm:$0xff] %v9366_v11  ;;  %13772 = vst [vmem:[#allocation82_spill] sm:$0xff] %v9374_v52  ;;  %v9386_v14 = vsel %vm1688_vm10, %v13774_v47, %v13773_v43  ;;  %v13779_v52 = vmax.f32 %v13778_v48, 0.0  ;;  %v13781_v31 = vmax.f32 %v13780_v56, 0.0  ;;  %v13782_v43 = vld [vmem:[#allocation26_spill] sm:$0xff]  ;;  %v13784_v32 = vrot.slane %v9300_v57, 1 }
 0x282   :  { %13775 = vst [vmem:[#allocation83_spill] sm:$0xff] %v9386_v14  ;;  %v1371_v20 = vsel %vm93_vm0, %v13777_v28, %v13776_v6  ;;  %v13783_v47 = vrot.slane %v13782_v43, 1  ;;  %v13785_v28 = vld [vmem:[#allocation19_spill] sm:$0xff]  ;;  %v1658_v56 = vrot.slane %v8661_v42, 6  ;;  %v1652_v29 = vrot.slane %v13792_v21, 6 }
 0x283   :  { %v9398_v11 = vmax.f32 %v13779_v52, %v6597_v58  ;;  %v9402_v30 = vmax.f32 %v13781_v31, %v1117_v44  ;;  %v9411_v0 = vmax.f32 %v9178_v1, %v1371_v20  ;;  %v13786_v22 = vmax.f32 %v13785_v28, 0.0  ;;  %v13787_v58 = vld [vmem:[#allocation18_spill] sm:$0xff] }
 0x284   :  { %v1372_v53 = vsel %vm93_vm0, %v13784_v32, %v13783_v47  ;;  %v13788_v52 = vmax.f32 %v13787_v58, 0.0  ;;  %v1499_v31 = vand.u32 31, %v1467_v15  ;;  %v1655_v44 = vrot.slane %v8608_v41, 6  ;;  %v13789_v47 = vld [vmem:[#allocation28_spill] sm:$0xff]  ;;  %v7213_v14 = vld [vmem:[%s13198_s3 + $0x164] ss:$8 sps:$4 sm:$0xff]  }
 0x285   :  { %v9415_v6 = vmax.f32 %v13786_v22, %v6592_v12  ;;  %v9424_v43 = vmax.f32 %v9300_v57, %v1372_v53  ;;  %v1653_v28 = vrot.slane %v13789_v47, 6  ;;  %v1654_v12 = vrot.slane %v8623_v13, 6 }
 0x286   :  { %v9419_v48 = vmax.f32 %v13788_v52, %v1116_v45  ;;  %v1657_v22 = vrot.slane %v8615_v17, 6  ;;  %v1659_v45 = vrot.slane %v8643_v35, 6  ;;  %v1656_v15 = vrot.slane %v8659_v61, 6 }
 0x287   :  { %vm9436_vm13 = vcmp.lt.s32.totalorder %v1499_v31, 28  ;;  %v1722_v51 = vsel %vm1688_vm10, %v1653_v28, %v1655_v44  ;;  %v13793_v53 = vrot.slane %v9402_v30, 1  ;;  %v13794_v20 = vrot.slane %v9398_v11, 1 }
 0x288   :  { %v13338_v52 = vrot.slane %v9419_v48, 1  ;;  %v9446_v8 = vsel %vm1688_vm10, %v1656_v15, %v1658_v56  ;;  %v13795_v18 = vrot.slane %v9415_v6, 1  ;;  %v1721_v16 = vsel %vm1688_vm10, %v1652_v29, %v1654_v12 }
 0x289   :  { %v1718_v58 = vsel %vm1688_vm10, %v1657_v22, %v1659_v45  ;;  %v1720_v60 = vsel %vm1688_vm10, %v1655_v44, %v1657_v22  ;;  %v9469_v63 = vsel %vm1688_vm10, %v1654_v12, %v1656_v15  ;;  %v13797_v2 = vrot.slane %v9411_v0, 6 }
 0x28a   :  { %v1391_v31 = vsel %vm93_vm0, %v13338_v52, %v13793_v53  ;;  %v1392_v10 = vsel %vm93_vm0, %v13795_v18, %v13794_v20  ;;  %v1663_v53 = vrot.slane %v8718_v46, 6  ;;  %v1660_v40 = vrot.slane %v8734_v33, 6  ;;  %v13799_v46 = vld [vmem:[#allocation36_spill] sm:$0xff] }
 0x28b   :  { %v1723_v18 = vsel %vm1688_vm10, %v13797_v2, %v1652_v29  ;;  %v1407_v12 = vmax.f32 %v9419_v48, %v1391_v31  ;;  %v1408_v15 = vmax.f32 %v9415_v6, %v1392_v10  ;;  %v13798_v26 = vrot.slane %v9424_v43, 6 }
 0x28c   :  { %v1661_v29 = vrot.slane %v13799_v46, 6  ;;  %v1665_v2 = vrot.slane %v8714_v3, 6  ;;  %v1667_v20 = vrot.slane %v8764_v49, 6  ;;  %v13801_v10 = vrot.slane %v8738_v55, 6  ;;  %v7193_v55 = vld [vmem:[%s13198_s3 + $0x100] ss:$8 sps:$4 sm:$0xff]  }
 0x28d   :  { %v1724_v27 = vsel %vm1688_vm10, %v13798_v26, %v1653_v28  ;;  %v9505_v26 = vadd.s32 56, %v7428_v7  ;;  %v2629_v49 = vpack.c.bf16 %v1721_v16, %v1723_v18  ;;  %v9524_v16 = vsel %vm9436_vm13, %v1408_v15, 0.0  ;;  %v7198_v18 = vld [vmem:[%s13198_s3 + $0x114] ss:$8 sps:$4 sm:$0xff]  }
 0x28e   :  { %v9502_v19 = vsel %vm1688_vm10, %v1660_v40, %v13801_v10  ;;  %v9509_v46 = vsel %vm1688_vm10, %v1661_v29, %v1663_v53  ;;  %v9520_v10 = vsel %vm9436_vm13, %v1407_v12, 0.0  ;;  %v9541_v32 = vsel %vm1688_vm10, %v1663_v53, %v1665_v2  ;;  %v13802_v12 = vld [vmem:[#allocation23_spill] sm:$0xff] }
 0x28f   :  { %v13803_v15 = vmax.f32 %v13802_v12, 0.0  ;;  %v13808_v53 = vrot.slane %v9415_v6, 1  ;;  %v13810_v6 = vrot.slane %v9419_v48, 1  ;;  %vm4460_vm12 = vcmask 1047559  }
 0x290   :  { %vm4510_vm13 = vcmask 654336  }
 0x293   :  { %v9472_v52 = vpop.permute.xlu0 %6579 }
 0x294   :  { %13796 = vst [vmem:[#allocation21_spill] sm:$0xff] %v9472_v52  ;;  %v13351_v22 = vunpack.i.l.bf16 %v9472_v52  ;;  %v13800_v37 = vunpack.i.h.bf16 %v9472_v52 }
 0x296   :  { %v2537_v44 = vsel %vm2073_vm14, %v1724_v27, %v13351_v22  ;;  %v2538_v31 = vsel %vm2073_vm14, %v1722_v51, %v13800_v37  ;;  %v9513_v27 = vsel %vm1688_vm10, %v1658_v56, %v1660_v40  ;;  %v9531_v40 = vsel %vm1688_vm10, %v1659_v45, %v1661_v29  ;;  %v13805_v22 = vld [vmem:[#allocation22_spill] sm:$0xff] }
 0x297   :  { %v6585_v28 = vpop.permute.xlu0 %6584  ;;  %v2630_v3 = vpack.c.bf16 %v2538_v31, %v2537_v44  ;;  %v9537_v44 = vsel %vm1688_vm10, %v1665_v2, %v1667_v20  ;;  %v13804_v45 = vrot.slane %v8780_v50, 6  ;;  %v13806_v56 = vmax.f32 %v13805_v22, 0.0 }
 0x298   :  { %v6587_v37 = vunpack.i.h.bf16 %v6585_v28  ;;  %v6586_v51 = vunpack.i.l.bf16 %v6585_v28 }
 0x299   :  { %3339 = vmatprep.mubr.bf16.mxu1 %v2630_v3  ;;  %v9550_v29 = vsel %vm1688_vm10, %v1667_v20, %v13804_v45 }
 0x29a   :  { %v1214_v31 = vmax.f32 %v13803_v15, %v6587_v37  ;;  %v1115_v3 = vsel %vm1112_vm6, %v6586_v51, %v6587_v37  ;;  %3340 = vmatmul.mubr.bf16.vlgmr.msra.gmra.mrb[0].mxu1 %v2629_v49  ;;  %v7196_v49 = vld [vmem:[%s13198_s3 + $0x110] ss:$8 sps:$4 sm:$0xff]  }
 0x29b   :  { %v1213_v52 = vmax.f32 %v13806_v56, %v1115_v3  ;;  %v9555_v54 = vpop.permute.xlu0 %6599  ;;  %3431 = vmatpush1.bf16.msra.mxu1 %v7193_v55  ;;  %v7201_v56 = vld [vmem:[%s13198_s3 + $0x124] ss:$8 sps:$4 sm:$0xff]   ;;  %v1781_v3 = vrot.slane %v13792_v21, 2  ;;  %v13809_v21 = vrot.slane %v9066_v62, 1 }
 0x29c   :  { %13807 = vst [vmem:[#allocation20_spill] sm:$0xff] %v9555_v54  ;;  %v1278_v20 = vrot.slane %v1214_v31, 1  ;;  %v13354_v51 = vunpack.i.h.bf16 %v9555_v54  ;;  %v13355_v12 = vunpack.i.l.bf16 %v9555_v54  ;;  %3432 = vmatprep.subr.bf16.mxu1 %v7198_v18 }
 0x29d   :  { %v1277_v15 = vrot.slane %v1213_v52, 1 }
 0x29e   :  { %v1394_v28 = vsel %vm93_vm0, %v1278_v20, %v13808_v53  ;;  %v2539_v18 = vsel %vm2073_vm14, %v1720_v60, %v13355_v12  ;;  %v2540_v37 = vsel %vm2073_vm14, %v1718_v58, %v13354_v51  ;;  %v1396_v55 = vsel %vm93_vm0, %v13809_v21, %v1278_v20  ;;  %v7199_v58 = vld [vmem:[%s13198_s3 + $0x120] ss:$8 sps:$4 sm:$0xff]   ;;  %v7207_v12 = vld [vmem:[%s13198_s3 + $0x144] ss:$8 sps:$4 sm:$0xff]  }
 0x29f   :  { %v9587_v2 = vmax.f32 %v1214_v31, %v1394_v28  ;;  %v1393_v53 = vsel %vm93_vm0, %v1277_v15, %v13810_v6  ;;  %v6605_v45 = vpop.permute.xlu0 %6604  ;;  %v2636_v22 = vpack.c.bf16 %v2540_v37, %v2539_v18  ;;  %v9594_v60 = vmax.f32 %v9066_v62, %v1396_v55  ;;  %3433 = vmatpush1.bf16.msra.mxu1 %v7196_v49  ;;  %v7204_v62 = vld [vmem:[%s13198_s3 + $0x134] ss:$8 sps:$4 sm:$0xff]  }
 0x2a0   :  { %v9599_v51 = vmax.f32 %v1213_v52, %v1393_v53  ;;  %v6607_v20 = vunpack.i.h.bf16 %v6605_v45  ;;  %v6606_v31 = vunpack.i.l.bf16 %v6605_v45  ;;  %v13812_v28 = vrot.slane %v9038_v38, 1  ;;  %3434 = vmatprep.subr.bf16.mxu1 %v7201_v56 }
 0x2a1   :  { %3349 = vmatprep.mubr.bf16.mxu1 %v2636_v22  ;;  %v6678_v37 = vpack.i.bf16 %v9594_v60, %v9195_v25  ;;  %v13813_v52 = vrot.slane %v9411_v0, 2  ;;  %v13816_v56 = vrot.slane %v8623_v13, 2  ;;  %v13817_v22 = vld [vmem:[#allocation25_spill] sm:$0xff]  ;;  %v13819_v6 = vpack.c.bf16 %v9446_v8, %v9469_v63 }
 0x2a2   :  { %13811 = vst [vmem:[#allocation26_spill] sm:$0xff] %v9599_v51  ;;  %v1395_v48 = vsel %vm93_vm0, %v13812_v28, %v1277_v15  ;;  %v13815_v15 = vrot.slane %v8659_v61, 2  ;;  %v13818_v18 = vmax.f32 %v13817_v22, 0.0  ;;  %v1757_v53 = vrot.slane %v9599_v51, 2 }
 0x2a3   :  { %v9611_v49 = vmax.f32 %v9038_v38, %v1395_v48  ;;  %v9617_v55 = vsel %vm158_vm1, %v13813_v52, %v1781_v3  ;;  %v1118_v38 = vsel %vm1112_vm6, %v6606_v31, %v6607_v20  ;;  %3350 = vmatmul.mubr.bf16.gmra.mrb[4].mxu1 %v13819_v6  ;;  %v13820_v28 = vmov %v13816_v56 }
 0x2a4   :  { %13814 = vst [vmem:[#allocation19_spill] sm:$0xff] %v9617_v55  ;;  %v9625_v45 = vsel %vm158_vm1, %v13816_v56, %v13815_v15  ;;  %v9629_v21 = vmax.f32 %v13818_v18, %v6607_v20  ;;  %v9640_v48 = vsel %vm158_vm1, %v1781_v3, %v13820_v28  ;;  %v13821_v15 = vld [vmem:[#allocation24_spill] sm:$0xff]  ;;  %v6610_v20 = vpop.permute.xlu0 %6609  ;;  %6679 = vrot.lane.b32.xlu1 %v6678_v37, %s7362_s14  ;;  %v13825_v52 = vmax.f32 %v8550_v39, 0.0 }
 0x2a5   :  { %v13822_v56 = vmax.f32 %v13821_v15, 0.0  ;;  %v6688_v63 = vpack.i.bf16 %v9611_v49, %v9062_v59  ;;  %v1755_v13 = vrot.slane %v9611_v49, 2  ;;  %3435 = vmatpush1.bf16.msra.mxu1 %v7199_v58  ;;  %v6612_v6 = vunpack.i.h.bf16 %v6610_v20 }
 0x2a6   :  { %v1284_v8 = vrot.slane %v9629_v21, 1  ;;  %3436 = vmatprep.subr.bf16.mxu1 %v7204_v62  ;;  %v6611_v28 = vunpack.i.l.bf16 %v6610_v20  ;;  %v13824_v58 = vrot.slane %v9062_v59, 2  ;;  %v6693_v39 = vpack.i.bf16 %v9524_v16, %v9587_v2  ;;  %v13847_v59 = vld [vmem:[#allocation33_spill] sm:$0xff] }
 0x2a7   :  { %v9645_v22 = vmax.f32 %v13822_v56, %v1118_v38  ;;  %v9647_v18 = vpop.permute.xlu1 %6614  ;;  %v7202_v38 = vld [vmem:[%s13198_s3 + $0x130] ss:$8 sps:$4 sm:$0xff]   ;;  %v1875_v15 = vsel %vm158_vm1, %v1755_v13, %v1757_v53  ;;  %v9671_v3 = vmax.f32 %v13825_v52, %v6612_v6 }
 0x2a8   :  { %13823 = vst [vmem:[#allocation18_spill] sm:$0xff] %v9647_v18  ;;  %v13360_v31 = vunpack.i.l.bf16 %v9647_v18  ;;  %v1877_v56 = vsel %vm158_vm1, %v13824_v58, %v1755_v13  ;;  %v13826_v37 = vunpack.i.h.bf16 %v9647_v18  ;;  %v1119_v13 = vsel %vm1112_vm6, %v6611_v28, %v6612_v6  ;;  %6689 = vrot.lane.b32.xlu1 %v6688_v63, %s7362_s14 }
 0x2a9   :  { %v6683_v62 = vpack.i.bf16 %v1875_v15, %v1877_v56  ;;  %v13827_v52 = vrot.slane %v9645_v22, 1  ;;  %v13828_v15 = vrot.slane %v9402_v30, 1  ;;  %3437 = vmatpush1.bf16.msra.mxu1 %v7202_v38  ;;  %v7210_v38 = vld [vmem:[%s13198_s3 + $0x154] ss:$8 sps:$4 sm:$0xff]  }
 0x2aa   :  { %v2541_v20 = vsel %vm2073_vm14, %v9531_v40, %v13360_v31  ;;  %v2542_v54 = vsel %vm2073_vm14, %v9509_v46, %v13826_v37  ;;  %v13829_v46 = vmax.f32 %v8537_v23, 0.0  ;;  %v6703_v23 = vpack.i.bf16 %v9520_v10, %v9599_v51  ;;  %3438 = vmatprep.subr.bf16.mxu1 %v7207_v12 }
 0x2ab   :  { %v6620_v58 = vpop.permute.xlu1 %6619  ;;  %v2642_v50 = vpack.c.bf16 %v2542_v54, %v2541_v20  ;;  %v1389_v40 = vsel %vm93_vm0, %v13828_v15, %v13827_v52  ;;  %6684 = vrot.lane.b32.xlu0 %v6683_v62, %s7363_s30  ;;  %v7205_v54 = vld [vmem:[%s13198_s3 + $0x140] ss:$8 sps:$4 sm:$0xff]   ;;  %v13831_v62 = vrot.slane %v9524_v16, 2  ;;  %v13833_v15 = vpack.c.bf16 %v9502_v19, %v9513_v27 }
 0x2ac   :  { %v9694_v37 = vmax.f32 %v13829_v46, %v1119_v13  ;;  %v6622_v6 = vunpack.i.h.bf16 %v6620_v58  ;;  %v6621_v28 = vunpack.i.l.bf16 %v6620_v58  ;;  %v9703_v20 = vmax.f32 %v9402_v30, %v1389_v40 }
 0x2ad   :  { %3359 = vmatprep.mubr.bf16.mxu1 %v2642_v50  ;;  %v9708_v13 = vadd.s32 88, %v7428_v7  ;;  %v13832_v50 = vrot.slane %v9587_v2, 2  ;;  %v13834_v12 = vrot.slane %v9520_v10, 2  ;;  %v13835_v46 = vrot.slane %v9398_v11, 1  ;;  %3439 = vmatpush1.bf16.msra.mxu1 %v7205_v54 }
 0x2ae   :  { %v9700_v63 = vpop.permute.xlu0 %6629  ;;  %v1120_v30 = vsel %vm1112_vm6, %v6621_v28, %v6622_v6  ;;  %3360 = vmatmul.mubr.bf16.gmra.mrb[8].mxu1 %v13833_v15  ;;  %v13842_v47 = vrot.slane %v9703_v20, 2  ;;  %3440 = vmatprep.subr.bf16.mxu1 %v7210_v38 }
 0x2af   :  { %13830 = vst [vmem:[#allocation30_spill] sm:$0xff] %v9700_v63  ;;  %v9719_v58 = vsel %vm158_vm1, %v13832_v50, %v13831_v62  ;;  %v1873_v40 = vsel %vm158_vm1, %v1757_v53, %v13834_v12  ;;  %v1390_v31 = vsel %vm93_vm0, %v13835_v46, %v1284_v8  ;;  %v1285_v62 = vrot.slane %v9694_v37, 1  ;;  %v13836_v50 = vld [vmem:[#allocation27_spill] sm:$0xff]  ;;  %v6625_v19 = vpop.permute.xlu1 %6624  ;;  %6694 = vrot.lane.b32.xlu0 %v6693_v39, %s7362_s14 }
 0x2b0   :  { %v13837_v28 = vmax.f32 %v13836_v50, 0.0  ;;  %v6627_v15 = vunpack.i.h.bf16 %v6625_v19  ;;  %v6626_v18 = vunpack.i.l.bf16 %v6625_v19  ;;  %v13838_v53 = vunpack.i.h.bf16 %v9700_v63  ;;  %v7208_v50 = vld [vmem:[%s13198_s3 + $0x150] ss:$8 sps:$4 sm:$0xff]  }
 0x2b1   :  { %v13839_v46 = vrot.slane %v9671_v3, 1  ;;  %3441 = vmatpush1.bf16.msra.mxu1 %v7208_v50  ;;  %v7216_v50 = vld [vmem:[%s13198_s3 + $0x174] ss:$8 sps:$4 sm:$0xff]  }
 0x2b2   :  { %v9737_v56 = vmax.f32 %v13837_v28, %v1120_v30  ;;  %v2544_v12 = vsel %vm2073_vm14, %v9537_v44, %v13838_v53  ;;  %v13840_v28 = vld [vmem:[#allocation29_spill] sm:$0xff]  ;;  %v6635_v27 = vpop.permute.xlu0 %6634  ;;  %v13843_v44 = vrot.slane %v9520_v10, 2  ;;  %3442 = vmatprep.subr.bf16.mxu1 %v7213_v14 }
 0x2b3   :  { %v1388_v30 = vsel %vm93_vm0, %v1284_v8, %v13839_v46  ;;  %v13841_v52 = vmax.f32 %v13840_v28, 0.0  ;;  %v13844_v8 = vunpack.i.l.bf16 %v9700_v63  ;;  %v13845_v46 = vld [vmem:[#allocation35_spill] sm:$0xff]  ;;  %v6637_v41 = vunpack.i.h.bf16 %v6635_v27  ;;  %6704 = vrot.lane.b32.xlu0 %v6703_v23, %s7362_s14 }
 0x2b4   :  { %v1287_v39 = vrot.slane %v9737_v56, 1  ;;  %v1871_v53 = vsel %vm158_vm1, %v13843_v44, %v13842_v47  ;;  %v13846_v28 = vmax.f32 %v13845_v46, 0.0  ;;  %v6636_v51 = vunpack.i.l.bf16 %v6635_v27 }
 0x2b5   :  { %v9755_v19 = vmax.f32 %v13841_v52, %v6622_v6  ;;  %v2543_v54 = vsel %vm2073_vm14, %v9541_v32, %v13844_v8  ;;  %v1121_v52 = vsel %vm1112_vm6, %v6626_v18, %v6627_v15  ;;  %v13848_v47 = vmax.f32 %v13847_v59, 0.0 }
 0x2b6   :  { %v9770_v6 = vmax.f32 %v13846_v28, %v6627_v15  ;;  %v6698_v63 = vpack.i.bf16 %v1871_v53, %v1873_v40  ;;  %v2648_v55 = vpack.c.bf16 %v2544_v12, %v2543_v54  ;;  %v9781_v32 = vmax.f32 %v9629_v21, %v1388_v30  ;;  %v13853_v12 = vld [vmem:[#allocation37_spill] sm:$0xff] }
 0x2b7   :  { %v9778_v44 = vmax.f32 %v13848_v47, %v1121_v52  ;;  %v1122_v38 = vsel %vm1112_vm6, %v6636_v51, %v6637_v41  ;;  %v13849_v18 = vrot.slane %v9645_v22, 1  ;;  %v13850_v15 = vand.u32 31, %v9505_v26  ;;  %v7211_v51 = vld [vmem:[%s13198_s3 + $0x160] ss:$8 sps:$4 sm:$0xff]   ;;  %v13866_v21 = vld [vmem:[#allocation41_spill] sm:$0xff] }
 0x2b8   :  { %v13373_v23 = vrot.slane %v9770_v6, 1  ;;  %v13854_v30 = vmax.f32 %v13853_v12, 0.0  ;;  %6699 = vrot.lane.b32.xlu1 %v6698_v63, %s7363_s30  ;;  %3369 = vmatprep.mubr.bf16.mxu1 %v2648_v55  ;;  %v6640_v26 = vpop.permute.xlu0 %6639  ;;  %v9808_v8 = vmax.f32 %v9398_v11, %v1390_v31  ;;  %v13855_v47 = vld [vmem:[#allocation3_spill] sm:$0xff]  ;;  %v1385_v55 = vsel %vm93_vm0, %v1285_v62, %v1287_v39 }
 0x2b9   :  { %v1387_v27 = vsel %vm93_vm0, %v13849_v18, %v1285_v62  ;;  %vm9791_vm15 = vcmp.lt.s32.totalorder %v13850_v15, 28  ;;  %v1289_v46 = vrot.slane %v9778_v44, 1  ;;  %v6642_v28 = vunpack.i.h.bf16 %v6640_v26  ;;  %v13859_v15 = vld [vmem:[#allocation38_spill] sm:$0xff]  ;;  %3443 = vmatpush1.bf16.msra.mxu1 %v7211_v51 }
 0x2ba   :  { %v9804_v53 = vmax.f32 %v13854_v30, %v1122_v38  ;;  %v9811_v54 = vmax.f32 %v9645_v22, %v1387_v27  ;;  %v6641_v52 = vunpack.i.l.bf16 %v6640_v26  ;;  %v13856_v38 = vld [vmem:[#allocation10_spill] sm:$0xff]  ;;  %v1288_v11 = vrot.slane %v9755_v19, 1  ;;  %v9823_v22 = vpop.permute.xlu1 %6644  ;;  %3444 = vmatprep.subr.bf16.mxu1 %v7216_v50 }
 0x2bb   :  { %v13857_v18 = vpack.c.bf16 %v13855_v47, %v13856_v38  ;;  %13858 = vst [vmem:[#allocation23_spill] sm:$0xff] %v9823_v22  ;;  %v6708_v31 = vpack.i.bf16 %v9781_v32, %v9808_v8  ;;  %v9828_v63 = vmax.f32 %v9694_v37, %v1385_v55  ;;  %v13860_v12 = vmax.f32 %v13859_v15, 0.0  ;;  %v7214_v47 = vld [vmem:[%s13198_s3 + $0x170] ss:$8 sps:$4 sm:$0xff]   ;;  %v13861_v38 = vld [vmem:[#allocation42_spill] sm:$0xff] }
 0x2bc   :  { %v1763_v27 = vrot.slane %v9811_v54, 2  ;;  %v13372_v14 = vunpack.i.h.bf16 %v9823_v22  ;;  %v13371_v62 = vunpack.i.l.bf16 %v9823_v22  ;;  %v13862_v37 = vmax.f32 %v13861_v38, 0.0 }
 0x2bd   :  { %3370 = vmatmul.mubr.bf16.gmra.mrb[12].mxu1 %v13857_v18  ;;  %v9833_v30 = vmax.f32 %v13860_v12, %v6637_v41  ;;  %v1123_v55 = vsel %vm1112_vm6, %v6641_v52, %v6642_v28  ;;  %6709 = vrot.lane.b32.xlu1 %v6708_v31, %s7362_s14  ;;  %v6718_v41 = vpack.i.bf16 %v9811_v54, %v9703_v20  ;;  %v1765_v15 = vrot.slane %v9828_v63, 2  ;;  %v13863_v12 = vld [vmem:[#allocation13_spill] sm:$0xff] }
 0x2be   :  { %v9843_v18 = vmax.f32 %v13862_v37, %v6642_v28  ;;  %v2545_v51 = vsel %vm2073_vm14, %v9550_v29, %v13371_v62  ;;  %v2546_v38 = vsel %vm2073_vm14, %v13863_v12, %v13372_v14  ;;  %v1383_v28 = vsel %vm93_vm0, %v1287_v39, %v1289_v46  ;;  %v6650_v31 = vpop.permute.xlu1 %6649  ;;  %v7219_v14 = vld [vmem:[%s13198_s3 + $0x184] ss:$8 sps:$4 sm:$0xff]   ;;  %3445 = vmatpush1.bf16.msra.mxu1 %v7214_v47  ;;  %v7222_v47 = vld [vmem:[%s13198_s3 + $0x194] ss:$8 sps:$4 sm:$0xff]  }
 0x2bf   :  { %v1384_v52 = vsel %vm93_vm0, %v1288_v11, %v13373_v23  ;;  %v1867_v50 = vsel %vm158_vm1, %v1763_v27, %v1765_v15  ;;  %v13864_v37 = vrot.slane %v9703_v20, 2  ;;  %v2654_v62 = vpack.c.bf16 %v2546_v38, %v2545_v51  ;;  %v9881_v35 = vpop.permute.xlu0 %6654  ;;  %3446 = vmatprep.subr.bf16.mxu1 %v7219_v14 }
 0x2c0   :  { %v13865_v12 = vrot.slane %v9671_v3, 1  ;;  %v13867_v40 = vmax.f32 %v13866_v21, 0.0  ;;  %v6652_v26 = vunpack.i.h.bf16 %v6650_v31  ;;  %v6651_v22 = vunpack.i.l.bf16 %v6650_v31  ;;  %13868 = vst [vmem:[#allocation22_spill] sm:$0xff] %v9881_v35 }
 0x2c1   :  { %v1869_v29 = vsel %vm158_vm1, %v13864_v37, %v1763_v27  ;;  %v7217_v27 = vld [vmem:[%s13198_s3 + $0x180] ss:$8 sps:$4 sm:$0xff]   ;;  %6719 = vrot.lane.b32.xlu1 %v6718_v41, %s7362_s14  ;;  %3379 = vmatprep.mubr.bf16.mxu1 %v2654_v62  ;;  %v1416_v21 = vmax.f32 %v9755_v19, %v1384_v52  ;;  %v13382_v38 = vunpack.i.h.bf16 %v9881_v35  ;;  %v13385_v41 = vunpack.i.l.bf16 %v9881_v35 }
 0x2c2   :  { %v1386_v39 = vsel %vm93_vm0, %v13865_v12, %v1288_v11  ;;  %v9879_v23 = vmax.f32 %v13867_v40, %v1123_v55  ;;  %v6713_v17 = vpack.i.bf16 %v1867_v50, %v1869_v29  ;;  %v1292_v11 = vrot.slane %v9833_v30, 1  ;;  %v13871_v62 = vld [vmem:[#allocation43_spill] sm:$0xff]  ;;  %3447 = vmatpush1.bf16.msra.mxu1 %v7217_v27  ;;  %v7220_v29 = vld [vmem:[%s13198_s3 + $0x190] ss:$8 sps:$4 sm:$0xff]  }
 0x2c3   :  { %v9889_v51 = vmax.f32 %v9671_v3, %v1386_v39  ;;  %v1415_v40 = vmax.f32 %v9737_v56, %v1383_v28  ;;  %v1124_v55 = vsel %vm1112_vm6, %v6651_v22, %v6652_v26  ;;  %v13869_v3 = vpack.c.bf16 %v8957_v24, %v9074_v5  ;;  %v6660_v22 = vpop.permute.xlu1 %6659  ;;  %v13873_v12 = vld [vmem:[#allocation45_spill] sm:$0xff]  ;;  %3448 = vmatprep.subr.bf16.mxu1 %v7222_v47  ;;  %v7225_v27 = vld [vmem:[%s13198_s3 + $0x1a4] ss:$8 sps:$4 sm:$0xff]  }
 0x2c4   :  { %6714 = vrot.lane.b32.xlu0 %v6713_v17, %s7363_s30  ;;  %v13870_v56 = vrot.slane %v9804_v53, 1  ;;  %v13872_v28 = vmax.f32 %v13871_v62, 0.0  ;;  %v9917_v31 = vsel %vm9791_vm15, %v1416_v21, 0.0  ;;  %v1294_v5 = vrot.slane %v9843_v18, 1  ;;  %v13875_v21 = vld [vmem:[#allocation2_spill] sm:$0xff]  ;;  %v13877_v62 = vld [vmem:[#allocation5_spill] sm:$0xff] }
 0x2c5   :  { %3380 = vmatmul.mubr.bf16.gmra.mrb[16].mxu1 %v13869_v3  ;;  %v9913_v17 = vsel %vm9791_vm15, %v1415_v40, 0.0  ;;  %v6662_v50 = vunpack.i.h.bf16 %v6660_v22  ;;  %v6661_v37 = vunpack.i.l.bf16 %v6660_v22  ;;  %v13874_v39 = vmax.f32 %v13873_v12, 0.0  ;;  %v13952_v35 = vld [vmem:[#allocation67_spill] sm:$0xff] }
 0x2c6   :  { %v1381_v19 = vsel %vm93_vm0, %v1289_v46, %v13870_v56  ;;  %v9909_v52 = vmax.f32 %v13872_v28, %v1124_v55  ;;  %v1293_v46 = vrot.slane %v9879_v23, 1  ;;  %v1767_v14 = vrot.slane %v9913_v17, 2  ;;  %3449 = vmatpush1.bf16.msra.mxu1 %v7220_v29 }
 0x2c7   :  { %v9920_v24 = vmax.f32 %v9778_v44, %v1381_v19  ;;  %v9929_v59 = vmax.f32 %v13874_v39, %v6652_v26  ;;  %v6723_v44 = vpack.i.bf16 %v9917_v31, %v9889_v51  ;;  %v13876_v55 = vmax.f32 %v13875_v21, 0.0  ;;  %3450 = vmatprep.subr.bf16.mxu1 %v7225_v27 }
 0x2c8   :  { %v1295_v40 = vrot.slane %v9909_v52, 1  ;;  %v1125_v56 = vsel %vm1112_vm6, %v6661_v37, %v6662_v50  ;;  %v6733_v19 = vpack.i.bf16 %v9913_v17, %v9828_v63  ;;  %v13878_v28 = vmax.f32 %v13877_v62, 0.0 }
 0x2c9   :  { %v9940_v3 = vmax.f32 %v13876_v55, %v6662_v50  ;;  %v1769_v26 = vrot.slane %v9920_v24, 2  ;;  %6724 = vrot.lane.b32.xlu0 %v6723_v44, %s7362_s14  ;;  %v1865_v47 = vsel %vm158_vm1, %v1765_v15, %v1767_v14  ;;  %v2547_v12 = vsel %vm2073_vm14, %v9088_v9, %v13385_v41  ;;  %v13903_v41 = vld [vmem:[#allocation19_spill] sm:$0xff] }
 0x2ca   :  { %v1233_v22 = vmax.f32 %v13878_v28, %v1125_v56  ;;  %v2548_v50 = vsel %vm2073_vm14, %v9097_v34, %v13382_v38  ;;  %v1380_v44 = vsel %vm93_vm0, %v1292_v11, %v1294_v5  ;;  %v13879_v56 = vrot.slane %v9770_v6, 1  ;;  %v7223_v34 = vld [vmem:[%s13198_s3 + $0x1a0] ss:$8 sps:$4 sm:$0xff]   ;;  %v13900_v38 = vld [vmem:[#allocation53_spill] sm:$0xff] }
 0x2cb   :  { %v1298_v37 = vrot.slane %v9940_v3, 1  ;;  %v1863_v39 = vsel %vm158_vm1, %v1767_v14, %v1769_v26  ;;  %v2660_v21 = vpack.c.bf16 %v2548_v50, %v2547_v12  ;;  %v9969_v62 = vmax.f32 %v9833_v30, %v1380_v44  ;;  %v7228_v30 = vld [vmem:[%s13198_s3 + $0x1b4] ss:$8 sps:$4 sm:$0xff]   ;;  %3451 = vmatpush1.bf16.msra.mxu1 %v7223_v34 }
 0x2cc   :  { %v1297_v15 = vrot.slane %v1233_v22, 1  ;;  %v6728_v55 = vpack.i.bf16 %v1863_v39, %v1865_v47  ;;  %v1382_v9 = vsel %vm93_vm0, %v13879_v56, %v1292_v11  ;;  %v1296_v14 = vrot.slane %v9929_v59, 1  ;;  %3452 = vmatprep.subr.bf16.mxu1 %v7228_v30  ;;  %v7231_v56 = vld [vmem:[%s13198_s3 + $0x1c4] ss:$8 sps:$4 sm:$0xff]   ;;  %v7229_v30 = vld [vmem:[%s13198_s3 + $0x1c0] ss:$8 sps:$4 sm:$0xff]  }
 0x2cd   :  { %3389 = vmatprep.mubr.bf16.mxu1 %v2660_v21  ;;  %v13880_v29 = vrot.slane %v9804_v53, 1  ;;  %v1377_v47 = vsel %vm93_vm0, %v1293_v46, %v1295_v40  ;;  %v1787_v11 = vrot.slane %v8661_v42, 2  ;;  %v13881_v12 = vrot.slane %v9178_v1, 1  ;;  %6734 = vrot.lane.b32.xlu0 %v6733_v19, %s7362_s14 }
 0x2ce   :  { %6729 = vrot.lane.b32.xlu1 %v6728_v55, %s7363_s30  ;;  %v9992_v50 = vmax.f32 %v9770_v6, %v1382_v9  ;;  %v13882_v42 = vand.u32 31, %v9708_v13  ;;  %v13885_v21 = vpack.c.bf16 %v9109_v36, %v9103_v4  ;;  %v10009_v19 = vmax.f32 %v9879_v23, %v1377_v47  ;;  %v7226_v23 = vld [vmem:[%s13198_s3 + $0x1b0] ss:$8 sps:$4 sm:$0xff]  }
 0x2cf   :  { %v1379_v28 = vsel %vm93_vm0, %v13880_v29, %v1293_v46  ;;  %v1373_v27 = vsel %vm93_vm0, %v1297_v15, %v13881_v12  ;;  %v1375_v6 = vsel %vm93_vm0, %v1295_v40, %v1297_v15  ;;  %v1376_v36 = vsel %vm93_vm0, %v1296_v14, %v1298_v37  ;;  %3453 = vmatpush1.bf16.msra.mxu1 %v7226_v23 }
 0x2d0   :  { %v9995_v46 = vmax.f32 %v9804_v53, %v1379_v28  ;;  %vm9999_vm2 = vcmp.lt.s32.totalorder %v13882_v42, 28  ;;  %v10003_v1 = vmax.f32 %v1233_v22, %v1373_v27  ;;  %3390 = vmatmul.mubr.bf16.gmra.mrb[20].mxu1 %v13885_v21  ;;  %v13886_v53 = vrot.slane %v8734_v33, 2  ;;  %3454 = vmatprep.subr.bf16.mxu1 %v7231_v56 }
 0x2d1   :  { %v6738_v22 = vpack.i.bf16 %v9969_v62, %v9992_v50  ;;  %v1756_v4 = vrot.slane %v9594_v60, 2  ;;  %v1773_v33 = vrot.slane %v10009_v19, 2  ;;  %v1378_v40 = vsel %vm93_vm0, %v1294_v5, %v1296_v14  ;;  %v10073_v27 = vpop.permute.xlu0 %6664 }
 0x2d2   :  { %v10017_v13 = vsel %vm158_vm1, %v1787_v11, %v13886_v53  ;;  %v1771_v44 = vrot.slane %v9995_v46, 2  ;;  %v1423_v15 = vmax.f32 %v9909_v52, %v1375_v6  ;;  %v1424_v55 = vmax.f32 %v9929_v59, %v1376_v36  ;;  %13889 = vst [vmem:[#allocation25_spill] sm:$0xff] %v10073_v27  ;;  %v7234_v6 = vld [vmem:[%s13198_s3 + $0x1d4] ss:$8 sps:$4 sm:$0xff]  }
 0x2d3   :  { %v13887_v9 = vrot.slane %v9300_v57, 1  ;;  %6739 = vrot.lane.b32.xlu1 %v6738_v22, %s7362_s14  ;;  %v13888_v5 = vrot.slane %v8659_v61, 2  ;;  %v1762_v59 = vrot.slane %v9808_v8, 2  ;;  %v1768_v61 = vrot.slane %v9917_v31, 2  ;;  %3455 = vmatpush1.bf16.msra.mxu1 %v7229_v30 }
 0x2d4   :  { %v1861_v29 = vsel %vm158_vm1, %v1769_v26, %v1771_v44  ;;  %v1859_v14 = vsel %vm158_vm1, %v1771_v44, %v1773_v33  ;;  %v10054_v57 = vsel %vm9999_vm2, %v1423_v15, 0.0  ;;  %v1777_v26 = vrot.slane %v10003_v1, 2  ;;  %3456 = vmatprep.subr.bf16.mxu1 %v7234_v6 }
 0x2d5   :  { %v1374_v34 = vsel %vm93_vm0, %v1298_v37, %v13887_v9  ;;  %v10047_v52 = vsel %vm158_vm1, %v13888_v5, %v1787_v11  ;;  %v10058_v37 = vsel %vm9999_vm2, %v1424_v55, 0.0  ;;  %v6748_v28 = vpack.i.bf16 %v9995_v46, %v9920_v24  ;;  %v13893_v9 = vld [vmem:[#allocation49_spill] sm:$0xff] }
 0x2d6   :  { %v6743_v47 = vpack.i.bf16 %v1859_v14, %v1861_v29  ;;  %v10065_v11 = vmax.f32 %v9843_v18, %v1378_v40  ;;  %v10071_v12 = vmax.f32 %v9940_v3, %v1374_v34  ;;  %v1775_v42 = vrot.slane %v10054_v57, 2  ;;  %v13894_v34 = vld [vmem:[#allocation17_spill] sm:$0xff] }
 0x2d7   :  { %v13890_v39 = vrot.slane %v9587_v2, 2  ;;  %v1764_v18 = vrot.slane %v9781_v32, 2  ;;  %v13380_v3 = vunpack.i.h.bf16 %v10073_v27  ;;  %v13381_v53 = vunpack.i.l.bf16 %v10073_v27  ;;  %6749 = vrot.lane.b32.xlu1 %v6748_v28, %s7362_s14  ;;  %v13946_v27 = vld [vmem:[#allocation65_spill] sm:$0xff] }
 0x2d8   :  { %6744 = vrot.lane.b32.xlu0 %v6743_v47, %s7363_s30  ;;  %v6753_v22 = vpack.i.bf16 %v10058_v37, %v10065_v11  ;;  %v13891_v44 = vrot.slane %v9195_v25, 2  ;;  %v1855_v23 = vsel %vm158_vm1, %v1775_v42, %v1777_v26  ;;  %v1857_v40 = vsel %vm158_vm1, %v1773_v33, %v1775_v42 }
 0x2d9   :  { %v10080_v21 = vsel %vm158_vm1, %v1756_v4, %v13890_v39  ;;  %v13892_v55 = vrot.slane %v9524_v16, 2  ;;  %v2550_v29 = vsel %vm2073_vm14, %v13894_v34, %v13380_v3  ;;  %v6758_v33 = vpack.i.bf16 %v1855_v23, %v1857_v40  ;;  %v7232_v39 = vld [vmem:[%s13198_s3 + $0x1d0] ss:$8 sps:$4 sm:$0xff]   ;;  %v10130_v23 = vpop.permute.xlu1 %6669  ;;  %v13897_v34 = vld [vmem:[#allocation51_spill] sm:$0xff] }
 0x2da   :  { %v10096_v36 = vsel %vm158_vm1, %v13891_v44, %v1756_v4  ;;  %v2549_v4 = vsel %vm2073_vm14, %v13893_v9, %v13381_v53  ;;  %v1766_v28 = vrot.slane %v9889_v51, 2  ;;  %v10123_v47 = vsel %vm158_vm1, %v1762_v59, %v1764_v18  ;;  %13895 = vst [vmem:[#allocation24_spill] sm:$0xff] %v10130_v23  ;;  %v7237_v9 = vld [vmem:[%s13198_s3 + $0x1e4] ss:$8 sps:$4 sm:$0xff]   ;;  %3457 = vmatpush1.bf16.msra.mxu1 %v7232_v39 }
 0x2db   :  { %v10108_v56 = vsel %vm158_vm1, %v13892_v55, %v1762_v59  ;;  %v2666_v14 = vpack.c.bf16 %v2550_v29, %v2549_v4  ;;  %v13386_v42 = vrot.slane %v9992_v50, 2  ;;  %v1626_v44 = vrot.slane %v9611_v49, 6  ;;  %6759 = vrot.lane.b32.xlu1 %v6758_v33, %s7363_s30  ;;  %v13896_v4 = vld [vmem:[#allocation50_spill] sm:$0xff]  ;;  %3458 = vmatprep.subr.bf16.mxu1 %v7237_v9 }
 0x2dc   :  { %6754 = vrot.lane.b32.xlu0 %v6753_v22, %s7362_s14  ;;  %v6768_v30 = vpack.i.bf16 %v9424_v43, %v10071_v12  ;;  %v6788_v59 = vpack.i.bf16 %v9625_v45, %v9640_v48  ;;  %v6798_v40 = vpack.i.bf16 %v10017_v13, %v10047_v52  ;;  %v13383_v6 = vunpack.i.h.bf16 %v10130_v23  ;;  %v13922_v52 = vld [vmem:[#allocation15_spill] sm:$0xff] }
 0x2dd   :  { %3399 = vmatprep.mubr.bf16.mxu1 %v2666_v14  ;;  %v13384_v49 = vunpack.i.l.bf16 %v10130_v23  ;;  %v10144_v55 = vsel %vm158_vm1, %v1764_v18, %v1766_v28  ;;  %v10150_v22 = vsel %vm158_vm1, %v1768_v61, %v13386_v42  ;;  %v13898_v29 = vpack.c.bf16 %v13896_v4, %v13897_v34  ;;  %v13901_v34 = vld [vmem:[#allocation52_spill] sm:$0xff] }
 0x2de   :  { %v6763_v33 = vpack.i.bf16 %v10054_v57, %v10009_v19  ;;  %v13899_v18 = vrot.slane %v9411_v0, 2  ;;  %v10168_v53 = vsel %vm158_vm1, %v1766_v28, %v1768_v61  ;;  %v1630_v61 = vrot.slane %v9520_v10, 6  ;;  %v7240_v10 = vld [vmem:[%s13198_s3 + $0x1f4] ss:$8 sps:$4 sm:$0xff]  }
 0x2df   :  { %3400 = vmatmul.mubr.bf16.gmra.mrb[24].mxu1 %v13898_v29  ;;  %v2551_v4 = vsel %vm2073_vm14, %v13900_v38, %v13384_v49  ;;  %v2552_v29 = vsel %vm2073_vm14, %v13901_v34, %v13383_v6  ;;  %v1639_v28 = vrot.slane %v9917_v31, 6  ;;  %6769 = vrot.lane.b32.xlu1 %v6768_v30, %s7362_s14  ;;  %v6778_v34 = vpack.i.bf16 %v9411_v0, %v10003_v1  ;;  %v10191_v49 = vpop.permute.xlu0 %6674  ;;  %v13904_v31 = vld [vmem:[#allocation48_spill] sm:$0xff] }
 0x2e0   :  { %v1853_v14 = vsel %vm158_vm1, %v1777_v26, %v13899_v18  ;;  %v7235_v18 = vld [vmem:[%s13198_s3 + $0x1e0] ss:$8 sps:$4 sm:$0xff]   ;;  %6764 = vrot.lane.b32.xlu0 %v6763_v33, %s7362_s14  ;;  %v2672_v38 = vpack.c.bf16 %v2552_v29, %v2551_v4  ;;  %v1627_v6 = vrot.slane %v9594_v60, 6  ;;  %v1647_v39 = vrot.slane %v10058_v37, 6  ;;  %13902 = vst [vmem:[#allocation27_spill] sm:$0xff] %v10191_v49 }
 0x2e1   :  { %v6773_v42 = vpack.i.bf16 %v13903_v41, %v1853_v14  ;;  %v13905_v33 = vrot.slane %v13904_v31, 6  ;;  %v1629_v4 = vrot.slane %v9587_v2, 6  ;;  %v13387_v60 = vunpack.i.h.bf16 %v10191_v49  ;;  %v13907_v14 = vld [vmem:[#allocation83_spill] sm:$0xff]  ;;  %3459 = vmatpush1.bf16.msra.mxu1 %v7235_v18  ;;  %v13910_v18 = vld [vmem:[#allocation57_spill] sm:$0xff] }
 0x2e2   :  { %v13388_v29 = vunpack.i.l.bf16 %v10191_v49  ;;  %3409 = vmatprep.mubr.bf16.mxu1 %v2672_v38  ;;  %v13906_v41 = vrot.slane %v9195_v25, 6  ;;  %v13908_v2 = vrot.slane %v9524_v16, 6  ;;  %v13909_v38 = vld [vmem:[#allocation26_spill] sm:$0xff]  ;;  %v1633_v3 = vrot.slane %v9808_v8, 6  ;;  %3460 = vmatprep.subr.bf16.mxu1 %v7240_v10  ;;  %v13943_v49 = vld [vmem:[#allocation4_spill] sm:$0xff] }
 0x2e3   :  { %v10201_v30 = vsel %vm1688_vm10, %v13905_v33, %v1626_v44  ;;  %v7238_v33 = vld [vmem:[%s13198_s3 + $0x1f0] ss:$8 sps:$4 sm:$0xff]   ;;  %v10225_v25 = vsel %vm1688_vm10, %v1627_v6, %v1629_v4  ;;  %6779 = vrot.lane.b32.xlu1 %v6778_v34, %s7362_s14  ;;  %v7243_v8 = vld [vmem:[%s13198_s3 + $0x204] ss:$8 sps:$4 sm:$0xff]   ;;  %vm2394_vm0 = vcmask 392192   ;;  %vm4442_vm6 = vcmask 1041409  }
 0x2e4   :  { %v10210_v9 = vsel %vm1688_vm10, %v13906_v41, %v1627_v6  ;;  %v10221_v26 = vsel %vm1688_vm10, %v1629_v4, %v13908_v2  ;;  %v1628_v41 = vrot.slane %v13909_v38, 6  ;;  %6774 = vrot.lane.b32.xlu0 %v6773_v42, %s7363_s30  ;;  %v2553_v31 = vsel %vm2073_vm14, %v13910_v18, %v13388_v29  ;;  %v13911_v2 = vld [vmem:[#allocation56_spill] sm:$0xff] }
 0x2e5   :  { %v2554_v5 = vsel %vm2073_vm14, %v13911_v2, %v13387_v60  ;;  %v1635_v6 = vrot.slane %v9781_v32, 6  ;;  %v1632_v4 = vrot.slane %v9703_v20, 6  ;;  %v13912_v18 = vrot.slane %v9524_v16, 6  ;;  %v13913_v20 = vld [vmem:[#allocation54_spill] sm:$0xff]  ;;  %3461 = vmatpush1.bf16.msra.mxu1 %v7238_v33  ;;  %v13925_v29 = vld [vmem:[#allocation36_spill] sm:$0xff] }
 0x2e6   :  { %v2678_v38 = vpack.c.bf16 %v2554_v5, %v2553_v31  ;;  %v10246_v42 = vsel %vm1688_vm10, %v1628_v41, %v1630_v61  ;;  %v10250_v34 = vsel %vm1688_vm10, %v1626_v44, %v1628_v41  ;;  %v13914_v5 = vld [vmem:[#allocation55_spill] sm:$0xff]  ;;  %v1634_v44 = vrot.slane %v9811_v54, 6  ;;  %3623 = vmatprep.subr.bf16.mxu1 %v7243_v8  ;;  %v13934_v31 = vld [vmem:[#allocation62_spill] sm:$0xff] }
 0x2e7   :  { %v10256_v32 = vsel %vm1688_vm10, %v13912_v18, %v1633_v3  ;;  %v13915_v10 = vpack.c.bf16 %v13913_v20, %v13914_v5  ;;  %v10265_v2 = vsel %vm1688_vm10, %v1633_v3, %v1635_v6  ;;  %v10270_v16 = vsel %vm1688_vm10, %v1630_v61, %v1632_v4  ;;  %v13917_v3 = vld [vmem:[#allocation28_spill] sm:$0xff]  ;;  %6789 = vrot.lane.b32.xlu1 %v6788_v59, %s7363_s30 }
 0x2e8   :  { %v1637_v41 = vrot.slane %v9889_v51, 6  ;;  %v1636_v18 = vrot.slane %v9828_v63, 6  ;;  %v1638_v20 = vrot.slane %v9913_v17, 6  ;;  %v1641_v5 = vrot.slane %v9992_v50, 6 }
 0x2e9   :  { %3410 = vmatmul.mubr.bf16.gmra.mrb[28].mxu1 %v13915_v10  ;;  %v13916_v10 = vld [vmem:[#allocation31_spill] sm:$0xff]  ;;  %v10286_v54 = vsel %vm1688_vm10, %v1632_v4, %v1634_v44  ;;  %v1643_v63 = vrot.slane %v9969_v62, 6  ;;  %v1640_v51 = vrot.slane %v9920_v24, 6  ;;  %v1642_v17 = vrot.slane %v9995_v46, 6 }
 0x2ea   :  { %3419 = vmatprep.mubr.bf16.mxu1 %v2678_v38  ;;  %v13918_v60 = vpack.i.bf16 %v13916_v10, %v13917_v3  ;;  %v10299_v45 = vsel %vm1688_vm10, %v1635_v6, %v1637_v41  ;;  %v10303_v48 = vsel %vm1688_vm10, %v1636_v18, %v1638_v20  ;;  %v10307_v24 = vsel %vm1688_vm10, %v1634_v44, %v1636_v18  ;;  %v13919_v44 = vld [vmem:[#allocation34_spill] sm:$0xff] }
 0x2eb   :  { %v10311_v46 = vsel %vm1688_vm10, %v1641_v5, %v1643_v63  ;;  %v10315_v59 = vsel %vm1688_vm10, %v1639_v28, %v1641_v5  ;;  %v10319_v33 = vsel %vm1688_vm10, %v1640_v51, %v1642_v17  ;;  %v10325_v4 = vsel %vm1688_vm10, %v1638_v20, %v1640_v51  ;;  %6799 = vrot.lane.b32.xlu1 %v6798_v40, %s7363_s30 }
 0x2ec   :  { %6784 = vrot.lane.b32.xlu0 %v13918_v60, %s7362_s14  ;;  %v10295_v60 = vsel %vm1688_vm10, %v1637_v41, %v1639_v28  ;;  %v1645_v38 = vrot.slane %v10065_v11, 6  ;;  %v1644_v8 = vrot.slane %v10009_v19, 6  ;;  %v13920_v41 = vld [vmem:[#allocation32_spill] sm:$0xff]  ;;  %v1646_v20 = vrot.slane %v10054_v57, 6  ;;  %v13923_v57 = vld [vmem:[#allocation58_spill] sm:$0xff] }
 0x2ed   :  { %v13921_v28 = vpack.i.bf16 %v13919_v44, %v13920_v41  ;;  %v13389_v5 = vrot.slane %v10071_v12, 6  ;;  %v1648_v51 = vrot.slane %v10003_v1, 6  ;;  %v13924_v40 = vpack.c.bf16 %v13922_v52, %v13923_v57  ;;  %v13926_v1 = vld [vmem:[#allocation40_spill] sm:$0xff]  ;;  %v13933_v52 = vld [vmem:[#allocation61_spill] sm:$0xff] }
 0x2ee   :  { %v10346_v19 = vsel %vm1688_vm10, %v1645_v38, %v1647_v39  ;;  %v10354_v13 = vsel %vm1688_vm10, %v1642_v17, %v1644_v8  ;;  %v6803_v18 = vpack.i.bf16 %v13926_v1, %v13925_v29  ;;  %v10363_v6 = vsel %vm1688_vm10, %v1644_v8, %v1646_v20  ;;  %v13928_v57 = vld [vmem:[#allocation60_spill] sm:$0xff] }
 0x2ef   :  { %v13927_v17 = vrot.slane %v9411_v0, 6  ;;  %v10383_v8 = vsel %vm1688_vm10, %v1646_v20, %v1648_v51  ;;  %v13935_v20 = vpack.i.bf16 %v13933_v52, %v13934_v31  ;;  %v13942_v0 = vld [vmem:[#allocation8_spill] sm:$0xff]  ;;  %v13948_v52 = vld [vmem:[#allocation14_spill] sm:$0xff]  ;;  %vm4651_vm15 = vcmask 523264  }
 0x2f0   :  { %6794 = vrot.lane.b32.xlu0 %v13921_v28, %s7362_s14  ;;  %v10350_v28 = vsel %vm1688_vm10, %v1643_v63, %v1645_v38  ;;  %v10371_v63 = vsel %vm1688_vm10, %v1647_v39, %v13389_v5  ;;  %v13931_v5 = vld [vmem:[#allocation39_spill] sm:$0xff]  ;;  %v13944_v23 = vpack.i.bf16 %v13942_v0, %v13943_v49  ;;  %vm4740_vm2 = vcmask 785408  }
 0x2f1   :  { %3420 = vmatmul.mubr.bf16.gmra.mrb[32].mxu1 %v13924_v40  ;;  %v10377_v38 = vsel %vm1688_vm10, %v1648_v51, %v13927_v17  ;;  %v13929_v40 = vld [vmem:[#allocation59_spill] sm:$0xff]  ;;  %v13932_v17 = vld [vmem:[#allocation44_spill] sm:$0xff]  ;;  %v13937_v51 = vld [vmem:[#allocation46_spill] sm:$0xff] }
 0x2f2   :  { %v13930_v39 = vpack.i.bf16 %v13928_v57, %v13929_v40  ;;  %v6813_v61 = vpack.i.bf16 %v13932_v17, %v13931_v5  ;;  %v13939_v57 = vld [vmem:[#allocation64_spill] sm:$0xff]  ;;  %v13940_v40 = vld [vmem:[#allocation63_spill] sm:$0xff] }
 0x2f3   :  { %v13958_v0 = vld [vmem:[#allocation71_spill] sm:$0xff] }
 0x2f4   :  { %6804 = vrot.lane.b32.xlu0 %v6803_v18, %s7362_s14  ;;  %6809 = vrot.lane.b32.xlu1 %v13930_v39, %s7363_s30  ;;  %v13936_v18 = vld [vmem:[#allocation6_spill] sm:$0xff]  ;;  %v13941_v39 = vpack.i.bf16 %v13939_v57, %v13940_v40  ;;  %v13954_v40 = vld [vmem:[#allocation9_spill] sm:$0xff] }
 0x2f5   :  { %v13938_v15 = vpack.i.bf16 %v13936_v18, %v13937_v51 }
 0x2f8   :  { %6814 = vrot.lane.b32.xlu0 %v6813_v61, %s7362_s14  ;;  %6819 = vrot.lane.b32.xlu1 %v13935_v20, %s7363_s30  ;;  %v13945_v61 = vld [vmem:[#allocation66_spill] sm:$0xff]  ;;  %v13949_v20 = vld [vmem:[#allocation7_spill] sm:$0xff] }
 0x2f9   :  { %v13947_v31 = vpack.i.bf16 %v13945_v61, %v13946_v27  ;;  %v13950_v18 = vpack.i.bf16 %v13948_v52, %v13949_v20  ;;  %v13960_v61 = vld [vmem:[#allocation47_spill] sm:$0xff]  ;;  %v13963_v20 = vld [vmem:[#allocation69_spill] sm:$0xff] }
 0x2fc   :  { %6824 = vrot.lane.b32.xlu0 %v13938_v15, %s7362_s14  ;;  %6829 = vrot.lane.b32.xlu1 %v13941_v39, %s7363_s30  ;;  %v13951_v15 = vld [vmem:[#allocation68_spill] sm:$0xff] }
 0x2fd   :  { %v13953_v57 = vpack.i.bf16 %v13951_v15, %v13952_v35  ;;  %v13955_v39 = vld [vmem:[#allocation12_spill] sm:$0xff]  ;;  %v1778_v15 = vrot.slane %v10071_v12, 2 }
 0x2fe   :  { %v13956_v49 = vpack.i.bf16 %v13954_v40, %v13955_v39  ;;  %v1774_v40 = vrot.slane %v10065_v11, 2  ;;  %v13966_v39 = vpack.i.bf16 %v10080_v21, %v10096_v36  ;;  %v13968_v21 = vpack.i.bf16 %v10144_v55, %v10123_v47 }
 0x2ff   :  { %v1780_v36 = vrot.slane %v9424_v43, 2 }
 0x300   :  { %6834 = vrot.lane.b32.xlu0 %v13944_v23, %s7362_s14  ;;  %6839 = vrot.lane.b32.xlu1 %v13947_v31, %s7363_s30  ;;  %v13957_v23 = vld [vmem:[#allocation70_spill] sm:$0xff]  ;;  %v13961_v31 = vld [vmem:[#allocation16_spill] sm:$0xff] }
 0x301   :  { %v13959_v27 = vpack.i.bf16 %v13957_v23, %v13958_v0  ;;  %v13962_v52 = vpack.i.bf16 %v13960_v61, %v13961_v31  ;;  %v1772_v23 = vrot.slane %v9969_v62, 2  ;;  %v1784_v62 = vrot.slane %v13916_v10, 2 }
 0x302   :  { %v1792_v31 = vrot.slane %v13926_v1, 2  ;;  %v1794_v10 = vrot.slane %v13931_v5, 2  ;;  %v1788_v1 = vrot.slane %v13919_v44, 2  ;;  %v1796_v44 = vrot.slane %v13932_v17, 2  ;;  %v13973_v17 = vld [vmem:[#allocation73_spill] sm:$0xff] }
 0x303   :  { %v1860_v0 = vsel %vm158_vm1, %v1772_v23, %v1774_v40 }
 0x304   :  { %6844 = vrot.lane.b32.xlu0 %v13950_v18, %s7362_s14  ;;  %6849 = vrot.lane.b32.xlu1 %v13953_v57, %s7363_s30  ;;  %v13964_v18 = vld [vmem:[#allocation72_spill] sm:$0xff]  ;;  %v1776_v57 = vrot.slane %v10058_v37, 2 }
 0x305   :  { %v13965_v35 = vpack.i.bf16 %v13963_v20, %v13964_v18 }
 0x306   :  { %v1856_v37 = vsel %vm158_vm1, %v1776_v57, %v1778_v15  ;;  %v1858_v11 = vsel %vm158_vm1, %v1774_v40, %v1776_v57 }
 0x307   :  { %v6898_v55 = vpack.i.bf16 %v1856_v37, %v1858_v11  ;;  %v13972_v37 = vld [vmem:[#allocation11_spill] sm:$0xff] }
 0x308   :  { %6854 = vrot.lane.b32.xlu0 %v13956_v49, %s7362_s14  ;;  %6859 = vrot.lane.b32.xlu1 %v13959_v27, %s7363_s30  ;;  %v13967_v49 = vpack.i.bf16 %v10108_v56, %v9719_v58  ;;  %v1786_v27 = vrot.slane %v13920_v41, 2  ;;  %v13969_v58 = vpack.i.bf16 %v10150_v22, %v10168_v53  ;;  %v13970_v56 = vrot.slane %v9992_v50, 2 }
 0x309   :  { %v1782_v41 = vrot.slane %v13917_v3, 2  ;;  %v1790_v22 = vrot.slane %v13925_v29, 2  ;;  %v1840_v29 = vsel %vm158_vm1, %v1792_v31, %v1794_v10  ;;  %v13974_v11 = vpack.i.bf16 %v13972_v37, %v13973_v17  ;;  %v7241_v37 = vld [vmem:[%s13198_s3 + $0x200] ss:$8 sps:$4 sm:$0xff]  }
 0x30a   :  { %v1862_v61 = vsel %vm158_vm1, %v13970_v56, %v1772_v23  ;;  %v1848_v53 = vsel %vm158_vm1, %v1784_v62, %v1786_v27  ;;  %v1838_v23 = vsel %vm158_vm1, %v1794_v10, %v1796_v44  ;;  %v13988_v17 = vpack.c.bf16 %v10201_v30, %v13907_v14 }
 0x30b   :  { %v6893_v47 = vpack.i.bf16 %v1860_v0, %v1862_v61  ;;  %v1852_v50 = vsel %vm158_vm1, %v1780_v36, %v1782_v41  ;;  %v1850_v3 = vsel %vm158_vm1, %v1782_v41, %v1784_v62  ;;  %v1842_v5 = vsel %vm158_vm1, %v1790_v22, %v1792_v31  ;;  %v13978_v62 = vld [vmem:[#allocation78_spill] sm:$0xff] }
 0x30c   :  { %6864 = vrot.lane.b32.xlu0 %v13962_v52, %s7362_s14  ;;  %6869 = vrot.lane.b32.xlu1 %v13965_v35, %s7363_s30  ;;  %v1854_v52 = vsel %vm158_vm1, %v1778_v15, %v1780_v36  ;;  %v6908_v18 = vpack.i.bf16 %v1848_v53, %v1850_v3  ;;  %v1844_v35 = vsel %vm158_vm1, %v1788_v1, %v1790_v22  ;;  %v13979_v36 = vld [vmem:[#allocation77_spill] sm:$0xff]  ;;  %v13981_v53 = vld [vmem:[#allocation79_spill] sm:$0xff]  ;;  %v13982_v22 = vld [vmem:[#allocation80_spill] sm:$0xff] }
 0x30d   :  { %v6903_v20 = vpack.i.bf16 %v1852_v50, %v1854_v52  ;;  %v1846_v15 = vsel %vm158_vm1, %v1786_v27, %v1788_v1  ;;  %v6918_v40 = vpack.i.bf16 %v1840_v29, %v1842_v5  ;;  %v13980_v56 = vpack.i.bf16 %v13978_v62, %v13979_v36  ;;  %v13984_v50 = vld [vmem:[#allocation74_spill] sm:$0xff]  ;;  %v13985_v3 = vld [vmem:[#allocation81_spill] sm:$0xff] }
 0x30e   :  { %v6913_v57 = vpack.i.bf16 %v1844_v35, %v1846_v15  ;;  %v13983_v10 = vpack.i.bf16 %v13981_v53, %v13982_v22  ;;  %v13986_v1 = vpack.i.bf16 %v13984_v50, %v13985_v3  ;;  %v13987_v5 = vld [vmem:[#allocation82_spill] sm:$0xff]  ;;  %v7252_v3 = vld [vmem:[%s13198_s3 + $0x234] ss:$8 sps:$4 sm:$0xff]  }
 0x310   :  { %6874 = vrot.lane.b32.xlu0 %v13966_v39, %s7363_s30  ;;  %6879 = vrot.lane.b32.xlu1 %v13967_v49, %s7363_s30  ;;  %v13971_v39 = vrot.slane %v13937_v51, 2  ;;  %v13975_v51 = vld [vmem:[#allocation75_spill] sm:$0xff] }
 0x312   :  { %v1836_v49 = vsel %vm158_vm1, %v1796_v44, %v13971_v39 }
 0x313   :  { %v6923_v0 = vpack.i.bf16 %v1836_v49, %v1838_v23 }
 0x314   :  { %6884 = vrot.lane.b32.xlu0 %v13968_v21, %s7363_s30  ;;  %6889 = vrot.lane.b32.xlu1 %v13969_v58, %s7363_s30  ;;  %v13976_v21 = vld [vmem:[#allocation76_spill] sm:$0xff] }
 0x315   :  { %v13977_v58 = vpack.i.bf16 %v13975_v51, %v13976_v21 }
 0x316   :  { %v6680_v27 = vpop.permute.xlu1 %6679 }
 0x317   :  { %v6682_v41 = vunpack.i.h.bf16 %v6680_v27  ;;  %v6681_v31 = vunpack.i.l.bf16 %v6680_v27  ;;  %v7244_v27 = vld [vmem:[%s13198_s3 + $0x210] ss:$8 sps:$4 sm:$0xff]  }
 0x318   :  { %6894 = vrot.lane.b32.xlu0 %v6893_v47, %s7363_s30  ;;  %6899 = vrot.lane.b32.xlu1 %v6898_v55, %s7363_s30 }
 0x31a   :  { %v6690_v61 = vpop.permute.xlu1 %6689 }
 0x31b   :  { %v6692_v47 = vunpack.i.h.bf16 %v6690_v61  ;;  %v6691_v55 = vunpack.i.l.bf16 %v6690_v61 }
 0x31c   :  { %6904 = vrot.lane.b32.xlu0 %v6903_v20, %s7363_s30  ;;  %6909 = vrot.lane.b32.xlu1 %v6908_v18, %s7363_s30 }
 0x31d   :  { %v10519_v52 = vpop.permute.xlu0 %6684  ;;  %v2075_v35 = vsel %vm2073_vm14, %v6692_v47, %v6682_v41  ;;  %v2074_v29 = vsel %vm2073_vm14, %v6691_v55, %v6681_v31  ;;  %v2523_v15 = vsel %vm2073_vm14, %v13987_v5, %v6691_v55  ;;  %v2524_v44 = vsel %vm2073_vm14, %v10210_v9, %v6692_v47  ;;  %v7246_v9 = vld [vmem:[%s13198_s3 + $0x214] ss:$8 sps:$4 sm:$0xff]  }
 0x31e   :  { %v13428_v20 = vunpack.i.h.bf16 %v10519_v52  ;;  %v6686_v18 = vunpack.i.l.bf16 %v10519_v52 }
 0x320   :  { %6914 = vrot.lane.b32.xlu0 %v6913_v57, %s7363_s30  ;;  %6919 = vrot.lane.b32.xlu1 %v6918_v40, %s7363_s30  ;;  %v2589_v57 = vpack.c.bf16 %v2075_v35, %v2074_v29  ;;  %v2588_v40 = vpack.c.bf16 %v2524_v44, %v2523_v15  ;;  %v2555_v39 = vsel %vm2394_vm0, %v6681_v31, %v6686_v18  ;;  %v7250_v29 = vld [vmem:[%s13198_s3 + $0x230] ss:$8 sps:$4 sm:$0xff]  }
 0x321   :  { %v2556_v49 = vsel %vm2394_vm0, %v6682_v41, %v13428_v20  ;;  %v6695_v23 = vpop.permute.xlu0 %6694 }
 0x322   :  { %3269 = vmatprep.mubr.bf16.mxu0 %v2588_v40  ;;  %v6697_v51 = vunpack.i.h.bf16 %v6695_v23  ;;  %v6696_v21 = vunpack.i.l.bf16 %v6695_v23 }
 0x323   :  { %3270 = vmatmul.mubr.bf16.vlgmr.msra.gmra.mrb[64].mxu0 %v13988_v17 }
 0x324   :  { %6924 = vrot.lane.b32.xlu0 %v6923_v0, %s7363_s30  ;;  %6929 = vrot.lane.b32.xlu1 %v13974_v11, %s7363_s30  ;;  %v2590_v0 = vpack.c.bf16 %v2556_v49, %v2555_v39  ;;  %v7255_v39 = vld [vmem:[%s13198_s3 + $0x244] ss:$8 sps:$4 sm:$0xff]  }
 0x325   :  { %v6705_v11 = vpop.permute.xlu0 %6704 }
 0x326   :  { %3462 = vmatprep.mubr.bf16.mxu1 %v2590_v0  ;;  %v6707_v62 = vunpack.i.h.bf16 %v6705_v11  ;;  %v6706_v36 = vunpack.i.l.bf16 %v6705_v11 }
 0x327   :  { %3463 = vmatmul.mubr.bf16.vlgmr.msra.gmra.mrb[36].mxu1 %v2589_v57 }
 0x328   :  { %6934 = vrot.lane.b32.xlu0 %v13977_v58, %s7363_s30  ;;  %6939 = vrot.lane.b32.xlu1 %v13980_v56, %s7363_s30  ;;  %v7249_v56 = vld [vmem:[%s13198_s3 + $0x224] ss:$8 sps:$4 sm:$0xff]   ;;  %v2525_v61 = vsel %vm2073_vm14, %v10225_v25, %v6706_v36  ;;  %v2526_v41 = vsel %vm2073_vm14, %v10221_v26, %v6707_v62  ;;  %v2076_v31 = vsel %vm2073_vm14, %v6706_v36, %v6696_v21  ;;  %v7247_v26 = vld [vmem:[%s13198_s3 + $0x220] ss:$8 sps:$4 sm:$0xff]  }
 0x329   :  { %3624 = vmatpush1.bf16.msra.mxu1 %v7241_v37  ;;  %v2077_v47 = vsel %vm2073_vm14, %v6707_v62, %v6697_v51  ;;  %v2594_v55 = vpack.c.bf16 %v2526_v41, %v2525_v61  ;;  %v13990_v62 = vpack.c.bf16 %v10286_v54, %v10270_v16  ;;  %v7256_v36 = vld [vmem:[%s13198_s3 + $0x250] ss:$8 sps:$4 sm:$0xff]  }
 0x32a   :  { %v10555_v58 = vpop.permute.xlu1 %6699  ;;  %3625 = vmatprep.subr.bf16.mxu1 %v7246_v9 }
 0x32b   :  { %v13402_v30 = vunpack.i.h.bf16 %v10555_v58  ;;  %v13403_v14 = vunpack.i.l.bf16 %v10555_v58  ;;  %3279 = vmatprep.mubr.bf16.mxu0 %v2594_v55 }
 0x32c   :  { %6944 = vrot.lane.b32.xlu0 %v13983_v10, %s7363_s30  ;;  %6949 = vrot.lane.b32.xlu1 %v13986_v1, %s7363_s30  ;;  %v2595_v10 = vpack.c.bf16 %v2077_v47, %v2076_v31  ;;  %v13989_v1 = vpack.c.bf16 %v10246_v42, %v10250_v34  ;;  %v7261_v47 = vld [vmem:[%s13198_s3 + $0x264] ss:$8 sps:$4 sm:$0xff]  }
 0x32d   :  { %v2557_v53 = vsel %vm2394_vm0, %v6696_v21, %v13403_v14  ;;  %v2558_v22 = vsel %vm2394_vm0, %v6697_v51, %v13402_v30  ;;  %3626 = vmatpush1.bf16.msra.mxu1 %v7244_v27  ;;  %v7258_v21 = vld [vmem:[%s13198_s3 + $0x254] ss:$8 sps:$4 sm:$0xff]  }
 0x32e   :  { %v2596_v25 = vpack.c.bf16 %v2558_v22, %v2557_v53  ;;  %3627 = vmatprep.subr.bf16.mxu1 %v7249_v56  ;;  %3280 = vmatmul.mubr.bf16.gmra.mrb[68].mxu0 %v13989_v1 }
 0x32f   :  { %v6710_v50 = vpop.permute.xlu1 %6709 }
 0x330   :  { %3472 = vmatprep.mubr.bf16.mxu1 %v2596_v25  ;;  %v6712_v5 = vunpack.i.h.bf16 %v6710_v50  ;;  %v6711_v15 = vunpack.i.l.bf16 %v6710_v50 }
 0x331   :  { %3473 = vmatmul.mubr.bf16.gmra.mrb[40].mxu1 %v2595_v10 }
 0x332   :  { %3628 = vmatpush1.bf16.msra.mxu1 %v7247_v26 }
 0x333   :  { %v6720_v35 = vpop.permute.xlu1 %6719  ;;  %3629 = vmatprep.subr.bf16.mxu1 %v7252_v3 }
 0x334   :  { %v6722_v44 = vunpack.i.h.bf16 %v6720_v35  ;;  %v6721_v57 = vunpack.i.l.bf16 %v6720_v35 }
 0x336   :  { %v10586_v40 = vpop.permute.xlu0 %6714  ;;  %v2527_v49 = vsel %vm2073_vm14, %v10256_v32, %v6721_v57  ;;  %v2528_v23 = vsel %vm2073_vm14, %v10265_v2, %v6722_v44  ;;  %v2078_v0 = vsel %vm2073_vm14, %v6721_v57, %v6711_v15  ;;  %v2079_v37 = vsel %vm2073_vm14, %v6722_v44, %v6712_v5  ;;  %3630 = vmatpush1.bf16.msra.mxu1 %v7250_v29  ;;  %v7253_v32 = vld [vmem:[%s13198_s3 + $0x240] ss:$8 sps:$4 sm:$0xff]  }
 0x337   :  { %v13400_v42 = vunpack.i.h.bf16 %v10586_v40  ;;  %v13401_v34 = vunpack.i.l.bf16 %v10586_v40  ;;  %v2600_v9 = vpack.c.bf16 %v2528_v23, %v2527_v49  ;;  %v2601_v27 = vpack.c.bf16 %v2079_v37, %v2078_v0  ;;  %3631 = vmatprep.subr.bf16.mxu1 %v7255_v39  ;;  %v7262_v0 = vld [vmem:[%s13198_s3 + $0x270] ss:$8 sps:$4 sm:$0xff]  }
 0x338   :  { %v13991_v44 = vpack.c.bf16 %v10303_v48, %v10307_v24 }
 0x339   :  { %v2559_v17 = vsel %vm2394_vm0, %v6711_v15, %v13401_v34  ;;  %v2560_v11 = vsel %vm2394_vm0, %v6712_v5, %v13400_v42  ;;  %3289 = vmatprep.mubr.bf16.mxu0 %v2600_v9  ;;  %v7259_v5 = vld [vmem:[%s13198_s3 + $0x260] ss:$8 sps:$4 sm:$0xff]  }
 0x33a   :  { %v2602_v51 = vpack.c.bf16 %v2560_v11, %v2559_v17  ;;  %3290 = vmatmul.mubr.bf16.gmra.mrb[72].mxu0 %v13990_v62  ;;  %3632 = vmatpush1.bf16.msra.mxu1 %v7253_v32  ;;  %v14012_v42 = vld [vmem:[#allocation22_spill] sm:$0xff] }
 0x33b   :  { %v6725_v2 = vpop.permute.xlu0 %6724  ;;  %3633 = vmatprep.subr.bf16.mxu1 %v7258_v21  ;;  %v14013_v34 = vunpack.i.l.bf16 %v14012_v42 }
 0x33c   :  { %3482 = vmatprep.mubr.bf16.mxu1 %v2602_v51  ;;  %v6727_v56 = vunpack.i.h.bf16 %v6725_v2  ;;  %v6726_v61 = vunpack.i.l.bf16 %v6725_v2 }
 0x33d   :  { %3483 = vmatmul.mubr.bf16.gmra.mrb[44].mxu1 %v2601_v27 }
 0x33e   :  { %3634 = vmatpush1.bf16.msra.mxu1 %v7256_v36 }
 0x33f   :  { %v6735_v31 = vpop.permute.xlu0 %6734  ;;  %3635 = vmatprep.subr.bf16.mxu1 %v7261_v47 }
 0x340   :  { %v10617_v41 = vpop.permute.xlu1 %6729  ;;  %v6737_v54 = vunpack.i.h.bf16 %v6735_v31  ;;  %v6736_v53 = vunpack.i.l.bf16 %v6735_v31 }
 0x341   :  { %v13398_v55 = vunpack.i.h.bf16 %v10617_v41  ;;  %v13399_v16 = vunpack.i.l.bf16 %v10617_v41 }
 0x342   :  { %v2529_v50 = vsel %vm2073_vm14, %v10299_v45, %v6736_v53  ;;  %v2530_v25 = vsel %vm2073_vm14, %v10295_v60, %v6737_v54  ;;  %v2080_v35 = vsel %vm2073_vm14, %v6736_v53, %v6726_v61  ;;  %v2081_v29 = vsel %vm2073_vm14, %v6737_v54, %v6727_v56  ;;  %v7264_v45 = vld [vmem:[%s13198_s3 + $0x274] ss:$8 sps:$4 sm:$0xff]   ;;  %v2763_v60 = vld [vmem:[%s13198_s3 + $0x280] sm:$0xff]  ;;  %3636 = vmatpush1.bf16.msra.mxu1 %v7259_v5 }
 0x343   :  { %v2561_v22 = vsel %vm2394_vm0, %v6726_v61, %v13399_v16  ;;  %v2562_v10 = vsel %vm2394_vm0, %v6727_v56, %v13398_v55  ;;  %v2606_v1 = vpack.c.bf16 %v2530_v25, %v2529_v50  ;;  %v2607_v15 = vpack.c.bf16 %v2081_v29, %v2080_v35  ;;  %3637 = vmatprep.subr.bf16.mxu1 %v7264_v45 }
 0x344   :  { %v2608_v3 = vpack.c.bf16 %v2562_v10, %v2561_v22  ;;  %v5856_v37 = vcombine.high %v2763_v60, %v2763_v60  ;;  %v5855_v48 = vcombine.low %v2763_v60, %v2763_v60  ;;  %v13992_v10 = vpack.c.bf16 %v10319_v33, %v10325_v4 }
 0x345   :  { %v6740_v26 = vpop.permute.xlu1 %6739  ;;  %3299 = vmatprep.mubr.bf16.mxu0 %v2606_v1 }
 0x346   :  { %3492 = vmatprep.mubr.bf16.mxu1 %v2608_v3  ;;  %3300 = vmatmul.mubr.bf16.gmra.mrb[76].mxu0 %v13991_v44  ;;  %v6742_v57 = vunpack.i.h.bf16 %v6740_v26  ;;  %v6741_v39 = vunpack.i.l.bf16 %v6740_v26  ;;  %v3232_v22 = vsel %vm3230_vm3, %v5855_v48, 0 }
 0x347   :  { %3493 = vmatmul.mubr.bf16.gmra.mrb[48].mxu1 %v2607_v15 }
 0x348   :  { %3638 = vmatpush1.bf16.msra.mxu1 %v7262_v0 }
 0x349   :  { %v6750_v49 = vpop.permute.xlu1 %6749  ;;  %5857 = vmatprep.subr.msk.bf16.mxu1 %vm3230_vm3, %v5856_v37 }
 0x34a   :  { %v10648_v23 = vpop.permute.xlu0 %6744  ;;  %v6752_v9 = vunpack.i.h.bf16 %v6750_v49  ;;  %v6751_v17 = vunpack.i.l.bf16 %v6750_v49 }
 0x34b   :  { %v6747_v11 = vunpack.i.h.bf16 %v10648_v23  ;;  %v6746_v27 = vunpack.i.l.bf16 %v10648_v23 }
 0x34c   :  { %v2531_v24 = vsel %vm2073_vm14, %v10315_v59, %v6751_v17  ;;  %v2532_v51 = vsel %vm2073_vm14, %v10311_v46, %v6752_v9  ;;  %v2082_v61 = vsel %vm2073_vm14, %v6751_v17, %v6741_v39  ;;  %v2083_v59 = vsel %vm2073_vm14, %v6752_v9, %v6742_v57  ;;  %3640 = vmatpush1.bf16.msra.mxu1 %v3232_v22 }
 0x34d   :  { %v2563_v32 = vsel %vm2394_vm0, %v6741_v39, %v6746_v27  ;;  %v2564_v2 = vsel %vm2394_vm0, %v6742_v57, %v6747_v11  ;;  %v10665_v62 = vpop.permute.xlu1 %6759  ;;  %v2612_v36 = vpack.c.bf16 %v2532_v51, %v2531_v24  ;;  %v2613_v53 = vpack.c.bf16 %v2083_v59, %v2082_v61 }
 0x34e   :  { %v6755_v21 = vpop.permute.xlu0 %6754  ;;  %v2614_v56 = vpack.c.bf16 %v2564_v2, %v2563_v32  ;;  %v6762_v47 = vunpack.i.h.bf16 %v10665_v62  ;;  %v6761_v54 = vunpack.i.l.bf16 %v10665_v62  ;;  %v13994_v17 = vrot.slane %v10071_v12, 6 }
 0x34f   :  { %v6757_v31 = vunpack.i.h.bf16 %v6755_v21  ;;  %v6756_v46 = vunpack.i.l.bf16 %v6755_v21  ;;  %3309 = vmatprep.mubr.bf16.mxu0 %v2612_v36  ;;  %v13995_v24 = vpack.c.bf16 %v10363_v6, %v10354_v13 }
 0x350   :  { %3502 = vmatprep.mubr.bf16.mxu1 %v2614_v56  ;;  %3310 = vmatmul.mubr.bf16.gmra.mrb[80].mxu0 %v13992_v10 }
 0x351   :  { %v2565_v50 = vsel %vm2394_vm0, %v6756_v46, %v6761_v54  ;;  %v2566_v25 = vsel %vm2394_vm0, %v6757_v31, %v6762_v47  ;;  %3503 = vmatmul.mubr.bf16.gmra.mrb[52].mxu1 %v2613_v53  ;;  %v6770_v3 = vpop.permute.xlu1 %6769 }
 0x352   :  { %v6765_v26 = vpop.permute.xlu0 %6764  ;;  %v2620_v1 = vpack.c.bf16 %v2566_v25, %v2565_v50  ;;  %v6772_v45 = vunpack.i.h.bf16 %v6770_v3  ;;  %v6771_v60 = vunpack.i.l.bf16 %v6770_v3 }
 0x353   :  { %v6767_v35 = vunpack.i.h.bf16 %v6765_v26  ;;  %v6766_v29 = vunpack.i.l.bf16 %v6765_v26 }
 0x354   :  { %3512 = vmatprep.mubr.bf16.mxu1 %v2620_v1 }
 0x355   :  { %v2533_v33 = vsel %vm2073_vm14, %v10350_v28, %v6766_v29  ;;  %v2534_v4 = vsel %vm2073_vm14, %v10346_v19, %v6767_v35  ;;  %v2084_v5 = vsel %vm2073_vm14, %v6766_v29, %v6756_v46  ;;  %v2085_v15 = vsel %vm2073_vm14, %v6767_v35, %v6757_v31  ;;  %v6780_v57 = vpop.permute.xlu1 %6779 }
 0x356   :  { %v10688_v44 = vpop.permute.xlu0 %6774  ;;  %v2618_v39 = vpack.c.bf16 %v2534_v4, %v2533_v33  ;;  %v2619_v49 = vpack.c.bf16 %v2085_v15, %v2084_v5  ;;  %v6782_v9 = vunpack.i.h.bf16 %v6780_v57  ;;  %v6781_v28 = vunpack.i.l.bf16 %v6780_v57  ;;  %v13997_v5 = vld [vmem:[#allocation21_spill] sm:$0xff] }
 0x357   :  { %v6777_v0 = vunpack.i.h.bf16 %v10688_v44  ;;  %v6776_v37 = vunpack.i.l.bf16 %v10688_v44  ;;  %v13993_v19 = vrot.slane %v9424_v43, 6  ;;  %v13996_v29 = vpack.c.bf16 %v10377_v38, %v10383_v8 }
 0x358   :  { %3319 = vmatprep.mubr.bf16.mxu0 %v2618_v39  ;;  %v2535_v43 = vsel %vm2073_vm14, %v10371_v63, %v6781_v28  ;;  %v2086_v31 = vsel %vm2073_vm14, %v6781_v28, %v6771_v60  ;;  %v2087_v63 = vsel %vm2073_vm14, %v6782_v9, %v6772_v45  ;;  %v13998_v15 = vunpack.i.l.bf16 %v13997_v5 }
 0x359   :  { %v1726_v48 = vsel %vm1688_vm10, %v13994_v17, %v13993_v19  ;;  %3320 = vmatmul.mubr.bf16.gmra.mrb[84].mxu0 %v13995_v24  ;;  %v2567_v51 = vsel %vm2394_vm0, %v6771_v60, %v6776_v37  ;;  %v2568_v32 = vsel %vm2394_vm0, %v6772_v45, %v6777_v0  ;;  %3513 = vmatmul.mubr.bf16.gmra.mrb[56].mxu1 %v2619_v49  ;;  %v10710_v21 = vpop.permute.xlu1 %6789  ;;  %v13999_v60 = vunpack.i.h.bf16 %v13997_v5 }
 0x35a   :  { %v2536_v12 = vsel %vm2073_vm14, %v1726_v48, %v6782_v9  ;;  %v2626_v36 = vpack.c.bf16 %v2568_v32, %v2567_v51  ;;  %v6792_v61 = vunpack.i.h.bf16 %v10710_v21  ;;  %v6791_v59 = vunpack.i.l.bf16 %v10710_v21 }
 0x35b   :  { %v2624_v6 = vpack.c.bf16 %v2536_v12, %v2535_v43  ;;  %v2625_v25 = vpack.c.bf16 %v2087_v63, %v2086_v31  ;;  %v14000_v43 = vld [vmem:[#allocation20_spill] sm:$0xff]  ;;  %vm4454_vm10 = vcmask 1045509  }
 0x35c   :  { %3522 = vmatprep.mubr.bf16.mxu1 %v2626_v36  ;;  %v14001_v12 = vunpack.i.l.bf16 %v14000_v43  ;;  %v14002_v36 = vunpack.i.h.bf16 %v14000_v43 }
 0x35d   :  { %3329 = vmatprep.mubr.bf16.mxu0 %v2624_v6  ;;  %v10722_v10 = vpop.permute.xlu1 %6799 }
 0x35e   :  { %v6785_v2 = vpop.permute.xlu0 %6784  ;;  %v6802_v1 = vunpack.i.h.bf16 %v10722_v10  ;;  %v6801_v35 = vunpack.i.l.bf16 %v10722_v10 }
 0x35f   :  { %v6787_v13 = vunpack.i.h.bf16 %v6785_v2  ;;  %v6786_v56 = vunpack.i.l.bf16 %v6785_v2 }
 0x361   :  { %v2569_v46 = vsel %vm2394_vm0, %v6786_v56, %v6791_v59  ;;  %v2570_v53 = vsel %vm2394_vm0, %v6787_v13, %v6792_v61  ;;  %3330 = vmatmul.mubr.bf16.gmra.mrb[88].mxu0 %v13996_v29  ;;  %3523 = vmatmul.mubr.bf16.gmra.mrb[60].mxu1 %v2625_v25  ;;  %v2088_v45 = vsel %vm2073_vm14, %v13998_v15, %v6786_v56 }
 0x362   :  { %v6795_v22 = vpop.permute.xlu0 %6794  ;;  %v2632_v50 = vpack.c.bf16 %v2570_v53, %v2569_v46  ;;  %v2089_v57 = vsel %vm2073_vm14, %v13999_v60, %v6787_v13 }
 0x363   :  { %v6797_v26 = vunpack.i.h.bf16 %v6795_v22  ;;  %v6796_v3 = vunpack.i.l.bf16 %v6795_v22  ;;  %v2631_v9 = vpack.c.bf16 %v2089_v57, %v2088_v45 }
 0x364   :  { %3532 = vmatprep.mubr.bf16.mxu1 %v2632_v50 }
 0x365   :  { %v2571_v39 = vsel %vm2394_vm0, %v6796_v3, %v6801_v35  ;;  %v2572_v38 = vsel %vm2394_vm0, %v6797_v26, %v6802_v1  ;;  %v2090_v2 = vsel %vm2073_vm14, %v14001_v12, %v6796_v3  ;;  %v2091_v6 = vsel %vm2073_vm14, %v14002_v36, %v6797_v26 }
 0x366   :  { %v6805_v33 = vpop.permute.xlu0 %6804  ;;  %v10729_v4 = vpop.permute.xlu1 %6809  ;;  %v2638_v28 = vpack.c.bf16 %v2572_v38, %v2571_v39  ;;  %v2637_v46 = vpack.c.bf16 %v2091_v6, %v2090_v2  ;;  %v14006_v6 = vld [vmem:[#allocation30_spill] sm:$0xff] }
 0x367   :  { %v6807_v19 = vunpack.i.h.bf16 %v6805_v33  ;;  %v6806_v17 = vunpack.i.l.bf16 %v6805_v33  ;;  %v6812_v48 = vunpack.i.h.bf16 %v10729_v4  ;;  %v6811_v24 = vunpack.i.l.bf16 %v10729_v4  ;;  %v14003_v33 = vld [vmem:[#allocation18_spill] sm:$0xff] }
 0x368   :  { %v14004_v5 = vunpack.i.l.bf16 %v14003_v33  ;;  %v14005_v45 = vunpack.i.h.bf16 %v14003_v33 }
 0x369   :  { %3533 = vmatmul.mubr.bf16.gmra.mrb[0].mxu1 %v2631_v9  ;;  %v2573_v13 = vsel %vm2394_vm0, %v6806_v17, %v6811_v24  ;;  %v2574_v56 = vsel %vm2394_vm0, %v6807_v19, %v6812_v48 }
 0x36a   :  { %v6815_v8 = vpop.permute.xlu0 %6814  ;;  %v10743_v49 = vpop.permute.xlu1 %6819  ;;  %3542 = vmatprep.mubr.bf16.mxu1 %v2638_v28  ;;  %v2644_v53 = vpack.c.bf16 %v2574_v56, %v2573_v13  ;;  %v2092_v15 = vsel %vm2073_vm14, %v14004_v5, %v6806_v17  ;;  %v2093_v60 = vsel %vm2073_vm14, %v14005_v45, %v6807_v19  ;;  %v14007_v13 = vunpack.i.l.bf16 %v14006_v6 }
 0x36b   :  { %v6817_v22 = vunpack.i.h.bf16 %v6815_v8  ;;  %v6816_v50 = vunpack.i.l.bf16 %v6815_v8  ;;  %v6822_v25 = vunpack.i.h.bf16 %v10743_v49  ;;  %v6821_v26 = vunpack.i.l.bf16 %v10743_v49 }
 0x36c   :  { %v2643_v9 = vpack.c.bf16 %v2093_v60, %v2092_v15 }
 0x36d   :  { %v2575_v57 = vsel %vm2394_vm0, %v6816_v50, %v6821_v26  ;;  %v2576_v39 = vsel %vm2394_vm0, %v6817_v22, %v6822_v25  ;;  %v2094_v56 = vsel %vm2073_vm14, %v14007_v13, %v6816_v50 }
 0x36e   :  { %v6825_v51 = vpop.permute.xlu0 %6824  ;;  %v10747_v32 = vpop.permute.xlu1 %6829  ;;  %v2650_v28 = vpack.c.bf16 %v2576_v39, %v2575_v57 }
 0x36f   :  { %v6827_v43 = vunpack.i.h.bf16 %v6825_v51  ;;  %v6826_v17 = vunpack.i.l.bf16 %v6825_v51  ;;  %v6832_v12 = vunpack.i.h.bf16 %v10747_v32  ;;  %v6831_v19 = vunpack.i.l.bf16 %v10747_v32 }
 0x371   :  { %3543 = vmatmul.mubr.bf16.gmra.mrb[4].mxu1 %v2637_v46  ;;  %v14008_v46 = vunpack.i.h.bf16 %v14006_v6  ;;  %v2577_v51 = vsel %vm2394_vm0, %v6826_v17, %v6831_v19  ;;  %v2578_v33 = vsel %vm2394_vm0, %v6827_v43, %v6832_v12  ;;  %v14009_v6 = vld [vmem:[#allocation23_spill] sm:$0xff] }
 0x372   :  { %v10761_v31 = vpop.permute.xlu0 %6834  ;;  %v10763_v63 = vpop.permute.xlu1 %6839  ;;  %3552 = vmatprep.mubr.bf16.mxu1 %v2644_v53  ;;  %v2656_v60 = vpack.c.bf16 %v2578_v33, %v2577_v51  ;;  %v14010_v13 = vunpack.i.l.bf16 %v14009_v6 }
 0x373   :  { %v2095_v53 = vsel %vm2073_vm14, %v14008_v46, %v6817_v22  ;;  %v6837_v50 = vunpack.i.h.bf16 %v10761_v31  ;;  %v6836_v57 = vunpack.i.l.bf16 %v10761_v31  ;;  %v6842_v22 = vunpack.i.h.bf16 %v10763_v63 }
 0x374   :  { %v2649_v45 = vpack.c.bf16 %v2095_v53, %v2094_v56  ;;  %v6841_v39 = vunpack.i.l.bf16 %v10763_v63  ;;  %v2096_v46 = vsel %vm2073_vm14, %v14010_v13, %v6826_v17  ;;  %v14011_v56 = vunpack.i.h.bf16 %v14009_v6 }
 0x375   :  { %v2580_v51 = vsel %vm2394_vm0, %v6837_v50, %v6842_v22  ;;  %v2098_v30 = vsel %vm2073_vm14, %v14013_v34, %v6836_v57 }
 0x376   :  { %v10767_v3 = vpop.permute.xlu0 %6844  ;;  %v10769_v29 = vpop.permute.xlu1 %6849  ;;  %v2097_v53 = vsel %vm2073_vm14, %v14011_v56, %v6827_v43  ;;  %v2579_v31 = vsel %vm2394_vm0, %v6836_v57, %v6841_v39 }
 0x377   :  { %v6847_v13 = vunpack.i.h.bf16 %v10767_v3  ;;  %v6846_v56 = vunpack.i.l.bf16 %v10767_v3  ;;  %v2662_v16 = vpack.c.bf16 %v2580_v51, %v2579_v31  ;;  %v6852_v14 = vunpack.i.h.bf16 %v10769_v29 }
 0x378   :  { %v14014_v31 = vunpack.i.h.bf16 %v14012_v42 }
 0x379   :  { %3553 = vmatmul.mubr.bf16.gmra.mrb[8].mxu1 %v2643_v9  ;;  %v2582_v62 = vsel %vm2394_vm0, %v6847_v13, %v6852_v14 }
 0x37a   :  { %v10783_v38 = vpop.permute.xlu0 %6854  ;;  %v10785_v8 = vpop.permute.xlu1 %6859  ;;  %3562 = vmatprep.mubr.bf16.mxu1 %v2650_v28  ;;  %v2099_v51 = vsel %vm2073_vm14, %v14014_v31, %v6837_v50 }
 0x37b   :  { %v6862_v21 = vunpack.i.h.bf16 %v10785_v8 }
 0x37e   :  { %v10789_v2 = vpop.permute.xlu0 %6864  ;;  %v10791_v36 = vpop.permute.xlu1 %6869 }
 0x37f   :  { %v6866_v32 = vunpack.i.l.bf16 %v10789_v2 }
 0x381   :  { %3563 = vmatmul.mubr.bf16.gmra.mrb[12].mxu1 %v2649_v45 }
 0x382   :  { %v10805_v5 = vpop.permute.xlu0 %6874  ;;  %v10807_v15 = vpop.permute.xlu1 %6879  ;;  %3572 = vmatprep.mubr.bf16.mxu1 %v2656_v60  ;;  %v2655_v60 = vpack.c.bf16 %v2097_v53, %v2096_v46  ;;  %v6851_v46 = vunpack.i.l.bf16 %v10769_v29 }
 0x386   :  { %v10813_v9 = vpop.permute.xlu0 %6884  ;;  %v10815_v28 = vpop.permute.xlu1 %6889 }
 0x389   :  { %3573 = vmatmul.mubr.bf16.gmra.mrb[16].mxu1 %v2655_v60 }
 0x38a   :  { %v10829_v33 = vpop.permute.xlu0 %6894  ;;  %v10831_v45 = vpop.permute.xlu1 %6899  ;;  %3582 = vmatprep.mubr.bf16.mxu1 %v2662_v16 }
 0x38b   :  { %v13406_v55 = vunpack.i.h.bf16 %v10829_v33  ;;  %v13415_v17 = vunpack.i.l.bf16 %v10829_v33  ;;  %v13404_v6 = vunpack.i.h.bf16 %v10831_v45  ;;  %v13405_v43 = vunpack.i.l.bf16 %v10831_v45 }
 0x38d   :  { %v10849_v53 = vsel %vm2394_vm0, %v6746_v27, %v13415_v17  ;;  %v10856_v3 = vsel %vm2394_vm0, %v6747_v11, %v13406_v55  ;;  %v10872_v23 = vsel %vm2394_vm0, %v6761_v54, %v13405_v43  ;;  %v10879_v11 = vsel %vm2394_vm0, %v6762_v47, %v13404_v6 }
 0x38e   :  { %v10858_v34 = vpop.permute.xlu0 %6904  ;;  %v10860_v57 = vpop.permute.xlu1 %6909  ;;  %v2581_v27 = vsel %vm2394_vm0, %v6846_v56, %v6851_v46  ;;  %v2661_v43 = vpack.c.bf16 %v2099_v51, %v2098_v30 }
 0x38f   :  { %v13407_v42 = vunpack.i.h.bf16 %v10858_v34  ;;  %v13409_v50 = vunpack.i.l.bf16 %v10858_v34  ;;  %v13410_v60 = vunpack.i.h.bf16 %v10860_v57  ;;  %v13408_v31 = vunpack.i.l.bf16 %v10860_v57 }
 0x391   :  { %v10898_v16 = vsel %vm2394_vm0, %v6776_v37, %v13409_v50  ;;  %v10905_v47 = vsel %vm2394_vm0, %v6777_v0, %v13407_v42  ;;  %v10918_v37 = vsel %vm2394_vm0, %v6791_v59, %v13408_v31  ;;  %v10925_v44 = vsel %vm2394_vm0, %v6792_v61, %v13410_v60  ;;  %3583 = vmatmul.mubr.bf16.gmra.mrb[20].mxu1 %v2661_v43 }
 0x392   :  { %v10907_v54 = vpop.permute.xlu0 %6914  ;;  %v10909_v6 = vpop.permute.xlu1 %6919  ;;  %v6857_v42 = vunpack.i.h.bf16 %v10783_v38  ;;  %v6856_v59 = vunpack.i.l.bf16 %v10783_v38  ;;  %v2668_v31 = vpack.c.bf16 %v2582_v62, %v2581_v27  ;;  %v6861_v61 = vunpack.i.l.bf16 %v10785_v8 }
 0x393   :  { %v13411_v0 = vunpack.i.h.bf16 %v10907_v54  ;;  %v13412_v30 = vunpack.i.l.bf16 %v10907_v54  ;;  %v13414_v51 = vunpack.i.h.bf16 %v10909_v6  ;;  %v13413_v55 = vunpack.i.l.bf16 %v10909_v6 }
 0x394   :  { %3592 = vmatprep.mubr.bf16.mxu1 %v2668_v31  ;;  %v2584_v17 = vsel %vm2394_vm0, %v6857_v42, %v6862_v21 }
 0x395   :  { %v10942_v60 = vsel %vm2394_vm0, %v6801_v35, %v13412_v30  ;;  %v10949_v38 = vsel %vm2394_vm0, %v6802_v1, %v13411_v0  ;;  %v10962_v35 = vsel %vm2394_vm0, %v6811_v24, %v13413_v55  ;;  %v10969_v10 = vsel %vm2394_vm0, %v6812_v48, %v13414_v51  ;;  %v14015_v0 = vld [vmem:[#allocation25_spill] sm:$0xff] }
 0x396   :  { %v10951_v27 = vpop.permute.xlu0 %6924  ;;  %v10953_v62 = vpop.permute.xlu1 %6929  ;;  %v14016_v30 = vunpack.i.l.bf16 %v14015_v0  ;;  %v14017_v55 = vunpack.i.h.bf16 %v14015_v0  ;;  %v2583_v51 = vsel %vm2394_vm0, %v6856_v59, %v6861_v61 }
 0x397   :  { %v13416_v1 = vunpack.i.h.bf16 %v10951_v27  ;;  %v13417_v43 = vunpack.i.l.bf16 %v10951_v27  ;;  %v13419_v8 = vunpack.i.h.bf16 %v10953_v62  ;;  %v13418_v50 = vunpack.i.l.bf16 %v10953_v62 }
 0x398   :  { %v2100_v24 = vsel %vm2073_vm14, %v14016_v30, %v6846_v56  ;;  %v2101_v4 = vsel %vm2073_vm14, %v14017_v55, %v6847_v13 }
 0x399   :  { %v10990_v31 = vsel %vm2394_vm0, %v6821_v26, %v13417_v43  ;;  %v10997_v55 = vsel %vm2394_vm0, %v6822_v25, %v13416_v1  ;;  %v11010_v26 = vsel %vm2394_vm0, %v6831_v19, %v13418_v50  ;;  %v11017_v49 = vsel %vm2394_vm0, %v6832_v12, %v13419_v8  ;;  %v14018_v50 = vld [vmem:[#allocation24_spill] sm:$0xff] }
 0x39a   :  { %v10999_v13 = vpop.permute.xlu0 %6934  ;;  %v11001_v56 = vpop.permute.xlu1 %6939  ;;  %v6867_v1 = vunpack.i.h.bf16 %v10789_v2  ;;  %v2667_v43 = vpack.c.bf16 %v2101_v4, %v2100_v24  ;;  %v2674_v19 = vpack.c.bf16 %v2584_v17, %v2583_v51  ;;  %v6871_v12 = vunpack.i.l.bf16 %v10791_v36 }
 0x39b   :  { %v13420_v25 = vunpack.i.h.bf16 %v10999_v13  ;;  %v13423_v30 = vunpack.i.l.bf16 %v10999_v13  ;;  %v13422_v0 = vunpack.i.h.bf16 %v11001_v56  ;;  %v13421_v48 = vunpack.i.l.bf16 %v11001_v56 }
 0x39c   :  { %v6872_v51 = vunpack.i.h.bf16 %v10791_v36  ;;  %3593 = vmatmul.mubr.bf16.gmra.mrb[24].mxu1 %v2667_v43  ;;  %v14020_v29 = vunpack.i.h.bf16 %v14018_v50 }
 0x39d   :  { %v11033_v8 = vsel %vm2394_vm0, %v6841_v39, %v13423_v30  ;;  %v11040_v17 = vsel %vm2394_vm0, %v6842_v22, %v13420_v25  ;;  %v11054_v39 = vsel %vm2394_vm0, %v6851_v46, %v13421_v48  ;;  %v11061_v63 = vsel %vm2394_vm0, %v6852_v14, %v13422_v0  ;;  %3602 = vmatprep.mubr.bf16.mxu1 %v2674_v19 }
 0x39e   :  { %v11043_v2 = vpop.permute.xlu0 %6944  ;;  %v11045_v24 = vpop.permute.xlu1 %6949  ;;  %v14019_v25 = vunpack.i.l.bf16 %v14018_v50  ;;  %v2103_v14 = vsel %vm2073_vm14, %v14020_v29, %v6857_v42  ;;  %v2585_v0 = vsel %vm2394_vm0, %v6866_v32, %v6871_v12  ;;  %v6877_v48 = vunpack.i.h.bf16 %v10805_v5 }
 0x39f   :  { %v13424_v36 = vunpack.i.h.bf16 %v11043_v2  ;;  %v13425_v22 = vunpack.i.l.bf16 %v11043_v2  ;;  %v13427_v43 = vunpack.i.h.bf16 %v11045_v24  ;;  %v13426_v4 = vunpack.i.l.bf16 %v11045_v24 }
 0x3a0   :  { %v2102_v46 = vsel %vm2073_vm14, %v14019_v25, %v6856_v59  ;;  %v2586_v59 = vsel %vm2394_vm0, %v6867_v1, %v6872_v51  ;;  %v6876_v25 = vunpack.i.l.bf16 %v10805_v5  ;;  %v14024_v5 = vunpack.i.h.bf16 %v10519_v52 }
 0x3a1   :  { %v11079_v19 = vsel %vm2394_vm0, %v6861_v61, %v13425_v22  ;;  %v11084_v30 = vsel %vm2394_vm0, %v6862_v21, %v13424_v36  ;;  %v11092_v42 = vsel %vm2394_vm0, %v6871_v12, %v13426_v4  ;;  %v11097_v50 = vsel %vm2394_vm0, %v6872_v51, %v13427_v43  ;;  %v14021_v36 = vld [vmem:[#allocation27_spill] sm:$0xff] }
 0x3a2   :  { %v2681_v61 = vpack.c.bf16 %v11097_v50, %v11092_v42  ;;  %v2673_v21 = vpack.c.bf16 %v2103_v14, %v2102_v46  ;;  %v2680_v29 = vpack.c.bf16 %v2586_v59, %v2585_v0  ;;  %v14022_v22 = vunpack.i.l.bf16 %v14021_v36  ;;  %v2764_v42 = vld [vmem:[%s13199_s4] sm:$0x3]  ;;  %s7364_s4 = smov 112  }
 0x3a3   :  { %v14023_v4 = vunpack.i.h.bf16 %v14021_v36  ;;  %v2592_v20 = vpack.c.bf16 %v6877_v48, %v6876_v25  ;;  %v2395_v0 = vsel %vm2394_vm0, %v6686_v18, %v6876_v25  ;;  %v2396_v46 = vsel %vm2394_vm0, %v14024_v5, %v6877_v48 }
 0x3a4   :  { %3603 = vmatmul.mubr.bf16.gmra.mrb[28].mxu1 %v2673_v21  ;;  %v2104_v12 = vsel %vm2073_vm14, %v14022_v22, %v6866_v32  ;;  %v6882_v32 = vunpack.i.h.bf16 %v10807_v15  ;;  %v6881_v36 = vunpack.i.l.bf16 %v10807_v15  ;;  %v2591_v22 = vpack.c.bf16 %v2396_v46, %v2395_v0 }
 0x3a5   :  { %3612 = vmatprep.mubr.bf16.mxu1 %v2680_v29  ;;  %v2105_v51 = vsel %vm2073_vm14, %v14023_v4, %v6867_v1  ;;  %v6887_v4 = vunpack.i.h.bf16 %v10813_v9  ;;  %v14026_v52 = vunpack.i.h.bf16 %v10555_v58  ;;  %v6892_v15 = vunpack.i.h.bf16 %v10815_v28 }
 0x3a6   :  { %v2679_v43 = vpack.c.bf16 %v2105_v51, %v2104_v12  ;;  %v2598_v1 = vpack.c.bf16 %v6882_v32, %v6881_v36  ;;  %v6891_v25 = vunpack.i.l.bf16 %v10815_v28  ;;  %v14027_v21 = vunpack.i.l.bf16 %v10586_v40 }
 0x3a7   :  { %v2398_v48 = vsel %vm2394_vm0, %v14026_v52, %v6882_v32  ;;  %v14028_v29 = vunpack.i.h.bf16 %v10586_v40  ;;  %v14029_v0 = vunpack.i.l.bf16 %v10617_v41  ;;  %v14030_v46 = vunpack.i.h.bf16 %v10617_v41 }
 0x3a8   :  { %v2610_v51 = vpack.c.bf16 %v6892_v15, %v6891_v25  ;;  %v14032_v40 = vunpack.i.h.bf16 %v10829_v33  ;;  %v14036_v41 = vunpack.i.l.bf16 %v10858_v34  ;;  %v14038_v52 = vpack.c.bf16 %v10879_v11, %v10872_v23 }
 0x3a9   :  { %v2400_v12 = vsel %vm2394_vm0, %v14028_v29, %v6887_v4  ;;  %v2401_v5 = vsel %vm2394_vm0, %v14029_v0, %v6891_v25  ;;  %v2402_v28 = vsel %vm2394_vm0, %v14030_v46, %v6892_v15  ;;  %v14044_v23 = vpack.c.bf16 %v10925_v44, %v10918_v37 }
 0x3aa   :  { %v2609_v32 = vpack.c.bf16 %v2402_v28, %v2401_v5  ;;  %v14046_v11 = vunpack.i.h.bf16 %v10909_v6  ;;  %v14050_v37 = vpack.c.bf16 %v10969_v10, %v10962_v35  ;;  %v14054_v35 = vunpack.i.l.bf16 %v10999_v13 }
 0x3ab   :  { %v14055_v10 = vunpack.i.h.bf16 %v10999_v13  ;;  %v14058_v5 = vunpack.i.h.bf16 %v11001_v56  ;;  %v14059_v28 = vpack.c.bf16 %v11040_v17, %v11033_v8  ;;  %v14066_v50 = vsub.s32 0, %v7428_v7 }
 0x3ac   :  { %3613 = vmatmul.mubr.bf16.gmra.mrb[32].mxu1 %v2679_v43  ;;  %v14025_v43 = vunpack.i.l.bf16 %v10555_v58  ;;  %vm4563_vm14 = vcmask 261120  }
 0x3ad   :  { %5858 = vmatprep.mubr.msk.bf16.mxu1 %vm3181_vm4, %v2592_v20  ;;  %v6886_v20 = vunpack.i.l.bf16 %v10813_v9 }
 0x3ae   :  { %v2397_v18 = vsel %vm2394_vm0, %v14025_v43, %v6881_v36  ;;  %v14031_v36 = vunpack.i.l.bf16 %v10829_v33  ;;  %v14035_v43 = vpack.c.bf16 %v10856_v3, %v10849_v53  ;;  %v14041_v53 = vpack.c.bf16 %v10905_v47, %v10898_v16 }
 0x3af   :  { %v2597_v14 = vpack.c.bf16 %v2398_v48, %v2397_v18  ;;  %v2604_v59 = vpack.c.bf16 %v6887_v4, %v6886_v20  ;;  %v2399_v9 = vsel %vm2394_vm0, %v14027_v21, %v6886_v20  ;;  %v14034_v4 = vunpack.i.h.bf16 %v10831_v45 }
 0x3b0   :  { %v2603_v58 = vpack.c.bf16 %v2400_v12, %v2399_v9  ;;  %v14037_v18 = vunpack.i.h.bf16 %v10858_v34  ;;  %v14040_v48 = vunpack.i.h.bf16 %v10860_v57  ;;  %v14042_v3 = vunpack.i.l.bf16 %v10907_v54 }
 0x3b1   :  { %v14043_v34 = vunpack.i.h.bf16 %v10907_v54  ;;  %v14047_v16 = vpack.c.bf16 %v10949_v38, %v10942_v60  ;;  %v14048_v54 = vunpack.i.l.bf16 %v10951_v27  ;;  %v14049_v47 = vunpack.i.h.bf16 %v10951_v27 }
 0x3b2   :  { %v2628_v33 = vpack.c.bf16 %v14037_v18, %v14036_v41  ;;  %v14052_v21 = vunpack.i.h.bf16 %v10953_v62  ;;  %v14053_v9 = vpack.c.bf16 %v10997_v55, %v10990_v31  ;;  %v2664_v12 = vpack.c.bf16 %v14055_v10, %v14054_v35 }
 0x3b3   :  { %v2652_v25 = vpack.c.bf16 %v14049_v47, %v14048_v54  ;;  %v14057_v55 = vunpack.i.l.bf16 %v11001_v56  ;;  %v14065_v41 = vpack.c.bf16 %v11084_v30, %v11079_v19 }
 0x3b4   :  { %3656 = vmatmul.mubr.bf16.vlgmr.msra.gmra.mrb[36].mxu1 %v2591_v22  ;;  %v2616_v22 = vpack.c.bf16 %v14032_v40, %v14031_v36  ;;  %v14060_v36 = vunpack.i.l.bf16 %v11043_v2  ;;  %v14061_v40 = vunpack.i.h.bf16 %v11043_v2 }
 0x3b5   :  { %5859 = vmatprep.mubr.msk.bf16.mxu1 %vm3181_vm4, %v2598_v1  ;;  %v14033_v1 = vunpack.i.l.bf16 %v10831_v45  ;;  %v14039_v45 = vunpack.i.l.bf16 %v10860_v57  ;;  %v14045_v57 = vunpack.i.l.bf16 %v10909_v6  ;;  %v14051_v6 = vunpack.i.l.bf16 %v10953_v62 }
 0x3b6   :  { %v2670_v46 = vpack.c.bf16 %v14058_v5, %v14057_v55  ;;  %v2676_v56 = vpack.c.bf16 %v14061_v40, %v14060_v36 }
 0x3b7   :  { %v2622_v20 = vpack.c.bf16 %v14034_v4, %v14033_v1  ;;  %v2646_v15 = vpack.c.bf16 %v14046_v11, %v14045_v57  ;;  %v2658_v60 = vpack.c.bf16 %v14052_v21, %v14051_v6 }
 0x3bc   :  { %3666 = vmatmul.mubr.bf16.gmra.mrb[40].mxu1 %v2597_v14  ;;  %v2634_v14 = vpack.c.bf16 %v14040_v48, %v14039_v45 }
 0x3bd   :  { %5860 = vmatprep.mubr.msk.bf16.mxu1 %vm3181_vm4, %v2604_v59  ;;  %v2640_v59 = vpack.c.bf16 %v14043_v34, %v14042_v3  ;;  %v14067_v3 = vsub.s32 1, %v7428_v7 }
 0x3bf   :  { %v11288_v34 = vrot.slane %v2764_v42, %v14067_v3 }
 0x3c4   :  { %3676 = vmatmul.mubr.bf16.gmra.mrb[44].mxu1 %v2603_v58 }
 0x3c5   :  { %5861 = vmatprep.mubr.msk.bf16.mxu1 %vm3181_vm4, %v2610_v51  ;;  %v14056_v51 = vpack.c.bf16 %v11017_v49, %v11010_v26 }
 0x3cc   :  { %3686 = vmatmul.mubr.bf16.gmra.mrb[48].mxu1 %v2609_v32 }
 0x3cd   :  { %5862 = vmatprep.mubr.msk.bf16.mxu1 %vm3181_vm4, %v2616_v22  ;;  %v14062_v22 = vpack.c.bf16 %v11061_v63, %v11054_v39 }
 0x3d4   :  { %3696 = vmatmul.mubr.bf16.gmra.mrb[52].mxu1 %v14035_v43  ;;  %v14064_v43 = vunpack.i.h.bf16 %v11045_v24 }
 0x3d5   :  { %5863 = vmatprep.mubr.msk.bf16.mxu1 %vm3181_vm4, %v2622_v20  ;;  %v14063_v20 = vunpack.i.l.bf16 %v11045_v24 }
 0x3d7   :  { %v2682_v2 = vpack.c.bf16 %v14064_v43, %v14063_v20 }
 0x3dc   :  { %3706 = vmatmul.mubr.bf16.gmra.mrb[56].mxu1 %v14038_v52 }
 0x3dd   :  { %5864 = vmatprep.mubr.msk.bf16.mxu1 %vm3181_vm4, %v2628_v33 }
 0x3e4   :  { %3716 = vmatmul.mubr.bf16.gmra.mrb[60].mxu1 %v14041_v53 }
 0x3e5   :  { %5865 = vmatprep.mubr.msk.bf16.mxu1 %vm3181_vm4, %v2634_v14 }
 0x3ec   :  { %3726 = vmatmul.mubr.bf16.gmra.mrb[0].mxu1 %v14044_v23 }
 0x3ed   :  { %5866 = vmatprep.mubr.msk.bf16.mxu1 %vm3181_vm4, %v2640_v59 }
 0x3f4   :  { %3736 = vmatmul.mubr.bf16.gmra.mrb[4].mxu1 %v14047_v16 }
 0x3f5   :  { %5867 = vmatprep.mubr.msk.bf16.mxu1 %vm3181_vm4, %v2646_v15 }
 0x3f6   :  { %v3271_v44 = vpop.f32.mrb[64].mxu0 }
 0x3f7   :  { %v3273_v38 = vpop.f32.mrb[65].mxu0 }
 0x3f8   :  { %v3275_v29 = vpop.f32.mrb[66].mxu0  ;;  %v3274_v23 = vadd.f32 %v3273_v38, %v11288_v34 }
 0x3f9   :  { %v3277_v27 = vpop.f32.mrb[67].mxu0 }
 0x3fa   :  { %v3278_v54 = vadd.f32 %v3277_v27, %v11288_v34 }
 0x3fc   :  { %3746 = vmatmul.mubr.bf16.gmra.mrb[8].mxu1 %v14050_v37 }
 0x3fd   :  { %5868 = vmatprep.mubr.msk.bf16.mxu1 %vm3181_vm4, %v2652_v25 }
 0x401   :  { %v3281_v58 = vpop.f32.mrb[68].mxu0 }
 0x402   :  { %v3283_v62 = vpop.f32.mrb[69].mxu0 }
 0x403   :  { %v3285_v0 = vpop.f32.mrb[70].mxu0  ;;  %v3284_v35 = vadd.f32 %v3283_v62, %v11288_v34 }
 0x404   :  { %3756 = vmatmul.mubr.bf16.gmra.mrb[12].mxu1 %v14053_v9  ;;  %v3287_v31 = vpop.f32.mrb[71].mxu0 }
 0x405   :  { %5869 = vmatprep.mubr.msk.bf16.mxu1 %vm3181_vm4, %v2658_v60 }
 0x40c   :  { %3766 = vmatmul.mubr.bf16.gmra.mrb[16].mxu1 %v14056_v51 }
 0x40d   :  { %5870 = vmatprep.mubr.msk.bf16.mxu1 %vm3181_vm4, %v2664_v12  ;;  %v11219_v13 = vpop.f32.mrb[72].mxu0 }
 0x40e   :  { %v11222_v26 = vpop.f32.mrb[73].mxu0 }
 0x40f   :  { %v11224_v49 = vpop.f32.mrb[74].mxu0 }
 0x410   :  { %v11226_v32 = vpop.f32.mrb[75].mxu0 }
 0x414   :  { %3776 = vmatmul.mubr.bf16.gmra.mrb[20].mxu1 %v14059_v28 }
 0x415   :  { %5871 = vmatprep.mubr.msk.bf16.mxu1 %vm3181_vm4, %v2670_v46  ;;  %v3288_v46 = vadd.f32 %v3287_v31, %v11288_v34 }
 0x419   :  { %v11236_v8 = vpop.f32.mrb[76].mxu0 }
 0x41a   :  { %v11238_v17 = vpop.f32.mrb[77].mxu0 }
 0x41b   :  { %v11240_v1 = vpop.f32.mrb[78].mxu0 }
 0x41c   :  { %3786 = vmatmul.mubr.bf16.gmra.mrb[24].mxu1 %v14062_v22  ;;  %v11242_v4 = vpop.f32.mrb[79].mxu0 }
 0x41d   :  { %5872 = vmatprep.mubr.msk.bf16.mxu1 %vm3181_vm4, %v2676_v56 }
 0x423   :  { %v11252_v39 = vpop.f32.mrb[80].mxu0 }
 0x424   :  { %3796 = vmatmul.mubr.bf16.gmra.mrb[28].mxu1 %v14065_v41  ;;  %v11254_v63 = vpop.f32.mrb[81].mxu0 }
 0x425   :  { %5873 = vmatprep.mubr.msk.bf16.mxu1 %vm3181_vm4, %v2682_v2  ;;  %v11256_v18 = vpop.f32.mrb[82].mxu0  ;;  %v3298_v2 = vadd.f32 %v11226_v32, %v11288_v34 }
 0x426   :  { %v11258_v33 = vpop.f32.mrb[83].mxu0 }
 0x42c   :  { %3806 = vmatmul.mubr.bf16.gmra.mrb[32].mxu1 %v2681_v61  ;;  %v11263_v24 = vpop.f32.mrb[84].mxu0  ;;  %v11284_v61 = vrot.slane %v2764_v42, %v14066_v50 }
 0x42d   :  { %v11265_v52 = vpop.f32.mrb[85].mxu0 }
 0x42e   :  { %v11267_v30 = vpop.f32.mrb[86].mxu0  ;;  %v3272_v59 = vadd.f32 %v3271_v44, %v11284_v61  ;;  %v3276_v11 = vadd.f32 %v3275_v29, %v11284_v61  ;;  %v3282_v27 = vadd.f32 %v3281_v58, %v11284_v61  ;;  %v3286_v51 = vadd.f32 %v3285_v0, %v11284_v61 }
 0x42f   :  { %v11269_v19 = vpop.f32.mrb[87].mxu0  ;;  %v3292_v56 = vadd.f32 %v11219_v13, %v11284_v61  ;;  %v3294_v0 = vadd.f32 %v11222_v26, %v11288_v34  ;;  %v3296_v31 = vadd.f32 %v11224_v49, %v11284_v61 }
 0x434   :  { %v11271_v45 = vpop.f32.mrb[88].mxu0 }
 0x435   :  { %v11273_v48 = vpop.f32.mrb[89].mxu0 }
 0x436   :  { %v11275_v14 = vpop.f32.mrb[90].mxu0 }
 0x437   :  { %v11277_v53 = vpop.f32.mrb[91].mxu0 }
 0x487   :  { %v3657_v57 = vpop.f32.mrb[36].mxu1 }
 0x488   :  { %v11293_v15 = vadd.f32 %v3657_v57, %v3272_v59  ;;  %v3659_v16 = vpop.f32.mrb[37].mxu1  ;;  %v3302_v57 = vadd.f32 %v11236_v8, %v11284_v61  ;;  %v3308_v8 = vadd.f32 %v11242_v4, %v11288_v34  ;;  %v3316_v4 = vadd.f32 %v11256_v18, %v11284_v61 }
 0x489   :  { %v11296_v47 = vadd.f32 %v3659_v16, %v3274_v23  ;;  %v3661_v25 = vpop.f32.mrb[38].mxu1 }
 0x48a   :  { %v13446_v37 = vmax.f32 %v11293_v15, 0.0  ;;  %v11299_v6 = vadd.f32 %v3661_v25, %v3276_v11  ;;  %v3663_v21 = vpop.f32.mrb[39].mxu1  ;;  %v3304_v11 = vadd.f32 %v11238_v17, %v11288_v34  ;;  %v3306_v25 = vadd.f32 %v11240_v1, %v11284_v61 }
 0x48b   :  { %v13451_v44 = vmax.f32 %v11296_v47, 0.0  ;;  %v11302_v60 = vadd.f32 %v3663_v21, %v3278_v54  ;;  %v3314_v1 = vadd.f32 %v11254_v63, %v11288_v34 }
 0x48c   :  { %v13450_v38 = vmax.f32 %v11299_v6, 0.0 }
 0x48d   :  { %v6953_v9 = vpack.i.bf16 %v13451_v44, %v13446_v37  ;;  %v13452_v29 = vmax.f32 %v11302_v60, 0.0 }
 0x48f   :  { %v6958_v10 = vpack.i.bf16 %v13452_v29, %v13450_v38  ;;  %v3667_v12 = vpop.f32.mrb[40].mxu1  ;;  %6954 = vrot.lane.b32.xlu0 %v6953_v9, %s7364_s4 }
 0x490   :  { %v11318_v55 = vadd.f32 %v3667_v12, %v3282_v27  ;;  %v3669_v5 = vpop.f32.mrb[41].mxu1 }
 0x491   :  { %v11321_v28 = vadd.f32 %v3669_v5, %v3284_v35  ;;  %v3671_v58 = vpop.f32.mrb[42].mxu1  ;;  %6959 = vrot.lane.b32.xlu1 %v6958_v10, %s7364_s4 }
 0x492   :  { %v11324_v62 = vadd.f32 %v3671_v58, %v3286_v51  ;;  %v3673_v36 = vpop.f32.mrb[43].mxu1  ;;  %v3312_v51 = vadd.f32 %v11252_v39, %v11284_v61 }
 0x493   :  { %v11326_v40 = vadd.f32 %v3673_v36, %v3288_v46  ;;  %v3318_v36 = vadd.f32 %v11258_v33, %v11288_v34 }
 0x497   :  { %v3677_v22 = vpop.f32.mrb[44].mxu1 }
 0x498   :  { %v11334_v20 = vadd.f32 %v3677_v22, %v3292_v56  ;;  %v3679_v43 = vpop.f32.mrb[45].mxu1 }
 0x499   :  { %v11338_v41 = vadd.f32 %v3679_v43, %v3294_v0  ;;  %v3681_v42 = vpop.f32.mrb[46].mxu1 }
 0x49a   :  { %v13445_v50 = vmax.f32 %v11334_v20, 0.0  ;;  %v11341_v3 = vadd.f32 %v3681_v42, %v3296_v31  ;;  %v3683_v13 = vpop.f32.mrb[47].mxu1  ;;  %v3322_v42 = vadd.f32 %v11263_v24, %v11284_v61  ;;  %v3328_v24 = vadd.f32 %v11269_v19, %v11288_v34 }
 0x49b   :  { %v13449_v26 = vmax.f32 %v11338_v41, 0.0  ;;  %v11344_v59 = vadd.f32 %v3683_v13, %v3298_v2  ;;  %v3324_v13 = vadd.f32 %v11265_v52, %v11288_v34  ;;  %v3336_v19 = vadd.f32 %v11275_v14, %v11284_v61 }
 0x49c   :  { %v13441_v49 = vmax.f32 %v11341_v3, 0.0 }
 0x49d   :  { %v6963_v23 = vpack.i.bf16 %v13449_v26, %v13445_v50  ;;  %v13442_v32 = vmax.f32 %v11344_v59, 0.0 }
 0x49f   :  { %v6968_v16 = vpack.i.bf16 %v13442_v32, %v13441_v49  ;;  %v3687_v54 = vpop.f32.mrb[48].mxu1  ;;  %6964 = vrot.lane.b32.xlu0 %v6963_v23, %s7364_s4 }
 0x4a0   :  { %v11363_v21 = vadd.f32 %v3687_v54, %v3302_v57  ;;  %v3689_v9 = vpop.f32.mrb[49].mxu1 }
 0x4a1   :  { %v11367_v27 = vadd.f32 %v3689_v9, %v3304_v11  ;;  %v3691_v17 = vpop.f32.mrb[50].mxu1  ;;  %6969 = vrot.lane.b32.xlu1 %v6968_v16, %s7364_s4  ;;  %v3326_v11 = vadd.f32 %v11267_v30, %v11284_v61  ;;  %v3334_v30 = vadd.f32 %v11273_v48, %v11288_v34 }
 0x4a2   :  { %14068 = vst [vmem:[#allocation29_spill] sm:$0xff] %v11363_v21  ;;  %v11370_v35 = vadd.f32 %v3691_v17, %v3306_v25  ;;  %v3693_v10 = vpop.f32.mrb[51].mxu1 }
 0x4a3   :  { %v11372_v12 = vadd.f32 %v3693_v10, %v3308_v8  ;;  %v3332_v10 = vadd.f32 %v11271_v45, %v11284_v61 }
 0x4a4   :  { %14069 = vst [vmem:[#allocation35_spill] sm:$0xff] %v11370_v35 }
 0x4a7   :  { %v3697_v5 = vpop.f32.mrb[52].mxu1 }
 0x4a8   :  { %v11380_v46 = vadd.f32 %v3697_v5, %v3312_v51  ;;  %v3699_v58 = vpop.f32.mrb[53].mxu1 }
 0x4a9   :  { %v11384_v56 = vadd.f32 %v3699_v58, %v3314_v1  ;;  %v3701_v0 = vpop.f32.mrb[54].mxu1 }
 0x4aa   :  { %v13439_v22 = vmax.f32 %v11380_v46, 0.0  ;;  %v11387_v31 = vadd.f32 %v3701_v0, %v3316_v4  ;;  %v3703_v39 = vpop.f32.mrb[55].mxu1  ;;  %v3338_v4 = vadd.f32 %v11277_v53, %v11288_v34 }
 0x4ab   :  { %v13440_v63 = vmax.f32 %v11384_v56, 0.0  ;;  %v11390_v43 = vadd.f32 %v3703_v39, %v3318_v36 }
 0x4ac   :  { %v13437_v18 = vmax.f32 %v11387_v31, 0.0 }
 0x4ad   :  { %v6973_v2 = vpack.i.bf16 %v13440_v63, %v13439_v22  ;;  %v13438_v33 = vmax.f32 %v11390_v43, 0.0 }
 0x4af   :  { %v6978_v23 = vpack.i.bf16 %v13438_v33, %v13437_v18  ;;  %v3707_v57 = vpop.f32.mrb[56].mxu1  ;;  %6974 = vrot.lane.b32.xlu0 %v6973_v2, %s7364_s4 }
 0x4b0   :  { %v11409_v16 = vadd.f32 %v3707_v57, %v3322_v42  ;;  %v3709_v54 = vpop.f32.mrb[57].mxu1 }
 0x4b1   :  { %v11413_v25 = vadd.f32 %v3709_v54, %v3324_v13  ;;  %v3711_v52 = vpop.f32.mrb[58].mxu1  ;;  %6979 = vrot.lane.b32.xlu1 %v6978_v23, %s7364_s4 }
 0x4b2   :  { %14070 = vst [vmem:[#allocation33_spill] sm:$0xff] %v11409_v16  ;;  %v11416_v9 = vadd.f32 %v3711_v52, %v3326_v11  ;;  %v3713_v8 = vpop.f32.mrb[59].mxu1 }
 0x4b3   :  { %14071 = vst [vmem:[#allocation37_spill] sm:$0xff] %v11413_v25  ;;  %v11418_v17 = vadd.f32 %v3713_v8, %v3328_v24 }
 0x4b4   :  { %14072 = vst [vmem:[#allocation3_spill] sm:$0xff] %v11416_v9 }
 0x4b5   :  { %14073 = vst [vmem:[#allocation10_spill] sm:$0xff] %v11418_v17 }
 0x4b7   :  { %v3717_v51 = vpop.f32.mrb[60].mxu1 }
 0x4b8   :  { %v11426_v1 = vadd.f32 %v3717_v51, %v3332_v10  ;;  %v3719_v5 = vpop.f32.mrb[61].mxu1 }
 0x4b9   :  { %v11430_v58 = vadd.f32 %v3719_v5, %v3334_v30  ;;  %v3721_v36 = vpop.f32.mrb[62].mxu1 }
 0x4ba   :  { %v13433_v0 = vmax.f32 %v11426_v1, 0.0  ;;  %v11433_v39 = vadd.f32 %v3721_v36, %v3336_v19  ;;  %v3723_v45 = vpop.f32.mrb[63].mxu1 }
 0x4bb   :  { %v13436_v48 = vmax.f32 %v11430_v58, 0.0  ;;  %v11436_v2 = vadd.f32 %v3723_v45, %v3338_v4 }
 0x4bc   :  { %v13429_v14 = vmax.f32 %v11433_v39, 0.0 }
 0x4bd   :  { %v6983_v42 = vpack.i.bf16 %v13436_v48, %v13433_v0  ;;  %v13432_v53 = vmax.f32 %v11436_v2, 0.0 }
 0x4bf   :  { %v6988_v13 = vpack.i.bf16 %v13432_v53, %v13429_v14  ;;  %v11448_v23 = vpop.f32.mrb[0].mxu1  ;;  %6984 = vrot.lane.b32.xlu0 %v6983_v42, %s7364_s4 }
 0x4c0   :  { %v11451_v57 = vpop.f32.mrb[1].mxu1 }
 0x4c1   :  { %v11453_v11 = vpop.f32.mrb[2].mxu1  ;;  %6989 = vrot.lane.b32.xlu1 %v6988_v13, %s7364_s4 }
 0x4c2   :  { %v11456_v54 = vpop.f32.mrb[3].mxu1 }
 0x4c3   :  { %14074 = vst [vmem:[#allocation38_spill] sm:$0xff] %v11456_v54 }
 0x4c7   :  { %v3737_v24 = vpop.f32.mrb[4].mxu1 }
 0x4c8   :  { %v11459_v52 = vadd.f32 %v3737_v24, %v11284_v61  ;;  %v3739_v8 = vpop.f32.mrb[5].mxu1 }
 0x4c9   :  { %v11462_v10 = vadd.f32 %v3739_v8, %v11288_v34  ;;  %v3741_v30 = vpop.f32.mrb[6].mxu1 }
 0x4ca   :  { %v13430_v51 = vmax.f32 %v11459_v52, 0.0  ;;  %v11466_v19 = vadd.f32 %v3741_v30, %v11284_v61  ;;  %v3743_v5 = vpop.f32.mrb[7].mxu1 }
 0x4cb   :  { %v13431_v4 = vmax.f32 %v11462_v10, 0.0  ;;  %v11470_v36 = vadd.f32 %v3743_v5, %v11288_v34 }
 0x4cc   :  { %v13434_v45 = vmax.f32 %v11466_v19, 0.0 }
 0x4cd   :  { %v6993_v42 = vpack.i.bf16 %v13431_v4, %v13430_v51  ;;  %v13435_v13 = vmax.f32 %v11470_v36, 0.0 }
 0x4cf   :  { %v6998_v24 = vpack.i.bf16 %v13435_v13, %v13434_v45  ;;  %v11482_v8 = vpop.f32.mrb[8].mxu1  ;;  %6994 = vrot.lane.b32.xlu0 %v6993_v42, %s7364_s4 }
 0x4d0   :  { %v11485_v30 = vpop.f32.mrb[9].mxu1 }
 0x4d1   :  { %v11487_v5 = vpop.f32.mrb[10].mxu1  ;;  %6999 = vrot.lane.b32.xlu1 %v6998_v24, %s7364_s4 }
 0x4d2   :  { %v11490_v14 = vpop.f32.mrb[11].mxu1 }
 0x4d7   :  { %v3757_v51 = vpop.f32.mrb[12].mxu1 }
 0x4d8   :  { %v11493_v4 = vadd.f32 %v3757_v51, %v11284_v61  ;;  %v3759_v53 = vpop.f32.mrb[13].mxu1 }
 0x4d9   :  { %v11496_v0 = vadd.f32 %v3759_v53, %v11288_v34  ;;  %v3761_v45 = vpop.f32.mrb[14].mxu1 }
 0x4da   :  { %v13443_v13 = vmax.f32 %v11493_v4, 0.0  ;;  %v11500_v42 = vadd.f32 %v3761_v45, %v11284_v61  ;;  %v3763_v48 = vpop.f32.mrb[15].mxu1 }
 0x4db   :  { %v13444_v18 = vmax.f32 %v11496_v0, 0.0  ;;  %v11504_v24 = vadd.f32 %v3763_v48, %v11288_v34 }
 0x4dc   :  { %14075 = vst [vmem:[#allocation42_spill] sm:$0xff] %v11500_v42  ;;  %v13447_v33 = vmax.f32 %v11500_v42, 0.0  ;;  %v11576_v42 = vadd.f32 %v11448_v23, %v11284_v61 }
 0x4dd   :  { %14076 = vst [vmem:[#allocation13_spill] sm:$0xff] %v11504_v24  ;;  %v7003_v53 = vpack.i.bf16 %v13444_v18, %v13443_v13  ;;  %v13448_v51 = vmax.f32 %v11504_v24, 0.0  ;;  %v14089_v24 = vmax.f32 %v11367_v27, 0.0 }
 0x4de   :  { %14086 = vst [vmem:[#allocation53_spill] sm:$0xff] %v11576_v42 }
 0x4df   :  { %v7008_v45 = vpack.i.bf16 %v13448_v51, %v13447_v33  ;;  %v3767_v22 = vpop.f32.mrb[16].mxu1  ;;  %7004 = vrot.lane.b32.xlu0 %v7003_v53, %s7364_s4 }
 0x4e0   :  { %v3769_v63 = vpop.f32.mrb[17].mxu1 }
 0x4e1   :  { %v11517_v48 = vpop.f32.mrb[18].mxu1  ;;  %7009 = vrot.lane.b32.xlu1 %v7008_v45, %s7364_s4 }
 0x4e2   :  { %14077 = vst [vmem:[#allocation41_spill] sm:$0xff] %v11517_v48  ;;  %v11520_v49 = vpop.f32.mrb[19].mxu1 }
 0x4e3   :  { %14078 = vst [vmem:[#allocation43_spill] sm:$0xff] %v11520_v49 }
 0x4e7   :  { %v3777_v32 = vpop.f32.mrb[20].mxu1 }
 0x4e8   :  { %v11523_v13 = vadd.f32 %v3777_v32, %v11284_v61  ;;  %v3779_v18 = vpop.f32.mrb[21].mxu1 }
 0x4e9   :  { %v11526_v50 = vadd.f32 %v3779_v18, %v11288_v34  ;;  %v3781_v37 = vpop.f32.mrb[22].mxu1 }
 0x4ea   :  { %14079 = vst [vmem:[#allocation45_spill] sm:$0xff] %v11523_v13  ;;  %v13454_v33 = vmax.f32 %v11523_v13, 0.0  ;;  %v11530_v53 = vadd.f32 %v3781_v37, %v11284_v61  ;;  %v3783_v51 = vpop.f32.mrb[23].mxu1 }
 0x4eb   :  { %14080 = vst [vmem:[#allocation2_spill] sm:$0xff] %v11526_v50  ;;  %v13455_v26 = vmax.f32 %v11526_v50, 0.0  ;;  %v11534_v45 = vadd.f32 %v3783_v51, %v11288_v34 }
 0x4ec   :  { %14081 = vst [vmem:[#allocation5_spill] sm:$0xff] %v11530_v53  ;;  %v13458_v38 = vmax.f32 %v11530_v53, 0.0 }
 0x4ed   :  { %14082 = vst [vmem:[#allocation49_spill] sm:$0xff] %v11534_v45  ;;  %v7013_v32 = vpack.i.bf16 %v13455_v26, %v13454_v33  ;;  %v13459_v18 = vmax.f32 %v11534_v45, 0.0 }
 0x4ef   :  { %v7018_v37 = vpack.i.bf16 %v13459_v18, %v13458_v38  ;;  %v3787_v44 = vpop.f32.mrb[24].mxu1  ;;  %7014 = vrot.lane.b32.xlu0 %v7013_v32, %s7364_s4 }
 0x4f0   :  { %v3789_v29 = vpop.f32.mrb[25].mxu1 }
 0x4f1   :  { %v11547_v51 = vpop.f32.mrb[26].mxu1  ;;  %7019 = vrot.lane.b32.xlu1 %v7018_v37, %s7364_s4 }
 0x4f2   :  { %v11550_v49 = vpop.f32.mrb[27].mxu1 }
 0x4f7   :  { %v3797_v13 = vpop.f32.mrb[28].mxu1 }
 0x4f8   :  { %v11553_v33 = vadd.f32 %v3797_v13, %v11284_v61  ;;  %v3799_v26 = vpop.f32.mrb[29].mxu1  ;;  %v11597_v13 = vadd.f32 %v11482_v8, %v11284_v61 }
 0x4f9   :  { %v11556_v53 = vadd.f32 %v3799_v26, %v11288_v34  ;;  %v3801_v45 = vpop.f32.mrb[30].mxu1 }
 0x4fa   :  { %14083 = vst [vmem:[#allocation17_spill] sm:$0xff] %v11553_v33  ;;  %v13463_v38 = vmax.f32 %v11553_v33, 0.0  ;;  %v11560_v32 = vadd.f32 %v3801_v45, %v11284_v61  ;;  %v3803_v18 = vpop.f32.mrb[31].mxu1  ;;  %14090 = vst [vmem:[#allocation52_spill] sm:$0xff] %v11597_v13 }
 0x4fb   :  { %14084 = vst [vmem:[#allocation50_spill] sm:$0xff] %v11556_v53  ;;  %v13464_v50 = vmax.f32 %v11556_v53, 0.0  ;;  %v11564_v37 = vadd.f32 %v3803_v18, %v11288_v34  ;;  %v11580_v18 = vadd.f32 %v11451_v57, %v11288_v34  ;;  %v14088_v57 = vmax.f32 %v11363_v21, 0.0 }
 0x4fc   :  { %14085 = vst [vmem:[#allocation51_spill] sm:$0xff] %v11560_v32  ;;  %v14087_v54 = vmax.f32 %v11560_v32, 0.0  ;;  %v11615_v32 = vadd.f32 %v3767_v22, %v11284_v61  ;;  %v13473_v21 = vmax.f32 %v11597_v13, 0.0  ;;  %v11631_v22 = vadd.f32 %v3789_v29, %v11288_v34 }
 0x4fd   :  { %v7023_v26 = vpack.i.bf16 %v13464_v50, %v13463_v38  ;;  %v13467_v45 = vmax.f32 %v11564_v37, 0.0  ;;  %v7033_v48 = vpack.i.bf16 %v14089_v24, %v14088_v57  ;;  %v14091_v24 = vmax.f32 %v11409_v16, 0.0 }
 0x4fe   :  { %v14092_v57 = vmax.f32 %v11413_v25, 0.0  ;;  %14093 = vst [vmem:[#allocation19_spill] sm:$0xff] %v11615_v32  ;;  %v11628_v25 = vadd.f32 %v3787_v44, %v11284_v61 }
 0x4ff   :  { %v7028_v33 = vpack.i.bf16 %v13467_v45, %v14087_v54  ;;  %v3807_v38 = vpop.f32.mrb[32].mxu1  ;;  %7024 = vrot.lane.b32.xlu0 %v7023_v26, %s7364_s4  ;;  %v11601_v54 = vadd.f32 %v11485_v30, %v11288_v34  ;;  %v11618_v30 = vadd.f32 %v3769_v63, %v11288_v34  ;;  %v14095_v26 = vmax.f32 %v11321_v28, 0.0 }
 0x500   :  { %v3809_v53 = vpop.f32.mrb[33].mxu1  ;;  %v7038_v8 = vpack.i.bf16 %v14092_v57, %v14091_v24  ;;  %14096 = vst [vmem:[#allocation48_spill] sm:$0xff] %v11628_v25  ;;  %v14097_v63 = vmax.f32 %v11576_v42, 0.0  ;;  %v13477_v57 = vmax.f32 %v11615_v32, 0.0 }
 0x501   :  { %v11603_v45 = vpop.f32.mrb[34].mxu1  ;;  %7029 = vrot.lane.b32.xlu1 %v7028_v33, %s7364_s4  ;;  %v14094_v33 = vmax.f32 %v11318_v55, 0.0  ;;  %v13474_v16 = vmax.f32 %v11601_v54, 0.0  ;;  %v11644_v44 = vadd.f32 %v3809_v53, %v11288_v34  ;;  %v6955_v13 = vpop.permute.xlu0 %6954 }
 0x502   :  { %v11608_v50 = vpop.f32.mrb[35].mxu1  ;;  %v6956_v32 = vunpack.i.l.bf16 %v6955_v13 }
 0x503   :  { %7034 = vrot.lane.b32.xlu0 %v7033_v48, %s7364_s4  ;;  %v7043_v23 = vpack.i.bf16 %v14095_v26, %v14094_v33  ;;  %v14098_v48 = vmax.f32 %v11580_v18, 0.0  ;;  %v13478_v26 = vmax.f32 %v11618_v30, 0.0  ;;  %v11641_v33 = vadd.f32 %v3807_v38, %v11284_v61  ;;  %14100 = vst [vmem:[#allocation26_spill] sm:$0xff] %v11644_v44 }
 0x504   :  { %v7053_v29 = vpack.i.bf16 %v13474_v16, %v13473_v21 }
 0x505   :  { %7039 = vrot.lane.b32.xlu1 %v7038_v8, %s7364_s4  ;;  %v7048_v24 = vpack.i.bf16 %v14098_v48, %v14097_v63  ;;  %14099 = vst [vmem:[#allocation83_spill] sm:$0xff] %v11641_v33  ;;  %v13479_v8 = vmax.f32 %v11628_v25, 0.0  ;;  %v13480_v63 = vmax.f32 %v11631_v22, 0.0  ;;  %v6960_v48 = vpop.permute.xlu1 %6959  ;;  %v7058_v38 = vpack.i.bf16 %v13478_v26, %v13477_v57 }
 0x506   :  { %v13481_v53 = vmax.f32 %v11641_v33, 0.0  ;;  %v6962_v21 = vunpack.i.h.bf16 %v6960_v48  ;;  %v6961_v16 = vunpack.i.l.bf16 %v6960_v48  ;;  %v13493_v57 = vmax.f32 %v11370_v35, 0.0 }
 0x507   :  { %7044 = vrot.lane.b32.xlu0 %v7043_v23, %s7364_s4  ;;  %v13482_v23 = vmax.f32 %v11644_v44, 0.0  ;;  %v7063_v42 = vpack.i.bf16 %v13480_v63, %v13479_v8 }
 0x508   :  { %v4074_v48 = vsel %vm4072_vm5, %v6961_v16, %v6962_v21 }
 0x509   :  { %7049 = vrot.lane.b32.xlu1 %v7048_v24, %s7364_s4  ;;  %v6957_v24 = vunpack.i.h.bf16 %v6955_v13  ;;  %v11681_v13 = vadd.f32 %v11490_v14, %v11288_v34  ;;  %v14104_v14 = vmax.f32 %v11296_v47, 0.0  ;;  %v14109_v47 = vmax.f32 %v11293_v15, 0.0 }
 0x50b   :  { %7054 = vrot.lane.b32.xlu0 %v7053_v29, %s7364_s4  ;;  %v7068_v29 = vpack.i.bf16 %v13482_v23, %v13481_v53  ;;  %v4073_v53 = vsel %vm4072_vm5, %v6956_v32, %v6957_v24  ;;  %v14102_v23 = vmax.f32 %v11302_v60, 0.0  ;;  %v11696_v25 = vmax.f32 %v14104_v14, %v6957_v24 }
 0x50c   :  { %v11711_v24 = vmax.f32 %v14109_v47, %v4073_v53  ;;  %v14115_v53 = vmax.f32 %v11324_v62, 0.0 }
 0x50d   :  { %7059 = vrot.lane.b32.xlu1 %v7058_v38, %s7364_s4  ;;  %v11677_v38 = vadd.f32 %v11487_v5, %v11284_v61  ;;  %v14103_v5 = vmax.f32 %v11372_v12, 0.0  ;;  %14105 = vst [vmem:[#allocation56_spill] sm:$0xff] %v11696_v25 }
 0x50e   :  { %14110 = vst [vmem:[#allocation55_spill] sm:$0xff] %v11711_v24 }
 0x50f   :  { %7064 = vrot.lane.b32.xlu0 %v7063_v42, %s7364_s4  ;;  %14101 = vst [vmem:[#allocation57_spill] sm:$0xff] %v11677_v38  ;;  %v11687_v42 = vmax.f32 %v14102_v23, %v6962_v21  ;;  %v7073_v33 = vpack.i.bf16 %v14103_v5, %v13493_v57  ;;  %v14107_v21 = vmax.f32 %v11338_v41, 0.0  ;;  %v13489_v44 = vmax.f32 %v11677_v38, 0.0  ;;  %v14163_v38 = vld [vmem:[#allocation5_spill] sm:$0xff] }
 0x510   :  { %v13491_v5 = vmax.f32 %v11681_v13, 0.0  ;;  %v11720_v41 = vadd.f32 %v11547_v51, %v11284_v61 }
 0x511   :  { %7069 = vrot.lane.b32.xlu1 %v7068_v29, %s7364_s4  ;;  %v6965_v63 = vpop.permute.xlu0 %6964  ;;  %v14106_v29 = vmax.f32 %v11299_v6, 0.0  ;;  %v14111_v6 = vmax.f32 %v11334_v20, 0.0  ;;  %v14116_v20 = vmax.f32 %v11326_v40, 0.0 }
 0x512   :  { %v6967_v16 = vunpack.i.h.bf16 %v6965_v63  ;;  %v6966_v26 = vunpack.i.l.bf16 %v6965_v63  ;;  %14113 = vst [vmem:[#allocation28_spill] sm:$0xff] %v11720_v41 }
 0x513   :  { %v11700_v32 = vmax.f32 %v14106_v29, %v4074_v48  ;;  %v6970_v60 = vpop.permute.xlu1 %6969  ;;  %v7083_v29 = vpack.i.bf16 %v14116_v20, %v14115_v53 }
 0x514   :  { %v11704_v23 = vmax.f32 %v14107_v21, %v6967_v16  ;;  %v4077_v63 = vsel %vm4072_vm5, %v6966_v26, %v6967_v16  ;;  %v6972_v8 = vunpack.i.h.bf16 %v6970_v60  ;;  %v6971_v35 = vunpack.i.l.bf16 %v6970_v60 }
 0x515   :  { %v11715_v48 = vmax.f32 %v14111_v6, %v4077_v63  ;;  %7074 = vrot.lane.b32.xlu1 %v7073_v33, %s7364_s4  ;;  %v13495_v26 = vrot.slane %v11687_v42, 2  ;;  %v14114_v16 = vmax.f32 %v11344_v59, 0.0  ;;  %v11734_v33 = vadd.f32 %v11550_v49, %v11288_v34 }
 0x516   :  { %14108 = vst [vmem:[#allocation54_spill] sm:$0xff] %v11704_v23  ;;  %v4078_v15 = vsel %vm4072_vm5, %v6971_v35, %v6972_v8  ;;  %v13494_v51 = vrot.slane %v11700_v32, 2  ;;  %v14118_v60 = vmax.f32 %v11341_v3, 0.0  ;;  %v13487_v59 = vrot.slane %v11696_v25, 2 }
 0x517   :  { %14112 = vst [vmem:[#allocation31_spill] sm:$0xff] %v11715_v48  ;;  %v11725_v14 = vmax.f32 %v14114_v16, %v6972_v8  ;;  %14117 = vst [vmem:[#allocation34_spill] sm:$0xff] %v11734_v33  ;;  %v13488_v63 = vrot.slane %v11704_v23, 2  ;;  %v13490_v8 = vrot.slane %v11711_v24, 2  ;;  %v13492_v47 = vrot.slane %v11715_v48, 2 }
 0x518   :  { %v11739_v21 = vmax.f32 %v14118_v60, %v4078_v15  ;;  %v7093_v3 = vpack.i.bf16 %v13491_v5, %v13489_v44  ;;  %v13498_v49 = vmax.f32 %v11720_v41, 0.0  ;;  %v4358_v16 = vsel %vm158_vm1, %v13487_v59, %v13495_v26  ;;  %v14158_v41 = vld [vmem:[#allocation45_spill] sm:$0xff] }
 0x519   :  { %v13497_v35 = vrot.slane %v11725_v14, 2  ;;  %7084 = vrot.lane.b32.xlu1 %v7083_v29, %s7364_s4  ;;  %v13499_v53 = vmax.f32 %v11734_v33, 0.0  ;;  %v4357_v20 = vsel %vm158_vm1, %v13490_v8, %v13494_v51  ;;  %v14119_v51 = vmax.f32 %v11384_v56, 0.0 }
 0x51a   :  { %v13496_v6 = vrot.slane %v11739_v21, 2  ;;  %v11790_v8 = vmax.f32 %v11711_v24, %v4357_v20  ;;  %v14159_v33 = vmax.f32 %v14158_v41, 0.0 }
 0x51b   :  { %v4350_v15 = vsel %vm158_vm1, %v13488_v63, %v13497_v35  ;;  %v11785_v63 = vmax.f32 %v11696_v25, %v4358_v16 }
 0x51c   :  { %v4349_v29 = vsel %vm158_vm1, %v13492_v47, %v13496_v6  ;;  %v11779_v60 = vmax.f32 %v11704_v23, %v4350_v15  ;;  %v7103_v15 = vpack.i.bf16 %v13499_v53, %v13498_v49  ;;  %v14121_v53 = vmax.f32 %v11380_v46, 0.0 }
 0x51d   :  { %v11782_v59 = vmax.f32 %v11715_v48, %v4349_v29  ;;  %7094 = vrot.lane.b32.xlu1 %v7093_v3, %s7364_s4  ;;  %v14127_v23 = vmax.f32 %v11426_v1, 0.0 }
 0x51e   :  { %v4462_v44 = vrot.slane %v11779_v60, 7 }
 0x51f   :  { %v4441_v5 = vrot.slane %v11782_v59, 7 }
 0x520   :  { %v4463_v29 = vsel %vm4442_vm6, %v4462_v44, %v11785_v63 }
 0x521   :  { %v4443_v16 = vsel %vm4442_vm6, %v4441_v5, %v11790_v8  ;;  %7104 = vrot.lane.b32.xlu1 %v7103_v15, %s7364_s4  ;;  %v6975_v47 = vpop.permute.xlu0 %6974  ;;  %v14123_v5 = vmax.f32 %v11390_v43, 0.0 }
 0x522   :  { %v6977_v3 = vunpack.i.h.bf16 %v6975_v47  ;;  %v6976_v57 = vunpack.i.l.bf16 %v6975_v47  ;;  %v14124_v47 = vmax.f32 %v11387_v31, 0.0 }
 0x523   :  { %v6980_v20 = vpop.permute.xlu1 %6979 }
 0x524   :  { %v11804_v26 = vmax.f32 %v14119_v51, %v6977_v3  ;;  %v4081_v6 = vsel %vm4072_vm5, %v6976_v57, %v6977_v3  ;;  %v6982_v35 = vunpack.i.h.bf16 %v6980_v20  ;;  %v6981_v49 = vunpack.i.l.bf16 %v6980_v20 }
 0x525   :  { %v11809_v44 = vmax.f32 %v14121_v53, %v4081_v6 }
 0x526   :  { %14120 = vst [vmem:[#allocation32_spill] sm:$0xff] %v11804_v26  ;;  %v11813_v24 = vmax.f32 %v14123_v5, %v6982_v35  ;;  %v4082_v15 = vsel %vm4072_vm5, %v6981_v49, %v6982_v35  ;;  %v13502_v56 = vrot.slane %v11804_v26, 2 }
 0x527   :  { %14122 = vst [vmem:[#allocation15_spill] sm:$0xff] %v11809_v44  ;;  %v11818_v25 = vmax.f32 %v14124_v47, %v4082_v15  ;;  %v13503_v51 = vrot.slane %v11809_v44, 2 }
 0x528   :  { %v13505_v57 = vrot.slane %v11813_v24, 2 }
 0x529   :  { %v13504_v46 = vrot.slane %v11818_v25, 2 }
 0x52a   :  { %v4342_v43 = vsel %vm158_vm1, %v13502_v56, %v13505_v57 }
 0x52b   :  { %v4341_v31 = vsel %vm158_vm1, %v13503_v51, %v13504_v46  ;;  %v11837_v35 = vmax.f32 %v11804_v26, %v4342_v43  ;;  %v14125_v51 = vmax.f32 %v11430_v58, 0.0 }
 0x52c   :  { %v11840_v6 = vmax.f32 %v11809_v44, %v4341_v31 }
 0x52d   :  { %v4464_v49 = vrot.slane %v11837_v35, 6 }
 0x52e   :  { %v4444_v53 = vrot.slane %v11840_v6, 6 }
 0x52f   :  { %v4465_v3 = vsel %vm4445_vm7, %v4464_v49, %v4463_v29  ;;  %v14129_v29 = vmax.f32 %v11436_v2, 0.0  ;;  %v7267_v2 = vld [vmem:[%s13200_s5 + $0x40] sm:$0xff]  }
 0x530   :  { %v4446_v20 = vsel %vm4445_vm7, %v4444_v53, %v4443_v16  ;;  %v14130_v53 = vmax.f32 %v11433_v39, 0.0  ;;  %5967 = vmatprep.subr.bf16.mxu0 %v7267_v2 }
 0x531   :  { %v6985_v5 = vpop.permute.xlu0 %6984 }
 0x532   :  { %v6987_v15 = vunpack.i.h.bf16 %v6985_v5  ;;  %v6986_v47 = vunpack.i.l.bf16 %v6985_v5 }
 0x533   :  { %v6990_v56 = vpop.permute.xlu1 %6989 }
 0x534   :  { %v11848_v43 = vmax.f32 %v14125_v51, %v6987_v15  ;;  %v4085_v46 = vsel %vm4072_vm5, %v6986_v47, %v6987_v15  ;;  %v6992_v31 = vunpack.i.h.bf16 %v6990_v56  ;;  %v6991_v57 = vunpack.i.l.bf16 %v6990_v56  ;;  %v7269_v15 = vld [vmem:[%s13200_s5 + $0x48] sm:$0xff]  }
 0x535   :  { %v11853_v48 = vmax.f32 %v14127_v23, %v4085_v46  ;;  %v7268_v23 = vld [vmem:[%s13200_s5] sm:$0xff]  }
 0x536   :  { %14126 = vst [vmem:[#allocation58_spill] sm:$0xff] %v11848_v43  ;;  %v11857_v49 = vmax.f32 %v14129_v29, %v6992_v31  ;;  %v4086_v16 = vsel %vm4072_vm5, %v6991_v57, %v6992_v31  ;;  %v13509_v58 = vrot.slane %v11848_v43, 2  ;;  %5968 = vmatpush3.bf16.msra.mxu0 %v7268_v23  ;;  %v7270_v31 = vld [vmem:[%s13200_s5 + $0x8] sm:$0xff]  }
 0x537   :  { %14128 = vst [vmem:[#allocation36_spill] sm:$0xff] %v11853_v48  ;;  %v11862_v5 = vmax.f32 %v14130_v53, %v4086_v16  ;;  %v13508_v51 = vrot.slane %v11853_v48, 2  ;;  %5969 = vmatprep.subr.bf16.mxu0 %v7269_v15  ;;  %v7271_v53 = vld [vmem:[%s13200_s5 + $0x50] sm:$0xff]   ;;  %v7273_v15 = vld [vmem:[%s13200_s5 + $0x58] sm:$0xff]  }
 0x538   :  { %v13511_v56 = vrot.slane %v11857_v49, 2 }
 0x539   :  { %v13510_v1 = vrot.slane %v11862_v5, 2 }
 0x53a   :  { %v4334_v39 = vsel %vm158_vm1, %v13509_v58, %v13511_v56  ;;  %5970 = vmatpush3.bf16.msra.mxu0 %v7270_v31  ;;  %v14131_v56 = vmax.f32 %v11462_v10, 0.0  ;;  %v7275_v10 = vld [vmem:[%s13200_s5 + $0x60] sm:$0xff]  }
 0x53b   :  { %v4333_v57 = vsel %vm158_vm1, %v13508_v51, %v13510_v1  ;;  %v11887_v46 = vmax.f32 %v11848_v43, %v4334_v39  ;;  %v7272_v39 = vld [vmem:[%s13200_s5 + $0x10] sm:$0xff]   ;;  %5971 = vmatprep.subr.bf16.mxu0 %v7271_v53 }
 0x53c   :  { %v11893_v47 = vmax.f32 %v11853_v48, %v4333_v57 }
 0x53d   :  { %v4466_v29 = vrot.slane %v11887_v46, 5 }
 0x53e   :  { %v4447_v16 = vrot.slane %v11893_v47, 5  ;;  %5972 = vmatpush3.bf16.msra.mxu0 %v7272_v39  ;;  %v7277_v39 = vld [vmem:[%s13200_s5 + $0x68] sm:$0xff]  }
 0x53f   :  { %v4467_v2 = vsel %vm4448_vm8, %v4466_v29, %v4465_v3  ;;  %5973 = vmatprep.subr.bf16.mxu0 %v7273_v15 }
 0x540   :  { %v4449_v23 = vsel %vm4448_vm8, %v4447_v16, %v4446_v20  ;;  %v7274_v20 = vld [vmem:[%s13200_s5 + $0x18] sm:$0xff]   ;;  %v14133_v16 = vmax.f32 %v11459_v52, 0.0 }
 0x541   :  { %v6995_v57 = vpop.permute.xlu0 %6994 }
 0x542   :  { %v6997_v51 = vunpack.i.h.bf16 %v6995_v57  ;;  %v6996_v58 = vunpack.i.l.bf16 %v6995_v57  ;;  %5974 = vmatpush3.bf16.msra.mxu0 %v7274_v20 }
 0x543   :  { %v7000_v1 = vpop.permute.xlu1 %6999  ;;  %5975 = vmatprep.subr.bf16.mxu0 %v7275_v10 }
 0x544   :  { %v11913_v48 = vmax.f32 %v14131_v56, %v6997_v51  ;;  %v4089_v3 = vsel %vm4072_vm5, %v6996_v58, %v6997_v51  ;;  %v7002_v31 = vunpack.i.h.bf16 %v7000_v1  ;;  %v7001_v29 = vunpack.i.l.bf16 %v7000_v1  ;;  %v7276_v51 = vld [vmem:[%s13200_s5 + $0x20] sm:$0xff]  }
 0x545   :  { %v11921_v53 = vmax.f32 %v14133_v16, %v4089_v3  ;;  %v14135_v56 = vmax.f32 %v11470_v36, 0.0  ;;  %v14136_v1 = vmax.f32 %v11466_v19, 0.0 }
 0x546   :  { %14132 = vst [vmem:[#allocation40_spill] sm:$0xff] %v11913_v48  ;;  %v4090_v58 = vsel %vm4072_vm5, %v7001_v29, %v7002_v31  ;;  %v13514_v15 = vrot.slane %v11913_v48, 2  ;;  %v7278_v29 = vld [vmem:[%s13200_s5 + $0x28] sm:$0xff]   ;;  %5976 = vmatpush3.bf16.msra.mxu0 %v7276_v51 }
 0x547   :  { %14134 = vst [vmem:[#allocation60_spill] sm:$0xff] %v11921_v53  ;;  %v11928_v57 = vmax.f32 %v14135_v56, %v7002_v31  ;;  %v11936_v52 = vmax.f32 %v14136_v1, %v4090_v58  ;;  %v13513_v3 = vrot.slane %v11921_v53, 2  ;;  %5977 = vmatprep.subr.bf16.mxu0 %v7277_v39  ;;  %v7279_v58 = vld [vmem:[%s13200_s5 + $0x70] sm:$0xff]   ;;  %v11978_v39 = vadd.f32 %v11453_v11, %v11284_v61  ;;  %v14142_v11 = vld [vmem:[#allocation13_spill] sm:$0xff] }
 0x549   :  { %v13516_v36 = vrot.slane %v11928_v57, 2  ;;  %v13515_v31 = vrot.slane %v11936_v52, 2  ;;  %14137 = vst [vmem:[#allocation59_spill] sm:$0xff] %v11978_v39 }
 0x54a   :  { %5978 = vmatpush3.bf16.msra.mxu0 %v7278_v29 }
 0x54b   :  { %v4326_v19 = vsel %vm158_vm1, %v13514_v15, %v13516_v36  ;;  %v4325_v20 = vsel %vm158_vm1, %v13513_v3, %v13515_v31  ;;  %v7280_v3 = vld [vmem:[%s13200_s5 + $0x30] sm:$0xff]   ;;  %5979 = vmatprep.subr.bf16.mxu0 %v7279_v58  ;;  %v14143_v58 = vmax.f32 %v14142_v11, 0.0 }
 0x54c   :  { %v11961_v16 = vmax.f32 %v11913_v48, %v4326_v19  ;;  %v11964_v10 = vmax.f32 %v11921_v53, %v4325_v20  ;;  %v14138_v53 = vmax.f32 %v11496_v0, 0.0 }
 0x54e   :  { %v4468_v56 = vrot.slane %v11961_v16, 4  ;;  %v4450_v1 = vrot.slane %v11964_v10, 4  ;;  %5980 = vmatpush3.bf16.msra.mxu0 %v7280_v3  ;;  %v14147_v3 = vld [vmem:[#allocation38_spill] sm:$0xff] }
 0x550   :  { %v4469_v19 = vsel %vm4451_vm9, %v4468_v56, %v4467_v2  ;;  %v4452_v20 = vsel %vm4451_vm9, %v4450_v1, %v4449_v23  ;;  %v14140_v23 = vmax.f32 %v11493_v4, 0.0  ;;  %v12047_v56 = vadd.f32 %v11608_v50, %v11288_v34 }
 0x551   :  { %v7005_v15 = vpop.permute.xlu0 %7004 }
 0x552   :  { %v7007_v51 = vunpack.i.h.bf16 %v7005_v15  ;;  %v7006_v31 = vunpack.i.l.bf16 %v7005_v15  ;;  %14154 = vst [vmem:[#allocation63_spill] sm:$0xff] %v12047_v56 }
 0x553   :  { %v7010_v36 = vpop.permute.xlu1 %7009 }
 0x554   :  { %v11982_v48 = vmax.f32 %v14138_v53, %v7007_v51  ;;  %v4093_v43 = vsel %vm4072_vm5, %v7006_v31, %v7007_v51  ;;  %v7012_v26 = vunpack.i.h.bf16 %v7010_v36  ;;  %v7011_v2 = vunpack.i.l.bf16 %v7010_v36  ;;  %v14144_v31 = vld [vmem:[#allocation42_spill] sm:$0xff] }
 0x555   :  { %v11987_v29 = vmax.f32 %v14140_v23, %v4093_v43  ;;  %v14145_v51 = vmax.f32 %v14144_v31, 0.0  ;;  %v12005_v23 = vadd.f32 %v14147_v3, %v11288_v34 }
 0x556   :  { %14139 = vst [vmem:[#allocation39_spill] sm:$0xff] %v11982_v48  ;;  %v11993_v1 = vmax.f32 %v14143_v58, %v7012_v26  ;;  %v4094_v0 = vsel %vm4072_vm5, %v7011_v2, %v7012_v26  ;;  %v13521_v4 = vrot.slane %v11982_v48, 2  ;;  %v14149_v26 = vld [vmem:[#allocation41_spill] sm:$0xff] }
 0x557   :  { %14141 = vst [vmem:[#allocation44_spill] sm:$0xff] %v11987_v29  ;;  %v11999_v36 = vmax.f32 %v14145_v51, %v4094_v0  ;;  %14148 = vst [vmem:[#allocation62_spill] sm:$0xff] %v12005_v23  ;;  %v13524_v11 = vrot.slane %v11987_v29, 2  ;;  %v12011_v2 = vadd.f32 %v14149_v26, %v11284_v61 }
 0x558   :  { %v13522_v43 = vrot.slane %v11993_v1, 2 }
 0x559   :  { %14146 = vst [vmem:[#allocation61_spill] sm:$0xff] %v11999_v36  ;;  %v13525_v58 = vrot.slane %v11999_v36, 2  ;;  %14150 = vst [vmem:[#allocation6_spill] sm:$0xff] %v12011_v2 }
 0x55a   :  { %v4318_v0 = vsel %vm158_vm1, %v13521_v4, %v13522_v43 }
 0x55b   :  { %v4317_v31 = vsel %vm158_vm1, %v13524_v11, %v13525_v58  ;;  %v12026_v51 = vmax.f32 %v11982_v48, %v4318_v0  ;;  %v14151_v11 = vld [vmem:[#allocation43_spill] sm:$0xff]  ;;  %v14155_v48 = vld [vmem:[#allocation2_spill] sm:$0xff] }
 0x55c   :  { %v12029_v3 = vmax.f32 %v11987_v29, %v4317_v31  ;;  %v12039_v0 = vadd.f32 %v14151_v11, %v11288_v34  ;;  %v12043_v31 = vadd.f32 %v11603_v45, %v11284_v61 }
 0x55d   :  { %v4470_v53 = vrot.slane %v12026_v51, 3 }
 0x55e   :  { %v4453_v4 = vrot.slane %v12029_v3, 3  ;;  %14152 = vst [vmem:[#allocation46_spill] sm:$0xff] %v12039_v0  ;;  %14153 = vst [vmem:[#allocation64_spill] sm:$0xff] %v12043_v31 }
 0x55f   :  { %v4471_v43 = vsel %vm4454_vm10, %v4470_v53, %v4469_v19  ;;  %v14156_v19 = vmax.f32 %v14155_v48, 0.0 }
 0x560   :  { %v4455_v15 = vsel %vm4454_vm10, %v4453_v4, %v4452_v20 }
 0x561   :  { %v7015_v44 = vpop.permute.xlu0 %7014 }
 0x562   :  { %v7017_v58 = vunpack.i.h.bf16 %v7015_v44  ;;  %v7016_v26 = vunpack.i.l.bf16 %v7015_v44  ;;  %v14161_v44 = vld [vmem:[#allocation49_spill] sm:$0xff] }
 0x563   :  { %v7020_v29 = vpop.permute.xlu1 %7019  ;;  %v14162_v34 = vmax.f32 %v14161_v44, 0.0 }
 0x564   :  { %v12051_v53 = vmax.f32 %v14156_v19, %v7017_v58  ;;  %v4097_v20 = vsel %vm4072_vm5, %v7016_v26, %v7017_v58  ;;  %v7022_v4 = vunpack.i.h.bf16 %v7020_v29  ;;  %v7021_v11 = vunpack.i.l.bf16 %v7020_v29 }
 0x565   :  { %v12056_v36 = vmax.f32 %v14159_v33, %v4097_v20  ;;  %v14164_v58 = vmax.f32 %v14163_v38, 0.0 }
 0x566   :  { %14157 = vst [vmem:[#allocation8_spill] sm:$0xff] %v12051_v53  ;;  %v12062_v50 = vmax.f32 %v14162_v34, %v7022_v4  ;;  %v4098_v48 = vsel %vm4072_vm5, %v7021_v11, %v7022_v4  ;;  %v13533_v41 = vrot.slane %v12051_v53, 2  ;;  %v4492_v34 = vrot.slane %v11785_v63, 4 }
 0x567   :  { %14160 = vst [vmem:[#allocation4_spill] sm:$0xff] %v12056_v36  ;;  %v12068_v26 = vmax.f32 %v14164_v58, %v4098_v48  ;;  %v13535_v29 = vrot.slane %v12056_v36, 2  ;;  %v4493_v58 = vrot.slane %v11779_v60, 3  ;;  %v14168_v63 = vmax.f32 %v11416_v9, 0.0 }
 0x568   :  { %v13534_v33 = vrot.slane %v12062_v50, 2  ;;  %v4479_v60 = vrot.slane %v11782_v59, 3 }
 0x569   :  { %14165 = vst [vmem:[#allocation66_spill] sm:$0xff] %v12068_v26  ;;  %v13536_v20 = vrot.slane %v12068_v26, 2 }
 0x56a   :  { %v4310_v4 = vsel %vm158_vm1, %v13533_v41, %v13534_v33 }
 0x56b   :  { %v12081_v38 = vmax.f32 %v12051_v53, %v4310_v4  ;;  %v4309_v11 = vsel %vm158_vm1, %v13535_v29, %v13536_v20  ;;  %v14169_v20 = vmax.f32 %v11418_v17, 0.0  ;;  %v14171_v17 = vmax.f32 %v11564_v37, 0.0 }
 0x56c   :  { %v12090_v44 = vmax.f32 %v12056_v36, %v4309_v11  ;;  %v4497_v11 = vrot.slane %v11887_v46, 1  ;;  %v14176_v46 = vmax.f32 %v12043_v31, 0.0  ;;  %v14177_v37 = vmax.f32 %v12047_v56, 0.0 }
 0x56d   :  { %v4472_v48 = vrot.slane %v12081_v38, 2  ;;  %v12109_v61 = vpack.i.bf16 %v14169_v20, %v14168_v63 }
 0x56e   :  { %v4456_v41 = vrot.slane %v12090_v44, 2 }
 0x56f   :  { %v12097_v4 = vsel %vm4457_vm11, %v4472_v48, %v4471_v43  ;;  %v4495_v43 = vrot.slane %v11837_v35, 2  ;;  %v14172_v35 = vmax.f32 %v11978_v39, 0.0  ;;  %v4483_v39 = vrot.slane %v11893_v47, 1 }
 0x570   :  { %14166 = vst [vmem:[#allocation65_spill] sm:$0xff] %v12097_v4  ;;  %v12100_v33 = vsel %vm4457_vm11, %v4456_v41, %v4455_v15  ;;  %v4478_v15 = vrot.slane %v11790_v8, 4  ;;  %v4481_v41 = vrot.slane %v11840_v6, 2  ;;  %v14174_v6 = vmax.f32 %v12011_v2, 0.0 }
 0x571   :  { %14167 = vst [vmem:[#allocation14_spill] sm:$0xff] %v12100_v33  ;;  %v7025_v19 = vpop.permute.xlu0 %7024  ;;  %v14173_v33 = vmax.f32 %v12005_v23, 0.0 }
 0x572   :  { %v7027_v36 = vunpack.i.h.bf16 %v7025_v19  ;;  %v4480_v2 = vsel %vm4442_vm6, %v4479_v60, %v4478_v15  ;;  %v14181_v60 = vld [vmem:[#allocation29_spill] sm:$0xff] }
 0x573   :  { %v12102_v45 = vpop.permute.xlu1 %7029  ;;  %v12126_v8 = vpack.i.bf16 %v14173_v33, %v14172_v35 }
 0x574   :  { %v14170_v9 = vunpack.i.h.bf16 %v12102_v45 }
 0x575   :  { %v7035_v29 = vpop.permute.xlu0 %7034 }
 0x576   :  { %v7037_v48 = vunpack.i.h.bf16 %v7035_v29  ;;  %v7036_v53 = vunpack.i.l.bf16 %v7035_v29  ;;  %v12120_v20 = vmax.f32 %v14171_v17, %v14170_v9  ;;  %v14175_v29 = vmax.f32 %v12039_v0, 0.0  ;;  %v14178_v0 = vld [vmem:[#allocation50_spill] sm:$0xff] }
 0x577   :  { %v7040_v4 = vpop.permute.xlu1 %7039  ;;  %v12138_v9 = vpack.i.bf16 %v14177_v37, %v14176_v46  ;;  %v4482_v46 = vsel %vm4445_vm7, %v4481_v41, %v4480_v2  ;;  %v7026_v37 = vunpack.i.l.bf16 %v7025_v19 }
 0x578   :  { %v7042_v63 = vunpack.i.h.bf16 %v7040_v4  ;;  %v7041_v59 = vunpack.i.l.bf16 %v7040_v4  ;;  %v12132_v26 = vpack.i.bf16 %v14175_v29, %v14174_v6  ;;  %v4494_v4 = vsel %vm4442_vm6, %v4493_v58, %v4492_v34 }
 0x579   :  { %v7045_v17 = vpop.permute.xlu0 %7044  ;;  %v4079_v33 = vsel %vm4072_vm5, %v7036_v53, %v7037_v48  ;;  %v4496_v35 = vsel %vm4445_vm7, %v4495_v43, %v4494_v4  ;;  %v14179_v6 = vmax.f32 %v14178_v0, 0.0  ;;  %v13550_v34 = vrot.slane %v12120_v20, 2 }
 0x57a   :  { %v7047_v31 = vunpack.i.h.bf16 %v7045_v17  ;;  %v7046_v23 = vunpack.i.l.bf16 %v7045_v17  ;;  %v4083_v47 = vsel %vm4072_vm5, %v7041_v59, %v7042_v63  ;;  %v4498_v53 = vsel %vm4448_vm8, %v4497_v11, %v4496_v35 }
 0x57b   :  { %v12147_v29 = vmax.f32 %v14179_v6, %v7027_v36  ;;  %v7050_v56 = vpop.permute.xlu1 %7049  ;;  %v14180_v58 = vmax.f32 %v11367_v27, 0.0  ;;  %v14182_v0 = vmax.f32 %v14181_v60, 0.0  ;;  %v14183_v6 = vld [vmem:[#allocation37_spill] sm:$0xff]  ;;  %v4499_v41 = vsel %vm4451_vm9, %v11961_v16, %v4498_v53 }
 0x57c   :  { %v4075_v17 = vsel %vm4072_vm5, %v7046_v23, %v7047_v31  ;;  %v7052_v4 = vunpack.i.h.bf16 %v7050_v56  ;;  %v14184_v2 = vmax.f32 %v14183_v6, 0.0  ;;  %v4500_v11 = vrot.slane %v12026_v51, 7 }
 0x57d   :  { %v12155_v43 = vmax.f32 %v14180_v58, %v7037_v48  ;;  %v12159_v15 = vmax.f32 %v14182_v0, %v4079_v33  ;;  %v4484_v27 = vsel %vm4448_vm8, %v4483_v39, %v4482_v46  ;;  %v7281_v48 = vld [vmem:[%s13200_s5 + $0x78] sm:$0xff]   ;;  %v13549_v59 = vrot.slane %v12147_v29, 2 }
 0x57e   :  { %v12164_v19 = vmax.f32 %v14184_v2, %v7042_v63  ;;  %v7031_v23 = vunpack.i.l.bf16 %v12102_v45  ;;  %v14185_v33 = vld [vmem:[#allocation33_spill] sm:$0xff]  ;;  %v4486_v16 = vrot.slane %v12029_v3, 7  ;;  %v4101_v51 = vsel %vm4072_vm5, %v7026_v37, %v7027_v36  ;;  %5981 = vmatprep.subr.bf16.mxu0 %v7281_v48 }
 0x57f   :  { %v14186_v35 = vmax.f32 %v14185_v33, 0.0  ;;  %v12179_v63 = vpop.permute.xlu1 %7059  ;;  %v14187_v39 = vmax.f32 %v11321_v28, 0.0  ;;  %v14188_v53 = vmax.f32 %v11318_v55, 0.0  ;;  %v4502_v0 = vrot.slane %v12081_v38, 6  ;;  %v14190_v2 = vld [vmem:[#allocation17_spill] sm:$0xff] }
 0x580   :  { %v4302_v3 = vsel %vm158_vm1, %v13549_v59, %v13550_v34  ;;  %v13552_v36 = vrot.slane %v12155_v43, 2  ;;  %v13551_v28 = vrot.slane %v12159_v15, 2  ;;  %v13555_v37 = vrot.slane %v12164_v19, 2  ;;  %v14196_v59 = vld [vmem:[#allocation51_spill] sm:$0xff] }
 0x581   :  { %v12177_v58 = vmax.f32 %v14186_v35, %v4083_v47  ;;  %v12185_v46 = vmax.f32 %v14187_v39, %v7047_v31  ;;  %v12189_v60 = vmax.f32 %v14188_v53, %v4075_v17  ;;  %v14189_v31 = vmax.f32 %v11580_v18, 0.0  ;;  %v7055_v47 = vpop.permute.xlu0 %7054 }
 0x582   :  { %v4501_v38 = vsel %vm4454_vm10, %v4500_v11, %v4499_v41  ;;  %v4485_v17 = vsel %vm4451_vm9, %v11964_v10, %v4484_v27  ;;  %v4488_v6 = vrot.slane %v12090_v44, 6  ;;  %v14191_v48 = vmax.f32 %v14190_v2, 0.0 }
 0x583   :  { %v12202_v55 = vmax.f32 %v14189_v31, %v7052_v4  ;;  %v14192_v35 = vunpack.i.h.bf16 %v12102_v45  ;;  %v13554_v39 = vrot.slane %v12177_v58, 2  ;;  %v4487_v53 = vsel %vm4454_vm10, %v4486_v16, %v4485_v17  ;;  %v12218_v31 = vpop.permute.xlu1 %7069 }
 0x584   :  { %v12211_v33 = vmax.f32 %v14191_v48, %v4101_v51  ;;  %v13560_v41 = vrot.slane %v12185_v46, 2  ;;  %v13559_v10 = vrot.slane %v12189_v60, 2  ;;  %v7051_v11 = vunpack.i.l.bf16 %v7050_v56 }
 0x585   :  { %v4102_v18 = vsel %vm4072_vm5, %v7031_v23, %v14192_v35  ;;  %v12223_v44 = vmax.f32 %v12147_v29, %v4302_v3  ;;  %v14193_v45 = vrot.slane %v11725_v14, 2  ;;  %v14194_v23 = vrot.slane %v11739_v21, 2 }
 0x586   :  { %v13553_v51 = vrot.slane %v12202_v55, 2  ;;  %v7057_v56 = vunpack.i.h.bf16 %v7055_v47  ;;  %v14195_v3 = vrot.slane %v11813_v24, 2  ;;  %v7056_v2 = vunpack.i.l.bf16 %v7055_v47 }
 0x587   :  { %v4348_v27 = vsel %vm158_vm1, %v14193_v45, %v13552_v36  ;;  %v4347_v16 = vsel %vm158_vm1, %v14194_v23, %v13551_v28  ;;  %v4503_v48 = vsel %vm4457_vm11, %v4502_v0, %v4501_v38  ;;  %v12246_v35 = vsel %vm4457_vm11, %v4488_v6, %v4487_v53 }
 0x588   :  { %v4340_v17 = vsel %vm158_vm1, %v14195_v3, %v13555_v37  ;;  %v13556_v45 = vrot.slane %v12211_v33, 2  ;;  %v14197_v23 = vmax.f32 %v14196_v59, 0.0  ;;  %v14198_v28 = vrot.slane %v11818_v25, 2  ;;  %v7075_v3 = vpop.permute.xlu1 %7074 }
 0x589   :  { %v4087_v47 = vsel %vm4072_vm5, %v7051_v11, %v7052_v4  ;;  %v12261_v0 = vmax.f32 %v11725_v14, %v4348_v27  ;;  %v12264_v38 = vmax.f32 %v11739_v21, %v4347_v16  ;;  %v14199_v59 = vrot.slane %v11687_v42, 2  ;;  %v12292_v16 = vpop.permute.xlu0 %7064 }
 0x58a   :  { %v12251_v34 = vmax.f32 %v14197_v23, %v4102_v18  ;;  %v4339_v36 = vsel %vm158_vm1, %v14198_v28, %v13554_v39  ;;  %v14200_v28 = vrot.slane %v11700_v32, 2  ;;  %v12279_v14 = vmax.f32 %v11813_v24, %v4340_v17  ;;  %v7282_v24 = vld [vmem:[%s13200_s5 + $0x38] sm:$0xff]  }
 0x58b   :  { %v4356_v6 = vsel %vm158_vm1, %v14199_v59, %v13560_v41  ;;  %v14201_v21 = vrot.slane %v11857_v49, 2  ;;  %v14202_v53 = vmax.f32 %v11601_v54, 0.0  ;;  %v4504_v27 = vrot.slane %v12223_v44, 5  ;;  %v14203_v23 = vld [vmem:[#allocation53_spill] sm:$0xff]  ;;  %5982 = vmatpush3.bf16.msra.mxu0 %v7282_v24 }
 0x58c   :  { %v4355_v4 = vsel %vm158_vm1, %v14200_v28, %v13559_v10  ;;  %v12298_v17 = vmax.f32 %v11818_v25, %v4339_v36  ;;  %v14204_v59 = vmax.f32 %v14203_v23, 0.0  ;;  %v7062_v54 = vunpack.i.h.bf16 %v12179_v63  ;;  %v7283_v25 = vld [vmem:[%s13200_s5 + $0xc0] sm:$0xff]   ;;  %v7085_v24 = vpop.permute.xlu1 %7084 }
 0x58d   :  { %v4332_v18 = vsel %vm158_vm1, %v14201_v21, %v13553_v51  ;;  %v12289_v11 = vmax.f32 %v14202_v53, %v7057_v56  ;;  %v4091_v21 = vsel %vm4072_vm5, %v7056_v2, %v7057_v56  ;;  %v13557_v53 = vrot.slane %v12251_v34, 2  ;;  %5989 = vmatprep.subr.bf16.mxu0 %v7283_v25 }
 0x58e   :  { %v12302_v28 = vmax.f32 %v14204_v59, %v4087_v47  ;;  %v12308_v51 = vmax.f32 %v11687_v42, %v4356_v6  ;;  %v12311_v39 = vmax.f32 %v11700_v32, %v4355_v4  ;;  %v4505_v37 = vsel %vm4460_vm12, %v4504_v27, %v4503_v48  ;;  %v14206_v6 = vld [vmem:[#allocation52_spill] sm:$0xff] }
 0x58f   :  { %v4545_v36 = vrot.slane %v12261_v0, 7  ;;  %v12320_v2 = vmax.f32 %v11857_v49, %v4332_v18  ;;  %4508 = vrot.lane.b32.xlu1 %v4505_v37, %s7365_s21  ;;  %v7067_v42 = vunpack.i.h.bf16 %v12292_v16  ;;  %v13558_v47 = vrot.slane %v12289_v11, 2 }
 0x590   :  { %14205 = vst [vmem:[#allocation7_spill] sm:$0xff] %v12302_v28  ;;  %v14207_v4 = vmax.f32 %v14206_v6, 0.0  ;;  %v13561_v37 = vrot.slane %v12302_v28, 2  ;;  %v14208_v23 = vmax.f32 %v11618_v30, 0.0  ;;  %v4301_v25 = vsel %vm158_vm1, %v13556_v45, %v13557_v53  ;;  %v7095_v10 = vpop.permute.xlu1 %7094 }
 0x591   :  { %v12340_v56 = vsel %vm4442_vm6, %v4545_v36, %v12308_v51  ;;  %v14209_v30 = vmax.f32 %v11631_v22, 0.0  ;;  %v12356_v36 = vmax.f32 %v12211_v33, %v4301_v25  ;;  %v7072_v48 = vunpack.i.h.bf16 %v12218_v31 }
 0x592   :  { %v12329_v27 = vmax.f32 %v14207_v4, %v4091_v21  ;;  %v12336_v59 = vmax.f32 %v14208_v23, %v7062_v54  ;;  %v7061_v21 = vunpack.i.l.bf16 %v12179_v63  ;;  %v14210_v63 = vrot.slane %v11928_v57, 2 }
 0x593   :  { %v12353_v23 = vmax.f32 %v14209_v30, %v7067_v42  ;;  %v7077_v49 = vunpack.i.h.bf16 %v7075_v3  ;;  %v7076_v32 = vunpack.i.l.bf16 %v7075_v3  ;;  %v14211_v22 = vrot.slane %v11862_v5, 2 }
 0x594   :  { %v4324_v6 = vsel %vm158_vm1, %v14210_v63, %v13558_v47  ;;  %v7066_v53 = vunpack.i.l.bf16 %v12292_v16  ;;  %v4490_v4 = vrot.slane %v12356_v36, 5  ;;  %v4095_v18 = vsel %vm4072_vm5, %v7061_v21, %v7062_v54  ;;  %v14215_v54 = vld [vmem:[#allocation35_spill] sm:$0xff] }
 0x595   :  { %v4331_v25 = vsel %vm158_vm1, %v14211_v22, %v13561_v37  ;;  %v14212_v63 = vmax.f32 %v11372_v12, 0.0  ;;  %v4080_v3 = vsel %vm4072_vm5, %v7076_v32, %v7077_v49  ;;  %v7087_v47 = vunpack.i.h.bf16 %v7085_v24  ;;  %v14213_v37 = vld [vmem:[#allocation26_spill] sm:$0xff] }
 0x596   :  { %v12382_v41 = vmax.f32 %v11928_v57, %v4324_v6  ;;  %v13565_v22 = vrot.slane %v12353_v23, 2  ;;  %v4491_v16 = vsel %vm4460_vm12, %v4490_v4, %v12246_v35  ;;  %v14214_v30 = vmax.f32 %v14213_v37, 0.0  ;;  %v14218_v35 = vld [vmem:[#allocation19_spill] sm:$0xff] }
 0x597   :  { %v12378_v45 = vmax.f32 %v14212_v63, %v7077_v49  ;;  %4506 = vrot.lane.b32.xlu0 %v4491_v16, %s7365_s21  ;;  %v14216_v32 = vmax.f32 %v14215_v54, 0.0  ;;  %v14217_v57 = vmax.f32 %v11326_v40, 0.0  ;;  %v7086_v21 = vunpack.i.l.bf16 %v7085_v24 }
 0x598   :  { %v12389_v28 = vmax.f32 %v14214_v30, %v7072_v48  ;;  %v12402_v63 = vmax.f32 %v11862_v5, %v4331_v25  ;;  %v14219_v37 = vmax.f32 %v14218_v35, 0.0  ;;  %v14220_v30 = vrot.slane %v12336_v59, 2 }
 0x599   :  { %v13564_v12 = vrot.slane %v12378_v45, 2  ;;  %v12395_v49 = vmax.f32 %v14216_v32, %v4080_v3  ;;  %v12399_v6 = vmax.f32 %v14217_v57, %v7087_v47  ;;  %v14221_v16 = vrot.slane %v11993_v1, 2 }
 0x59a   :  { %v12406_v4 = vmax.f32 %v14219_v37, %v4095_v18  ;;  %v7097_v54 = vunpack.i.h.bf16 %v7095_v10  ;;  %v4099_v40 = vsel %vm4072_vm5, %v7066_v53, %v7067_v42  ;;  %v14222_v5 = vrot.slane %v12155_v43, 2 }
 0x59b   :  { %v4316_v3 = vsel %vm158_vm1, %v14221_v16, %v14220_v30  ;;  %v4247_v32 = vrot.slane %v12395_v49, 2  ;;  %v13571_v18 = vrot.slane %v12399_v6, 2  ;;  %v14223_v25 = vrot.slane %v12062_v50, 2  ;;  %7079 = vrot.lane.b32.xlu0 %v12109_v61, %s7364_s4 }
 0x59c   :  { %v4346_v24 = vsel %vm158_vm1, %v14222_v5, %v13564_v12  ;;  %v7071_v53 = vunpack.i.l.bf16 %v12218_v31  ;;  %v4076_v35 = vsel %vm4072_vm5, %v7086_v21, %v7087_v47  ;;  %v13566_v37 = vrot.slane %v12389_v28, 2  ;;  %v14227_v12 = vld [vmem:[#allocation48_spill] sm:$0xff] }
 0x59d   :  { %v4308_v57 = vsel %vm158_vm1, %v14223_v25, %v13565_v22  ;;  %v4374_v42 = vmax.f32 %v12155_v43, %v4346_v24  ;;  %v14224_v30 = vrot.slane %v12159_v15, 2  ;;  %v14225_v5 = vmax.f32 %v11324_v62, 0.0 }
 0x59e   :  { %v14226_v43 = vmax.f32 %v11681_v13, 0.0  ;;  %v4551_v47 = vrot.slane %v12382_v41, 4  ;;  %v13567_v21 = vrot.slane %v12406_v4, 2  ;;  %v12452_v61 = vmax.f32 %v11993_v1, %v4316_v3 }
 0x59f   :  { %v4345_v16 = vsel %vm158_vm1, %v14224_v30, %v4247_v32  ;;  %v12443_v25 = vmax.f32 %v14225_v5, %v4076_v35  ;;  %v14228_v22 = vmax.f32 %v14227_v12, 0.0  ;;  %v14229_v13 = vrot.slane %v12185_v46, 2  ;;  %7089 = vrot.lane.b32.xlu0 %v12126_v8, %s7364_s4 }
 0x5a0   :  { %v12447_v31 = vmax.f32 %v14226_v43, %v7097_v54  ;;  %v4373_v24 = vmax.f32 %v12159_v15, %v4345_v16  ;;  %v7096_v5 = vunpack.i.l.bf16 %v7095_v10  ;;  %v12467_v43 = vmax.f32 %v12062_v50, %v4308_v57 }
 0x5a1   :  { %v12457_v30 = vmax.f32 %v14228_v22, %v4099_v40  ;;  %v13572_v62 = vrot.slane %v12443_v25, 2  ;;  %v4354_v35 = vsel %vm158_vm1, %v14229_v13, %v13571_v18  ;;  %v4103_v1 = vsel %vm4072_vm5, %v7071_v53, %v7072_v48 }
 0x5a2   :  { %v4633_v15 = vrot.slane %v4374_v42, 7  ;;  %v4366_v12 = vmax.f32 %v12185_v46, %v4354_v35  ;;  %v14230_v22 = vrot.slane %v12120_v20, 2  ;;  %v4671_v40 = vrot.slane %v4374_v42, 3  ;;  %v14232_v42 = vld [vmem:[#allocation83_spill] sm:$0xff] }
 0x5a3   :  { %v14231_v50 = vrot.slane %v12189_v60, 2  ;;  %v13568_v46 = vrot.slane %v12447_v31, 2  ;;  %v4619_v48 = vrot.slane %v4373_v24, 7  ;;  %v14233_v13 = vmax.f32 %v14232_v42, 0.0  ;;  %7099 = vrot.lane.b32.xlu0 %v12132_v26, %s7364_s4 }
 0x5a4   :  { %v4300_v3 = vsel %vm158_vm1, %v14230_v22, %v13566_v37  ;;  %v12488_v53 = vsel %vm4442_vm6, %v4633_v15, %v4366_v12  ;;  %v4670_v16 = vrot.slane %v4366_v12, 4  ;;  %v4657_v8 = vrot.slane %v4373_v24, 3 }
 0x5a5   :  { %v4353_v10 = vsel %vm158_vm1, %v14231_v50, %v13572_v62  ;;  %v12492_v35 = vmax.f32 %v14233_v13, %v4103_v1  ;;  %v4092_v22 = vsel %vm4072_vm5, %v7096_v5, %v7097_v54  ;;  %v14234_v50 = vrot.slane %v12289_v11, 2 }
 0x5a6   :  { %v4365_v57 = vmax.f32 %v12189_v60, %v4353_v10  ;;  %v12505_v12 = vsel %vm4442_vm6, %v4671_v40, %v4670_v16  ;;  %v12508_v1 = vmax.f32 %v12120_v20, %v4300_v3  ;;  %v14235_v24 = vrot.slane %v12329_v27, 2  ;;  %v14237_v10 = vld [vmem:[#allocation57_spill] sm:$0xff] }
 0x5a7   :  { %v4322_v37 = vsel %vm158_vm1, %v14234_v50, %v13568_v46  ;;  %v14236_v54 = vrot.slane %v11936_v52, 2  ;;  %v14239_v20 = vrot.slane %v12279_v14, 6  ;;  %v14240_v13 = vrot.slane %v12320_v2, 5  ;;  %7109 = vrot.lane.b32.xlu0 %v12138_v9, %s7364_s4 }
 0x5a8   :  { %v12502_v60 = vsel %vm4442_vm6, %v4619_v48, %v4365_v57  ;;  %v4656_v15 = vrot.slane %v4365_v57, 4  ;;  %v14238_v48 = vmax.f32 %v14237_v10, 0.0  ;;  %v12523_v40 = vmax.f32 %v12289_v11, %v4322_v37  ;;  %v7105_v57 = vpop.permute.xlu1 %7104 }
 0x5a9   :  { %v4323_v5 = vsel %vm158_vm1, %v14236_v54, %v14235_v24  ;;  %v4548_v3 = vsel %vm4445_vm7, %v14239_v20, %v12340_v56  ;;  %v4553_v50 = vrot.slane %v12452_v61, 3  ;;  %v4285_v11 = vrot.slane %v12457_v30, 2 }
 0x5aa   :  { %v12520_v42 = vmax.f32 %v14238_v48, %v4092_v22  ;;  %v12530_v16 = vsel %vm4442_vm6, %v4657_v8, %v4656_v15  ;;  %v4550_v26 = vsel %vm4448_vm8, %v14240_v13, %v4548_v3  ;;  %v4555_v22 = vrot.slane %v12467_v43, 2  ;;  %v14241_v8 = vld [vmem:[#allocation61_spill] sm:$0xff] }
 0x5ab   :  { %v13569_v37 = vrot.slane %v12492_v35, 2  ;;  %v4552_v56 = vsel %vm4451_vm9, %v4551_v47, %v4550_v26  ;;  %v14242_v15 = vrot.slane %v14241_v8, 2  ;;  %v4557_v48 = vrot.slane %v12508_v1, 1 }
 0x5ac   :  { %v13570_v24 = vrot.slane %v12520_v42, 2  ;;  %v4554_v10 = vsel %vm4454_vm10, %v4553_v50, %v4552_v56  ;;  %v7107_v20 = vunpack.i.h.bf16 %v7105_v57  ;;  %v4395_v3 = vmax.f32 %v11936_v52, %v4323_v5  ;;  %v14244_v5 = vld [vmem:[#allocation34_spill] sm:$0xff] }
 0x5ad   :  { %v4315_v54 = vsel %vm158_vm1, %v14242_v15, %v13567_v21  ;;  %v14243_v13 = vrot.slane %v12329_v27, 2  ;;  %v4556_v26 = vsel %vm4457_vm11, %v4555_v22, %v4554_v10  ;;  %v7106_v15 = vunpack.i.l.bf16 %v7105_v57 }
 0x5ae   :  { %v4535_v50 = vrot.slane %v12402_v63, 5  ;;  %v4558_v52 = vsel %vm4460_vm12, %v4557_v48, %v4556_v26  ;;  %v14245_v21 = vmax.f32 %v14244_v5, 0.0  ;;  %v14246_v9 = vrot.slane %v12251_v34, 2  ;;  %v14249_v26 = vld [vmem:[#allocation28_spill] sm:$0xff] }
 0x5af   :  { %v4321_v47 = vsel %vm158_vm1, %v14243_v13, %v13570_v24  ;;  %4561 = vrot.lane.b32.xlu1 %v4558_v52, %s7366_s22  ;;  %v4100_v22 = vsel %vm4072_vm5, %v7106_v15, %v7107_v20  ;;  %v4584_v13 = vrot.slane %v12279_v14, 2  ;;  %v14250_v15 = vmax.f32 %v14249_v26, 0.0 }
 0x5b0   :  { %v12561_v56 = vmax.f32 %v12329_v27, %v4321_v47  ;;  %v12566_v46 = vmax.f32 %v14245_v21, %v7107_v20  ;;  %v4299_v57 = vsel %vm158_vm1, %v14246_v9, %v13569_v37  ;;  %v14247_v27 = vld [vmem:[#allocation66_spill] sm:$0xff]  ;;  %v4403_v21 = vmax.f32 %v14241_v8, %v4315_v54 }
 0x5b1   :  { %v14248_v10 = vrot.slane %v14247_v27, 2  ;;  %v4581_v47 = vrot.slane %v12308_v51, 4  ;;  %v12586_v52 = vmax.f32 %v14250_v15, %v4100_v22  ;;  %v4570_v5 = vrot.slane %v12298_v17, 2 }
 0x5b2   :  { %v4288_v20 = vrot.slane %v12566_v46, 2  ;;  %v14251_v37 = vrot.slane %v12264_v38, 7  ;;  %v4537_v8 = vrot.slane %v4395_v3, 4  ;;  %v14252_v51 = vrot.slane %v12353_v23, 2 }
 0x5b3   :  { %v4307_v48 = vsel %vm158_vm1, %v14248_v10, %v4285_v11  ;;  %v4287_v14 = vrot.slane %v12586_v52, 2  ;;  %v4419_v22 = vmax.f32 %v12251_v34, %v4299_v57  ;;  %v14253_v26 = vrot.slane %v12298_v17, 6 }
 0x5b4   :  { %v4411_v9 = vmax.f32 %v14247_v27, %v4307_v48  ;;  %v4532_v10 = vsel %vm4442_vm6, %v14251_v37, %v12311_v39  ;;  %v4306_v54 = vsel %vm158_vm1, %v14252_v51, %v4288_v20  ;;  %v14254_v48 = vrot.slane %v12311_v39, 4 }
 0x5b5   :  { %v4534_v27 = vsel %vm4445_vm7, %v14253_v26, %v4532_v10  ;;  %v14255_v37 = vrot.slane %v12264_v38, 3  ;;  %v12611_v24 = vmax.f32 %v12353_v23, %v4306_v54  ;;  %v4539_v62 = vrot.slane %v4403_v21, 3 }
 0x5b6   :  { %v4536_v18 = vsel %vm4448_vm8, %v4535_v50, %v4534_v27  ;;  %v14256_v51 = vrot.slane %v12261_v0, 3  ;;  %v4305_v17 = vsel %vm158_vm1, %v4285_v11, %v4287_v14  ;;  %v4541_v38 = vrot.slane %v4411_v9, 2 }
 0x5b7   :  { %v4569_v15 = vsel %vm4442_vm6, %v14255_v37, %v14254_v48  ;;  %v4538_v39 = vsel %vm4451_vm9, %v4537_v8, %v4536_v18  ;;  %v4572_v57 = vrot.slane %v12402_v63, 1  ;;  %v4586_v23 = vrot.slane %v12320_v2, 1 }
 0x5b8   :  { %v4583_v34 = vsel %vm4442_vm6, %v14256_v51, %v4581_v47  ;;  %v4459_v10 = vrot.slane %v12356_v36, 1  ;;  %v12626_v50 = vmax.f32 %v12457_v30, %v4305_v17  ;;  %v4589_v0 = vrot.slane %v12452_v61, 7 }
 0x5b9   :  { %v4591_v47 = vrot.slane %v12467_v43, 6  ;;  %v4540_v54 = vsel %vm4454_vm10, %v4539_v62, %v4538_v39  ;;  %v4543_v26 = vrot.slane %v4419_v22, 1  ;;  %v4593_v11 = vrot.slane %v12508_v1, 5  ;;  %v14257_v1 = vld [vmem:[#allocation14_spill] sm:$0xff] }
 0x5ba   :  { %v4542_v18 = vsel %vm4457_vm11, %v4541_v38, %v4540_v54  ;;  %v4575_v8 = vrot.slane %v4403_v21, 7  ;;  %v4577_v63 = vrot.slane %v4411_v9, 6  ;;  %v4571_v36 = vsel %vm4445_vm7, %v4570_v5, %v4569_v15  ;;  %v14258_v5 = vld [vmem:[#allocation65_spill] sm:$0xff]  ;;  %v14261_v38 = vld [vmem:[#allocation32_spill] sm:$0xff] }
 0x5bb   :  { %v4544_v2 = vsel %vm4460_vm12, %v4543_v26, %v4542_v18  ;;  %v4585_v30 = vsel %vm4445_vm7, %v4584_v13, %v4583_v34  ;;  %v4474_v27 = vrot.slane %v12223_v44, 1  ;;  %v4579_v61 = vrot.slane %v4419_v22, 5 }
 0x5bc   :  { %4559 = vrot.lane.b32.xlu0 %v4544_v2, %s7366_s22  ;;  %v4573_v62 = vsel %vm4448_vm8, %v4572_v57, %v4571_v36  ;;  %v4587_v43 = vsel %vm4448_vm8, %v4586_v23, %v4585_v30  ;;  %v4461_v48 = vsel %vm4460_vm12, %v4459_v10, %v14257_v1  ;;  %v14262_v57 = vrot.slane %v14261_v38, 2 }
 0x5bd   :  { %v4574_v21 = vsel %vm4451_vm9, %v4395_v3, %v4573_v62  ;;  %v4588_v9 = vsel %vm4451_vm9, %v12382_v41, %v4587_v43  ;;  %v4475_v13 = vsel %vm4460_vm12, %v4474_v27, %v14258_v5  ;;  %v14259_v3 = vld [vmem:[#allocation15_spill] sm:$0xff]  ;;  %v14263_v23 = vrot.slane %v12378_v45, 2  ;;  %v14273_v62 = vld [vmem:[#allocation44_spill] sm:$0xff] }
 0x5be   :  { %v4576_v44 = vsel %vm4454_vm10, %v4575_v8, %v4574_v21  ;;  %v4590_v22 = vsel %vm4454_vm10, %v4589_v0, %v4588_v9  ;;  %v14260_v41 = vrot.slane %v14259_v3, 2  ;;  %v14264_v0 = vld [vmem:[#allocation31_spill] sm:$0xff]  ;;  %v14266_v54 = vrot.slane %v12443_v25, 2 }
 0x5bf   :  { %v4578_v37 = vsel %vm4457_vm11, %v4577_v63, %v4576_v44  ;;  %v4592_v15 = vsel %vm4457_vm11, %v4591_v47, %v4590_v22  ;;  %v4344_v10 = vsel %vm158_vm1, %v14263_v23, %v14262_v57  ;;  %v14265_v47 = vrot.slane %v14264_v0, 2  ;;  %v14270_v63 = vld [vmem:[#allocation39_spill] sm:$0xff] }
 0x5c0   :  { %v4580_v51 = vsel %vm4460_vm12, %v4579_v61, %v4578_v37  ;;  %v4594_v34 = vsel %vm4460_vm12, %v4593_v11, %v4592_v15  ;;  %v4343_v39 = vsel %vm158_vm1, %v4247_v32, %v14260_v41  ;;  %v14267_v11 = vld [vmem:[#allocation54_spill] sm:$0xff]  ;;  %v14269_v8 = vrot.slane %v12399_v6, 2 }
 0x5c1   :  { %v7113_v17 = vpack.i.bf16 %v4594_v34, %v4580_v51  ;;  %v4351_v26 = vsel %vm158_vm1, %v14266_v54, %v14265_v47  ;;  %v14268_v18 = vrot.slane %v14267_v11, 2  ;;  %v14271_v2 = vrot.slane %v14270_v63, 2  ;;  %v7285_v34 = vld [vmem:[%s13200_s5 + $0xc8] sm:$0xff]  }
 0x5c2   :  { %v14272_v36 = vrot.slane %v12447_v31, 2  ;;  %v4375_v27 = vmax.f32 %v12395_v49, %v4343_v39  ;;  %v4376_v61 = vmax.f32 %v12378_v45, %v4344_v10  ;;  %v14274_v43 = vrot.slane %v14273_v62, 2  ;;  %v7284_v45 = vld [vmem:[%s13200_s5 + $0x80] sm:$0xff]  }
 0x5c3   :  { %7114 = vrot.lane.b32.xlu0 %v7113_v17, %s7364_s4  ;;  %v4352_v32 = vsel %vm158_vm1, %v14269_v8, %v14268_v18  ;;  %v14275_v1 = vrot.slane %v12520_v42, 2  ;;  %v4367_v44 = vmax.f32 %v12443_v25, %v4351_v26  ;;  %v4751_v51 = vpack.c.bf16 %v4461_v48, %v4461_v48  ;;  %v14278_v10 = vld [vmem:[#allocation10_spill] sm:$0xff]  ;;  %v7287_v26 = vld [vmem:[%s13200_s5 + $0xd0] sm:$0xff]  }
 0x5c4   :  { %v4320_v30 = vsel %vm158_vm1, %v14272_v36, %v14271_v2  ;;  %v4368_v22 = vmax.f32 %v12399_v6, %v4352_v32  ;;  %v4708_v17 = vrot.slane %v4375_v27, 7  ;;  %v14276_v6 = vrot.slane %v12211_v33, 2  ;;  %v14280_v32 = vld [vmem:[#allocation3_spill] sm:$0xff] }
 0x5c5   :  { %v4319_v21 = vsel %vm158_vm1, %v14275_v1, %v14274_v43  ;;  %v4400_v37 = vmax.f32 %v12447_v31, %v4320_v30  ;;  %v14277_v3 = vrot.slane %v12147_v29, 2  ;;  %v4639_v38 = vrot.slane %v12523_v40, 4  ;;  %v7286_v29 = vld [vmem:[%s13200_s5 + $0x88] sm:$0xff]  }
 0x5c6   :  { %v4399_v49 = vmax.f32 %v12520_v42, %v4319_v21  ;;  %v12709_v31 = vsel %vm158_vm1, %v4287_v14, %v14276_v6  ;;  %v12720_v39 = vsel %vm4442_vm6, %v4708_v17, %v4367_v44  ;;  %v14279_v0 = vmax.f32 %v14278_v10, 0.0  ;;  %v7288_v21 = vld [vmem:[%s13200_s5 + $0x90] sm:$0xff]  }
 0x5c7   :  { %v12717_v42 = vsel %vm158_vm1, %v4288_v20, %v14277_v3  ;;  %v12724_v14 = vrot.slane %v4400_v37, 4  ;;  %v4625_v20 = vrot.slane %v12561_v56, 4  ;;  %v4643_v8 = vrot.slane %v12611_v24, 2  ;;  %v14287_v3 = vld [vmem:[#allocation36_spill] sm:$0xff] }
 0x5c8   :  { %v12730_v57 = vrot.slane %v4399_v49, 4  ;;  %v4416_v18 = vmax.f32 %v12566_v46, %v12717_v42  ;;  %v14281_v63 = vmax.f32 %v14280_v32, 0.0  ;;  %v4680_v30 = vrot.slane %v12611_v24, 6  ;;  %v14285_v49 = vld [vmem:[#allocation62_spill] sm:$0xff] }
 0x5c9   :  { %v4629_v44 = vrot.slane %v12626_v50, 2 }
 0x5ca   :  { %v4732_v24 = vrot.slane %v4416_v18, 2 }
 0x601   :  { %v12732_v23 = vpop.permute.xlu1 %4508 }
 0x609   :  { %v4507_v9 = vpop.permute.xlu0 %4506 }
 0x60a   :  { %v4745_v5 = vsel %vm4510_vm13, %v4475_v13, %v4507_v9  ;;  %v4722_v13 = vrot.slane %v4376_v61, 7  ;;  %v12750_v43 = vsel %vm4510_vm13, %v4507_v9, %v12732_v23 }
 0x60b   :  { %v4752_v15 = vpack.c.bf16 %v4745_v5, %v4745_v5  ;;  %v4666_v5 = vrot.slane %v12626_v50, 6 }
 0x60c   :  { %v4723_v33 = vsel %vm4442_vm6, %v4722_v13, %v4368_v22  ;;  %v14282_v22 = vld [vmem:[#allocation58_spill] sm:$0xff]  ;;  %v7289_v13 = vld [vmem:[%s13200_s5 + $0xd8] sm:$0xff]  }
 0x60d   :  { %5533 = vmatprep.mubr.bf16.mxu0 %v4752_v15  ;;  %v7080_v25 = vpop.permute.xlu0 %7079  ;;  %v14283_v37 = vrot.slane %v14282_v22, 2  ;;  %v7290_v22 = vld [vmem:[%s13200_s5 + $0x98] sm:$0xff]  }
 0x60e   :  { %v7082_v48 = vunpack.i.h.bf16 %v7080_v25  ;;  %v7081_v41 = vunpack.i.l.bf16 %v7080_v25  ;;  %5534 = vmatmul.mubr.bf16.vlgmr.msra.gmra.mrb[92].mxu0 %v4751_v51  ;;  %v14286_v51 = vmax.f32 %v14285_v49, 0.0 }
 0x60f   :  { %5990 = vmatpush3.bf16.msra.mxu0 %v7284_v45  ;;  %v14284_v45 = vrot.slane %v12164_v19, 2 }
 0x610   :  { %v4192_v47 = vmax.f32 %v14279_v0, %v7082_v48  ;;  %v4084_v54 = vsel %vm4072_vm5, %v7081_v41, %v7082_v48  ;;  %5991 = vmatprep.subr.bf16.mxu0 %v7285_v34  ;;  %v14288_v48 = vrot.slane %v14287_v3, 2 }
 0x611   :  { %v4191_v2 = vmax.f32 %v14281_v63, %v4084_v54  ;;  %v7090_v36 = vpop.permute.xlu0 %7089  ;;  %v14290_v63 = vld [vmem:[#allocation59_spill] sm:$0xff] }
 0x612   :  { %v4256_v27 = vrot.slane %v4192_v47, 2  ;;  %v7092_v61 = vunpack.i.h.bf16 %v7090_v36  ;;  %v7091_v62 = vunpack.i.l.bf16 %v7090_v36  ;;  %v14291_v36 = vmax.f32 %v14290_v63, 0.0 }
 0x613   :  { %v4255_v1 = vrot.slane %v4191_v2, 2  ;;  %5992 = vmatpush3.bf16.msra.mxu0 %v7286_v29  ;;  %v14289_v29 = vrot.slane %v12177_v58, 2 }
 0x614   :  { %v4336_v15 = vsel %vm158_vm1, %v4256_v27, %v14283_v37  ;;  %v4338_v9 = vsel %vm158_vm1, %v14284_v45, %v4256_v27  ;;  %v4200_v34 = vmax.f32 %v14286_v51, %v7092_v61  ;;  %v4088_v17 = vsel %vm4072_vm5, %v7091_v62, %v7092_v61  ;;  %5993 = vmatprep.subr.bf16.mxu0 %v7287_v26 }
 0x615   :  { %v4382_v25 = vmax.f32 %v12164_v19, %v4338_v9  ;;  %v4384_v6 = vmax.f32 %v4192_v47, %v4336_v15  ;;  %v4335_v41 = vsel %vm158_vm1, %v4255_v1, %v14288_v48  ;;  %v4337_v10 = vsel %vm158_vm1, %v14289_v29, %v4255_v1  ;;  %v7100_v0 = vpop.permute.xlu0 %7099 }
 0x616   :  { %v12781_v54 = vmax.f32 %v12177_v58, %v4337_v10  ;;  %v4383_v26 = vmax.f32 %v4191_v2, %v4335_v41  ;;  %v4264_v32 = vrot.slane %v4200_v34, 2  ;;  %v4199_v19 = vmax.f32 %v14291_v36, %v4088_v17  ;;  %v14292_v2 = vld [vmem:[#allocation40_spill] sm:$0xff]  ;;  %v14295_v41 = vld [vmem:[#allocation46_spill] sm:$0xff] }
 0x617   :  { %v4635_v47 = vrot.slane %v4382_v25, 6  ;;  %v4673_v27 = vrot.slane %v4382_v25, 2  ;;  %v4724_v61 = vrot.slane %v4384_v6, 6  ;;  %v7102_v62 = vunpack.i.h.bf16 %v7100_v0  ;;  %5994 = vmatpush3.bf16.msra.mxu0 %v7288_v21  ;;  %v7291_v21 = vld [vmem:[%s13200_s5 + $0xe0] sm:$0xff]  }
 0x618   :  { %v4753_v1 = vpack.c.bf16 %v12750_v43, %v12750_v43  ;;  %v4621_v58 = vrot.slane %v12781_v54, 6  ;;  %v4710_v37 = vrot.slane %v4383_v26, 6  ;;  %v14293_v15 = vrot.slane %v14292_v2, 2  ;;  %5995 = vmatprep.subr.bf16.mxu0 %v7289_v13  ;;  %v7292_v36 = vld [vmem:[%s13200_s5 + $0xa0] sm:$0xff]   ;;  %v7302_v43 = vld [vmem:[%s13200_s5 + $0x108] sm:$0xff]  }
 0x619   :  { %v12800_v9 = vsel %vm4445_vm7, %v4635_v47, %v12488_v53  ;;  %v12804_v49 = vsel %vm4445_vm7, %v4673_v27, %v12505_v12  ;;  %v4659_v51 = vrot.slane %v12781_v54, 2  ;;  %v14294_v17 = vrot.slane %v12202_v55, 2  ;;  %v7110_v13 = vpop.permute.xlu0 %7109  ;;  %v7298_v54 = vld [vmem:[%s13200_s5 + $0xb8] sm:$0xff]  }
 0x61a   :  { %v4328_v45 = vsel %vm158_vm1, %v4264_v32, %v14293_v15  ;;  %v4725_v6 = vsel %vm4445_vm7, %v4724_v61, %v4723_v33  ;;  %v4263_v53 = vrot.slane %v4199_v19, 2  ;;  %v14296_v29 = vmax.f32 %v14295_v41, 0.0  ;;  %v14299_v61 = vld [vmem:[#allocation7_spill] sm:$0xff] }
 0x61b   :  { %v4330_v25 = vsel %vm158_vm1, %v14294_v17, %v4264_v32  ;;  %v4392_v48 = vmax.f32 %v4200_v34, %v4328_v45  ;;  %v7101_v12 = vunpack.i.l.bf16 %v7100_v0  ;;  %v7112_v26 = vunpack.i.h.bf16 %v7110_v13  ;;  %5996 = vmatpush3.bf16.msra.mxu0 %v7290_v22  ;;  %v14297_v34 = vld [vmem:[#allocation60_spill] sm:$0xff]  ;;  %v7293_v0 = vld [vmem:[%s13200_s5 + $0xe8] sm:$0xff]  }
 0x61c   :  { %v12813_v3 = vmax.f32 %v12202_v55, %v4330_v25  ;;  %v4216_v10 = vmax.f32 %v14296_v29, %v7102_v62  ;;  %v7111_v63 = vunpack.i.l.bf16 %v7110_v13  ;;  %v12822_v32 = vsel %vm4445_vm7, %v4710_v37, %v12720_v39  ;;  %5997 = vmatprep.subr.bf16.mxu0 %v7291_v21  ;;  %v14301_v25 = vld [vmem:[#allocation6_spill] sm:$0xff] }
 0x61d   :  { %v4726_v33 = vrot.slane %v4392_v48, 5  ;;  %v14298_v47 = vrot.slane %v14297_v34, 2  ;;  %v14300_v22 = vrot.slane %v14299_v61, 2  ;;  %v4096_v15 = vsel %vm4072_vm5, %v7101_v12, %v7102_v62  ;;  %v14303_v48 = vld [vmem:[#allocation63_spill] sm:$0xff] }
 0x61e   :  { %v4637_v55 = vrot.slane %v12813_v3, 5  ;;  %v4280_v2 = vrot.slane %v4216_v10, 2  ;;  %v4675_v45 = vrot.slane %v12813_v3, 1  ;;  %v14302_v13 = vmax.f32 %v14301_v25, 0.0 }
 0x61f   :  { %v4327_v27 = vsel %vm158_vm1, %v4263_v53, %v14298_v47  ;;  %v4329_v39 = vsel %vm158_vm1, %v14300_v22, %v4263_v53  ;;  %v14304_v41 = vmax.f32 %v14303_v48, 0.0  ;;  %v12844_v34 = vsel %vm4448_vm8, %v4726_v33, %v4725_v6  ;;  %v14305_v47 = vld [vmem:[#allocation8_spill] sm:$0xff]  ;;  %5998 = vmatpush3.bf16.msra.mxu0 %v7292_v36 }
 0x620   :  { %v4391_v37 = vmax.f32 %v4199_v19, %v4327_v27  ;;  %v4389_v17 = vmax.f32 %v14299_v61, %v4329_v39  ;;  %v4215_v21 = vmax.f32 %v14302_v13, %v4096_v15  ;;  %v14306_v11 = vrot.slane %v14305_v47, 2  ;;  %v7294_v27 = vld [vmem:[%s13200_s5 + $0xa8] sm:$0xff]   ;;  %5999 = vmatprep.subr.bf16.mxu0 %v7293_v0  ;;  %v14310_v0 = vld [vmem:[#allocation4_spill] sm:$0xff] }
 0x621   :  { %v4232_v29 = vmax.f32 %v14304_v41, %v7112_v26  ;;  %v14307_v62 = vrot.slane %v12336_v59, 2  ;;  %v4104_v12 = vsel %vm4072_vm5, %v7111_v63, %v7112_v26  ;;  %v14308_v26 = vld [vmem:[#allocation64_spill] sm:$0xff]  ;;  %v4660_v15 = vsel %vm4445_vm7, %v4659_v51, %v12530_v16 }
 0x622   :  { %v4312_v19 = vsel %vm158_vm1, %v4280_v2, %v14306_v11  ;;  %v4661_v61 = vrot.slane %v4389_v17, 1  ;;  %v12858_v6 = vrot.slane %v4391_v37, 5  ;;  %v7295_v11 = vld [vmem:[%s13200_s5 + $0xf0] sm:$0xff]   ;;  %v4279_v39 = vrot.slane %v4215_v21, 2 }
 0x623   :  { %v4314_v53 = vsel %vm158_vm1, %v14307_v62, %v4280_v2  ;;  %v4408_v22 = vmax.f32 %v4216_v10, %v4312_v19  ;;  %v4296_v2 = vrot.slane %v4232_v29, 2  ;;  %v14309_v63 = vmax.f32 %v14308_v26, 0.0  ;;  %v14314_v51 = vld [vmem:[#allocation56_spill] sm:$0xff]  ;;  %6000 = vmatpush3.bf16.msra.mxu0 %v7294_v27  ;;  %v7297_v26 = vld [vmem:[%s13200_s5 + $0xf8] sm:$0xff]  }
 0x624   :  { %v12861_v33 = vmax.f32 %v12336_v59, %v4314_v53  ;;  %v4623_v37 = vrot.slane %v4389_v17, 5  ;;  %v4662_v10 = vsel %vm4448_vm8, %v4661_v61, %v4660_v15  ;;  %v14311_v13 = vrot.slane %v14310_v0, 2  ;;  %v7296_v53 = vld [vmem:[%s13200_s5 + $0xb0] sm:$0xff]   ;;  %6001 = vmatprep.subr.bf16.mxu0 %v7295_v11 }
 0x625   :  { %v12868_v36 = vmax.f32 %v14309_v63, %v4104_v12  ;;  %v14312_v41 = vrot.slane %v12406_v4, 2  ;;  %v14313_v19 = vrot.slane %v12389_v28, 2  ;;  %v14315_v17 = vrot.slane %v14314_v51, 2 }
 0x626   :  { %v4641_v25 = vrot.slane %v12861_v33, 3  ;;  %v4678_v59 = vrot.slane %v12861_v33, 7  ;;  %v4311_v48 = vsel %vm158_vm1, %v4279_v39, %v14311_v13  ;;  %v4730_v12 = vrot.slane %v4408_v22, 3 }
 0x627   :  { %v4313_v47 = vsel %vm158_vm1, %v14312_v41, %v4279_v39  ;;  %v4298_v16 = vsel %vm158_vm1, %v14313_v19, %v4296_v2  ;;  %v4360_v62 = vsel %vm158_vm1, %v4296_v2, %v14315_v17  ;;  %v4407_v33 = vmax.f32 %v4215_v21, %v4311_v48  ;;  %6002 = vmatpush3.bf16.msra.mxu0 %v7296_v53 }
 0x628   :  { %v4405_v61 = vmax.f32 %v12406_v4, %v4313_v47  ;;  %v4424_v39 = vmax.f32 %v4232_v29, %v4360_v62  ;;  %v4422_v63 = vmax.f32 %v12389_v28, %v4298_v16  ;;  %v4295_v15 = vrot.slane %v12868_v36, 2  ;;  %6003 = vmatprep.subr.bf16.mxu0 %v7297_v26 }
 0x629   :  { %v4663_v27 = vsel %vm4451_vm9, %v12561_v56, %v4662_v10  ;;  %v4676_v22 = vsel %vm4448_vm8, %v4675_v45, %v12804_v49  ;;  %v4716_v29 = vrot.slane %v4407_v33, 3  ;;  %v4622_v11 = vsel %vm4445_vm7, %v4621_v58, %v12502_v60 }
 0x62a   :  { %v4627_v4 = vrot.slane %v4405_v61, 3  ;;  %v4664_v21 = vrot.slane %v4405_v61, 7  ;;  %v4734_v0 = vrot.slane %v4424_v39, 1  ;;  %v14316_v28 = vrot.slane %v12492_v35, 2 }
 0x62b   :  { %v4677_v49 = vsel %vm4451_vm9, %v12523_v40, %v4676_v22  ;;  %v4682_v19 = vrot.slane %v4422_v63, 5  ;;  %v4638_v17 = vsel %vm4448_vm8, %v4637_v55, %v12800_v9  ;;  %6004 = vmatpush3.bf16.msra.mxu0 %v7298_v54  ;;  %v4729_v3 = vsel %vm4451_vm9, %v12724_v14, %v12844_v34  ;;  %v7300_v40 = vld [vmem:[%s13200_s5 + $0x100] sm:$0xff]   ;;  %v7304_v22 = vld [vmem:[%s13200_s5 + $0x110] sm:$0xff]   ;;  %v7314_v54 = vld [vmem:[%s13200_s5 + $0x138] sm:$0xff]  }
 0x62c   :  { %v4297_v13 = vsel %vm158_vm1, %v14316_v28, %v4295_v15  ;;  %v4665_v45 = vsel %vm4454_vm10, %v4664_v21, %v4663_v27  ;;  %v4679_v48 = vsel %vm4454_vm10, %v4678_v59, %v4677_v49  ;;  %v4731_v34 = vsel %vm4454_vm10, %v4730_v12, %v4729_v3  ;;  %v7307_v21 = vld [vmem:[%s13200_s5 + $0x160] sm:$0xff]   ;;  %v7311_v28 = vld [vmem:[%s13200_s5 + $0x170] sm:$0xff]   ;;  %v4562_v49 = vpop.permute.xlu1 %4561 }
 0x62d   :  { %v4421_v60 = vmax.f32 %v12492_v35, %v4297_v13  ;;  %v4667_v41 = vsel %vm4457_vm11, %v4666_v5, %v4665_v45  ;;  %v4681_v47 = vsel %vm4457_vm11, %v4680_v30, %v4679_v48  ;;  %v4624_v35 = vsel %vm4448_vm8, %v4623_v37, %v4622_v11  ;;  %v7309_v11 = vld [vmem:[%s13200_s5 + $0x168] sm:$0xff]   ;;  %v7312_v13 = vld [vmem:[%s13200_s5 + $0x130] sm:$0xff]   ;;  %v7316_v48 = vld [vmem:[%s13200_s5 + $0x180] sm:$0xff]  }
 0x62e   :  { %v12900_v2 = vpop.permute.xlu0 %4559  ;;  %v4626_v59 = vsel %vm4451_vm9, %v4625_v20, %v4624_v35  ;;  %v4683_v5 = vsel %vm4460_vm12, %v4682_v19, %v4681_v47  ;;  %v4640_v30 = vsel %vm4451_vm9, %v4639_v38, %v4638_v17  ;;  %v4645_v37 = vrot.slane %v4422_v63, 1  ;;  %v7319_v47 = vld [vmem:[%s13200_s5 + $0x1d0] sm:$0xff]   ;;  %v7321_v35 = vld [vmem:[%s13200_s5 + $0x1d8] sm:$0xff]   ;;  %v7325_v17 = vld [vmem:[%s13200_s5 + $0x1e8] sm:$0xff]  }
 0x62f   :  { %v4746_v10 = vsel %vm4563_vm14, %v12732_v23, %v12900_v2  ;;  %v7299_v23 = vld [vmem:[%s13200_s5 + $0x140] sm:$0xff]   ;;  %v4668_v16 = vrot.slane %v4421_v60, 5  ;;  %v4631_v51 = vrot.slane %v4421_v60, 1  ;;  %v4628_v62 = vsel %vm4454_vm10, %v4627_v4, %v4626_v59  ;;  %v7320_v19 = vld [vmem:[%s13200_s5 + $0x190] sm:$0xff]  }
 0x630   :  { %v4754_v58 = vpack.c.bf16 %v4746_v10, %v4746_v10  ;;  %v4630_v20 = vsel %vm4457_vm11, %v4629_v44, %v4628_v62  ;;  %v4642_v9 = vsel %vm4454_vm10, %v4641_v25, %v4640_v30  ;;  %6011 = vmatprep.subr.bf16.mxu0 %v7299_v23  ;;  %v7301_v44 = vld [vmem:[%s13200_s5 + $0x148] sm:$0xff]   ;;  %v4713_v26 = vsel %vm4448_vm8, %v12858_v6, %v12822_v32  ;;  %v7303_v32 = vld [vmem:[%s13200_s5 + $0x150] sm:$0xff]   ;;  %v7313_v10 = vld [vmem:[%s13200_s5 + $0x178] sm:$0xff]  }
 0x631   :  { %v4669_v56 = vsel %vm4460_vm12, %v4668_v16, %v4667_v41  ;;  %v4632_v50 = vsel %vm4460_vm12, %v4631_v51, %v4630_v20  ;;  %v4644_v14 = vsel %vm4457_vm11, %v4643_v8, %v4642_v9  ;;  %v14317_v25 = vld [vmem:[#allocation55_spill] sm:$0xff]  ;;  %v4715_v63 = vsel %vm4451_vm9, %v12730_v57, %v4713_v26  ;;  %v7322_v16 = vld [vmem:[%s13200_s5 + $0x198] sm:$0xff]   ;;  %v7323_v59 = vld [vmem:[%s13200_s5 + $0x1e0] sm:$0xff]  }
 0x632   :  { %5573 = vmatprep.mubr.bf16.mxu0 %v4754_v58  ;;  %v7123_v61 = vpack.i.bf16 %v4683_v5, %v4669_v56  ;;  %v14318_v33 = vrot.slane %v14317_v25, 2  ;;  %v4646_v8 = vsel %vm4460_vm12, %v4645_v37, %v4644_v14  ;;  %v4717_v46 = vsel %vm4454_vm10, %v4716_v29, %v4715_v63  ;;  %v7308_v29 = vld [vmem:[%s13200_s5 + $0x120] sm:$0xff]   ;;  %v7317_v41 = vld [vmem:[%s13200_s5 + $0x1c8] sm:$0xff]   ;;  %v7327_v62 = vld [vmem:[%s13200_s5 + $0x1f0] sm:$0xff]  }
 0x633   :  { %5574 = vmatmul.mubr.bf16.vlgmr.msra.gmra.mrb[96].mxu0 %v4753_v1  ;;  %v7118_v7 = vpack.i.bf16 %v4646_v8, %v4632_v50  ;;  %v4733_v1 = vsel %vm4457_vm11, %v4732_v24, %v4731_v34  ;;  %v14319_v57 = vmax.f32 %v12586_v52, %v12709_v31  ;;  %v7305_v52 = vld [vmem:[%s13200_s5 + $0x158] sm:$0xff]   ;;  %v4564_v60 = vsel %vm4563_vm14, %v12900_v2, %v4562_v49  ;;  %v7315_v58 = vld [vmem:[%s13200_s5 + $0x1c0] sm:$0xff]   ;;  %v7318_v2 = vld [vmem:[%s13200_s5 + $0x188] sm:$0xff]  }
 0x634   :  { %v4359_v39 = vsel %vm158_vm1, %v4295_v15, %v14318_v33  ;;  %7124 = vrot.lane.b32.xlu0 %v7123_v61, %s7367_s28  ;;  %6012 = vmatpush3.bf16.msra.mxu0 %v7300_v40  ;;  %v7306_v31 = vld [vmem:[%s13200_s5 + $0x118] sm:$0xff]   ;;  %v7324_v51 = vld [vmem:[%s13200_s5 + $0x1a0] sm:$0xff]   ;;  %v7326_v5 = vld [vmem:[%s13200_s5 + $0x1a8] sm:$0xff]   ;;  %vm4688_vm1 = vcmask 130048  }
 0x635   :  { %v12947_v53 = vpop.permute.xlu0 %7114  ;;  %v4423_v12 = vmax.f32 %v12868_v36, %v4359_v39  ;;  %6013 = vmatprep.subr.bf16.mxu0 %v7301_v44  ;;  %v4718_v6 = vrot.slane %v14319_v57, 2  ;;  %7119 = vrot.lane.b32.xlu1 %v7118_v7, %s7368_s8  ;;  %v4735_v36 = vsel %vm4460_vm12, %v4734_v0, %v4733_v1  ;;  %v7310_v0 = vld [vmem:[%s13200_s5 + $0x128] sm:$0xff]   ;;  %v7328_v30 = vld [vmem:[%s13200_s5 + $0x1b0] sm:$0xff]   ;;  %v7329_v37 = vld [vmem:[%s13200_s5 + $0x1f8] sm:$0xff]  }
 0x636   :  { %v7117_v38 = vunpack.i.h.bf16 %v12947_v53  ;;  %v7116_v55 = vunpack.i.l.bf16 %v12947_v53  ;;  %v7330_v56 = vld [vmem:[%s13200_s5 + $0x1b8] sm:$0xff]   ;;  %v7331_v20 = vld [vmem:[%s13200_s5 + $0x240] sm:$0xff]   ;;  %v7333_v7 = vld [vmem:[%s13200_s5 + $0x248] sm:$0xff]  }
 0x637   :  { %v4720_v42 = vrot.slane %v4423_v12, 1  ;;  %v4719_v27 = vsel %vm4457_vm11, %v4718_v6, %v4717_v46  ;;  %v7332_v24 = vld [vmem:[%s13200_s5 + $0x200] sm:$0xff]   ;;  %v7334_v53 = vld [vmem:[%s13200_s5 + $0x208] sm:$0xff]   ;;  %v7337_v1 = vld [vmem:[%s13200_s5 + $0x258] sm:$0xff]  }
 0x638   :  { %v4599_v18 = vsel %vm4072_vm5, %v7116_v55, %v7117_v38  ;;  %4738 = vrot.lane.b32.xlu0 %v4735_v36, %s7369_s9  ;;  %6014 = vmatpush3.bf16.msra.mxu0 %v7302_v43  ;;  %v4747_v45 = vsel %vm4072_vm5, %v4564_v60, %v7116_v55  ;;  %v7336_v43 = vld [vmem:[%s13200_s5 + $0x210] sm:$0xff]   ;;  %v7338_v46 = vld [vmem:[%s13200_s5 + $0x218] sm:$0xff]   ;;  %v7342_v57 = vld [vmem:[%s13200_s5 + $0x228] sm:$0xff]  }
 0x639   :  { %v4756_v15 = vpack.c.bf16 %v4599_v18, %v4599_v18  ;;  %v4721_v4 = vsel %vm4460_vm12, %v4720_v42, %v4719_v27  ;;  %6015 = vmatprep.subr.bf16.mxu0 %v7303_v32  ;;  %v4755_v23 = vpack.c.bf16 %v4747_v45, %v4747_v45  ;;  %v7339_v42 = vld [vmem:[%s13200_s5 + $0x260] sm:$0xff]   ;;  %v7341_v32 = vld [vmem:[%s13200_s5 + $0x268] sm:$0xff]   ;;  %v7343_v6 = vld [vmem:[%s13200_s5 + $0x270] sm:$0xff]  }
 0x63a   :  { %4736 = vrot.lane.b32.xlu1 %v4721_v4, %s7369_s9  ;;  %v7340_v18 = vld [vmem:[%s13200_s5 + $0x220] sm:$0xff]   ;;  %v7344_v36 = vld [vmem:[%s13200_s5 + $0x230] sm:$0xff]   ;;  %v7346_v27 = vld [vmem:[%s13200_s5 + $0x238] sm:$0xff]  }
 0x63b   :  { %5613 = vmatprep.mubr.bf16.mxu0 %v4756_v15  ;;  %v7345_v15 = vld [vmem:[%s13200_s5 + $0x278] sm:$0xff]   ;;  %v7347_v4 = vld [vmem:[%s13200_s5 + $0x280] sm:$0xff]  }
 0x63c   :  { %6016 = vmatpush3.bf16.msra.mxu0 %v7304_v22  ;;  %v7354_v45 = vld [vmem:[%s13200_s5 + $0x2b8] sm:$0xff]  }
 0x63d   :  { %6017 = vmatprep.subr.bf16.mxu0 %v7305_v52 }
 0x640   :  { %6018 = vmatpush3.bf16.msra.mxu0 %v7306_v31  ;;  %v14320_v31 = vmov 0  }
 0x641   :  { %6019 = vmatprep.subr.bf16.mxu0 %v7307_v21 }
 0x644   :  { %6020 = vmatpush3.bf16.msra.mxu0 %v7308_v29  ;;  %v7348_v29 = vld [vmem:[%s13200_s5 + $0x288] sm:$0xff]  }
 0x645   :  { %6021 = vmatprep.subr.bf16.mxu0 %v7309_v11  ;;  %v7349_v11 = vld [vmem:[%s13200_s5 + $0x290] sm:$0xff]  }
 0x648   :  { %6022 = vmatpush3.bf16.msra.mxu0 %v7310_v0  ;;  %v7350_v0 = vld [vmem:[%s13200_s5 + $0x298] sm:$0xff]  }
 0x649   :  { %6023 = vmatprep.subr.bf16.mxu0 %v7311_v28  ;;  %v7351_v28 = vld [vmem:[%s13200_s5 + $0x2a0] sm:$0xff]  }
 0x64c   :  { %6024 = vmatpush3.bf16.msra.mxu0 %v7312_v13  ;;  %v7352_v13 = vld [vmem:[%s13200_s5 + $0x2a8] sm:$0xff]  }
 0x64d   :  { %6025 = vmatprep.subr.bf16.mxu0 %v7313_v10  ;;  %v7353_v10 = vld [vmem:[%s13200_s5 + $0x2b0] sm:$0xff]  }
 0x650   :  { %6026 = vmatpush3.bf16.msra.mxu0 %v7314_v54 }
 0x651   :  { %6033 = vmatprep.subr.bf16.mxu0 %v7315_v58 }
 0x653   :  { %5614 = vmatmul.mubr.bf16.vlgmr.msra.gmra.mrb[100].mxu0 %v4755_v23  ;;  %v7355_v23 = vld [vmem:[%s13200_s5 + $0x2c0] sm:$0xff]  }
 0x654   :  { %6034 = vmatpush3.bf16.msra.mxu0 %v7316_v48 }
 0x655   :  { %6035 = vmatprep.subr.bf16.mxu0 %v7317_v41  ;;  %v7356_v41 = vld [vmem:[%s13200_s5 + $0x2c8] sm:$0xff]  }
 0x658   :  { %6036 = vmatpush3.bf16.msra.mxu0 %v7318_v2  ;;  %v7357_v2 = vld [vmem:[%s13200_s5 + $0x2d0] sm:$0xff]  }
 0x659   :  { %6037 = vmatprep.subr.bf16.mxu0 %v7319_v47 }
 0x65c   :  { %6038 = vmatpush3.bf16.msra.mxu0 %v7320_v19  ;;  %v5874_v19 = vld [vmem:[%s13201_s6] ss:$0 sm:$0xff] }
 0x65d   :  { %6039 = vmatprep.subr.bf16.mxu0 %v7321_v35 }
 0x660   :  { %6040 = vmatpush3.bf16.msra.mxu0 %v7322_v16 }
 0x661   :  { %6041 = vmatprep.subr.bf16.mxu0 %v7323_v59 }
 0x664   :  { %6042 = vmatpush3.bf16.msra.mxu0 %v7324_v51 }
 0x665   :  { %6043 = vmatprep.subr.bf16.mxu0 %v7325_v17 }
 0x668   :  { %6044 = vmatpush3.bf16.msra.mxu0 %v7326_v5 }
 0x669   :  { %6045 = vmatprep.subr.bf16.mxu0 %v7327_v62 }
 0x66c   :  { %6046 = vmatpush3.bf16.msra.mxu0 %v7328_v30 }
 0x66d   :  { %6047 = vmatprep.subr.bf16.mxu0 %v7329_v37 }
 0x670   :  { %6048 = vmatpush3.bf16.msra.mxu0 %v7330_v56 }
 0x671   :  { %6055 = vmatprep.subr.bf16.mxu0 %v7331_v20 }
 0x6a6   :  { %v7125_v9 = vpop.permute.xlu0 %7124 }
 0x6a7   :  { %v7127_v3 = vunpack.i.h.bf16 %v7125_v9  ;;  %v7126_v40 = vunpack.i.l.bf16 %v7125_v9  ;;  %v7120_v55 = vpop.permute.xlu1 %7119 }
 0x6a8   :  { %v7122_v61 = vunpack.i.h.bf16 %v7120_v55  ;;  %v7121_v50 = vunpack.i.l.bf16 %v7120_v55 }
 0x6a9   :  { %v4689_v14 = vsel %vm4688_vm1, %v7126_v40, %v7127_v3 }
 0x6aa   :  { %v4739_v44 = vpop.permute.xlu0 %4738  ;;  %v4748_v34 = vsel %vm4651_vm15, %v7117_v38, %v7121_v50  ;;  %v4652_v25 = vsel %vm4651_vm15, %v7121_v50, %v7122_v61  ;;  %v7335_v38 = vld [vmem:[%s13200_s5 + $0x250] sm:$0xff]   ;;  %v4749_v22 = vsel %vm4688_vm1, %v7122_v61, %v7126_v40 }
 0x6ab   :  { %v4757_v33 = vpack.c.bf16 %v4748_v34, %v4748_v34  ;;  %v4758_v26 = vpack.c.bf16 %v4652_v25, %v4652_v25  ;;  %v4759_v52 = vpack.c.bf16 %v4749_v22, %v4749_v22  ;;  %v4762_v21 = vpack.c.bf16 %v4739_v44, %v4739_v44 }
 0x6ac   :  { %v4737_v39 = vpop.permute.xlu1 %4736 }
 0x6ad   :  { %v13097_v8 = vsel %vm4740_vm2, %v4737_v39, %v4739_v44  ;;  %v4750_v12 = vsel %vm4740_vm2, %v4689_v14, %v4737_v39  ;;  %5653 = vmatprep.mubr.bf16.mxu0 %v4758_v26 }
 0x6ae   :  { %v4760_v63 = vpack.c.bf16 %v4750_v12, %v4750_v12  ;;  %5654 = vmatmul.mubr.bf16.vlgmr.msra.gmra.mrb[104].mxu0 %v4757_v33  ;;  %v4761_v47 = vpack.c.bf16 %v13097_v8, %v13097_v8 }
 0x6af   :  { %6056 = vmatpush3.bf16.msra.mxu0 %v7332_v24 }
 0x6b0   :  { %5693 = vmatprep.mubr.bf16.mxu0 %v4760_v63  ;;  %6057 = vmatprep.subr.bf16.mxu0 %v7333_v7 }
 0x6b3   :  { %6058 = vmatpush3.bf16.msra.mxu0 %v7334_v53 }
 0x6b4   :  { %6059 = vmatprep.subr.bf16.mxu0 %v7335_v38 }
 0x6b7   :  { %6060 = vmatpush3.bf16.msra.mxu0 %v7336_v43 }
 0x6b8   :  { %6061 = vmatprep.subr.bf16.mxu0 %v7337_v1 }
 0x6bb   :  { %6062 = vmatpush3.bf16.msra.mxu0 %v7338_v46 }
 0x6bc   :  { %6063 = vmatprep.subr.bf16.mxu0 %v7339_v42 }
 0x6bf   :  { %6064 = vmatpush3.bf16.msra.mxu0 %v7340_v18 }
 0x6c0   :  { %6065 = vmatprep.subr.bf16.mxu0 %v7341_v32 }
 0x6c3   :  { %6066 = vmatpush3.bf16.msra.mxu0 %v7342_v57 }
 0x6c4   :  { %6067 = vmatprep.subr.bf16.mxu0 %v7343_v6 }
 0x6c7   :  { %6068 = vmatpush3.bf16.msra.mxu0 %v7344_v36 }
 0x6c8   :  { %6069 = vmatprep.subr.bf16.mxu0 %v7345_v15 }
 0x6cb   :  { %6070 = vmatpush3.bf16.msra.mxu0 %v7346_v27 }
 0x6cc   :  { %5701 = vmatprep.subr.bf16.mxu0 %v14320_v31 }
 0x6ce   :  { %5694 = vmatmul.mubr.bf16.vlgmr.msra.gmra.mrb[108].mxu0 %v4759_v52 }
 0x6cf   :  { %5702 = vmatpush1.bf16.msra.mxu0 %v7347_v4  ;;  %5966 = vmatprep.mubr.msk.bf16.mxu0 %vm2394_vm0, %v4762_v21 }
 0x6d0   :  { %5703 = vmatprep.subr.bf16.mxu0 %v14320_v31 }
 0x6d3   :  { %5704 = vmatpush1.bf16.msra.mxu0 %v7348_v29 }
 0x6d4   :  { %5705 = vmatprep.subr.bf16.mxu0 %v14320_v31 }
 0x6d7   :  { %5706 = vmatpush1.bf16.msra.mxu0 %v7349_v11 }
 0x6d8   :  { %5707 = vmatprep.subr.bf16.mxu0 %v14320_v31 }
 0x6db   :  { %5708 = vmatpush1.bf16.msra.mxu0 %v7350_v0 }
 0x6dc   :  { %5709 = vmatprep.subr.bf16.mxu0 %v14320_v31 }
 0x6df   :  { %5710 = vmatpush1.bf16.msra.mxu0 %v7351_v28 }
 0x6e0   :  { %5711 = vmatprep.subr.bf16.mxu0 %v14320_v31 }
 0x6e1   :  { %v5983_v49 = vpop.f32.mrb[92].mxu0 }
 0x6e2   :  { %v5984_v54 = vpop.f32.mrb[93].mxu0 }
 0x6e3   :  { %5712 = vmatpush1.bf16.msra.mxu0 %v7352_v13  ;;  %v5985_v60 = vadd.f32 %v5984_v54, %v5983_v49  ;;  %v5986_v58 = vpop.f32.mrb[94].mxu0 }
 0x6e4   :  { %5713 = vmatprep.subr.bf16.mxu0 %v14320_v31  ;;  %v5987_v48 = vpop.f32.mrb[95].mxu0 }
 0x6e5   :  { %v5536_v59 = vadd.f32 %v5985_v60, %v5874_v19 }
 0x6e7   :  { %5714 = vmatpush1.bf16.msra.mxu0 %v7353_v10 }
 0x6e8   :  { %5715 = vmatprep.subr.bf16.mxu0 %v14320_v31 }
 0x6eb   :  { %5716 = vmatpush1.bf16.msra.mxu0 %v7354_v45 }
 0x6ec   :  { %5717 = vmatprep.subr.bf16.mxu0 %v14320_v31 }
 0x6ef   :  { %5718 = vmatpush1.bf16.msra.mxu0 %v7355_v23 }
 0x6f0   :  { %5719 = vmatprep.subr.bf16.mxu0 %v14320_v31 }
 0x6f3   :  { %5720 = vmatpush1.bf16.msra.mxu0 %v7356_v41 }
 0x6f4   :  { %5721 = vmatprep.subr.bf16.mxu0 %v14320_v31 }
 0x6f7   :  { %5722 = vmatpush1.bf16.msra.mxu0 %v7357_v2 }
 0x6fa   :  { %5734 = vmatmul.mubr.bf16.vlgmr.msra.gmra.mrb[112].mxu0 %v4761_v47 }
 0x706   :  { %v6005_v35 = vpop.f32.mrb[96].mxu0 }
 0x707   :  { %v6006_v16 = vpop.f32.mrb[97].mxu0 }
 0x708   :  { %v6007_v51 = vadd.f32 %v6006_v16, %v6005_v35  ;;  %v6008_v17 = vpop.f32.mrb[98].mxu0 }
 0x709   :  { %v6009_v5 = vpop.f32.mrb[99].mxu0 }
 0x70a   :  { %v5576_v62 = vadd.f32 %v6007_v51, %v5536_v59 }
 0x726   :  { %v6027_v30 = vpop.f32.mrb[100].mxu0 }
 0x727   :  { %v6028_v37 = vpop.f32.mrb[101].mxu0 }
 0x728   :  { %v6029_v56 = vadd.f32 %v6028_v37, %v6027_v30  ;;  %v6030_v20 = vpop.f32.mrb[102].mxu0 }
 0x729   :  { %v6031_v9 = vpop.f32.mrb[103].mxu0 }
 0x72a   :  { %v5616_v3 = vadd.f32 %v6029_v56, %v5576_v62 }
 0x781   :  { %v6049_v40 = vpop.f32.mrb[104].mxu0 }
 0x782   :  { %v6050_v55 = vpop.f32.mrb[105].mxu0 }
 0x783   :  { %v6051_v61 = vadd.f32 %v6050_v55, %v6049_v40  ;;  %v6052_v50 = vpop.f32.mrb[106].mxu0 }
 0x784   :  { %v6053_v44 = vpop.f32.mrb[107].mxu0 }
 0x785   :  { %v5656_v14 = vadd.f32 %v6051_v61, %v5616_v3 }
 0x7a1   :  { %v6071_v34 = vpop.f32.mrb[108].mxu0 }
 0x7a2   :  { %v6072_v25 = vpop.f32.mrb[109].mxu0 }
 0x7a3   :  { %v6073_v33 = vadd.f32 %v6072_v25, %v6071_v34  ;;  %v6074_v39 = vpop.f32.mrb[110].mxu0 }
 0x7a4   :  { %v6075_v26 = vpop.f32.mrb[111].mxu0 }
 0x7a5   :  { %v5696_v24 = vadd.f32 %v6073_v33, %v5656_v14 }
 0x7cd   :  { %v5735_v8 = vpop.f32.mrb[112].mxu0 }
 0x7ce   :  { %v5736_v12 = vadd.f32 %v5735_v8, %v5696_v24  ;;  %v5737_v7 = vpop.f32.mrb[113].mxu0 }
 0x7cf   :  { %v5738_v63 = vpop.f32.mrb[114].mxu0 }
 0x7d0   :  { %5741 = vst [vmem:[%s13202_s7] sm:$0xff] %v5736_v12  ;;  %v5739_v53 = vpop.f32.mrb[115].mxu0 }

</bundles_post_ra>
